<compile_context>
chip_gen: v6e
topology: v6e:2x2x1
jax: 0.10.0
libtpu: 0.0.40
codegen_flags: <defaults>
</compile_context>

<pallas_src>
import functools

import numpy as np
import jax
import jax.numpy as jnp
from jax.experimental import pallas as pl
from jax.experimental.pallas import tpu as pltpu


DIRECTIONS_8 = [(1, 2), (1, -1), (-1, 1), (-2, -1), (1, 0), (-2, 0), (0, 1), (0, -1)]


@functools.lru_cache(maxsize=None)
def _vmem_limit_bytes():
    # v5e/v6e: 128 MiB physical VMEM -> ~96 MiB scoped; v7x: 64 MiB -> ~48 MiB.
    try:
        cap = int(pltpu.get_tpu_info().vmem_capacity_bytes)
    except Exception:
        return 48 * 1024 * 1024          # safe on every generation
    return max(32 * 1024 * 1024, min((cap * 3) // 4, 100 * 1024 * 1024))


def _sigmoid(x):
    # tanh formulation: one EUP transcendental, no VALU divide.
    return 0.5 * (jnp.tanh(0.5 * x) + 1.0)


# ----------------------------------------------------------------------------
# Kernel 1: fused (3x3 encoder conv ∘ per-direction 1x1 gate conv) matmul.
# ----------------------------------------------------------------------------

def _fused_gates_kernel(x_ref, w_ref, b_ref, o_ref, *, sig_cols):
    # x_ref: (1, TN, Kp); w_ref: (Kp, Mp); b_ref: (1, Mp) f32; o_ref: (1, TN, Mp) f32.
    r = jnp.dot(x_ref[0], w_ref[...], preferred_element_type=jnp.float32) + b_ref[...]
    # Two static column-range stores (sig_cols = 2*nd*C = 128 here, a lane boundary):
    # sigmoid on the z/s blocks only, identity on the h (+pad) block.  No iota/select
    # mask and no tanh on the final third of the columns.
    o_ref[0, :, :sig_cols] = _sigmoid(r[:, :sig_cols])
    o_ref[0, :, sig_cols:] = r[:, sig_cols:]


def _pick_tile_n(N, Kp, Mp, in_bytes, vmem_limit):
    # Largest tile that divides N and fits double-buffered x/out tiles + weights +
    # the f32 matmul temporary inside roughly half the scoped-VMEM budget.
    budget = vmem_limit // 2
    for t in (4096, 2048, 1024, 512, 256, 128):
        if N % t:
            continue
        need = (2 * t * Kp * in_bytes          # x tile, double buffered
                + 2 * t * Mp * 4               # out tile, double buffered
                + t * Mp * 4                   # f32 matmul temporary
                + Kp * Mp * in_bytes + Mp * 4)  # weights + bias (resident)
        if need <= budget:
            return t
    return N


def fused_gates(x_col, w_all, b_all, sig_cols, tile_n, vmem_limit):
    B, N, K = x_col.shape
    M = w_all.shape[1]
    return pl.pallas_call(
        functools.partial(_fused_gates_kernel, sig_cols=sig_cols),
        out_shape=jax.ShapeDtypeStruct((B, N, M), jnp.float32),
        grid=(B, N // tile_n),
        in_specs=[
            pl.BlockSpec((1, tile_n, K), lambda b, n: (b, n, 0)),
            pl.BlockSpec((K, M), lambda b, n: (0, 0)),
            pl.BlockSpec((1, M), lambda b, n: (0, 0)),
        ],
        out_specs=pl.BlockSpec((1, tile_n, M), lambda b, n: (b, n, 0)),
        compiler_params=pltpu.CompilerParams(
            dimension_semantics=("parallel", "parallel"),
            vmem_limit_bytes=vmem_limit),
    )(x_col, w_all, b_all)


# ----------------------------------------------------------------------------
# Kernels 2/3: directional GRU scan + (h_d * s_d) accumulation.
#
# Unified per-cell recurrence (undefined torch.empty boundary reads pinned to h0):
#     out[i, j] = z[i, j] * h~[i, j] + (1 - z[i, j]) * out[i - d1, j - d2]
# On a lane-flattened (T, S*C) slab this is a row-band scan; a negative row step
# is a reversed band order, a column step is a lane shift of the carried band by
# |d2|*C with h0 injected into the vacated lanes.
# ----------------------------------------------------------------------------

def _scan_direction_body(z_ref, h_ref, h0_ref, hbuf, *, d1, d2, T, L, C):
    dh, rev_r = abs(d1), d1 < 0
    shift, rev_c = abs(d2) * C, d2 < 0
    nb = T // dh
    h0_row = h0_ref[0]                                   # (1, L)
    # Loop-invariant broadcasts hoisted out of the band loop (JAX does not CSE
    # broadcast_in_dim; emitting them per band is pure VALU/layout waste).
    prev = jnp.broadcast_to(h0_row, (dh, L))
    pad = prev[:, :shift] if shift > 0 else None         # h0 fill for vacated lanes
    order = range(nb - 1, -1, -1) if rev_r else range(nb)
    # TODO(synk): convert to lax.fori_loop with a small unroll once nb grows past ~32.
    for step, r in enumerate(order):                     # static unroll (T small here)
        lo = r * dh
        if step > 0 and shift > 0:
            if rev_c:   # depends on column j + |d2|  -> shift lanes left
                prev = jnp.concatenate([prev[:, shift:], pad], axis=-1)
            else:       # depends on column j - |d2|  -> shift lanes right
                prev = jnp.concatenate([pad, prev[:, :L - shift]], axis=-1)
        z = z_ref[0, 0, lo:lo + dh, :]
        ht = h_ref[0, 0, lo:lo + dh, :]
        h_band = z * ht + (1.0 - z) * prev
        hbuf[lo:lo + dh, :] = h_band                      # store-only (no acc RMW per band)
        prev = h_band


def _make_scan_combine_kernel(dirs, T, L, C):
    def kernel(z_ref, s_ref, h_ref, h0_ref, acc_ref, hbuf):
        d = pl.program_id(1)

        @pl.when(d == 0)
        def _():
            acc_ref[...] = jnp.zeros_like(acc_ref)

        # One direction per grid step: only that direction's (T, L) slabs + the
        # scratch are resident, so VMEM stays bounded at realistic H/W/C.
        # The per-direction scan parameters are static; dispatch via pl.when.
        for di, (d1, d2) in enumerate(dirs):
            pl.when(d == di)(functools.partial(
                _scan_direction_body, z_ref, h_ref, h0_ref, hbuf,
                d1=d1, d2=d2, T=T, L=L, C=C))

        # Single full-slab fused combine per direction into the resident accumulator.
        acc_ref[0] = acc_ref[0] + hbuf[...] * s_ref[0, 0]
    return kernel


def scan_combine(z_slab, s_slab, h_slab, h0_slab, dirs, C, vmem_limit):
    """z/s/h slabs: (ndg, B, T, L=S*C) f32; h0_slab: (ndg, 1, L); returns (B, T, L)."""
    ndg, B, T, L = z_slab.shape
    assert len(dirs) == ndg
    for d1, _ in dirs:
        assert d1 != 0 and T % abs(d1) == 0, "scan step must divide the scan extent"
    spec_dir = pl.BlockSpec((1, 1, T, L), lambda b, d: (d, b, 0, 0))
    # NOTE: on v7x with B == 1 only one TensorCore is used here; split the direction
    # set across cores in that case if it ever matters (batch >= 2 in practice).
    return pl.pallas_call(
        _make_scan_combine_kernel(dirs, T, L, C),
        out_shape=jax.ShapeDtypeStruct((B, T, L), jnp.float32),
        grid=(B, ndg),
        in_specs=[spec_dir, spec_dir, spec_dir,
                  pl.BlockSpec((1, 1, L), lambda b, d: (d, 0, 0))],
        out_specs=pl.BlockSpec((1, T, L), lambda b, d: (b, 0, 0)),
        scratch_shapes=[pltpu.VMEM((T, L), jnp.float32)],
        compiler_params=pltpu.CompilerParams(
            dimension_semantics=("parallel", "arbitrary"),
            vmem_limit_bytes=vmem_limit),
    )(z_slab, s_slab, h_slab, h0_slab)


# ----------------------------------------------------------------------------
# Full forward
# ----------------------------------------------------------------------------

def gru_conv2d_forward(x_nchw, params, directions, matmul_dtype=jnp.bfloat16):
    B, Cin, H, W = x_nchw.shape
    Cout = params["w_z_en"].shape[0]
    C = Cout
    nd = len(directions)
    vmem_limit = _vmem_limit_bytes()

    # step / shape guards (mirror the reference's step bookkeeping)
    for d1, d2 in directions:
        if d1 != 0 and d2 != 0:
            assert H % abs(d1) == 0, "diagonal scan needs H % |d1| == 0"
        elif d1 != 0:
            assert H % abs(d1) == 0 and (W + abs(d1) - 1) // abs(d1) == H // abs(d1)
        else:
            assert d2 != 0
            assert W % abs(d2) == 0 and (H + abs(d2) - 1) // abs(d2) == W // abs(d2)

    # Group A: directions advancing along H (diagonals + H-axial); group B: W-axial.
    idx_A = [i for i, (d1, _) in enumerate(directions) if d1 != 0]
    idx_B = [i for i, (d1, _) in enumerate(directions) if d1 == 0]
    perm = idx_A + idx_B          # column order within each gate block: A first, then B
    ndA, ndB = len(idx_A), len(idx_B)

    # ---- fold 3x3 encoder convs with the per-direction 1x1 gate convs (f32) ----
    def col_w(w_oihw):   # (Cout, Cin, 3, 3) -> (9*Cin, Cout), rows ordered (kh, kw, cin)
        return jnp.transpose(w_oihw, (2, 3, 1, 0)).reshape(9 * Cin, Cout)

    w_blocks, b_blocks = [], []
    for wen, ben, wg, bg in (("w_z_en", "b_z_en", "w_z", "b_z"),
                             ("w_s_en", "b_s_en", "w_s", "b_s"),
                             ("w_h_en", "b_h_en", "w_h", "b_h")):
        w_en_col = col_w(params[wen])
        b_en = params[ben]
        for d in perm:                              # group-A columns first, then group-B
            w1 = params[wg][d]                      # (Cout, Cout), [out, in]
            w_blocks.append(w_en_col @ w1.T)        # composed (9*Cin, Cout)
            b_blocks.append(b_en @ w1.T + params[bg][d])
    w_all = jnp.concatenate(w_blocks, axis=1)       # (9*Cin, 3*nd*C)
    b_all = jnp.concatenate(b_blocks, axis=0).reshape(1, 3 * nd * C)

    # pad contraction dim K and output dim M up to lane multiples: unmasked
    # loads/stores and a fully-filled MXU contraction.
    K, M = 9 * Cin, 3 * nd * C
    Kp = max(128, ((K + 127) // 128) * 128)
    Mp = max(128, ((M + 127) // 128) * 128)
    w_all = jnp.pad(w_all, ((0, Kp - K), (0, Mp - M)))
    b_all = jnp.pad(b_all, ((0, 0), (0, Mp - M)))

    # ---- im2col (channels-last, zero-padded to Kp) + one lane-dense gate matmul ----
    x = jnp.transpose(x_nchw, (0, 2, 3, 1))
    xp = jnp.pad(x, ((0, 0), (1, 1), (1, 1), (0, 0)))
    cols = [xp[:, kh:kh + H, kw:kw + W, :] for kh in range(3) for kw in range(3)]
    x_col = jnp.concatenate(cols, axis=-1).reshape(B, H * W, K)
    x_col = jnp.pad(x_col, ((0, 0), (0, 0), (0, Kp - K)))

    N = H * W
    in_bytes = jnp.dtype(matmul_dtype).itemsize
    tile_n = _pick_tile_n(N, Kp, Mp, in_bytes, vmem_limit)
    gates = fused_gates(x_col.astype(matmul_dtype), w_all.astype(matmul_dtype),
                        b_all.astype(jnp.float32), sig_cols=2 * nd * C,
                        tile_n=tile_n, vmem_limit=vmem_limit)          # (B, N, Mp) f32

    h0 = params["h0"]                                # (nd, C)
    out_nhwc = jnp.zeros((B, H, W, C), jnp.float32)

    # gate columns (post-perm) are [z_A | z_B | s_A | s_B | h_A | h_B | pad] — every
    # per-group block is a static slice (no gather), followed by one reshape/transpose.
    def slab(g, lo, n, layout):
        blk = gates[:, :, g * nd * C + lo * C: g * nd * C + (lo + n) * C]
        blk = blk.reshape(B, H, W, n, C)
        if layout == "A":                                              # (n, B, H, W*C)
            return jnp.transpose(blk, (3, 0, 1, 2, 4)).reshape(n, B, H, W * C)
        return jnp.transpose(blk, (3, 0, 2, 1, 4)).reshape(n, B, W, H * C)  # (n, B, W, H*C)

    if ndA:
        dirsA = [directions[i] for i in idx_A]
        zA, sA, hA = slab(0, 0, ndA, "A"), slab(1, 0, ndA, "A"), slab(2, 0, ndA, "A")
        h0A = jnp.broadcast_to(h0[jnp.array(idx_A)][:, None, None, :],
                               (ndA, 1, W, C)).reshape(ndA, 1, W * C)
        accA = scan_combine(zA, sA, hA, h0A, dirsA, C, vmem_limit)     # (B, H, W*C)
        out_nhwc = out_nhwc + accA.reshape(B, H, W, C)

    if ndB:
        dirsB = [(directions[i][1], 0) for i in idx_B]                 # scan rows = W
        zB, sB, hB = slab(0, ndA, ndB, "B"), slab(1, ndA, ndB, "B"), slab(2, ndA, ndB, "B")
        h0B = jnp.broadcast_to(h0[jnp.array(idx_B)][:, None, None, :],
                               (ndB, 1, H, C)).reshape(ndB, 1, H * C)
        accB = scan_combine(zB, sB, hB, h0B, dirsB, C, vmem_limit)     # (B, W, H*C)
        out_nhwc = out_nhwc + jnp.transpose(accB.reshape(B, W, H, C), (0, 2, 1, 3))

    return jnp.transpose(out_nhwc, (0, 3, 1, 2))                       # back to NCHW


# ----------------------------------------------------------------------------
# Deterministic parameter init (shapes per the module's __init__)
# ----------------------------------------------------------------------------

def init_params(key, in_channels, out_channels, n_dir):
    ks = jax.random.split(key, 13)
    def rnd(k, shape, scale):
        return (scale * jax.random.normal(k, shape)).astype(jnp.float32)
    return {
        "w_z_en": rnd(ks[0], (out_channels, in_channels, 3, 3), 0.25),
        "b_z_en": rnd(ks[1], (out_channels,), 0.1),
        "w_s_en": rnd(ks[2], (out_channels, in_channels, 3, 3), 0.25),
        "b_s_en": rnd(ks[3], (out_channels,), 0.1),
        "w_h_en": rnd(ks[4], (out_channels, in_channels, 3, 3), 0.25),
        "b_h_en": rnd(ks[5], (out_channels,), 0.1),
        "w_z": rnd(ks[6], (n_dir, out_channels, out_channels), 0.25),
        "b_z": rnd(ks[7], (n_dir, out_channels), 0.1),
        "w_s": rnd(ks[8], (n_dir, out_channels, out_channels), 0.25),
        "b_s": rnd(ks[9], (n_dir, out_channels), 0.1),
        "w_h": rnd(ks[10], (n_dir, out_channels, out_channels), 0.25),
        "b_h": rnd(ks[11], (n_dir, out_channels), 0.1),
        # module uses zeros(1, C, 1, 1); randomized (deterministically) so the
        # boundary-condition path is actually exercised.
        "h0": rnd(ks[12], (n_dir, out_channels), 0.5),
    }


# ----------------------------------------------------------------------------
# Pure numpy reference (mirrors the PyTorch code; torch.empty reads pinned to h0)
# ----------------------------------------------------------------------------

def _np_conv3x3(x, w, b):
    B, Cin, H, W = x.shape
    Cout = w.shape[0]
    xp = np.pad(x, ((0, 0), (0, 0), (1, 1), (1, 1)))
    out = np.zeros((B, Cout, H, W), dtype=np.float64)
    for kh in range(3):
        for kw in range(3):
            out += np.einsum("bchw,oc->bohw", xp[:, :, kh:kh + H, kw:kw + W], w[:, :, kh, kw])
    return out + b.reshape(1, Cout, 1, 1)


def _ref_direction(z, _h, h0, d1, d2):
    ds = np.array([d1, d2])
    if int((ds != 0).sum()) == 1:
        idx = int(np.nonzero(ds)[0][0])
        dval = int(ds[idx])
        d = abs(dval)
        ax = idx + 2
        flip = (lambda a: np.flip(a, axis=ax)) if dval < 0 else (lambda a: a)
        trans = lambda a: np.swapaxes(a, -1, ax)
        _h = trans(flip(_h)); z = trans(flip(z))
        B, C, H, W = z.shape
        h = np.broadcast_to(h0, (B, C, H, W + d)).astype(np.float64).copy()
        t_num = (H + d - 1) // d
        for ti in range(t_num):
            t0, t1, t2 = ti * d, (ti + 1) * d, (ti + 2) * d
            h[..., t1:t2] = z[..., t0:t1] * _h[..., t0:t1] + (1 - z[..., t0:t1]) * h[..., t0:t1]
        return flip(trans(h[..., d:]))
    flip_axes = tuple(int(i) + 2 for i in np.nonzero(ds < 0)[0])
    flip = (lambda a: np.flip(a, axis=flip_axes)) if flip_axes else (lambda a: a)
    _h = flip(_h); z = flip(z)
    B, C, H, W = z.shape
    dh, dw = abs(d1), abs(d2)
    h = np.broadcast_to(h0, (B, C, H + dh, W + dw)).astype(np.float64).copy()
    t_num = min((H + dh - 1) // dh, (W + dw - 1) // dw)
    for ti in range(t_num):
        r0, r1, r2 = ti * dh, (ti + 1) * dh, (ti + 2) * dh
        c0, c1, c2 = ti * dw, (ti + 1) * dw, (ti + 2) * dw
        h_1 = h[..., r0:r1, c0:-dw]
        zt, _ht = z[..., r0:r1, c0:], _h[..., r0:r1, c0:]
        h[..., r1:r2, c1:] = zt * _ht + (1 - zt) * h_1
        h_1 = h[..., r1:-dh, c0:c1]
        zt, _ht = z[..., r1:, c0:c1], _h[..., r1:, c0:c1]
        h[..., r2:, c1:c2] = zt * _ht + (1 - zt) * h_1
    return flip(h[..., dh:, dw:])


def reference_forward(x, params, directions):
    p = {k: np.asarray(v, dtype=np.float64) for k, v in params.items()}
    x = np.asarray(x, dtype=np.float64)
    zf = _np_conv3x3(x, p["w_z_en"], p["b_z_en"])
    sf = _np_conv3x3(x, p["w_s_en"], p["b_s_en"])
    hf = _np_conv3x3(x, p["w_h_en"], p["b_h_en"])
    sig = lambda v: 1.0 / (1.0 + np.exp(-v))
    c1 = lambda f, w, b: np.einsum("bchw,oc->bohw", f, w) + b.reshape(1, -1, 1, 1)
    out = np.zeros_like(zf)
    for i, (d1, d2) in enumerate(directions):
        _h_i = c1(hf, p["w_h"][i], p["b_h"][i])
        z_i = sig(c1(zf, p["w_z"][i], p["b_z"][i]))
        s_i = sig(c1(sf, p["w_s"][i], p["b_s"][i]))
        h0 = p["h0"][i].reshape(1, -1, 1, 1)
        out += _ref_direction(z_i, _h_i, h0, d1, d2) * s_i
    return out


# ----------------------------------------------------------------------------

if __name__ == "__main__":
    B, Cin, Cout, H, W = 2, 4, 8, 16, 16
    directions = DIRECTIONS_8

    key = jax.random.PRNGKey(0)
    kx, kp = jax.random.split(key)
    x = jax.random.normal(kx, (B, Cin, H, W), dtype=jnp.float32)
    params = init_params(kp, Cin, Cout, len(directions))

    ref = reference_forward(np.asarray(x), params, directions)

    # (1) f32 MXU path: tight check of the kernel / scan logic.
    fwd_f32 = jax.jit(functools.partial(gru_conv2d_forward, directions=directions,
                                        matmul_dtype=jnp.float32))
    out_f32 = np.asarray(jax.block_until_ready(fwd_f32(x, params)), dtype=np.float64)
    assert out_f32.shape == (B, Cout, H, W)
    err32 = np.max(np.abs(out_f32 - ref))
    if not np.allclose(out_f32, ref, atol=2e-3, rtol=2e-3):
        raise AssertionError(f"f32 path mismatch vs reference, max abs err = {err32}")

    # (2) default perf path: bf16 MXU inputs, f32 accumulation / scan state.
    fwd = jax.jit(functools.partial(gru_conv2d_forward, directions=directions))
    out = np.asarray(jax.block_until_ready(fwd(x, params)), dtype=np.float64)
    errbf = np.max(np.abs(out - ref))
    if not np.allclose(out, ref, atol=1e-1, rtol=2e-2):   # bf16 rounding tolerance
        raise AssertionError(f"bf16 path mismatch vs reference, max abs err = {errbf}")

    print("KERNEL_OK")
</pallas_src>

<mosaic_0001>
module attributes {stable_mosaic.version = 11 : i64} {
  func.func @_fused_gates_kernel(%arg0: i32, %arg1: i32, %arg2: memref<1x256x128xf32, #tpu.memory_space<vmem>>, %arg3: memref<128x256xf32, #tpu.memory_space<vmem>>, %arg4: memref<1x256xf32, #tpu.memory_space<vmem>>, %arg5: memref<1x256x256xf32, #tpu.memory_space<vmem>>) attributes {dimension_semantics = [#tpu.dimension_semantics<parallel>, #tpu.dimension_semantics<parallel>], iteration_bounds = array<i64: 2, 1>, scalar_prefetch = 0 : i64, scratch_operands = 0 : i64, tpu.core_type = #tpu.core_type<tc>, window_params = [{transform_indices = @transform_0, window_bounds = array<i64: 1, 256, 128>}, {pipeline_mode = #tpu.pipeline_mode<synchronous>, transform_indices = @transform_1, window_bounds = array<i64: 128, 256>}, {pipeline_mode = #tpu.pipeline_mode<synchronous>, transform_indices = @transform_2, window_bounds = array<i64: 1, 256>}, {transform_indices = @transform_3, window_bounds = array<i64: 1, 256, 256>}]} {
    %c0 = arith.constant 0 : index
    %c0_0 = arith.constant 0 : index
    %c0_1 = arith.constant 0 : index
    %0 = vector.load %arg2[%c0, %c0_0, %c0_1] : memref<1x256x128xf32, #tpu.memory_space<vmem>>, vector<1x256x128xf32>
    %1 = vector.shape_cast %0 : vector<1x256x128xf32> to vector<256x128xf32>
    %c0_2 = arith.constant 0 : index
    %c0_3 = arith.constant 0 : index
    %2 = vector.load %arg3[%c0_2, %c0_3] : memref<128x256xf32, #tpu.memory_space<vmem>>, vector<128x256xf32>
    %cst = arith.constant dense<0.000000e+00> : vector<256x256xf32>
    %3 = tpu.matmul %1, %2, %cst {dimension_numbers = #tpu.dot_dimension_numbers<[1], [0], [0], [1], [0, 0, 1, 1], [], []>} : vector<256x128xf32>, vector<128x256xf32>, vector<256x256xf32> -> vector<256x256xf32>
    %c0_4 = arith.constant 0 : index
    %c0_5 = arith.constant 0 : index
    %4 = vector.load %arg4[%c0_4, %c0_5] : memref<1x256xf32, #tpu.memory_space<vmem>>, vector<1x256xf32>
    %5 = vector.broadcast %4 : vector<1x256xf32> to vector<256x256xf32>
    %6 = arith.addf %3, %5 : vector<256x256xf32>
    %7 = vector.extract_strided_slice %6 {offsets = [0, 0], sizes = [256, 128], strides = [1, 1]} : vector<256x256xf32> to vector<256x128xf32>
    %cst_6 = arith.constant 5.000000e-01 : f32
    %8 = vector.broadcast %cst_6 : f32 to vector<256x128xf32>
    %9 = arith.mulf %8, %7 : vector<256x128xf32>
    %10 = math.tanh %9 : vector<256x128xf32>
    %cst_7 = arith.constant 1.000000e+00 : f32
    %11 = vector.broadcast %cst_7 : f32 to vector<256x128xf32>
    %12 = arith.addf %10, %11 : vector<256x128xf32>
    %cst_8 = arith.constant 5.000000e-01 : f32
    %13 = vector.broadcast %cst_8 : f32 to vector<256x128xf32>
    %14 = arith.mulf %13, %12 : vector<256x128xf32>
    %c0_9 = arith.constant 0 : index
    %c0_10 = arith.constant 0 : index
    %c0_11 = arith.constant 0 : index
    %15 = vector.load %arg5[%c0_9, %c0_10, %c0_11] : memref<1x256x256xf32, #tpu.memory_space<vmem>>, vector<1x256x128xf32>
    %16 = vector.shape_cast %15 : vector<1x256x128xf32> to vector<256x128xf32>
    %17 = vector.shape_cast %14 : vector<256x128xf32> to vector<1x256x128xf32>
    tpu.vector_store %arg5[%c0_9, %c0_10, %c0_11], %17 {strides = array<i32>} : memref<1x256x256xf32, #tpu.memory_space<vmem>>, vector<1x256x128xf32>,
    %18 = vector.extract_strided_slice %6 {offsets = [0, 128], sizes = [256, 128], strides = [1, 1]} : vector<256x256xf32> to vector<256x128xf32>
    %c0_12 = arith.constant 0 : index
    %c0_13 = arith.constant 0 : index
    %c128 = arith.constant 128 : index
    %19 = vector.load %arg5[%c0_12, %c0_13, %c128] : memref<1x256x256xf32, #tpu.memory_space<vmem>>, vector<1x256x128xf32>
    %20 = vector.shape_cast %19 : vector<1x256x128xf32> to vector<256x128xf32>
    %21 = vector.shape_cast %18 : vector<256x128xf32> to vector<1x256x128xf32>
    tpu.vector_store %arg5[%c0_12, %c0_13, %c128], %21 {strides = array<i32>} : memref<1x256x256xf32, #tpu.memory_space<vmem>>, vector<1x256x128xf32>,
    return
  }
  func.func @transform_0(%arg0: i32, %arg1: i32) -> (i32, i32, i32) {
    %c0_i32 = arith.constant 0 : i32
    %c0_i32_0 = arith.constant 0 : i32
    return %arg0, %arg1, %c0_i32 : i32, i32, i32
  }
  func.func @transform_1(%arg0: i32, %arg1: i32) -> (i32, i32) {
    %c0_i32 = arith.constant 0 : i32
    %c0_i32_0 = arith.constant 0 : i32
    %c0_i32_1 = arith.constant 0 : i32
    return %c0_i32, %c0_i32_0 : i32, i32
  }
  func.func @transform_2(%arg0: i32, %arg1: i32) -> (i32, i32) {
    %c0_i32 = arith.constant 0 : i32
    %c0_i32_0 = arith.constant 0 : i32
    %c0_i32_1 = arith.constant 0 : i32
    return %c0_i32, %c0_i32_0 : i32, i32
  }
  func.func @transform_3(%arg0: i32, %arg1: i32) -> (i32, i32, i32) {
    %c0_i32 = arith.constant 0 : i32
    %c0_i32_0 = arith.constant 0 : i32
    return %arg0, %arg1, %c0_i32 : i32, i32, i32
  }
}

module attributes {stable_mosaic.version = 11 : i64} {
  func.func @kernel(%arg0: i32, %arg1: i32, %arg2: memref<1x1x16x128xf32, #tpu.memory_space<vmem>>, %arg3: memref<1x1x16x128xf32, #tpu.memory_space<vmem>>, %arg4: memref<1x1x16x128xf32, #tpu.memory_space<vmem>>, %arg5: memref<1x1x128xf32, #tpu.memory_space<vmem>>, %arg6: memref<1x16x128xf32, #tpu.memory_space<vmem>>, %arg7: memref<16x128xf32, #tpu.memory_space<vmem>>) attributes {dimension_semantics = [#tpu.dimension_semantics<parallel>, #tpu.dimension_semantics<arbitrary>], iteration_bounds = array<i64: 2, 2>, scalar_prefetch = 0 : i64, scratch_operands = 1 : i64, tpu.core_type = #tpu.core_type<tc>, window_params = [{transform_indices = @transform_0, window_bounds = array<i64: 1, 1, 16, 128>}, {transform_indices = @transform_1, window_bounds = array<i64: 1, 1, 16, 128>}, {transform_indices = @transform_2, window_bounds = array<i64: 1, 1, 16, 128>}, {transform_indices = @transform_3, window_bounds = array<i64: 1, 1, 128>}, {transform_indices = @transform_4, window_bounds = array<i64: 1, 16, 128>}]} {
    %c0_i32 = arith.constant 0 : i32
    %0 = arith.cmpi eq, %arg1, %c0_i32 : i32
    %1 = arith.extui %0 : i1 to i32
    %c0_i32_0 = arith.constant 0 : i32
    %2 = arith.cmpi ne, %1, %c0_i32_0 : i32
    scf.if %2 {
      %cst = arith.constant 0.000000e+00 : f32
      %19 = vector.broadcast %cst : f32 to vector<1x16x128xf32>
      %c0_15 = arith.constant 0 : index
      %c0_16 = arith.constant 0 : index
      %c0_17 = arith.constant 0 : index
      %20 = vector.load %arg6[%c0_15, %c0_16, %c0_17] : memref<1x16x128xf32, #tpu.memory_space<vmem>>, vector<1x16x128xf32>
      tpu.vector_store %arg6[%c0_15, %c0_16, %c0_17], %19 {strides = array<i32>} : memref<1x16x128xf32, #tpu.memory_space<vmem>>, vector<1x16x128xf32>,
    } else {
    }
    %c0_i32_1 = arith.constant 0 : i32
    %3 = arith.cmpi eq, %arg1, %c0_i32_1 : i32
    %4 = arith.extui %3 : i1 to i32
    %c0_i32_2 = arith.constant 0 : i32
    %5 = arith.cmpi ne, %4, %c0_i32_2 : i32
    scf.if %5 {
      %c0_15 = arith.constant 0 : index
      %c0_16 = arith.constant 0 : index
      %c0_17 = arith.constant 0 : index
      %19 = vector.load %arg5[%c0_15, %c0_16, %c0_17] : memref<1x1x128xf32, #tpu.memory_space<vmem>>, vector<1x1x128xf32>
      %20 = vector.shape_cast %19 : vector<1x1x128xf32> to vector<1x128xf32>
      %c0_18 = arith.constant 0 : index
      %c0_19 = arith.constant 0 : index
      %c0_20 = arith.constant 0 : index
      %c0_21 = arith.constant 0 : index
      %21 = vector.load %arg2[%c0_18, %c0_19, %c0_20, %c0_21] : memref<1x1x16x128xf32, #tpu.memory_space<vmem>>, vector<1x1x1x128xf32>
      %22 = vector.shape_cast %21 : vector<1x1x1x128xf32> to vector<1x128xf32>
      %c0_22 = arith.constant 0 : index
      %c0_23 = arith.constant 0 : index
      %c0_24 = arith.constant 0 : index
      %c0_25 = arith.constant 0 : index
      %23 = vector.load %arg4[%c0_22, %c0_23, %c0_24, %c0_25] : memref<1x1x16x128xf32, #tpu.memory_space<vmem>>, vector<1x1x1x128xf32>
      %24 = vector.shape_cast %23 : vector<1x1x1x128xf32> to vector<1x128xf32>
      %25 = arith.mulf %22, %24 : vector<1x128xf32>
      %cst = arith.constant 1.000000e+00 : f32
      %26 = vector.broadcast %cst : f32 to vector<1x128xf32>
      %27 = arith.subf %26, %22 : vector<1x128xf32>
      %28 = arith.mulf %27, %20 : vector<1x128xf32>
      %29 = arith.addf %25, %28 : vector<1x128xf32>
      %c0_26 = arith.constant 0 : index
      %c0_27 = arith.constant 0 : index
      %30 = vector.load %arg7[%c0_26, %c0_27] : memref<16x128xf32, #tpu.memory_space<vmem>>, vector<1x128xf32>
      tpu.vector_store %arg7[%c0_26, %c0_27], %29 {strides = array<i32>} : memref<16x128xf32, #tpu.memory_space<vmem>>, vector<1x128xf32>,
      %c0_28 = arith.constant 0 : index
      %c0_29 = arith.constant 0 : index
      %c1 = arith.constant 1 : index
      %c0_30 = arith.constant 0 : index
      %31 = vector.load %arg2[%c0_28, %c0_29, %c1, %c0_30] : memref<1x1x16x128xf32, #tpu.memory_space<vmem>>, vector<1x1x1x128xf32>
      %32 = vector.shape_cast %31 : vector<1x1x1x128xf32> to vector<1x128xf32>
      %c0_31 = arith.constant 0 : index
      %c0_32 = arith.constant 0 : index
      %c1_33 = arith.constant 1 : index
      %c0_34 = arith.constant 0 : index
      %33 = vector.load %arg4[%c0_31, %c0_32, %c1_33, %c0_34] : memref<1x1x16x128xf32, #tpu.memory_space<vmem>>, vector<1x1x1x128xf32>
      %34 = vector.shape_cast %33 : vector<1x1x1x128xf32> to vector<1x128xf32>
      %35 = arith.mulf %32, %34 : vector<1x128xf32>
      %cst_35 = arith.constant 1.000000e+00 : f32
      %36 = vector.broadcast %cst_35 : f32 to vector<1x128xf32>
      %37 = arith.subf %36, %32 : vector<1x128xf32>
      %38 = arith.mulf %37, %29 : vector<1x128xf32>
      %39 = arith.addf %35, %38 : vector<1x128xf32>
      %c1_36 = arith.constant 1 : index
      %c0_37 = arith.constant 0 : index
      %40 = vector.load %arg7[%c1_36, %c0_37] : memref<16x128xf32, #tpu.memory_space<vmem>>, vector<1x128xf32>
      tpu.vector_store %arg7[%c1_36, %c0_37], %39 {strides = array<i32>} : memref<16x128xf32, #tpu.memory_space<vmem>>, vector<1x128xf32>,
      %c0_38 = arith.constant 0 : index
      %c0_39 = arith.constant 0 : index
      %c2 = arith.constant 2 : index
      %c0_40 = arith.constant 0 : index
      %41 = vector.load %arg2[%c0_38, %c0_39, %c2, %c0_40] : memref<1x1x16x128xf32, #tpu.memory_space<vmem>>, vector<1x1x1x128xf32>
      %42 = vector.shape_cast %41 : vector<1x1x1x128xf32> to vector<1x128xf32>
      %c0_41 = arith.constant 0 : index
      %c0_42 = arith.constant 0 : index
      %c2_43 = arith.constant 2 : index
      %c0_44 = arith.constant 0 : index
      %43 = vector.load %arg4[%c0_41, %c0_42, %c2_43, %c0_44] : memref<1x1x16x128xf32, #tpu.memory_space<vmem>>, vector<1x1x1x128xf32>
      %44 = vector.shape_cast %43 : vector<1x1x1x128xf32> to vector<1x128xf32>
      %45 = arith.mulf %42, %44 : vector<1x128xf32>
      %cst_45 = arith.constant 1.000000e+00 : f32
      %46 = vector.broadcast %cst_45 : f32 to vector<1x128xf32>
      %47 = arith.subf %46, %42 : vector<1x128xf32>
      %48 = arith.mulf %47, %39 : vector<1x128xf32>
      %49 = arith.addf %45, %48 : vector<1x128xf32>
      %c2_46 = arith.constant 2 : index
      %c0_47 = arith.constant 0 : index
      %50 = vector.load %arg7[%c2_46, %c0_47] : memref<16x128xf32, #tpu.memory_space<vmem>>, vector<1x128xf32>
      tpu.vector_store %arg7[%c2_46, %c0_47], %49 {strides = array<i32>} : memref<16x128xf32, #tpu.memory_space<vmem>>, vector<1x128xf32>,
      %c0_48 = arith.constant 0 : index
      %c0_49 = arith.constant 0 : index
      %c3 = arith.constant 3 : index
      %c0_50 = arith.constant 0 : index
      %51 = vector.load %arg2[%c0_48, %c0_49, %c3, %c0_50] : memref<1x1x16x128xf32, #tpu.memory_space<vmem>>, vector<1x1x1x128xf32>
      %52 = vector.shape_cast %51 : vector<1x1x1x128xf32> to vector<1x128xf32>
      %c0_51 = arith.constant 0 : index
      %c0_52 = arith.constant 0 : index
      %c3_53 = arith.constant 3 : index
      %c0_54 = arith.constant 0 : index
      %53 = vector.load %arg4[%c0_51, %c0_52, %c3_53, %c0_54] : memref<1x1x16x128xf32, #tpu.memory_space<vmem>>, vector<1x1x1x128xf32>
      %54 = vector.shape_cast %53 : vector<1x1x1x128xf32> to vector<1x128xf32>
      %55 = arith.mulf %52, %54 : vector<1x128xf32>
      %cst_55 = arith.constant 1.000000e+00 : f32
      %56 = vector.broadcast %cst_55 : f32 to vector<1x128xf32>
      %57 = arith.subf %56, %52 : vector<1x128xf32>
      %58 = arith.mulf %57, %49 : vector<1x128xf32>
      %59 = arith.addf %55, %58 : vector<1x128xf32>
      %c3_56 = arith.constant 3 : index
      %c0_57 = arith.constant 0 : index
      %60 = vector.load %arg7[%c3_56, %c0_57] : memref<16x128xf32, #tpu.memory_space<vmem>>, vector<1x128xf32>
      tpu.vector_store %arg7[%c3_56, %c0_57], %59 {strides = array<i32>} : memref<16x128xf32, #tpu.memory_space<vmem>>, vector<1x128xf32>,
      %c0_58 = arith.constant 0 : index
      %c0_59 = arith.constant 0 : index
      %c4 = arith.constant 4 : index
      %c0_60 = arith.constant 0 : index
      %61 = vector.load %arg2[%c0_58, %c0_59, %c4, %c0_60] : memref<1x1x16x128xf32, #tpu.memory_space<vmem>>, vector<1x1x1x128xf32>
      %62 = vector.shape_cast %61 : vector<1x1x1x128xf32> to vector<1x128xf32>
      %c0_61 = arith.constant 0 : index
      %c0_62 = arith.constant 0 : index
      %c4_63 = arith.constant 4 : index
      %c0_64 = arith.constant 0 : index
      %63 = vector.load %arg4[%c0_61, %c0_62, %c4_63, %c0_64] : memref<1x1x16x128xf32, #tpu.memory_space<vmem>>, vector<1x1x1x128xf32>
      %64 = vector.shape_cast %63 : vector<1x1x1x128xf32> to vector<1x128xf32>
      %65 = arith.mulf %62, %64 : vector<1x128xf32>
      %cst_65 = arith.constant 1.000000e+00 : f32
      %66 = vector.broadcast %cst_65 : f32 to vector<1x128xf32>
      %67 = arith.subf %66, %62 : vector<1x128xf32>
      %68 = arith.mulf %67, %59 : vector<1x128xf32>
      %69 = arith.addf %65, %68 : vector<1x128xf32>
      %c4_66 = arith.constant 4 : index
      %c0_67 = arith.constant 0 : index
      %70 = vector.load %arg7[%c4_66, %c0_67] : memref<16x128xf32, #tpu.memory_space<vmem>>, vector<1x128xf32>
      tpu.vector_store %arg7[%c4_66, %c0_67], %69 {strides = array<i32>} : memref<16x128xf32, #tpu.memory_space<vmem>>, vector<1x128xf32>,
      %c0_68 = arith.constant 0 : index
      %c0_69 = arith.constant 0 : index
      %c5 = arith.constant 5 : index
      %c0_70 = arith.constant 0 : index
      %71 = vector.load %arg2[%c0_68, %c0_69, %c5, %c0_70] : memref<1x1x16x128xf32, #tpu.memory_space<vmem>>, vector<1x1x1x128xf32>
      %72 = vector.shape_cast %71 : vector<1x1x1x128xf32> to vector<1x128xf32>
      %c0_71 = arith.constant 0 : index
      %c0_72 = arith.constant 0 : index
      %c5_73 = arith.constant 5 : index
      %c0_74 = arith.constant 0 : index
      %73 = vector.load %arg4[%c0_71, %c0_72, %c5_73, %c0_74] : memref<1x1x16x128xf32, #tpu.memory_space<vmem>>, vector<1x1x1x128xf32>
      %74 = vector.shape_cast %73 : vector<1x1x1x128xf32> to vector<1x128xf32>
      %75 = arith.mulf %72, %74 : vector<1x128xf32>
      %cst_75 = arith.constant 1.000000e+00 : f32
      %76 = vector.broadcast %cst_75 : f32 to vector<1x128xf32>
      %77 = arith.subf %76, %72 : vector<1x128xf32>
      %78 = arith.mulf %77, %69 : vector<1x128xf32>
      %79 = arith.addf %75, %78 : vector<1x128xf32>
      %c5_76 = arith.constant 5 : index
      %c0_77 = arith.constant 0 : index
      %80 = vector.load %arg7[%c5_76, %c0_77] : memref<16x128xf32, #tpu.memory_space<vmem>>, vector<1x128xf32>
      tpu.vector_store %arg7[%c5_76, %c0_77], %79 {strides = array<i32>} : memref<16x128xf32, #tpu.memory_space<vmem>>, vector<1x128xf32>,
      %c0_78 = arith.constant 0 : index
      %c0_79 = arith.constant 0 : index
      %c6 = arith.constant 6 : index
      %c0_80 = arith.constant 0 : index
      %81 = vector.load %arg2[%c0_78, %c0_79, %c6, %c0_80] : memref<1x1x16x128xf32, #tpu.memory_space<vmem>>, vector<1x1x1x128xf32>
      %82 = vector.shape_cast %81 : vector<1x1x1x128xf32> to vector<1x128xf32>
      %c0_81 = arith.constant 0 : index
      %c0_82 = arith.constant 0 : index
      %c6_83 = arith.constant 6 : index
      %c0_84 = arith.constant 0 : index
      %83 = vector.load %arg4[%c0_81, %c0_82, %c6_83, %c0_84] : memref<1x1x16x128xf32, #tpu.memory_space<vmem>>, vector<1x1x1x128xf32>
      %84 = vector.shape_cast %83 : vector<1x1x1x128xf32> to vector<1x128xf32>
      %85 = arith.mulf %82, %84 : vector<1x128xf32>
      %cst_85 = arith.constant 1.000000e+00 : f32
      %86 = vector.broadcast %cst_85 : f32 to vector<1x128xf32>
      %87 = arith.subf %86, %82 : vector<1x128xf32>
      %88 = arith.mulf %87, %79 : vector<1x128xf32>
      %89 = arith.addf %85, %88 : vector<1x128xf32>
      %c6_86 = arith.constant 6 : index
      %c0_87 = arith.constant 0 : index
      %90 = vector.load %arg7[%c6_86, %c0_87] : memref<16x128xf32, #tpu.memory_space<vmem>>, vector<1x128xf32>
      tpu.vector_store %arg7[%c6_86, %c0_87], %89 {strides = array<i32>} : memref<16x128xf32, #tpu.memory_space<vmem>>, vector<1x128xf32>,
      %c0_88 = arith.constant 0 : index
      %c0_89 = arith.constant 0 : index
      %c7 = arith.constant 7 : index
      %c0_90 = arith.constant 0 : index
      %91 = vector.load %arg2[%c0_88, %c0_89, %c7, %c0_90] : memref<1x1x16x128xf32, #tpu.memory_space<vmem>>, vector<1x1x1x128xf32>
      %92 = vector.shape_cast %91 : vector<1x1x1x128xf32> to vector<1x128xf32>
      %c0_91 = arith.constant 0 : index
      %c0_92 = arith.constant 0 : index
      %c7_93 = arith.constant 7 : index
      %c0_94 = arith.constant 0 : index
      %93 = vector.load %arg4[%c0_91, %c0_92, %c7_93, %c0_94] : memref<1x1x16x128xf32, #tpu.memory_space<vmem>>, vector<1x1x1x128xf32>
      %94 = vector.shape_cast %93 : vector<1x1x1x128xf32> to vector<1x128xf32>
      %95 = arith.mulf %92, %94 : vector<1x128xf32>
      %cst_95 = arith.constant 1.000000e+00 : f32
      %96 = vector.broadcast %cst_95 : f32 to vector<1x128xf32>
      %97 = arith.subf %96, %92 : vector<1x128xf32>
      %98 = arith.mulf %97, %89 : vector<1x128xf32>
      %99 = arith.addf %95, %98 : vector<1x128xf32>
      %c7_96 = arith.constant 7 : index
      %c0_97 = arith.constant 0 : index
      %100 = vector.load %arg7[%c7_96, %c0_97] : memref<16x128xf32, #tpu.memory_space<vmem>>, vector<1x128xf32>
      tpu.vector_store %arg7[%c7_96, %c0_97], %99 {strides = array<i32>} : memref<16x128xf32, #tpu.memory_space<vmem>>, vector<1x128xf32>,
      %c0_98 = arith.constant 0 : index
      %c0_99 = arith.constant 0 : index
      %c8 = arith.constant 8 : index
      %c0_100 = arith.constant 0 : index
      %101 = vector.load %arg2[%c0_98, %c0_99, %c8, %c0_100] : memref<1x1x16x128xf32, #tpu.memory_space<vmem>>, vector<1x1x1x128xf32>
      %102 = vector.shape_cast %101 : vector<1x1x1x128xf32> to vector<1x128xf32>
      %c0_101 = arith.constant 0 : index
      %c0_102 = arith.constant 0 : index
      %c8_103 = arith.constant 8 : index
      %c0_104 = arith.constant 0 : index
      %103 = vector.load %arg4[%c0_101, %c0_102, %c8_103, %c0_104] : memref<1x1x16x128xf32, #tpu.memory_space<vmem>>, vector<1x1x1x128xf32>
      %104 = vector.shape_cast %103 : vector<1x1x1x128xf32> to vector<1x128xf32>
      %105 = arith.mulf %102, %104 : vector<1x128xf32>
      %cst_105 = arith.constant 1.000000e+00 : f32
      %106 = vector.broadcast %cst_105 : f32 to vector<1x128xf32>
      %107 = arith.subf %106, %102 : vector<1x128xf32>
      %108 = arith.mulf %107, %99 : vector<1x128xf32>
      %109 = arith.addf %105, %108 : vector<1x128xf32>
      %c8_106 = arith.constant 8 : index
      %c0_107 = arith.constant 0 : index
      %110 = vector.load %arg7[%c8_106, %c0_107] : memref<16x128xf32, #tpu.memory_space<vmem>>, vector<1x128xf32>
      tpu.vector_store %arg7[%c8_106, %c0_107], %109 {strides = array<i32>} : memref<16x128xf32, #tpu.memory_space<vmem>>, vector<1x128xf32>,
      %c0_108 = arith.constant 0 : index
      %c0_109 = arith.constant 0 : index
      %c9 = arith.constant 9 : index
      %c0_110 = arith.constant 0 : index
      %111 = vector.load %arg2[%c0_108, %c0_109, %c9, %c0_110] : memref<1x1x16x128xf32, #tpu.memory_space<vmem>>, vector<1x1x1x128xf32>
      %112 = vector.shape_cast %111 : vector<1x1x1x128xf32> to vector<1x128xf32>
      %c0_111 = arith.constant 0 : index
      %c0_112 = arith.constant 0 : index
      %c9_113 = arith.constant 9 : index
      %c0_114 = arith.constant 0 : index
      %113 = vector.load %arg4[%c0_111, %c0_112, %c9_113, %c0_114] : memref<1x1x16x128xf32, #tpu.memory_space<vmem>>, vector<1x1x1x128xf32>
      %114 = vector.shape_cast %113 : vector<1x1x1x128xf32> to vector<1x128xf32>
      %115 = arith.mulf %112, %114 : vector<1x128xf32>
      %cst_115 = arith.constant 1.000000e+00 : f32
      %116 = vector.broadcast %cst_115 : f32 to vector<1x128xf32>
      %117 = arith.subf %116, %112 : vector<1x128xf32>
      %118 = arith.mulf %117, %109 : vector<1x128xf32>
      %119 = arith.addf %115, %118 : vector<1x128xf32>
      %c9_116 = arith.constant 9 : index
      %c0_117 = arith.constant 0 : index
      %120 = vector.load %arg7[%c9_116, %c0_117] : memref<16x128xf32, #tpu.memory_space<vmem>>, vector<1x128xf32>
      tpu.vector_store %arg7[%c9_116, %c0_117], %119 {strides = array<i32>} : memref<16x128xf32, #tpu.memory_space<vmem>>, vector<1x128xf32>,
      %c0_118 = arith.constant 0 : index
      %c0_119 = arith.constant 0 : index
      %c10 = arith.constant 10 : index
      %c0_120 = arith.constant 0 : index
      %121 = vector.load %arg2[%c0_118, %c0_119, %c10, %c0_120] : memref<1x1x16x128xf32, #tpu.memory_space<vmem>>, vector<1x1x1x128xf32>
      %122 = vector.shape_cast %121 : vector<1x1x1x128xf32> to vector<1x128xf32>
      %c0_121 = arith.constant 0 : index
      %c0_122 = arith.constant 0 : index
      %c10_123 = arith.constant 10 : index
      %c0_124 = arith.constant 0 : index
      %123 = vector.load %arg4[%c0_121, %c0_122, %c10_123, %c0_124] : memref<1x1x16x128xf32, #tpu.memory_space<vmem>>, vector<1x1x1x128xf32>
      %124 = vector.shape_cast %123 : vector<1x1x1x128xf32> to vector<1x128xf32>
      %125 = arith.mulf %122, %124 : vector<1x128xf32>
      %cst_125 = arith.constant 1.000000e+00 : f32
      %126 = vector.broadcast %cst_125 : f32 to vector<1x128xf32>
      %127 = arith.subf %126, %122 : vector<1x128xf32>
      %128 = arith.mulf %127, %119 : vector<1x128xf32>
      %129 = arith.addf %125, %128 : vector<1x128xf32>
      %c10_126 = arith.constant 10 : index
      %c0_127 = arith.constant 0 : index
      %130 = vector.load %arg7[%c10_126, %c0_127] : memref<16x128xf32, #tpu.memory_space<vmem>>, vector<1x128xf32>
      tpu.vector_store %arg7[%c10_126, %c0_127], %129 {strides = array<i32>} : memref<16x128xf32, #tpu.memory_space<vmem>>, vector<1x128xf32>,
      %c0_128 = arith.constant 0 : index
      %c0_129 = arith.constant 0 : index
      %c11 = arith.constant 11 : index
      %c0_130 = arith.constant 0 : index
      %131 = vector.load %arg2[%c0_128, %c0_129, %c11, %c0_130] : memref<1x1x16x128xf32, #tpu.memory_space<vmem>>, vector<1x1x1x128xf32>
      %132 = vector.shape_cast %131 : vector<1x1x1x128xf32> to vector<1x128xf32>
      %c0_131 = arith.constant 0 : index
      %c0_132 = arith.constant 0 : index
      %c11_133 = arith.constant 11 : index
      %c0_134 = arith.constant 0 : index
      %133 = vector.load %arg4[%c0_131, %c0_132, %c11_133, %c0_134] : memref<1x1x16x128xf32, #tpu.memory_space<vmem>>, vector<1x1x1x128xf32>
      %134 = vector.shape_cast %133 : vector<1x1x1x128xf32> to vector<1x128xf32>
      %135 = arith.mulf %132, %134 : vector<1x128xf32>
      %cst_135 = arith.constant 1.000000e+00 : f32
      %136 = vector.broadcast %cst_135 : f32 to vector<1x128xf32>
      %137 = arith.subf %136, %132 : vector<1x128xf32>
      %138 = arith.mulf %137, %129 : vector<1x128xf32>
      %139 = arith.addf %135, %138 : vector<1x128xf32>
      %c11_136 = arith.constant 11 : index
      %c0_137 = arith.constant 0 : index
      %140 = vector.load %arg7[%c11_136, %c0_137] : memref<16x128xf32, #tpu.memory_space<vmem>>, vector<1x128xf32>
      tpu.vector_store %arg7[%c11_136, %c0_137], %139 {strides = array<i32>} : memref<16x128xf32, #tpu.memory_space<vmem>>, vector<1x128xf32>,
      %c0_138 = arith.constant 0 : index
      %c0_139 = arith.constant 0 : index
      %c12 = arith.constant 12 : index
      %c0_140 = arith.constant 0 : index
      %141 = vector.load %arg2[%c0_138, %c0_139, %c12, %c0_140] : memref<1x1x16x128xf32, #tpu.memory_space<vmem>>, vector<1x1x1x128xf32>
      %142 = vector.shape_cast %141 : vector<1x1x1x128xf32> to vector<1x128xf32>
      %c0_141 = arith.constant 0 : index
      %c0_142 = arith.constant 0 : index
      %c12_143 = arith.constant 12 : index
      %c0_144 = arith.constant 0 : index
      %143 = vector.load %arg4[%c0_141, %c0_142, %c12_143, %c0_144] : memref<1x1x16x128xf32, #tpu.memory_space<vmem>>, vector<1x1x1x128xf32>
      %144 = vector.shape_cast %143 : vector<1x1x1x128xf32> to vector<1x128xf32>
      %145 = arith.mulf %142, %144 : vector<1x128xf32>
      %cst_145 = arith.constant 1.000000e+00 : f32
      %146 = vector.broadcast %cst_145 : f32 to vector<1x128xf32>
      %147 = arith.subf %146, %142 : vector<1x128xf32>
      %148 = arith.mulf %147, %139 : vector<1x128xf32>
      %149 = arith.addf %145, %148 : vector<1x128xf32>
      %c12_146 = arith.constant 12 : index
      %c0_147 = arith.constant 0 : index
      %150 = vector.load %arg7[%c12_146, %c0_147] : memref<16x128xf32, #tpu.memory_space<vmem>>, vector<1x128xf32>
      tpu.vector_store %arg7[%c12_146, %c0_147], %149 {strides = array<i32>} : memref<16x128xf32, #tpu.memory_space<vmem>>, vector<1x128xf32>,
      %c0_148 = arith.constant 0 : index
      %c0_149 = arith.constant 0 : index
      %c13 = arith.constant 13 : index
      %c0_150 = arith.constant 0 : index
      %151 = vector.load %arg2[%c0_148, %c0_149, %c13, %c0_150] : memref<1x1x16x128xf32, #tpu.memory_space<vmem>>, vector<1x1x1x128xf32>
      %152 = vector.shape_cast %151 : vector<1x1x1x128xf32> to vector<1x128xf32>
      %c0_151 = arith.constant 0 : index
      %c0_152 = arith.constant 0 : index
      %c13_153 = arith.constant 13 : index
      %c0_154 = arith.constant 0 : index
      %153 = vector.load %arg4[%c0_151, %c0_152, %c13_153, %c0_154] : memref<1x1x16x128xf32, #tpu.memory_space<vmem>>, vector<1x1x1x128xf32>
      %154 = vector.shape_cast %153 : vector<1x1x1x128xf32> to vector<1x128xf32>
      %155 = arith.mulf %152, %154 : vector<1x128xf32>
      %cst_155 = arith.constant 1.000000e+00 : f32
      %156 = vector.broadcast %cst_155 : f32 to vector<1x128xf32>
      %157 = arith.subf %156, %152 : vector<1x128xf32>
      %158 = arith.mulf %157, %149 : vector<1x128xf32>
      %159 = arith.addf %155, %158 : vector<1x128xf32>
      %c13_156 = arith.constant 13 : index
      %c0_157 = arith.constant 0 : index
      %160 = vector.load %arg7[%c13_156, %c0_157] : memref<16x128xf32, #tpu.memory_space<vmem>>, vector<1x128xf32>
      tpu.vector_store %arg7[%c13_156, %c0_157], %159 {strides = array<i32>} : memref<16x128xf32, #tpu.memory_space<vmem>>, vector<1x128xf32>,
      %c0_158 = arith.constant 0 : index
      %c0_159 = arith.constant 0 : index
      %c14 = arith.constant 14 : index
      %c0_160 = arith.constant 0 : index
      %161 = vector.load %arg2[%c0_158, %c0_159, %c14, %c0_160] : memref<1x1x16x128xf32, #tpu.memory_space<vmem>>, vector<1x1x1x128xf32>
      %162 = vector.shape_cast %161 : vector<1x1x1x128xf32> to vector<1x128xf32>
      %c0_161 = arith.constant 0 : index
      %c0_162 = arith.constant 0 : index
      %c14_163 = arith.constant 14 : index
      %c0_164 = arith.constant 0 : index
      %163 = vector.load %arg4[%c0_161, %c0_162, %c14_163, %c0_164] : memref<1x1x16x128xf32, #tpu.memory_space<vmem>>, vector<1x1x1x128xf32>
      %164 = vector.shape_cast %163 : vector<1x1x1x128xf32> to vector<1x128xf32>
      %165 = arith.mulf %162, %164 : vector<1x128xf32>
      %cst_165 = arith.constant 1.000000e+00 : f32
      %166 = vector.broadcast %cst_165 : f32 to vector<1x128xf32>
      %167 = arith.subf %166, %162 : vector<1x128xf32>
      %168 = arith.mulf %167, %159 : vector<1x128xf32>
      %169 = arith.addf %165, %168 : vector<1x128xf32>
      %c14_166 = arith.constant 14 : index
      %c0_167 = arith.constant 0 : index
      %170 = vector.load %arg7[%c14_166, %c0_167] : memref<16x128xf32, #tpu.memory_space<vmem>>, vector<1x128xf32>
      tpu.vector_store %arg7[%c14_166, %c0_167], %169 {strides = array<i32>} : memref<16x128xf32, #tpu.memory_space<vmem>>, vector<1x128xf32>,
      %c0_168 = arith.constant 0 : index
      %c0_169 = arith.constant 0 : index
      %c15 = arith.constant 15 : index
      %c0_170 = arith.constant 0 : index
      %171 = vector.load %arg2[%c0_168, %c0_169, %c15, %c0_170] : memref<1x1x16x128xf32, #tpu.memory_space<vmem>>, vector<1x1x1x128xf32>
      %172 = vector.shape_cast %171 : vector<1x1x1x128xf32> to vector<1x128xf32>
      %c0_171 = arith.constant 0 : index
      %c0_172 = arith.constant 0 : index
      %c15_173 = arith.constant 15 : index
      %c0_174 = arith.constant 0 : index
      %173 = vector.load %arg4[%c0_171, %c0_172, %c15_173, %c0_174] : memref<1x1x16x128xf32, #tpu.memory_space<vmem>>, vector<1x1x1x128xf32>
      %174 = vector.shape_cast %173 : vector<1x1x1x128xf32> to vector<1x128xf32>
      %175 = arith.mulf %172, %174 : vector<1x128xf32>
      %cst_175 = arith.constant 1.000000e+00 : f32
      %176 = vector.broadcast %cst_175 : f32 to vector<1x128xf32>
      %177 = arith.subf %176, %172 : vector<1x128xf32>
      %178 = arith.mulf %177, %169 : vector<1x128xf32>
      %179 = arith.addf %175, %178 : vector<1x128xf32>
      %c15_176 = arith.constant 15 : index
      %c0_177 = arith.constant 0 : index
      %180 = vector.load %arg7[%c15_176, %c0_177] : memref<16x128xf32, #tpu.memory_space<vmem>>, vector<1x128xf32>
      tpu.vector_store %arg7[%c15_176, %c0_177], %179 {strides = array<i32>} : memref<16x128xf32, #tpu.memory_space<vmem>>, vector<1x128xf32>,
    } else {
    }
    %c1_i32 = arith.constant 1 : i32
    %6 = arith.cmpi eq, %arg1, %c1_i32 : i32
    %7 = arith.extui %6 : i1 to i32
    %c0_i32_3 = arith.constant 0 : i32
    %8 = arith.cmpi ne, %7, %c0_i32_3 : i32
    scf.if %8 {
      %c0_15 = arith.constant 0 : index
      %c0_16 = arith.constant 0 : index
      %c0_17 = arith.constant 0 : index
      %19 = vector.load %arg5[%c0_15, %c0_16, %c0_17] : memref<1x1x128xf32, #tpu.memory_space<vmem>>, vector<1x1x128xf32>
      %20 = vector.shape_cast %19 : vector<1x1x128xf32> to vector<1x128xf32>
      %c0_18 = arith.constant 0 : index
      %c0_19 = arith.constant 0 : index
      %c15 = arith.constant 15 : index
      %c0_20 = arith.constant 0 : index
      %21 = vector.load %arg2[%c0_18, %c0_19, %c15, %c0_20] : memref<1x1x16x128xf32, #tpu.memory_space<vmem>>, vector<1x1x1x128xf32>
      %22 = vector.shape_cast %21 : vector<1x1x1x128xf32> to vector<1x128xf32>
      %c0_21 = arith.constant 0 : index
      %c0_22 = arith.constant 0 : index
      %c15_23 = arith.constant 15 : index
      %c0_24 = arith.constant 0 : index
      %23 = vector.load %arg4[%c0_21, %c0_22, %c15_23, %c0_24] : memref<1x1x16x128xf32, #tpu.memory_space<vmem>>, vector<1x1x1x128xf32>
      %24 = vector.shape_cast %23 : vector<1x1x1x128xf32> to vector<1x128xf32>
      %25 = arith.mulf %22, %24 : vector<1x128xf32>
      %cst = arith.constant 1.000000e+00 : f32
      %26 = vector.broadcast %cst : f32 to vector<1x128xf32>
      %27 = arith.subf %26, %22 : vector<1x128xf32>
      %28 = arith.mulf %27, %20 : vector<1x128xf32>
      %29 = arith.addf %25, %28 : vector<1x128xf32>
      %c15_25 = arith.constant 15 : index
      %c0_26 = arith.constant 0 : index
      %30 = vector.load %arg7[%c15_25, %c0_26] : memref<16x128xf32, #tpu.memory_space<vmem>>, vector<1x128xf32>
      tpu.vector_store %arg7[%c15_25, %c0_26], %29 {strides = array<i32>} : memref<16x128xf32, #tpu.memory_space<vmem>>, vector<1x128xf32>,
      %c0_27 = arith.constant 0 : index
      %c0_28 = arith.constant 0 : index
      %c14 = arith.constant 14 : index
      %c0_29 = arith.constant 0 : index
      %31 = vector.load %arg2[%c0_27, %c0_28, %c14, %c0_29] : memref<1x1x16x128xf32, #tpu.memory_space<vmem>>, vector<1x1x1x128xf32>
      %32 = vector.shape_cast %31 : vector<1x1x1x128xf32> to vector<1x128xf32>
      %c0_30 = arith.constant 0 : index
      %c0_31 = arith.constant 0 : index
      %c14_32 = arith.constant 14 : index
      %c0_33 = arith.constant 0 : index
      %33 = vector.load %arg4[%c0_30, %c0_31, %c14_32, %c0_33] : memref<1x1x16x128xf32, #tpu.memory_space<vmem>>, vector<1x1x1x128xf32>
      %34 = vector.shape_cast %33 : vector<1x1x1x128xf32> to vector<1x128xf32>
      %35 = arith.mulf %32, %34 : vector<1x128xf32>
      %cst_34 = arith.constant 1.000000e+00 : f32
      %36 = vector.broadcast %cst_34 : f32 to vector<1x128xf32>
      %37 = arith.subf %36, %32 : vector<1x128xf32>
      %38 = arith.mulf %37, %29 : vector<1x128xf32>
      %39 = arith.addf %35, %38 : vector<1x128xf32>
      %c14_35 = arith.constant 14 : index
      %c0_36 = arith.constant 0 : index
      %40 = vector.load %arg7[%c14_35, %c0_36] : memref<16x128xf32, #tpu.memory_space<vmem>>, vector<1x128xf32>
      tpu.vector_store %arg7[%c14_35, %c0_36], %39 {strides = array<i32>} : memref<16x128xf32, #tpu.memory_space<vmem>>, vector<1x128xf32>,
      %c0_37 = arith.constant 0 : index
      %c0_38 = arith.constant 0 : index
      %c13 = arith.constant 13 : index
      %c0_39 = arith.constant 0 : index
      %41 = vector.load %arg2[%c0_37, %c0_38, %c13, %c0_39] : memref<1x1x16x128xf32, #tpu.memory_space<vmem>>, vector<1x1x1x128xf32>
      %42 = vector.shape_cast %41 : vector<1x1x1x128xf32> to vector<1x128xf32>
      %c0_40 = arith.constant 0 : index
      %c0_41 = arith.constant 0 : index
      %c13_42 = arith.constant 13 : index
      %c0_43 = arith.constant 0 : index
      %43 = vector.load %arg4[%c0_40, %c0_41, %c13_42, %c0_43] : memref<1x1x16x128xf32, #tpu.memory_space<vmem>>, vector<1x1x1x128xf32>
      %44 = vector.shape_cast %43 : vector<1x1x1x128xf32> to vector<1x128xf32>
      %45 = arith.mulf %42, %44 : vector<1x128xf32>
      %cst_44 = arith.constant 1.000000e+00 : f32
      %46 = vector.broadcast %cst_44 : f32 to vector<1x128xf32>
      %47 = arith.subf %46, %42 : vector<1x128xf32>
      %48 = arith.mulf %47, %39 : vector<1x128xf32>
      %49 = arith.addf %45, %48 : vector<1x128xf32>
      %c13_45 = arith.constant 13 : index
      %c0_46 = arith.constant 0 : index
      %50 = vector.load %arg7[%c13_45, %c0_46] : memref<16x128xf32, #tpu.memory_space<vmem>>, vector<1x128xf32>
      tpu.vector_store %arg7[%c13_45, %c0_46], %49 {strides = array<i32>} : memref<16x128xf32, #tpu.memory_space<vmem>>, vector<1x128xf32>,
      %c0_47 = arith.constant 0 : index
      %c0_48 = arith.constant 0 : index
      %c12 = arith.constant 12 : index
      %c0_49 = arith.constant 0 : index
      %51 = vector.load %arg2[%c0_47, %c0_48, %c12, %c0_49] : memref<1x1x16x128xf32, #tpu.memory_space<vmem>>, vector<1x1x1x128xf32>
      %52 = vector.shape_cast %51 : vector<1x1x1x128xf32> to vector<1x128xf32>
      %c0_50 = arith.constant 0 : index
      %c0_51 = arith.constant 0 : index
      %c12_52 = arith.constant 12 : index
      %c0_53 = arith.constant 0 : index
      %53 = vector.load %arg4[%c0_50, %c0_51, %c12_52, %c0_53] : memref<1x1x16x128xf32, #tpu.memory_space<vmem>>, vector<1x1x1x128xf32>
      %54 = vector.shape_cast %53 : vector<1x1x1x128xf32> to vector<1x128xf32>
      %55 = arith.mulf %52, %54 : vector<1x128xf32>
      %cst_54 = arith.constant 1.000000e+00 : f32
      %56 = vector.broadcast %cst_54 : f32 to vector<1x128xf32>
      %57 = arith.subf %56, %52 : vector<1x128xf32>
      %58 = arith.mulf %57, %49 : vector<1x128xf32>
      %59 = arith.addf %55, %58 : vector<1x128xf32>
      %c12_55 = arith.constant 12 : index
      %c0_56 = arith.constant 0 : index
      %60 = vector.load %arg7[%c12_55, %c0_56] : memref<16x128xf32, #tpu.memory_space<vmem>>, vector<1x128xf32>
      tpu.vector_store %arg7[%c12_55, %c0_56], %59 {strides = array<i32>} : memref<16x128xf32, #tpu.memory_space<vmem>>, vector<1x128xf32>,
      %c0_57 = arith.constant 0 : index
      %c0_58 = arith.constant 0 : index
      %c11 = arith.constant 11 : index
      %c0_59 = arith.constant 0 : index
      %61 = vector.load %arg2[%c0_57, %c0_58, %c11, %c0_59] : memref<1x1x16x128xf32, #tpu.memory_space<vmem>>, vector<1x1x1x128xf32>
      %62 = vector.shape_cast %61 : vector<1x1x1x128xf32> to vector<1x128xf32>
      %c0_60 = arith.constant 0 : index
      %c0_61 = arith.constant 0 : index
      %c11_62 = arith.constant 11 : index
      %c0_63 = arith.constant 0 : index
      %63 = vector.load %arg4[%c0_60, %c0_61, %c11_62, %c0_63] : memref<1x1x16x128xf32, #tpu.memory_space<vmem>>, vector<1x1x1x128xf32>
      %64 = vector.shape_cast %63 : vector<1x1x1x128xf32> to vector<1x128xf32>
      %65 = arith.mulf %62, %64 : vector<1x128xf32>
      %cst_64 = arith.constant 1.000000e+00 : f32
      %66 = vector.broadcast %cst_64 : f32 to vector<1x128xf32>
      %67 = arith.subf %66, %62 : vector<1x128xf32>
      %68 = arith.mulf %67, %59 : vector<1x128xf32>
      %69 = arith.addf %65, %68 : vector<1x128xf32>
      %c11_65 = arith.constant 11 : index
      %c0_66 = arith.constant 0 : index
      %70 = vector.load %arg7[%c11_65, %c0_66] : memref<16x128xf32, #tpu.memory_space<vmem>>, vector<1x128xf32>
      tpu.vector_store %arg7[%c11_65, %c0_66], %69 {strides = array<i32>} : memref<16x128xf32, #tpu.memory_space<vmem>>, vector<1x128xf32>,
      %c0_67 = arith.constant 0 : index
      %c0_68 = arith.constant 0 : index
      %c10 = arith.constant 10 : index
      %c0_69 = arith.constant 0 : index
      %71 = vector.load %arg2[%c0_67, %c0_68, %c10, %c0_69] : memref<1x1x16x128xf32, #tpu.memory_space<vmem>>, vector<1x1x1x128xf32>
      %72 = vector.shape_cast %71 : vector<1x1x1x128xf32> to vector<1x128xf32>
      %c0_70 = arith.constant 0 : index
      %c0_71 = arith.constant 0 : index
      %c10_72 = arith.constant 10 : index
      %c0_73 = arith.constant 0 : index
      %73 = vector.load %arg4[%c0_70, %c0_71, %c10_72, %c0_73] : memref<1x1x16x128xf32, #tpu.memory_space<vmem>>, vector<1x1x1x128xf32>
      %74 = vector.shape_cast %73 : vector<1x1x1x128xf32> to vector<1x128xf32>
      %75 = arith.mulf %72, %74 : vector<1x128xf32>
      %cst_74 = arith.constant 1.000000e+00 : f32
      %76 = vector.broadcast %cst_74 : f32 to vector<1x128xf32>
      %77 = arith.subf %76, %72 : vector<1x128xf32>
      %78 = arith.mulf %77, %69 : vector<1x128xf32>
      %79 = arith.addf %75, %78 : vector<1x128xf32>
      %c10_75 = arith.constant 10 : index
      %c0_76 = arith.constant 0 : index
      %80 = vector.load %arg7[%c10_75, %c0_76] : memref<16x128xf32, #tpu.memory_space<vmem>>, vector<1x128xf32>
      tpu.vector_store %arg7[%c10_75, %c0_76], %79 {strides = array<i32>} : memref<16x128xf32, #tpu.memory_space<vmem>>, vector<1x128xf32>,
      %c0_77 = arith.constant 0 : index
      %c0_78 = arith.constant 0 : index
      %c9 = arith.constant 9 : index
      %c0_79 = arith.constant 0 : index
      %81 = vector.load %arg2[%c0_77, %c0_78, %c9, %c0_79] : memref<1x1x16x128xf32, #tpu.memory_space<vmem>>, vector<1x1x1x128xf32>
      %82 = vector.shape_cast %81 : vector<1x1x1x128xf32> to vector<1x128xf32>
      %c0_80 = arith.constant 0 : index
      %c0_81 = arith.constant 0 : index
      %c9_82 = arith.constant 9 : index
      %c0_83 = arith.constant 0 : index
      %83 = vector.load %arg4[%c0_80, %c0_81, %c9_82, %c0_83] : memref<1x1x16x128xf32, #tpu.memory_space<vmem>>, vector<1x1x1x128xf32>
      %84 = vector.shape_cast %83 : vector<1x1x1x128xf32> to vector<1x128xf32>
      %85 = arith.mulf %82, %84 : vector<1x128xf32>
      %cst_84 = arith.constant 1.000000e+00 : f32
      %86 = vector.broadcast %cst_84 : f32 to vector<1x128xf32>
      %87 = arith.subf %86, %82 : vector<1x128xf32>
      %88 = arith.mulf %87, %79 : vector<1x128xf32>
      %89 = arith.addf %85, %88 : vector<1x128xf32>
      %c9_85 = arith.constant 9 : index
      %c0_86 = arith.constant 0 : index
      %90 = vector.load %arg7[%c9_85, %c0_86] : memref<16x128xf32, #tpu.memory_space<vmem>>, vector<1x128xf32>
      tpu.vector_store %arg7[%c9_85, %c0_86], %89 {strides = array<i32>} : memref<16x128xf32, #tpu.memory_space<vmem>>, vector<1x128xf32>,
      %c0_87 = arith.constant 0 : index
      %c0_88 = arith.constant 0 : index
      %c8 = arith.constant 8 : index
      %c0_89 = arith.constant 0 : index
      %91 = vector.load %arg2[%c0_87, %c0_88, %c8, %c0_89] : memref<1x1x16x128xf32, #tpu.memory_space<vmem>>, vector<1x1x1x128xf32>
      %92 = vector.shape_cast %91 : vector<1x1x1x128xf32> to vector<1x128xf32>
      %c0_90 = arith.constant 0 : index
      %c0_91 = arith.constant 0 : index
      %c8_92 = arith.constant 8 : index
      %c0_93 = arith.constant 0 : index
      %93 = vector.load %arg4[%c0_90, %c0_91, %c8_92, %c0_93] : memref<1x1x16x128xf32, #tpu.memory_space<vmem>>, vector<1x1x1x128xf32>
      %94 = vector.shape_cast %93 : vector<1x1x1x128xf32> to vector<1x128xf32>
      %95 = arith.mulf %92, %94 : vector<1x128xf32>
      %cst_94 = arith.constant 1.000000e+00 : f32
      %96 = vector.broadcast %cst_94 : f32 to vector<1x128xf32>
      %97 = arith.subf %96, %92 : vector<1x128xf32>
      %98 = arith.mulf %97, %89 : vector<1x128xf32>
      %99 = arith.addf %95, %98 : vector<1x128xf32>
      %c8_95 = arith.constant 8 : index
      %c0_96 = arith.constant 0 : index
      %100 = vector.load %arg7[%c8_95, %c0_96] : memref<16x128xf32, #tpu.memory_space<vmem>>, vector<1x128xf32>
      tpu.vector_store %arg7[%c8_95, %c0_96], %99 {strides = array<i32>} : memref<16x128xf32, #tpu.memory_space<vmem>>, vector<1x128xf32>,
      %c0_97 = arith.constant 0 : index
      %c0_98 = arith.constant 0 : index
      %c7 = arith.constant 7 : index
      %c0_99 = arith.constant 0 : index
      %101 = vector.load %arg2[%c0_97, %c0_98, %c7, %c0_99] : memref<1x1x16x128xf32, #tpu.memory_space<vmem>>, vector<1x1x1x128xf32>
      %102 = vector.shape_cast %101 : vector<1x1x1x128xf32> to vector<1x128xf32>
      %c0_100 = arith.constant 0 : index
      %c0_101 = arith.constant 0 : index
      %c7_102 = arith.constant 7 : index
      %c0_103 = arith.constant 0 : index
      %103 = vector.load %arg4[%c0_100, %c0_101, %c7_102, %c0_103] : memref<1x1x16x128xf32, #tpu.memory_space<vmem>>, vector<1x1x1x128xf32>
      %104 = vector.shape_cast %103 : vector<1x1x1x128xf32> to vector<1x128xf32>
      %105 = arith.mulf %102, %104 : vector<1x128xf32>
      %cst_104 = arith.constant 1.000000e+00 : f32
      %106 = vector.broadcast %cst_104 : f32 to vector<1x128xf32>
      %107 = arith.subf %106, %102 : vector<1x128xf32>
      %108 = arith.mulf %107, %99 : vector<1x128xf32>
      %109 = arith.addf %105, %108 : vector<1x128xf32>
      %c7_105 = arith.constant 7 : index
      %c0_106 = arith.constant 0 : index
      %110 = vector.load %arg7[%c7_105, %c0_106] : memref<16x128xf32, #tpu.memory_space<vmem>>, vector<1x128xf32>
      tpu.vector_store %arg7[%c7_105, %c0_106], %109 {strides = array<i32>} : memref<16x128xf32, #tpu.memory_space<vmem>>, vector<1x128xf32>,
      %c0_107 = arith.constant 0 : index
      %c0_108 = arith.constant 0 : index
      %c6 = arith.constant 6 : index
      %c0_109 = arith.constant 0 : index
      %111 = vector.load %arg2[%c0_107, %c0_108, %c6, %c0_109] : memref<1x1x16x128xf32, #tpu.memory_space<vmem>>, vector<1x1x1x128xf32>
      %112 = vector.shape_cast %111 : vector<1x1x1x128xf32> to vector<1x128xf32>
      %c0_110 = arith.constant 0 : index
      %c0_111 = arith.constant 0 : index
      %c6_112 = arith.constant 6 : index
      %c0_113 = arith.constant 0 : index
      %113 = vector.load %arg4[%c0_110, %c0_111, %c6_112, %c0_113] : memref<1x1x16x128xf32, #tpu.memory_space<vmem>>, vector<1x1x1x128xf32>
      %114 = vector.shape_cast %113 : vector<1x1x1x128xf32> to vector<1x128xf32>
      %115 = arith.mulf %112, %114 : vector<1x128xf32>
      %cst_114 = arith.constant 1.000000e+00 : f32
      %116 = vector.broadcast %cst_114 : f32 to vector<1x128xf32>
      %117 = arith.subf %116, %112 : vector<1x128xf32>
      %118 = arith.mulf %117, %109 : vector<1x128xf32>
      %119 = arith.addf %115, %118 : vector<1x128xf32>
      %c6_115 = arith.constant 6 : index
      %c0_116 = arith.constant 0 : index
      %120 = vector.load %arg7[%c6_115, %c0_116] : memref<16x128xf32, #tpu.memory_space<vmem>>, vector<1x128xf32>
      tpu.vector_store %arg7[%c6_115, %c0_116], %119 {strides = array<i32>} : memref<16x128xf32, #tpu.memory_space<vmem>>, vector<1x128xf32>,
      %c0_117 = arith.constant 0 : index
      %c0_118 = arith.constant 0 : index
      %c5 = arith.constant 5 : index
      %c0_119 = arith.constant 0 : index
      %121 = vector.load %arg2[%c0_117, %c0_118, %c5, %c0_119] : memref<1x1x16x128xf32, #tpu.memory_space<vmem>>, vector<1x1x1x128xf32>
      %122 = vector.shape_cast %121 : vector<1x1x1x128xf32> to vector<1x128xf32>
      %c0_120 = arith.constant 0 : index
      %c0_121 = arith.constant 0 : index
      %c5_122 = arith.constant 5 : index
      %c0_123 = arith.constant 0 : index
      %123 = vector.load %arg4[%c0_120, %c0_121, %c5_122, %c0_123] : memref<1x1x16x128xf32, #tpu.memory_space<vmem>>, vector<1x1x1x128xf32>
      %124 = vector.shape_cast %123 : vector<1x1x1x128xf32> to vector<1x128xf32>
      %125 = arith.mulf %122, %124 : vector<1x128xf32>
      %cst_124 = arith.constant 1.000000e+00 : f32
      %126 = vector.broadcast %cst_124 : f32 to vector<1x128xf32>
      %127 = arith.subf %126, %122 : vector<1x128xf32>
      %128 = arith.mulf %127, %119 : vector<1x128xf32>
      %129 = arith.addf %125, %128 : vector<1x128xf32>
      %c5_125 = arith.constant 5 : index
      %c0_126 = arith.constant 0 : index
      %130 = vector.load %arg7[%c5_125, %c0_126] : memref<16x128xf32, #tpu.memory_space<vmem>>, vector<1x128xf32>
      tpu.vector_store %arg7[%c5_125, %c0_126], %129 {strides = array<i32>} : memref<16x128xf32, #tpu.memory_space<vmem>>, vector<1x128xf32>,
      %c0_127 = arith.constant 0 : index
      %c0_128 = arith.constant 0 : index
      %c4 = arith.constant 4 : index
      %c0_129 = arith.constant 0 : index
      %131 = vector.load %arg2[%c0_127, %c0_128, %c4, %c0_129] : memref<1x1x16x128xf32, #tpu.memory_space<vmem>>, vector<1x1x1x128xf32>
      %132 = vector.shape_cast %131 : vector<1x1x1x128xf32> to vector<1x128xf32>
      %c0_130 = arith.constant 0 : index
      %c0_131 = arith.constant 0 : index
      %c4_132 = arith.constant 4 : index
      %c0_133 = arith.constant 0 : index
      %133 = vector.load %arg4[%c0_130, %c0_131, %c4_132, %c0_133] : memref<1x1x16x128xf32, #tpu.memory_space<vmem>>, vector<1x1x1x128xf32>
      %134 = vector.shape_cast %133 : vector<1x1x1x128xf32> to vector<1x128xf32>
      %135 = arith.mulf %132, %134 : vector<1x128xf32>
      %cst_134 = arith.constant 1.000000e+00 : f32
      %136 = vector.broadcast %cst_134 : f32 to vector<1x128xf32>
      %137 = arith.subf %136, %132 : vector<1x128xf32>
      %138 = arith.mulf %137, %129 : vector<1x128xf32>
      %139 = arith.addf %135, %138 : vector<1x128xf32>
      %c4_135 = arith.constant 4 : index
      %c0_136 = arith.constant 0 : index
      %140 = vector.load %arg7[%c4_135, %c0_136] : memref<16x128xf32, #tpu.memory_space<vmem>>, vector<1x128xf32>
      tpu.vector_store %arg7[%c4_135, %c0_136], %139 {strides = array<i32>} : memref<16x128xf32, #tpu.memory_space<vmem>>, vector<1x128xf32>,
      %c0_137 = arith.constant 0 : index
      %c0_138 = arith.constant 0 : index
      %c3 = arith.constant 3 : index
      %c0_139 = arith.constant 0 : index
      %141 = vector.load %arg2[%c0_137, %c0_138, %c3, %c0_139] : memref<1x1x16x128xf32, #tpu.memory_space<vmem>>, vector<1x1x1x128xf32>
      %142 = vector.shape_cast %141 : vector<1x1x1x128xf32> to vector<1x128xf32>
      %c0_140 = arith.constant 0 : index
      %c0_141 = arith.constant 0 : index
      %c3_142 = arith.constant 3 : index
      %c0_143 = arith.constant 0 : index
      %143 = vector.load %arg4[%c0_140, %c0_141, %c3_142, %c0_143] : memref<1x1x16x128xf32, #tpu.memory_space<vmem>>, vector<1x1x1x128xf32>
      %144 = vector.shape_cast %143 : vector<1x1x1x128xf32> to vector<1x128xf32>
      %145 = arith.mulf %142, %144 : vector<1x128xf32>
      %cst_144 = arith.constant 1.000000e+00 : f32
      %146 = vector.broadcast %cst_144 : f32 to vector<1x128xf32>
      %147 = arith.subf %146, %142 : vector<1x128xf32>
      %148 = arith.mulf %147, %139 : vector<1x128xf32>
      %149 = arith.addf %145, %148 : vector<1x128xf32>
      %c3_145 = arith.constant 3 : index
      %c0_146 = arith.constant 0 : index
      %150 = vector.load %arg7[%c3_145, %c0_146] : memref<16x128xf32, #tpu.memory_space<vmem>>, vector<1x128xf32>
      tpu.vector_store %arg7[%c3_145, %c0_146], %149 {strides = array<i32>} : memref<16x128xf32, #tpu.memory_space<vmem>>, vector<1x128xf32>,
      %c0_147 = arith.constant 0 : index
      %c0_148 = arith.constant 0 : index
      %c2 = arith.constant 2 : index
      %c0_149 = arith.constant 0 : index
      %151 = vector.load %arg2[%c0_147, %c0_148, %c2, %c0_149] : memref<1x1x16x128xf32, #tpu.memory_space<vmem>>, vector<1x1x1x128xf32>
      %152 = vector.shape_cast %151 : vector<1x1x1x128xf32> to vector<1x128xf32>
      %c0_150 = arith.constant 0 : index
      %c0_151 = arith.constant 0 : index
      %c2_152 = arith.constant 2 : index
      %c0_153 = arith.constant 0 : index
      %153 = vector.load %arg4[%c0_150, %c0_151, %c2_152, %c0_153] : memref<1x1x16x128xf32, #tpu.memory_space<vmem>>, vector<1x1x1x128xf32>
      %154 = vector.shape_cast %153 : vector<1x1x1x128xf32> to vector<1x128xf32>
      %155 = arith.mulf %152, %154 : vector<1x128xf32>
      %cst_154 = arith.constant 1.000000e+00 : f32
      %156 = vector.broadcast %cst_154 : f32 to vector<1x128xf32>
      %157 = arith.subf %156, %152 : vector<1x128xf32>
      %158 = arith.mulf %157, %149 : vector<1x128xf32>
      %159 = arith.addf %155, %158 : vector<1x128xf32>
      %c2_155 = arith.constant 2 : index
      %c0_156 = arith.constant 0 : index
      %160 = vector.load %arg7[%c2_155, %c0_156] : memref<16x128xf32, #tpu.memory_space<vmem>>, vector<1x128xf32>
      tpu.vector_store %arg7[%c2_155, %c0_156], %159 {strides = array<i32>} : memref<16x128xf32, #tpu.memory_space<vmem>>, vector<1x128xf32>,
      %c0_157 = arith.constant 0 : index
      %c0_158 = arith.constant 0 : index
      %c1 = arith.constant 1 : index
      %c0_159 = arith.constant 0 : index
      %161 = vector.load %arg2[%c0_157, %c0_158, %c1, %c0_159] : memref<1x1x16x128xf32, #tpu.memory_space<vmem>>, vector<1x1x1x128xf32>
      %162 = vector.shape_cast %161 : vector<1x1x1x128xf32> to vector<1x128xf32>
      %c0_160 = arith.constant 0 : index
      %c0_161 = arith.constant 0 : index
      %c1_162 = arith.constant 1 : index
      %c0_163 = arith.constant 0 : index
      %163 = vector.load %arg4[%c0_160, %c0_161, %c1_162, %c0_163] : memref<1x1x16x128xf32, #tpu.memory_space<vmem>>, vector<1x1x1x128xf32>
      %164 = vector.shape_cast %163 : vector<1x1x1x128xf32> to vector<1x128xf32>
      %165 = arith.mulf %162, %164 : vector<1x128xf32>
      %cst_164 = arith.constant 1.000000e+00 : f32
      %166 = vector.broadcast %cst_164 : f32 to vector<1x128xf32>
      %167 = arith.subf %166, %162 : vector<1x128xf32>
      %168 = arith.mulf %167, %159 : vector<1x128xf32>
      %169 = arith.addf %165, %168 : vector<1x128xf32>
      %c1_165 = arith.constant 1 : index
      %c0_166 = arith.constant 0 : index
      %170 = vector.load %arg7[%c1_165, %c0_166] : memref<16x128xf32, #tpu.memory_space<vmem>>, vector<1x128xf32>
      tpu.vector_store %arg7[%c1_165, %c0_166], %169 {strides = array<i32>} : memref<16x128xf32, #tpu.memory_space<vmem>>, vector<1x128xf32>,
      %c0_167 = arith.constant 0 : index
      %c0_168 = arith.constant 0 : index
      %c0_169 = arith.constant 0 : index
      %c0_170 = arith.constant 0 : index
      %171 = vector.load %arg2[%c0_167, %c0_168, %c0_169, %c0_170] : memref<1x1x16x128xf32, #tpu.memory_space<vmem>>, vector<1x1x1x128xf32>
      %172 = vector.shape_cast %171 : vector<1x1x1x128xf32> to vector<1x128xf32>
      %c0_171 = arith.constant 0 : index
      %c0_172 = arith.constant 0 : index
      %c0_173 = arith.constant 0 : index
      %c0_174 = arith.constant 0 : index
      %173 = vector.load %arg4[%c0_171, %c0_172, %c0_173, %c0_174] : memref<1x1x16x128xf32, #tpu.memory_space<vmem>>, vector<1x1x1x128xf32>
      %174 = vector.shape_cast %173 : vector<1x1x1x128xf32> to vector<1x128xf32>
      %175 = arith.mulf %172, %174 : vector<1x128xf32>
      %cst_175 = arith.constant 1.000000e+00 : f32
      %176 = vector.broadcast %cst_175 : f32 to vector<1x128xf32>
      %177 = arith.subf %176, %172 : vector<1x128xf32>
      %178 = arith.mulf %177, %169 : vector<1x128xf32>
      %179 = arith.addf %175, %178 : vector<1x128xf32>
      %c0_176 = arith.constant 0 : index
      %c0_177 = arith.constant 0 : index
      %180 = vector.load %arg7[%c0_176, %c0_177] : memref<16x128xf32, #tpu.memory_space<vmem>>, vector<1x128xf32>
      tpu.vector_store %arg7[%c0_176, %c0_177], %179 {strides = array<i32>} : memref<16x128xf32, #tpu.memory_space<vmem>>, vector<1x128xf32>,
    } else {
    }
    %c0 = arith.constant 0 : index
    %c0_4 = arith.constant 0 : index
    %c0_5 = arith.constant 0 : index
    %9 = vector.load %arg6[%c0, %c0_4, %c0_5] : memref<1x16x128xf32, #tpu.memory_space<vmem>>, vector<1x16x128xf32>
    %10 = vector.shape_cast %9 : vector<1x16x128xf32> to vector<16x128xf32>
    %c0_6 = arith.constant 0 : index
    %c0_7 = arith.constant 0 : index
    %11 = vector.load %arg7[%c0_6, %c0_7] : memref<16x128xf32, #tpu.memory_space<vmem>>, vector<16x128xf32>
    %c0_8 = arith.constant 0 : index
    %c0_9 = arith.constant 0 : index
    %c0_10 = arith.constant 0 : index
    %c0_11 = arith.constant 0 : index
    %12 = vector.load %arg3[%c0_8, %c0_9, %c0_10, %c0_11] : memref<1x1x16x128xf32, #tpu.memory_space<vmem>>, vector<1x1x16x128xf32>
    %13 = vector.shape_cast %12 : vector<1x1x16x128xf32> to vector<16x128xf32>
    %14 = arith.mulf %11, %13 : vector<16x128xf32>
    %15 = arith.addf %10, %14 : vector<16x128xf32>
    %c0_12 = arith.constant 0 : index
    %c0_13 = arith.constant 0 : index
    %c0_14 = arith.constant 0 : index
    %16 = vector.load %arg6[%c0_12, %c0_13, %c0_14] : memref<1x16x128xf32, #tpu.memory_space<vmem>>, vector<1x16x128xf32>
    %17 = vector.shape_cast %16 : vector<1x16x128xf32> to vector<16x128xf32>
    %18 = vector.shape_cast %15 : vector<16x128xf32> to vector<1x16x128xf32>
    tpu.vector_store %arg6[%c0_12, %c0_13, %c0_14], %18 {strides = array<i32>} : memref<1x16x128xf32, #tpu.memory_space<vmem>>, vector<1x16x128xf32>,
    return
  }
  func.func @transform_0(%arg0: i32, %arg1: i32) -> (i32, i32, i32, i32) {
    %c0_i32 = arith.constant 0 : i32
    %c0_i32_0 = arith.constant 0 : i32
    %c0_i32_1 = arith.constant 0 : i32
    return %arg1, %arg0, %c0_i32, %c0_i32_0 : i32, i32, i32, i32
  }
  func.func @transform_1(%arg0: i32, %arg1: i32) -> (i32, i32, i32, i32) {
    %c0_i32 = arith.constant 0 : i32
    %c0_i32_0 = arith.constant 0 : i32
    %c0_i32_1 = arith.constant 0 : i32
    return %arg1, %arg0, %c0_i32, %c0_i32_0 : i32, i32, i32, i32
  }
  func.func @transform_2(%arg0: i32, %arg1: i32) -> (i32, i32, i32, i32) {
    %c0_i32 = arith.constant 0 : i32
    %c0_i32_0 = arith.constant 0 : i32
    %c0_i32_1 = arith.constant 0 : i32
    return %arg1, %arg0, %c0_i32, %c0_i32_0 : i32, i32, i32, i32
  }
  func.func @transform_3(%arg0: i32, %arg1: i32) -> (i32, i32, i32) {
    %c0_i32 = arith.constant 0 : i32
    %c0_i32_0 = arith.constant 0 : i32
    %c0_i32_1 = arith.constant 0 : i32
    return %arg1, %c0_i32, %c0_i32_0 : i32, i32, i32
  }
  func.func @transform_4(%arg0: i32, %arg1: i32) -> (i32, i32, i32) {
    %c0_i32 = arith.constant 0 : i32
    %c0_i32_0 = arith.constant 0 : i32
    %c0_i32_1 = arith.constant 0 : i32
    return %arg0, %c0_i32, %c0_i32_0 : i32, i32, i32
  }
}

module attributes {stable_mosaic.version = 11 : i64} {
  func.func @kernel(%arg0: i32, %arg1: i32, %arg2: memref<1x1x16x128xf32, #tpu.memory_space<vmem>>, %arg3: memref<1x1x16x128xf32, #tpu.memory_space<vmem>>, %arg4: memref<1x1x16x128xf32, #tpu.memory_space<vmem>>, %arg5: memref<1x1x128xf32, #tpu.memory_space<vmem>>, %arg6: memref<1x16x128xf32, #tpu.memory_space<vmem>>, %arg7: memref<16x128xf32, #tpu.memory_space<vmem>>) attributes {dimension_semantics = [#tpu.dimension_semantics<parallel>, #tpu.dimension_semantics<arbitrary>], iteration_bounds = array<i64: 2, 6>, scalar_prefetch = 0 : i64, scratch_operands = 1 : i64, tpu.core_type = #tpu.core_type<tc>, window_params = [{transform_indices = @transform_0, window_bounds = array<i64: 1, 1, 16, 128>}, {transform_indices = @transform_1, window_bounds = array<i64: 1, 1, 16, 128>}, {transform_indices = @transform_2, window_bounds = array<i64: 1, 1, 16, 128>}, {transform_indices = @transform_3, window_bounds = array<i64: 1, 1, 128>}, {transform_indices = @transform_4, window_bounds = array<i64: 1, 16, 128>}]} {
    %c0_i32 = arith.constant 0 : i32
    %0 = arith.cmpi eq, %arg1, %c0_i32 : i32
    %1 = arith.extui %0 : i1 to i32
    %c0_i32_0 = arith.constant 0 : i32
    %2 = arith.cmpi ne, %1, %c0_i32_0 : i32
    scf.if %2 {
      %cst = arith.constant 0.000000e+00 : f32
      %31 = vector.broadcast %cst : f32 to vector<1x16x128xf32>
      %c0_19 = arith.constant 0 : index
      %c0_20 = arith.constant 0 : index
      %c0_21 = arith.constant 0 : index
      %32 = vector.load %arg6[%c0_19, %c0_20, %c0_21] : memref<1x16x128xf32, #tpu.memory_space<vmem>>, vector<1x16x128xf32>
      tpu.vector_store %arg6[%c0_19, %c0_20, %c0_21], %31 {strides = array<i32>} : memref<1x16x128xf32, #tpu.memory_space<vmem>>, vector<1x16x128xf32>,
    } else {
    }
    %c0_i32_1 = arith.constant 0 : i32
    %3 = arith.cmpi eq, %arg1, %c0_i32_1 : i32
    %4 = arith.extui %3 : i1 to i32
    %c0_i32_2 = arith.constant 0 : i32
    %5 = arith.cmpi ne, %4, %c0_i32_2 : i32
    scf.if %5 {
      %c0_19 = arith.constant 0 : index
      %c0_20 = arith.constant 0 : index
      %c0_21 = arith.constant 0 : index
      %31 = vector.load %arg5[%c0_19, %c0_20, %c0_21] : memref<1x1x128xf32, #tpu.memory_space<vmem>>, vector<1x1x128xf32>
      %32 = vector.shape_cast %31 : vector<1x1x128xf32> to vector<1x128xf32>
      %33 = vector.extract_strided_slice %32 {offsets = [0, 0], sizes = [1, 16], strides = [1, 1]} : vector<1x128xf32> to vector<1x16xf32>
      %c0_22 = arith.constant 0 : index
      %c0_23 = arith.constant 0 : index
      %c0_24 = arith.constant 0 : index
      %c0_25 = arith.constant 0 : index
      %34 = vector.load %arg2[%c0_22, %c0_23, %c0_24, %c0_25] : memref<1x1x16x128xf32, #tpu.memory_space<vmem>>, vector<1x1x1x128xf32>
      %35 = vector.shape_cast %34 : vector<1x1x1x128xf32> to vector<1x128xf32>
      %c0_26 = arith.constant 0 : index
      %c0_27 = arith.constant 0 : index
      %c0_28 = arith.constant 0 : index
      %c0_29 = arith.constant 0 : index
      %36 = vector.load %arg4[%c0_26, %c0_27, %c0_28, %c0_29] : memref<1x1x16x128xf32, #tpu.memory_space<vmem>>, vector<1x1x1x128xf32>
      %37 = vector.shape_cast %36 : vector<1x1x1x128xf32> to vector<1x128xf32>
      %38 = arith.mulf %35, %37 : vector<1x128xf32>
      %cst = arith.constant 1.000000e+00 : f32
      %39 = vector.broadcast %cst : f32 to vector<1x128xf32>
      %40 = arith.subf %39, %35 : vector<1x128xf32>
      %41 = arith.mulf %40, %32 : vector<1x128xf32>
      %42 = arith.addf %38, %41 : vector<1x128xf32>
      %c0_30 = arith.constant 0 : index
      %c0_31 = arith.constant 0 : index
      %43 = vector.load %arg7[%c0_30, %c0_31] : memref<16x128xf32, #tpu.memory_space<vmem>>, vector<1x128xf32>
      tpu.vector_store %arg7[%c0_30, %c0_31], %42 {strides = array<i32>} : memref<16x128xf32, #tpu.memory_space<vmem>>, vector<1x128xf32>,
      %44 = vector.extract_strided_slice %42 {offsets = [0, 0], sizes = [1, 112], strides = [1, 1]} : vector<1x128xf32> to vector<1x112xf32>
      %45 = tpu.concatenate %33, %44 in 1 : vector<1x16xf32>, vector<1x112xf32> -> vector<1x128xf32>
      %c0_32 = arith.constant 0 : index
      %c0_33 = arith.constant 0 : index
      %c1 = arith.constant 1 : index
      %c0_34 = arith.constant 0 : index
      %46 = vector.load %arg2[%c0_32, %c0_33, %c1, %c0_34] : memref<1x1x16x128xf32, #tpu.memory_space<vmem>>, vector<1x1x1x128xf32>
      %47 = vector.shape_cast %46 : vector<1x1x1x128xf32> to vector<1x128xf32>
      %c0_35 = arith.constant 0 : index
      %c0_36 = arith.constant 0 : index
      %c1_37 = arith.constant 1 : index
      %c0_38 = arith.constant 0 : index
      %48 = vector.load %arg4[%c0_35, %c0_36, %c1_37, %c0_38] : memref<1x1x16x128xf32, #tpu.memory_space<vmem>>, vector<1x1x1x128xf32>
      %49 = vector.shape_cast %48 : vector<1x1x1x128xf32> to vector<1x128xf32>
      %50 = arith.mulf %47, %49 : vector<1x128xf32>
      %cst_39 = arith.constant 1.000000e+00 : f32
      %51 = vector.broadcast %cst_39 : f32 to vector<1x128xf32>
      %52 = arith.subf %51, %47 : vector<1x128xf32>
      %53 = arith.mulf %52, %45 : vector<1x128xf32>
      %54 = arith.addf %50, %53 : vector<1x128xf32>
      %c1_40 = arith.constant 1 : index
      %c0_41 = arith.constant 0 : index
      %55 = vector.load %arg7[%c1_40, %c0_41] : memref<16x128xf32, #tpu.memory_space<vmem>>, vector<1x128xf32>
      tpu.vector_store %arg7[%c1_40, %c0_41], %54 {strides = array<i32>} : memref<16x128xf32, #tpu.memory_space<vmem>>, vector<1x128xf32>,
      %56 = vector.extract_strided_slice %54 {offsets = [0, 0], sizes = [1, 112], strides = [1, 1]} : vector<1x128xf32> to vector<1x112xf32>
      %57 = tpu.concatenate %33, %56 in 1 : vector<1x16xf32>, vector<1x112xf32> -> vector<1x128xf32>
      %c0_42 = arith.constant 0 : index
      %c0_43 = arith.constant 0 : index
      %c2 = arith.constant 2 : index
      %c0_44 = arith.constant 0 : index
      %58 = vector.load %arg2[%c0_42, %c0_43, %c2, %c0_44] : memref<1x1x16x128xf32, #tpu.memory_space<vmem>>, vector<1x1x1x128xf32>
      %59 = vector.shape_cast %58 : vector<1x1x1x128xf32> to vector<1x128xf32>
      %c0_45 = arith.constant 0 : index
      %c0_46 = arith.constant 0 : index
      %c2_47 = arith.constant 2 : index
      %c0_48 = arith.constant 0 : index
      %60 = vector.load %arg4[%c0_45, %c0_46, %c2_47, %c0_48] : memref<1x1x16x128xf32, #tpu.memory_space<vmem>>, vector<1x1x1x128xf32>
      %61 = vector.shape_cast %60 : vector<1x1x1x128xf32> to vector<1x128xf32>
      %62 = arith.mulf %59, %61 : vector<1x128xf32>
      %cst_49 = arith.constant 1.000000e+00 : f32
      %63 = vector.broadcast %cst_49 : f32 to vector<1x128xf32>
      %64 = arith.subf %63, %59 : vector<1x128xf32>
      %65 = arith.mulf %64, %57 : vector<1x128xf32>
      %66 = arith.addf %62, %65 : vector<1x128xf32>
      %c2_50 = arith.constant 2 : index
      %c0_51 = arith.constant 0 : index
      %67 = vector.load %arg7[%c2_50, %c0_51] : memref<16x128xf32, #tpu.memory_space<vmem>>, vector<1x128xf32>
      tpu.vector_store %arg7[%c2_50, %c0_51], %66 {strides = array<i32>} : memref<16x128xf32, #tpu.memory_space<vmem>>, vector<1x128xf32>,
      %68 = vector.extract_strided_slice %66 {offsets = [0, 0], sizes = [1, 112], strides = [1, 1]} : vector<1x128xf32> to vector<1x112xf32>
      %69 = tpu.concatenate %33, %68 in 1 : vector<1x16xf32>, vector<1x112xf32> -> vector<1x128xf32>
      %c0_52 = arith.constant 0 : index
      %c0_53 = arith.constant 0 : index
      %c3 = arith.constant 3 : index
      %c0_54 = arith.constant 0 : index
      %70 = vector.load %arg2[%c0_52, %c0_53, %c3, %c0_54] : memref<1x1x16x128xf32, #tpu.memory_space<vmem>>, vector<1x1x1x128xf32>
      %71 = vector.shape_cast %70 : vector<1x1x1x128xf32> to vector<1x128xf32>
      %c0_55 = arith.constant 0 : index
      %c0_56 = arith.constant 0 : index
      %c3_57 = arith.constant 3 : index
      %c0_58 = arith.constant 0 : index
      %72 = vector.load %arg4[%c0_55, %c0_56, %c3_57, %c0_58] : memref<1x1x16x128xf32, #tpu.memory_space<vmem>>, vector<1x1x1x128xf32>
      %73 = vector.shape_cast %72 : vector<1x1x1x128xf32> to vector<1x128xf32>
      %74 = arith.mulf %71, %73 : vector<1x128xf32>
      %cst_59 = arith.constant 1.000000e+00 : f32
      %75 = vector.broadcast %cst_59 : f32 to vector<1x128xf32>
      %76 = arith.subf %75, %71 : vector<1x128xf32>
      %77 = arith.mulf %76, %69 : vector<1x128xf32>
      %78 = arith.addf %74, %77 : vector<1x128xf32>
      %c3_60 = arith.constant 3 : index
      %c0_61 = arith.constant 0 : index
      %79 = vector.load %arg7[%c3_60, %c0_61] : memref<16x128xf32, #tpu.memory_space<vmem>>, vector<1x128xf32>
      tpu.vector_store %arg7[%c3_60, %c0_61], %78 {strides = array<i32>} : memref<16x128xf32, #tpu.memory_space<vmem>>, vector<1x128xf32>,
      %80 = vector.extract_strided_slice %78 {offsets = [0, 0], sizes = [1, 112], strides = [1, 1]} : vector<1x128xf32> to vector<1x112xf32>
      %81 = tpu.concatenate %33, %80 in 1 : vector<1x16xf32>, vector<1x112xf32> -> vector<1x128xf32>
      %c0_62 = arith.constant 0 : index
      %c0_63 = arith.constant 0 : index
      %c4 = arith.constant 4 : index
      %c0_64 = arith.constant 0 : index
      %82 = vector.load %arg2[%c0_62, %c0_63, %c4, %c0_64] : memref<1x1x16x128xf32, #tpu.memory_space<vmem>>, vector<1x1x1x128xf32>
      %83 = vector.shape_cast %82 : vector<1x1x1x128xf32> to vector<1x128xf32>
      %c0_65 = arith.constant 0 : index
      %c0_66 = arith.constant 0 : index
      %c4_67 = arith.constant 4 : index
      %c0_68 = arith.constant 0 : index
      %84 = vector.load %arg4[%c0_65, %c0_66, %c4_67, %c0_68] : memref<1x1x16x128xf32, #tpu.memory_space<vmem>>, vector<1x1x1x128xf32>
      %85 = vector.shape_cast %84 : vector<1x1x1x128xf32> to vector<1x128xf32>
      %86 = arith.mulf %83, %85 : vector<1x128xf32>
      %cst_69 = arith.constant 1.000000e+00 : f32
      %87 = vector.broadcast %cst_69 : f32 to vector<1x128xf32>
      %88 = arith.subf %87, %83 : vector<1x128xf32>
      %89 = arith.mulf %88, %81 : vector<1x128xf32>
      %90 = arith.addf %86, %89 : vector<1x128xf32>
      %c4_70 = arith.constant 4 : index
      %c0_71 = arith.constant 0 : index
      %91 = vector.load %arg7[%c4_70, %c0_71] : memref<16x128xf32, #tpu.memory_space<vmem>>, vector<1x128xf32>
      tpu.vector_store %arg7[%c4_70, %c0_71], %90 {strides = array<i32>} : memref<16x128xf32, #tpu.memory_space<vmem>>, vector<1x128xf32>,
      %92 = vector.extract_strided_slice %90 {offsets = [0, 0], sizes = [1, 112], strides = [1, 1]} : vector<1x128xf32> to vector<1x112xf32>
      %93 = tpu.concatenate %33, %92 in 1 : vector<1x16xf32>, vector<1x112xf32> -> vector<1x128xf32>
      %c0_72 = arith.constant 0 : index
      %c0_73 = arith.constant 0 : index
      %c5 = arith.constant 5 : index
      %c0_74 = arith.constant 0 : index
      %94 = vector.load %arg2[%c0_72, %c0_73, %c5, %c0_74] : memref<1x1x16x128xf32, #tpu.memory_space<vmem>>, vector<1x1x1x128xf32>
      %95 = vector.shape_cast %94 : vector<1x1x1x128xf32> to vector<1x128xf32>
      %c0_75 = arith.constant 0 : index
      %c0_76 = arith.constant 0 : index
      %c5_77 = arith.constant 5 : index
      %c0_78 = arith.constant 0 : index
      %96 = vector.load %arg4[%c0_75, %c0_76, %c5_77, %c0_78] : memref<1x1x16x128xf32, #tpu.memory_space<vmem>>, vector<1x1x1x128xf32>
      %97 = vector.shape_cast %96 : vector<1x1x1x128xf32> to vector<1x128xf32>
      %98 = arith.mulf %95, %97 : vector<1x128xf32>
      %cst_79 = arith.constant 1.000000e+00 : f32
      %99 = vector.broadcast %cst_79 : f32 to vector<1x128xf32>
      %100 = arith.subf %99, %95 : vector<1x128xf32>
      %101 = arith.mulf %100, %93 : vector<1x128xf32>
      %102 = arith.addf %98, %101 : vector<1x128xf32>
      %c5_80 = arith.constant 5 : index
      %c0_81 = arith.constant 0 : index
      %103 = vector.load %arg7[%c5_80, %c0_81] : memref<16x128xf32, #tpu.memory_space<vmem>>, vector<1x128xf32>
      tpu.vector_store %arg7[%c5_80, %c0_81], %102 {strides = array<i32>} : memref<16x128xf32, #tpu.memory_space<vmem>>, vector<1x128xf32>,
      %104 = vector.extract_strided_slice %102 {offsets = [0, 0], sizes = [1, 112], strides = [1, 1]} : vector<1x128xf32> to vector<1x112xf32>
      %105 = tpu.concatenate %33, %104 in 1 : vector<1x16xf32>, vector<1x112xf32> -> vector<1x128xf32>
      %c0_82 = arith.constant 0 : index
      %c0_83 = arith.constant 0 : index
      %c6 = arith.constant 6 : index
      %c0_84 = arith.constant 0 : index
      %106 = vector.load %arg2[%c0_82, %c0_83, %c6, %c0_84] : memref<1x1x16x128xf32, #tpu.memory_space<vmem>>, vector<1x1x1x128xf32>
      %107 = vector.shape_cast %106 : vector<1x1x1x128xf32> to vector<1x128xf32>
      %c0_85 = arith.constant 0 : index
      %c0_86 = arith.constant 0 : index
      %c6_87 = arith.constant 6 : index
      %c0_88 = arith.constant 0 : index
      %108 = vector.load %arg4[%c0_85, %c0_86, %c6_87, %c0_88] : memref<1x1x16x128xf32, #tpu.memory_space<vmem>>, vector<1x1x1x128xf32>
      %109 = vector.shape_cast %108 : vector<1x1x1x128xf32> to vector<1x128xf32>
      %110 = arith.mulf %107, %109 : vector<1x128xf32>
      %cst_89 = arith.constant 1.000000e+00 : f32
      %111 = vector.broadcast %cst_89 : f32 to vector<1x128xf32>
      %112 = arith.subf %111, %107 : vector<1x128xf32>
      %113 = arith.mulf %112, %105 : vector<1x128xf32>
      %114 = arith.addf %110, %113 : vector<1x128xf32>
      %c6_90 = arith.constant 6 : index
      %c0_91 = arith.constant 0 : index
      %115 = vector.load %arg7[%c6_90, %c0_91] : memref<16x128xf32, #tpu.memory_space<vmem>>, vector<1x128xf32>
      tpu.vector_store %arg7[%c6_90, %c0_91], %114 {strides = array<i32>} : memref<16x128xf32, #tpu.memory_space<vmem>>, vector<1x128xf32>,
      %116 = vector.extract_strided_slice %114 {offsets = [0, 0], sizes = [1, 112], strides = [1, 1]} : vector<1x128xf32> to vector<1x112xf32>
      %117 = tpu.concatenate %33, %116 in 1 : vector<1x16xf32>, vector<1x112xf32> -> vector<1x128xf32>
      %c0_92 = arith.constant 0 : index
      %c0_93 = arith.constant 0 : index
      %c7 = arith.constant 7 : index
      %c0_94 = arith.constant 0 : index
      %118 = vector.load %arg2[%c0_92, %c0_93, %c7, %c0_94] : memref<1x1x16x128xf32, #tpu.memory_space<vmem>>, vector<1x1x1x128xf32>
      %119 = vector.shape_cast %118 : vector<1x1x1x128xf32> to vector<1x128xf32>
      %c0_95 = arith.constant 0 : index
      %c0_96 = arith.constant 0 : index
      %c7_97 = arith.constant 7 : index
      %c0_98 = arith.constant 0 : index
      %120 = vector.load %arg4[%c0_95, %c0_96, %c7_97, %c0_98] : memref<1x1x16x128xf32, #tpu.memory_space<vmem>>, vector<1x1x1x128xf32>
      %121 = vector.shape_cast %120 : vector<1x1x1x128xf32> to vector<1x128xf32>
      %122 = arith.mulf %119, %121 : vector<1x128xf32>
      %cst_99 = arith.constant 1.000000e+00 : f32
      %123 = vector.broadcast %cst_99 : f32 to vector<1x128xf32>
      %124 = arith.subf %123, %119 : vector<1x128xf32>
      %125 = arith.mulf %124, %117 : vector<1x128xf32>
      %126 = arith.addf %122, %125 : vector<1x128xf32>
      %c7_100 = arith.constant 7 : index
      %c0_101 = arith.constant 0 : index
      %127 = vector.load %arg7[%c7_100, %c0_101] : memref<16x128xf32, #tpu.memory_space<vmem>>, vector<1x128xf32>
      tpu.vector_store %arg7[%c7_100, %c0_101], %126 {strides = array<i32>} : memref<16x128xf32, #tpu.memory_space<vmem>>, vector<1x128xf32>,
      %128 = vector.extract_strided_slice %126 {offsets = [0, 0], sizes = [1, 112], strides = [1, 1]} : vector<1x128xf32> to vector<1x112xf32>
      %129 = tpu.concatenate %33, %128 in 1 : vector<1x16xf32>, vector<1x112xf32> -> vector<1x128xf32>
      %c0_102 = arith.constant 0 : index
      %c0_103 = arith.constant 0 : index
      %c8 = arith.constant 8 : index
      %c0_104 = arith.constant 0 : index
      %130 = vector.load %arg2[%c0_102, %c0_103, %c8, %c0_104] : memref<1x1x16x128xf32, #tpu.memory_space<vmem>>, vector<1x1x1x128xf32>
      %131 = vector.shape_cast %130 : vector<1x1x1x128xf32> to vector<1x128xf32>
      %c0_105 = arith.constant 0 : index
      %c0_106 = arith.constant 0 : index
      %c8_107 = arith.constant 8 : index
      %c0_108 = arith.constant 0 : index
      %132 = vector.load %arg4[%c0_105, %c0_106, %c8_107, %c0_108] : memref<1x1x16x128xf32, #tpu.memory_space<vmem>>, vector<1x1x1x128xf32>
      %133 = vector.shape_cast %132 : vector<1x1x1x128xf32> to vector<1x128xf32>
      %134 = arith.mulf %131, %133 : vector<1x128xf32>
      %cst_109 = arith.constant 1.000000e+00 : f32
      %135 = vector.broadcast %cst_109 : f32 to vector<1x128xf32>
      %136 = arith.subf %135, %131 : vector<1x128xf32>
      %137 = arith.mulf %136, %129 : vector<1x128xf32>
      %138 = arith.addf %134, %137 : vector<1x128xf32>
      %c8_110 = arith.constant 8 : index
      %c0_111 = arith.constant 0 : index
      %139 = vector.load %arg7[%c8_110, %c0_111] : memref<16x128xf32, #tpu.memory_space<vmem>>, vector<1x128xf32>
      tpu.vector_store %arg7[%c8_110, %c0_111], %138 {strides = array<i32>} : memref<16x128xf32, #tpu.memory_space<vmem>>, vector<1x128xf32>,
      %140 = vector.extract_strided_slice %138 {offsets = [0, 0], sizes = [1, 112], strides = [1, 1]} : vector<1x128xf32> to vector<1x112xf32>
      %141 = tpu.concatenate %33, %140 in 1 : vector<1x16xf32>, vector<1x112xf32> -> vector<1x128xf32>
      %c0_112 = arith.constant 0 : index
      %c0_113 = arith.constant 0 : index
      %c9 = arith.constant 9 : index
      %c0_114 = arith.constant 0 : index
      %142 = vector.load %arg2[%c0_112, %c0_113, %c9, %c0_114] : memref<1x1x16x128xf32, #tpu.memory_space<vmem>>, vector<1x1x1x128xf32>
      %143 = vector.shape_cast %142 : vector<1x1x1x128xf32> to vector<1x128xf32>
      %c0_115 = arith.constant 0 : index
      %c0_116 = arith.constant 0 : index
      %c9_117 = arith.constant 9 : index
      %c0_118 = arith.constant 0 : index
      %144 = vector.load %arg4[%c0_115, %c0_116, %c9_117, %c0_118] : memref<1x1x16x128xf32, #tpu.memory_space<vmem>>, vector<1x1x1x128xf32>
      %145 = vector.shape_cast %144 : vector<1x1x1x128xf32> to vector<1x128xf32>
      %146 = arith.mulf %143, %145 : vector<1x128xf32>
      %cst_119 = arith.constant 1.000000e+00 : f32
      %147 = vector.broadcast %cst_119 : f32 to vector<1x128xf32>
      %148 = arith.subf %147, %143 : vector<1x128xf32>
      %149 = arith.mulf %148, %141 : vector<1x128xf32>
      %150 = arith.addf %146, %149 : vector<1x128xf32>
      %c9_120 = arith.constant 9 : index
      %c0_121 = arith.constant 0 : index
      %151 = vector.load %arg7[%c9_120, %c0_121] : memref<16x128xf32, #tpu.memory_space<vmem>>, vector<1x128xf32>
      tpu.vector_store %arg7[%c9_120, %c0_121], %150 {strides = array<i32>} : memref<16x128xf32, #tpu.memory_space<vmem>>, vector<1x128xf32>,
      %152 = vector.extract_strided_slice %150 {offsets = [0, 0], sizes = [1, 112], strides = [1, 1]} : vector<1x128xf32> to vector<1x112xf32>
      %153 = tpu.concatenate %33, %152 in 1 : vector<1x16xf32>, vector<1x112xf32> -> vector<1x128xf32>
      %c0_122 = arith.constant 0 : index
      %c0_123 = arith.constant 0 : index
      %c10 = arith.constant 10 : index
      %c0_124 = arith.constant 0 : index
      %154 = vector.load %arg2[%c0_122, %c0_123, %c10, %c0_124] : memref<1x1x16x128xf32, #tpu.memory_space<vmem>>, vector<1x1x1x128xf32>
      %155 = vector.shape_cast %154 : vector<1x1x1x128xf32> to vector<1x128xf32>
      %c0_125 = arith.constant 0 : index
      %c0_126 = arith.constant 0 : index
      %c10_127 = arith.constant 10 : index
      %c0_128 = arith.constant 0 : index
      %156 = vector.load %arg4[%c0_125, %c0_126, %c10_127, %c0_128] : memref<1x1x16x128xf32, #tpu.memory_space<vmem>>, vector<1x1x1x128xf32>
      %157 = vector.shape_cast %156 : vector<1x1x1x128xf32> to vector<1x128xf32>
      %158 = arith.mulf %155, %157 : vector<1x128xf32>
      %cst_129 = arith.constant 1.000000e+00 : f32
      %159 = vector.broadcast %cst_129 : f32 to vector<1x128xf32>
      %160 = arith.subf %159, %155 : vector<1x128xf32>
      %161 = arith.mulf %160, %153 : vector<1x128xf32>
      %162 = arith.addf %158, %161 : vector<1x128xf32>
      %c10_130 = arith.constant 10 : index
      %c0_131 = arith.constant 0 : index
      %163 = vector.load %arg7[%c10_130, %c0_131] : memref<16x128xf32, #tpu.memory_space<vmem>>, vector<1x128xf32>
      tpu.vector_store %arg7[%c10_130, %c0_131], %162 {strides = array<i32>} : memref<16x128xf32, #tpu.memory_space<vmem>>, vector<1x128xf32>,
      %164 = vector.extract_strided_slice %162 {offsets = [0, 0], sizes = [1, 112], strides = [1, 1]} : vector<1x128xf32> to vector<1x112xf32>
      %165 = tpu.concatenate %33, %164 in 1 : vector<1x16xf32>, vector<1x112xf32> -> vector<1x128xf32>
      %c0_132 = arith.constant 0 : index
      %c0_133 = arith.constant 0 : index
      %c11 = arith.constant 11 : index
      %c0_134 = arith.constant 0 : index
      %166 = vector.load %arg2[%c0_132, %c0_133, %c11, %c0_134] : memref<1x1x16x128xf32, #tpu.memory_space<vmem>>, vector<1x1x1x128xf32>
      %167 = vector.shape_cast %166 : vector<1x1x1x128xf32> to vector<1x128xf32>
      %c0_135 = arith.constant 0 : index
      %c0_136 = arith.constant 0 : index
      %c11_137 = arith.constant 11 : index
      %c0_138 = arith.constant 0 : index
      %168 = vector.load %arg4[%c0_135, %c0_136, %c11_137, %c0_138] : memref<1x1x16x128xf32, #tpu.memory_space<vmem>>, vector<1x1x1x128xf32>
      %169 = vector.shape_cast %168 : vector<1x1x1x128xf32> to vector<1x128xf32>
      %170 = arith.mulf %167, %169 : vector<1x128xf32>
      %cst_139 = arith.constant 1.000000e+00 : f32
      %171 = vector.broadcast %cst_139 : f32 to vector<1x128xf32>
      %172 = arith.subf %171, %167 : vector<1x128xf32>
      %173 = arith.mulf %172, %165 : vector<1x128xf32>
      %174 = arith.addf %170, %173 : vector<1x128xf32>
      %c11_140 = arith.constant 11 : index
      %c0_141 = arith.constant 0 : index
      %175 = vector.load %arg7[%c11_140, %c0_141] : memref<16x128xf32, #tpu.memory_space<vmem>>, vector<1x128xf32>
      tpu.vector_store %arg7[%c11_140, %c0_141], %174 {strides = array<i32>} : memref<16x128xf32, #tpu.memory_space<vmem>>, vector<1x128xf32>,
      %176 = vector.extract_strided_slice %174 {offsets = [0, 0], sizes = [1, 112], strides = [1, 1]} : vector<1x128xf32> to vector<1x112xf32>
      %177 = tpu.concatenate %33, %176 in 1 : vector<1x16xf32>, vector<1x112xf32> -> vector<1x128xf32>
      %c0_142 = arith.constant 0 : index
      %c0_143 = arith.constant 0 : index
      %c12 = arith.constant 12 : index
      %c0_144 = arith.constant 0 : index
      %178 = vector.load %arg2[%c0_142, %c0_143, %c12, %c0_144] : memref<1x1x16x128xf32, #tpu.memory_space<vmem>>, vector<1x1x1x128xf32>
      %179 = vector.shape_cast %178 : vector<1x1x1x128xf32> to vector<1x128xf32>
      %c0_145 = arith.constant 0 : index
      %c0_146 = arith.constant 0 : index
      %c12_147 = arith.constant 12 : index
      %c0_148 = arith.constant 0 : index
      %180 = vector.load %arg4[%c0_145, %c0_146, %c12_147, %c0_148] : memref<1x1x16x128xf32, #tpu.memory_space<vmem>>, vector<1x1x1x128xf32>
      %181 = vector.shape_cast %180 : vector<1x1x1x128xf32> to vector<1x128xf32>
      %182 = arith.mulf %179, %181 : vector<1x128xf32>
      %cst_149 = arith.constant 1.000000e+00 : f32
      %183 = vector.broadcast %cst_149 : f32 to vector<1x128xf32>
      %184 = arith.subf %183, %179 : vector<1x128xf32>
      %185 = arith.mulf %184, %177 : vector<1x128xf32>
      %186 = arith.addf %182, %185 : vector<1x128xf32>
      %c12_150 = arith.constant 12 : index
      %c0_151 = arith.constant 0 : index
      %187 = vector.load %arg7[%c12_150, %c0_151] : memref<16x128xf32, #tpu.memory_space<vmem>>, vector<1x128xf32>
      tpu.vector_store %arg7[%c12_150, %c0_151], %186 {strides = array<i32>} : memref<16x128xf32, #tpu.memory_space<vmem>>, vector<1x128xf32>,
      %188 = vector.extract_strided_slice %186 {offsets = [0, 0], sizes = [1, 112], strides = [1, 1]} : vector<1x128xf32> to vector<1x112xf32>
      %189 = tpu.concatenate %33, %188 in 1 : vector<1x16xf32>, vector<1x112xf32> -> vector<1x128xf32>
      %c0_152 = arith.constant 0 : index
      %c0_153 = arith.constant 0 : index
      %c13 = arith.constant 13 : index
      %c0_154 = arith.constant 0 : index
      %190 = vector.load %arg2[%c0_152, %c0_153, %c13, %c0_154] : memref<1x1x16x128xf32, #tpu.memory_space<vmem>>, vector<1x1x1x128xf32>
      %191 = vector.shape_cast %190 : vector<1x1x1x128xf32> to vector<1x128xf32>
      %c0_155 = arith.constant 0 : index
      %c0_156 = arith.constant 0 : index
      %c13_157 = arith.constant 13 : index
      %c0_158 = arith.constant 0 : index
      %192 = vector.load %arg4[%c0_155, %c0_156, %c13_157, %c0_158] : memref<1x1x16x128xf32, #tpu.memory_space<vmem>>, vector<1x1x1x128xf32>
      %193 = vector.shape_cast %192 : vector<1x1x1x128xf32> to vector<1x128xf32>
      %194 = arith.mulf %191, %193 : vector<1x128xf32>
      %cst_159 = arith.constant 1.000000e+00 : f32
      %195 = vector.broadcast %cst_159 : f32 to vector<1x128xf32>
      %196 = arith.subf %195, %191 : vector<1x128xf32>
      %197 = arith.mulf %196, %189 : vector<1x128xf32>
      %198 = arith.addf %194, %197 : vector<1x128xf32>
      %c13_160 = arith.constant 13 : index
      %c0_161 = arith.constant 0 : index
      %199 = vector.load %arg7[%c13_160, %c0_161] : memref<16x128xf32, #tpu.memory_space<vmem>>, vector<1x128xf32>
      tpu.vector_store %arg7[%c13_160, %c0_161], %198 {strides = array<i32>} : memref<16x128xf32, #tpu.memory_space<vmem>>, vector<1x128xf32>,
      %200 = vector.extract_strided_slice %198 {offsets = [0, 0], sizes = [1, 112], strides = [1, 1]} : vector<1x128xf32> to vector<1x112xf32>
      %201 = tpu.concatenate %33, %200 in 1 : vector<1x16xf32>, vector<1x112xf32> -> vector<1x128xf32>
      %c0_162 = arith.constant 0 : index
      %c0_163 = arith.constant 0 : index
      %c14 = arith.constant 14 : index
      %c0_164 = arith.constant 0 : index
      %202 = vector.load %arg2[%c0_162, %c0_163, %c14, %c0_164] : memref<1x1x16x128xf32, #tpu.memory_space<vmem>>, vector<1x1x1x128xf32>
      %203 = vector.shape_cast %202 : vector<1x1x1x128xf32> to vector<1x128xf32>
      %c0_165 = arith.constant 0 : index
      %c0_166 = arith.constant 0 : index
      %c14_167 = arith.constant 14 : index
      %c0_168 = arith.constant 0 : index
      %204 = vector.load %arg4[%c0_165, %c0_166, %c14_167, %c0_168] : memref<1x1x16x128xf32, #tpu.memory_space<vmem>>, vector<1x1x1x128xf32>
      %205 = vector.shape_cast %204 : vector<1x1x1x128xf32> to vector<1x128xf32>
      %206 = arith.mulf %203, %205 : vector<1x128xf32>
      %cst_169 = arith.constant 1.000000e+00 : f32
      %207 = vector.broadcast %cst_169 : f32 to vector<1x128xf32>
      %208 = arith.subf %207, %203 : vector<1x128xf32>
      %209 = arith.mulf %208, %201 : vector<1x128xf32>
      %210 = arith.addf %206, %209 : vector<1x128xf32>
      %c14_170 = arith.constant 14 : index
      %c0_171 = arith.constant 0 : index
      %211 = vector.load %arg7[%c14_170, %c0_171] : memref<16x128xf32, #tpu.memory_space<vmem>>, vector<1x128xf32>
      tpu.vector_store %arg7[%c14_170, %c0_171], %210 {strides = array<i32>} : memref<16x128xf32, #tpu.memory_space<vmem>>, vector<1x128xf32>,
      %212 = vector.extract_strided_slice %210 {offsets = [0, 0], sizes = [1, 112], strides = [1, 1]} : vector<1x128xf32> to vector<1x112xf32>
      %213 = tpu.concatenate %33, %212 in 1 : vector<1x16xf32>, vector<1x112xf32> -> vector<1x128xf32>
      %c0_172 = arith.constant 0 : index
      %c0_173 = arith.constant 0 : index
      %c15 = arith.constant 15 : index
      %c0_174 = arith.constant 0 : index
      %214 = vector.load %arg2[%c0_172, %c0_173, %c15, %c0_174] : memref<1x1x16x128xf32, #tpu.memory_space<vmem>>, vector<1x1x1x128xf32>
      %215 = vector.shape_cast %214 : vector<1x1x1x128xf32> to vector<1x128xf32>
      %c0_175 = arith.constant 0 : index
      %c0_176 = arith.constant 0 : index
      %c15_177 = arith.constant 15 : index
      %c0_178 = arith.constant 0 : index
      %216 = vector.load %arg4[%c0_175, %c0_176, %c15_177, %c0_178] : memref<1x1x16x128xf32, #tpu.memory_space<vmem>>, vector<1x1x1x128xf32>
      %217 = vector.shape_cast %216 : vector<1x1x1x128xf32> to vector<1x128xf32>
      %218 = arith.mulf %215, %217 : vector<1x128xf32>
      %cst_179 = arith.constant 1.000000e+00 : f32
      %219 = vector.broadcast %cst_179 : f32 to vector<1x128xf32>
      %220 = arith.subf %219, %215 : vector<1x128xf32>
      %221 = arith.mulf %220, %213 : vector<1x128xf32>
      %222 = arith.addf %218, %221 : vector<1x128xf32>
      %c15_180 = arith.constant 15 : index
      %c0_181 = arith.constant 0 : index
      %223 = vector.load %arg7[%c15_180, %c0_181] : memref<16x128xf32, #tpu.memory_space<vmem>>, vector<1x128xf32>
      tpu.vector_store %arg7[%c15_180, %c0_181], %222 {strides = array<i32>} : memref<16x128xf32, #tpu.memory_space<vmem>>, vector<1x128xf32>,
    } else {
    }
    %c1_i32 = arith.constant 1 : i32
    %6 = arith.cmpi eq, %arg1, %c1_i32 : i32
    %7 = arith.extui %6 : i1 to i32
    %c0_i32_3 = arith.constant 0 : i32
    %8 = arith.cmpi ne, %7, %c0_i32_3 : i32
    scf.if %8 {
      %c0_19 = arith.constant 0 : index
      %c0_20 = arith.constant 0 : index
      %c0_21 = arith.constant 0 : index
      %31 = vector.load %arg5[%c0_19, %c0_20, %c0_21] : memref<1x1x128xf32, #tpu.memory_space<vmem>>, vector<1x1x128xf32>
      %32 = vector.shape_cast %31 : vector<1x1x128xf32> to vector<1x128xf32>
      %33 = vector.extract_strided_slice %32 {offsets = [0, 0], sizes = [1, 8], strides = [1, 1]} : vector<1x128xf32> to vector<1x8xf32>
      %c0_22 = arith.constant 0 : index
      %c0_23 = arith.constant 0 : index
      %c0_24 = arith.constant 0 : index
      %c0_25 = arith.constant 0 : index
      %34 = vector.load %arg2[%c0_22, %c0_23, %c0_24, %c0_25] : memref<1x1x16x128xf32, #tpu.memory_space<vmem>>, vector<1x1x1x128xf32>
      %35 = vector.shape_cast %34 : vector<1x1x1x128xf32> to vector<1x128xf32>
      %c0_26 = arith.constant 0 : index
      %c0_27 = arith.constant 0 : index
      %c0_28 = arith.constant 0 : index
      %c0_29 = arith.constant 0 : index
      %36 = vector.load %arg4[%c0_26, %c0_27, %c0_28, %c0_29] : memref<1x1x16x128xf32, #tpu.memory_space<vmem>>, vector<1x1x1x128xf32>
      %37 = vector.shape_cast %36 : vector<1x1x1x128xf32> to vector<1x128xf32>
      %38 = arith.mulf %35, %37 : vector<1x128xf32>
      %cst = arith.constant 1.000000e+00 : f32
      %39 = vector.broadcast %cst : f32 to vector<1x128xf32>
      %40 = arith.subf %39, %35 : vector<1x128xf32>
      %41 = arith.mulf %40, %32 : vector<1x128xf32>
      %42 = arith.addf %38, %41 : vector<1x128xf32>
      %c0_30 = arith.constant 0 : index
      %c0_31 = arith.constant 0 : index
      %43 = vector.load %arg7[%c0_30, %c0_31] : memref<16x128xf32, #tpu.memory_space<vmem>>, vector<1x128xf32>
      tpu.vector_store %arg7[%c0_30, %c0_31], %42 {strides = array<i32>} : memref<16x128xf32, #tpu.memory_space<vmem>>, vector<1x128xf32>,
      %44 = vector.extract_strided_slice %42 {offsets = [0, 8], sizes = [1, 120], strides = [1, 1]} : vector<1x128xf32> to vector<1x120xf32>
      %45 = tpu.concatenate %44, %33 in 1 : vector<1x120xf32>, vector<1x8xf32> -> vector<1x128xf32>
      %c0_32 = arith.constant 0 : index
      %c0_33 = arith.constant 0 : index
      %c1 = arith.constant 1 : index
      %c0_34 = arith.constant 0 : index
      %46 = vector.load %arg2[%c0_32, %c0_33, %c1, %c0_34] : memref<1x1x16x128xf32, #tpu.memory_space<vmem>>, vector<1x1x1x128xf32>
      %47 = vector.shape_cast %46 : vector<1x1x1x128xf32> to vector<1x128xf32>
      %c0_35 = arith.constant 0 : index
      %c0_36 = arith.constant 0 : index
      %c1_37 = arith.constant 1 : index
      %c0_38 = arith.constant 0 : index
      %48 = vector.load %arg4[%c0_35, %c0_36, %c1_37, %c0_38] : memref<1x1x16x128xf32, #tpu.memory_space<vmem>>, vector<1x1x1x128xf32>
      %49 = vector.shape_cast %48 : vector<1x1x1x128xf32> to vector<1x128xf32>
      %50 = arith.mulf %47, %49 : vector<1x128xf32>
      %cst_39 = arith.constant 1.000000e+00 : f32
      %51 = vector.broadcast %cst_39 : f32 to vector<1x128xf32>
      %52 = arith.subf %51, %47 : vector<1x128xf32>
      %53 = arith.mulf %52, %45 : vector<1x128xf32>
      %54 = arith.addf %50, %53 : vector<1x128xf32>
      %c1_40 = arith.constant 1 : index
      %c0_41 = arith.constant 0 : index
      %55 = vector.load %arg7[%c1_40, %c0_41] : memref<16x128xf32, #tpu.memory_space<vmem>>, vector<1x128xf32>
      tpu.vector_store %arg7[%c1_40, %c0_41], %54 {strides = array<i32>} : memref<16x128xf32, #tpu.memory_space<vmem>>, vector<1x128xf32>,
      %56 = vector.extract_strided_slice %54 {offsets = [0, 8], sizes = [1, 120], strides = [1, 1]} : vector<1x128xf32> to vector<1x120xf32>
      %57 = tpu.concatenate %56, %33 in 1 : vector<1x120xf32>, vector<1x8xf32> -> vector<1x128xf32>
      %c0_42 = arith.constant 0 : index
      %c0_43 = arith.constant 0 : index
      %c2 = arith.constant 2 : index
      %c0_44 = arith.constant 0 : index
      %58 = vector.load %arg2[%c0_42, %c0_43, %c2, %c0_44] : memref<1x1x16x128xf32, #tpu.memory_space<vmem>>, vector<1x1x1x128xf32>
      %59 = vector.shape_cast %58 : vector<1x1x1x128xf32> to vector<1x128xf32>
      %c0_45 = arith.constant 0 : index
      %c0_46 = arith.constant 0 : index
      %c2_47 = arith.constant 2 : index
      %c0_48 = arith.constant 0 : index
      %60 = vector.load %arg4[%c0_45, %c0_46, %c2_47, %c0_48] : memref<1x1x16x128xf32, #tpu.memory_space<vmem>>, vector<1x1x1x128xf32>
      %61 = vector.shape_cast %60 : vector<1x1x1x128xf32> to vector<1x128xf32>
      %62 = arith.mulf %59, %61 : vector<1x128xf32>
      %cst_49 = arith.constant 1.000000e+00 : f32
      %63 = vector.broadcast %cst_49 : f32 to vector<1x128xf32>
      %64 = arith.subf %63, %59 : vector<1x128xf32>
      %65 = arith.mulf %64, %57 : vector<1x128xf32>
      %66 = arith.addf %62, %65 : vector<1x128xf32>
      %c2_50 = arith.constant 2 : index
      %c0_51 = arith.constant 0 : index
      %67 = vector.load %arg7[%c2_50, %c0_51] : memref<16x128xf32, #tpu.memory_space<vmem>>, vector<1x128xf32>
      tpu.vector_store %arg7[%c2_50, %c0_51], %66 {strides = array<i32>} : memref<16x128xf32, #tpu.memory_space<vmem>>, vector<1x128xf32>,
      %68 = vector.extract_strided_slice %66 {offsets = [0, 8], sizes = [1, 120], strides = [1, 1]} : vector<1x128xf32> to vector<1x120xf32>
      %69 = tpu.concatenate %68, %33 in 1 : vector<1x120xf32>, vector<1x8xf32> -> vector<1x128xf32>
      %c0_52 = arith.constant 0 : index
      %c0_53 = arith.constant 0 : index
      %c3 = arith.constant 3 : index
      %c0_54 = arith.constant 0 : index
      %70 = vector.load %arg2[%c0_52, %c0_53, %c3, %c0_54] : memref<1x1x16x128xf32, #tpu.memory_space<vmem>>, vector<1x1x1x128xf32>
      %71 = vector.shape_cast %70 : vector<1x1x1x128xf32> to vector<1x128xf32>
      %c0_55 = arith.constant 0 : index
      %c0_56 = arith.constant 0 : index
      %c3_57 = arith.constant 3 : index
      %c0_58 = arith.constant 0 : index
      %72 = vector.load %arg4[%c0_55, %c0_56, %c3_57, %c0_58] : memref<1x1x16x128xf32, #tpu.memory_space<vmem>>, vector<1x1x1x128xf32>
      %73 = vector.shape_cast %72 : vector<1x1x1x128xf32> to vector<1x128xf32>
      %74 = arith.mulf %71, %73 : vector<1x128xf32>
      %cst_59 = arith.constant 1.000000e+00 : f32
      %75 = vector.broadcast %cst_59 : f32 to vector<1x128xf32>
      %76 = arith.subf %75, %71 : vector<1x128xf32>
      %77 = arith.mulf %76, %69 : vector<1x128xf32>
      %78 = arith.addf %74, %77 : vector<1x128xf32>
      %c3_60 = arith.constant 3 : index
      %c0_61 = arith.constant 0 : index
      %79 = vector.load %arg7[%c3_60, %c0_61] : memref<16x128xf32, #tpu.memory_space<vmem>>, vector<1x128xf32>
      tpu.vector_store %arg7[%c3_60, %c0_61], %78 {strides = array<i32>} : memref<16x128xf32, #tpu.memory_space<vmem>>, vector<1x128xf32>,
      %80 = vector.extract_strided_slice %78 {offsets = [0, 8], sizes = [1, 120], strides = [1, 1]} : vector<1x128xf32> to vector<1x120xf32>
      %81 = tpu.concatenate %80, %33 in 1 : vector<1x120xf32>, vector<1x8xf32> -> vector<1x128xf32>
      %c0_62 = arith.constant 0 : index
      %c0_63 = arith.constant 0 : index
      %c4 = arith.constant 4 : index
      %c0_64 = arith.constant 0 : index
      %82 = vector.load %arg2[%c0_62, %c0_63, %c4, %c0_64] : memref<1x1x16x128xf32, #tpu.memory_space<vmem>>, vector<1x1x1x128xf32>
      %83 = vector.shape_cast %82 : vector<1x1x1x128xf32> to vector<1x128xf32>
      %c0_65 = arith.constant 0 : index
      %c0_66 = arith.constant 0 : index
      %c4_67 = arith.constant 4 : index
      %c0_68 = arith.constant 0 : index
      %84 = vector.load %arg4[%c0_65, %c0_66, %c4_67, %c0_68] : memref<1x1x16x128xf32, #tpu.memory_space<vmem>>, vector<1x1x1x128xf32>
      %85 = vector.shape_cast %84 : vector<1x1x1x128xf32> to vector<1x128xf32>
      %86 = arith.mulf %83, %85 : vector<1x128xf32>
      %cst_69 = arith.constant 1.000000e+00 : f32
      %87 = vector.broadcast %cst_69 : f32 to vector<1x128xf32>
      %88 = arith.subf %87, %83 : vector<1x128xf32>
      %89 = arith.mulf %88, %81 : vector<1x128xf32>
      %90 = arith.addf %86, %89 : vector<1x128xf32>
      %c4_70 = arith.constant 4 : index
      %c0_71 = arith.constant 0 : index
      %91 = vector.load %arg7[%c4_70, %c0_71] : memref<16x128xf32, #tpu.memory_space<vmem>>, vector<1x128xf32>
      tpu.vector_store %arg7[%c4_70, %c0_71], %90 {strides = array<i32>} : memref<16x128xf32, #tpu.memory_space<vmem>>, vector<1x128xf32>,
      %92 = vector.extract_strided_slice %90 {offsets = [0, 8], sizes = [1, 120], strides = [1, 1]} : vector<1x128xf32> to vector<1x120xf32>
      %93 = tpu.concatenate %92, %33 in 1 : vector<1x120xf32>, vector<1x8xf32> -> vector<1x128xf32>
      %c0_72 = arith.constant 0 : index
      %c0_73 = arith.constant 0 : index
      %c5 = arith.constant 5 : index
      %c0_74 = arith.constant 0 : index
      %94 = vector.load %arg2[%c0_72, %c0_73, %c5, %c0_74] : memref<1x1x16x128xf32, #tpu.memory_space<vmem>>, vector<1x1x1x128xf32>
      %95 = vector.shape_cast %94 : vector<1x1x1x128xf32> to vector<1x128xf32>
      %c0_75 = arith.constant 0 : index
      %c0_76 = arith.constant 0 : index
      %c5_77 = arith.constant 5 : index
      %c0_78 = arith.constant 0 : index
      %96 = vector.load %arg4[%c0_75, %c0_76, %c5_77, %c0_78] : memref<1x1x16x128xf32, #tpu.memory_space<vmem>>, vector<1x1x1x128xf32>
      %97 = vector.shape_cast %96 : vector<1x1x1x128xf32> to vector<1x128xf32>
      %98 = arith.mulf %95, %97 : vector<1x128xf32>
      %cst_79 = arith.constant 1.000000e+00 : f32
      %99 = vector.broadcast %cst_79 : f32 to vector<1x128xf32>
      %100 = arith.subf %99, %95 : vector<1x128xf32>
      %101 = arith.mulf %100, %93 : vector<1x128xf32>
      %102 = arith.addf %98, %101 : vector<1x128xf32>
      %c5_80 = arith.constant 5 : index
      %c0_81 = arith.constant 0 : index
      %103 = vector.load %arg7[%c5_80, %c0_81] : memref<16x128xf32, #tpu.memory_space<vmem>>, vector<1x128xf32>
      tpu.vector_store %arg7[%c5_80, %c0_81], %102 {strides = array<i32>} : memref<16x128xf32, #tpu.memory_space<vmem>>, vector<1x128xf32>,
      %104 = vector.extract_strided_slice %102 {offsets = [0, 8], sizes = [1, 120], strides = [1, 1]} : vector<1x128xf32> to vector<1x120xf32>
      %105 = tpu.concatenate %104, %33 in 1 : vector<1x120xf32>, vector<1x8xf32> -> vector<1x128xf32>
      %c0_82 = arith.constant 0 : index
      %c0_83 = arith.constant 0 : index
      %c6 = arith.constant 6 : index
      %c0_84 = arith.constant 0 : index
      %106 = vector.load %arg2[%c0_82, %c0_83, %c6, %c0_84] : memref<1x1x16x128xf32, #tpu.memory_space<vmem>>, vector<1x1x1x128xf32>
      %107 = vector.shape_cast %106 : vector<1x1x1x128xf32> to vector<1x128xf32>
      %c0_85 = arith.constant 0 : index
      %c0_86 = arith.constant 0 : index
      %c6_87 = arith.constant 6 : index
      %c0_88 = arith.constant 0 : index
      %108 = vector.load %arg4[%c0_85, %c0_86, %c6_87, %c0_88] : memref<1x1x16x128xf32, #tpu.memory_space<vmem>>, vector<1x1x1x128xf32>
      %109 = vector.shape_cast %108 : vector<1x1x1x128xf32> to vector<1x128xf32>
      %110 = arith.mulf %107, %109 : vector<1x128xf32>
      %cst_89 = arith.constant 1.000000e+00 : f32
      %111 = vector.broadcast %cst_89 : f32 to vector<1x128xf32>
      %112 = arith.subf %111, %107 : vector<1x128xf32>
      %113 = arith.mulf %112, %105 : vector<1x128xf32>
      %114 = arith.addf %110, %113 : vector<1x128xf32>
      %c6_90 = arith.constant 6 : index
      %c0_91 = arith.constant 0 : index
      %115 = vector.load %arg7[%c6_90, %c0_91] : memref<16x128xf32, #tpu.memory_space<vmem>>, vector<1x128xf32>
      tpu.vector_store %arg7[%c6_90, %c0_91], %114 {strides = array<i32>} : memref<16x128xf32, #tpu.memory_space<vmem>>, vector<1x128xf32>,
      %116 = vector.extract_strided_slice %114 {offsets = [0, 8], sizes = [1, 120], strides = [1, 1]} : vector<1x128xf32> to vector<1x120xf32>
      %117 = tpu.concatenate %116, %33 in 1 : vector<1x120xf32>, vector<1x8xf32> -> vector<1x128xf32>
      %c0_92 = arith.constant 0 : index
      %c0_93 = arith.constant 0 : index
      %c7 = arith.constant 7 : index
      %c0_94 = arith.constant 0 : index
      %118 = vector.load %arg2[%c0_92, %c0_93, %c7, %c0_94] : memref<1x1x16x128xf32, #tpu.memory_space<vmem>>, vector<1x1x1x128xf32>
      %119 = vector.shape_cast %118 : vector<1x1x1x128xf32> to vector<1x128xf32>
      %c0_95 = arith.constant 0 : index
      %c0_96 = arith.constant 0 : index
      %c7_97 = arith.constant 7 : index
      %c0_98 = arith.constant 0 : index
      %120 = vector.load %arg4[%c0_95, %c0_96, %c7_97, %c0_98] : memref<1x1x16x128xf32, #tpu.memory_space<vmem>>, vector<1x1x1x128xf32>
      %121 = vector.shape_cast %120 : vector<1x1x1x128xf32> to vector<1x128xf32>
      %122 = arith.mulf %119, %121 : vector<1x128xf32>
      %cst_99 = arith.constant 1.000000e+00 : f32
      %123 = vector.broadcast %cst_99 : f32 to vector<1x128xf32>
      %124 = arith.subf %123, %119 : vector<1x128xf32>
      %125 = arith.mulf %124, %117 : vector<1x128xf32>
      %126 = arith.addf %122, %125 : vector<1x128xf32>
      %c7_100 = arith.constant 7 : index
      %c0_101 = arith.constant 0 : index
      %127 = vector.load %arg7[%c7_100, %c0_101] : memref<16x128xf32, #tpu.memory_space<vmem>>, vector<1x128xf32>
      tpu.vector_store %arg7[%c7_100, %c0_101], %126 {strides = array<i32>} : memref<16x128xf32, #tpu.memory_space<vmem>>, vector<1x128xf32>,
      %128 = vector.extract_strided_slice %126 {offsets = [0, 8], sizes = [1, 120], strides = [1, 1]} : vector<1x128xf32> to vector<1x120xf32>
      %129 = tpu.concatenate %128, %33 in 1 : vector<1x120xf32>, vector<1x8xf32> -> vector<1x128xf32>
      %c0_102 = arith.constant 0 : index
      %c0_103 = arith.constant 0 : index
      %c8 = arith.constant 8 : index
      %c0_104 = arith.constant 0 : index
      %130 = vector.load %arg2[%c0_102, %c0_103, %c8, %c0_104] : memref<1x1x16x128xf32, #tpu.memory_space<vmem>>, vector<1x1x1x128xf32>
      %131 = vector.shape_cast %130 : vector<1x1x1x128xf32> to vector<1x128xf32>
      %c0_105 = arith.constant 0 : index
      %c0_106 = arith.constant 0 : index
      %c8_107 = arith.constant 8 : index
      %c0_108 = arith.constant 0 : index
      %132 = vector.load %arg4[%c0_105, %c0_106, %c8_107, %c0_108] : memref<1x1x16x128xf32, #tpu.memory_space<vmem>>, vector<1x1x1x128xf32>
      %133 = vector.shape_cast %132 : vector<1x1x1x128xf32> to vector<1x128xf32>
      %134 = arith.mulf %131, %133 : vector<1x128xf32>
      %cst_109 = arith.constant 1.000000e+00 : f32
      %135 = vector.broadcast %cst_109 : f32 to vector<1x128xf32>
      %136 = arith.subf %135, %131 : vector<1x128xf32>
      %137 = arith.mulf %136, %129 : vector<1x128xf32>
      %138 = arith.addf %134, %137 : vector<1x128xf32>
      %c8_110 = arith.constant 8 : index
      %c0_111 = arith.constant 0 : index
      %139 = vector.load %arg7[%c8_110, %c0_111] : memref<16x128xf32, #tpu.memory_space<vmem>>, vector<1x128xf32>
      tpu.vector_store %arg7[%c8_110, %c0_111], %138 {strides = array<i32>} : memref<16x128xf32, #tpu.memory_space<vmem>>, vector<1x128xf32>,
      %140 = vector.extract_strided_slice %138 {offsets = [0, 8], sizes = [1, 120], strides = [1, 1]} : vector<1x128xf32> to vector<1x120xf32>
      %141 = tpu.concatenate %140, %33 in 1 : vector<1x120xf32>, vector<1x8xf32> -> vector<1x128xf32>
      %c0_112 = arith.constant 0 : index
      %c0_113 = arith.constant 0 : index
      %c9 = arith.constant 9 : index
      %c0_114 = arith.constant 0 : index
      %142 = vector.load %arg2[%c0_112, %c0_113, %c9, %c0_114] : memref<1x1x16x128xf32, #tpu.memory_space<vmem>>, vector<1x1x1x128xf32>
      %143 = vector.shape_cast %142 : vector<1x1x1x128xf32> to vector<1x128xf32>
      %c0_115 = arith.constant 0 : index
      %c0_116 = arith.constant 0 : index
      %c9_117 = arith.constant 9 : index
      %c0_118 = arith.constant 0 : index
      %144 = vector.load %arg4[%c0_115, %c0_116, %c9_117, %c0_118] : memref<1x1x16x128xf32, #tpu.memory_space<vmem>>, vector<1x1x1x128xf32>
      %145 = vector.shape_cast %144 : vector<1x1x1x128xf32> to vector<1x128xf32>
      %146 = arith.mulf %143, %145 : vector<1x128xf32>
      %cst_119 = arith.constant 1.000000e+00 : f32
      %147 = vector.broadcast %cst_119 : f32 to vector<1x128xf32>
      %148 = arith.subf %147, %143 : vector<1x128xf32>
      %149 = arith.mulf %148, %141 : vector<1x128xf32>
      %150 = arith.addf %146, %149 : vector<1x128xf32>
      %c9_120 = arith.constant 9 : index
      %c0_121 = arith.constant 0 : index
      %151 = vector.load %arg7[%c9_120, %c0_121] : memref<16x128xf32, #tpu.memory_space<vmem>>, vector<1x128xf32>
      tpu.vector_store %arg7[%c9_120, %c0_121], %150 {strides = array<i32>} : memref<16x128xf32, #tpu.memory_space<vmem>>, vector<1x128xf32>,
      %152 = vector.extract_strided_slice %150 {offsets = [0, 8], sizes = [1, 120], strides = [1, 1]} : vector<1x128xf32> to vector<1x120xf32>
      %153 = tpu.concatenate %152, %33 in 1 : vector<1x120xf32>, vector<1x8xf32> -> vector<1x128xf32>
      %c0_122 = arith.constant 0 : index
      %c0_123 = arith.constant 0 : index
      %c10 = arith.constant 10 : index
      %c0_124 = arith.constant 0 : index
      %154 = vector.load %arg2[%c0_122, %c0_123, %c10, %c0_124] : memref<1x1x16x128xf32, #tpu.memory_space<vmem>>, vector<1x1x1x128xf32>
      %155 = vector.shape_cast %154 : vector<1x1x1x128xf32> to vector<1x128xf32>
      %c0_125 = arith.constant 0 : index
      %c0_126 = arith.constant 0 : index
      %c10_127 = arith.constant 10 : index
      %c0_128 = arith.constant 0 : index
      %156 = vector.load %arg4[%c0_125, %c0_126, %c10_127, %c0_128] : memref<1x1x16x128xf32, #tpu.memory_space<vmem>>, vector<1x1x1x128xf32>
      %157 = vector.shape_cast %156 : vector<1x1x1x128xf32> to vector<1x128xf32>
      %158 = arith.mulf %155, %157 : vector<1x128xf32>
      %cst_129 = arith.constant 1.000000e+00 : f32
      %159 = vector.broadcast %cst_129 : f32 to vector<1x128xf32>
      %160 = arith.subf %159, %155 : vector<1x128xf32>
      %161 = arith.mulf %160, %153 : vector<1x128xf32>
      %162 = arith.addf %158, %161 : vector<1x128xf32>
      %c10_130 = arith.constant 10 : index
      %c0_131 = arith.constant 0 : index
      %163 = vector.load %arg7[%c10_130, %c0_131] : memref<16x128xf32, #tpu.memory_space<vmem>>, vector<1x128xf32>
      tpu.vector_store %arg7[%c10_130, %c0_131], %162 {strides = array<i32>} : memref<16x128xf32, #tpu.memory_space<vmem>>, vector<1x128xf32>,
      %164 = vector.extract_strided_slice %162 {offsets = [0, 8], sizes = [1, 120], strides = [1, 1]} : vector<1x128xf32> to vector<1x120xf32>
      %165 = tpu.concatenate %164, %33 in 1 : vector<1x120xf32>, vector<1x8xf32> -> vector<1x128xf32>
      %c0_132 = arith.constant 0 : index
      %c0_133 = arith.constant 0 : index
      %c11 = arith.constant 11 : index
      %c0_134 = arith.constant 0 : index
      %166 = vector.load %arg2[%c0_132, %c0_133, %c11, %c0_134] : memref<1x1x16x128xf32, #tpu.memory_space<vmem>>, vector<1x1x1x128xf32>
      %167 = vector.shape_cast %166 : vector<1x1x1x128xf32> to vector<1x128xf32>
      %c0_135 = arith.constant 0 : index
      %c0_136 = arith.constant 0 : index
      %c11_137 = arith.constant 11 : index
      %c0_138 = arith.constant 0 : index
      %168 = vector.load %arg4[%c0_135, %c0_136, %c11_137, %c0_138] : memref<1x1x16x128xf32, #tpu.memory_space<vmem>>, vector<1x1x1x128xf32>
      %169 = vector.shape_cast %168 : vector<1x1x1x128xf32> to vector<1x128xf32>
      %170 = arith.mulf %167, %169 : vector<1x128xf32>
      %cst_139 = arith.constant 1.000000e+00 : f32
      %171 = vector.broadcast %cst_139 : f32 to vector<1x128xf32>
      %172 = arith.subf %171, %167 : vector<1x128xf32>
      %173 = arith.mulf %172, %165 : vector<1x128xf32>
      %174 = arith.addf %170, %173 : vector<1x128xf32>
      %c11_140 = arith.constant 11 : index
      %c0_141 = arith.constant 0 : index
      %175 = vector.load %arg7[%c11_140, %c0_141] : memref<16x128xf32, #tpu.memory_space<vmem>>, vector<1x128xf32>
      tpu.vector_store %arg7[%c11_140, %c0_141], %174 {strides = array<i32>} : memref<16x128xf32, #tpu.memory_space<vmem>>, vector<1x128xf32>,
      %176 = vector.extract_strided_slice %174 {offsets = [0, 8], sizes = [1, 120], strides = [1, 1]} : vector<1x128xf32> to vector<1x120xf32>
      %177 = tpu.concatenate %176, %33 in 1 : vector<1x120xf32>, vector<1x8xf32> -> vector<1x128xf32>
      %c0_142 = arith.constant 0 : index
      %c0_143 = arith.constant 0 : index
      %c12 = arith.constant 12 : index
      %c0_144 = arith.constant 0 : index
      %178 = vector.load %arg2[%c0_142, %c0_143, %c12, %c0_144] : memref<1x1x16x128xf32, #tpu.memory_space<vmem>>, vector<1x1x1x128xf32>
      %179 = vector.shape_cast %178 : vector<1x1x1x128xf32> to vector<1x128xf32>
      %c0_145 = arith.constant 0 : index
      %c0_146 = arith.constant 0 : index
      %c12_147 = arith.constant 12 : index
      %c0_148 = arith.constant 0 : index
      %180 = vector.load %arg4[%c0_145, %c0_146, %c12_147, %c0_148] : memref<1x1x16x128xf32, #tpu.memory_space<vmem>>, vector<1x1x1x128xf32>
      %181 = vector.shape_cast %180 : vector<1x1x1x128xf32> to vector<1x128xf32>
      %182 = arith.mulf %179, %181 : vector<1x128xf32>
      %cst_149 = arith.constant 1.000000e+00 : f32
      %183 = vector.broadcast %cst_149 : f32 to vector<1x128xf32>
      %184 = arith.subf %183, %179 : vector<1x128xf32>
      %185 = arith.mulf %184, %177 : vector<1x128xf32>
      %186 = arith.addf %182, %185 : vector<1x128xf32>
      %c12_150 = arith.constant 12 : index
      %c0_151 = arith.constant 0 : index
      %187 = vector.load %arg7[%c12_150, %c0_151] : memref<16x128xf32, #tpu.memory_space<vmem>>, vector<1x128xf32>
      tpu.vector_store %arg7[%c12_150, %c0_151], %186 {strides = array<i32>} : memref<16x128xf32, #tpu.memory_space<vmem>>, vector<1x128xf32>,
      %188 = vector.extract_strided_slice %186 {offsets = [0, 8], sizes = [1, 120], strides = [1, 1]} : vector<1x128xf32> to vector<1x120xf32>
      %189 = tpu.concatenate %188, %33 in 1 : vector<1x120xf32>, vector<1x8xf32> -> vector<1x128xf32>
      %c0_152 = arith.constant 0 : index
      %c0_153 = arith.constant 0 : index
      %c13 = arith.constant 13 : index
      %c0_154 = arith.constant 0 : index
      %190 = vector.load %arg2[%c0_152, %c0_153, %c13, %c0_154] : memref<1x1x16x128xf32, #tpu.memory_space<vmem>>, vector<1x1x1x128xf32>
      %191 = vector.shape_cast %190 : vector<1x1x1x128xf32> to vector<1x128xf32>
      %c0_155 = arith.constant 0 : index
      %c0_156 = arith.constant 0 : index
      %c13_157 = arith.constant 13 : index
      %c0_158 = arith.constant 0 : index
      %192 = vector.load %arg4[%c0_155, %c0_156, %c13_157, %c0_158] : memref<1x1x16x128xf32, #tpu.memory_space<vmem>>, vector<1x1x1x128xf32>
      %193 = vector.shape_cast %192 : vector<1x1x1x128xf32> to vector<1x128xf32>
      %194 = arith.mulf %191, %193 : vector<1x128xf32>
      %cst_159 = arith.constant 1.000000e+00 : f32
      %195 = vector.broadcast %cst_159 : f32 to vector<1x128xf32>
      %196 = arith.subf %195, %191 : vector<1x128xf32>
      %197 = arith.mulf %196, %189 : vector<1x128xf32>
      %198 = arith.addf %194, %197 : vector<1x128xf32>
      %c13_160 = arith.constant 13 : index
      %c0_161 = arith.constant 0 : index
      %199 = vector.load %arg7[%c13_160, %c0_161] : memref<16x128xf32, #tpu.memory_space<vmem>>, vector<1x128xf32>
      tpu.vector_store %arg7[%c13_160, %c0_161], %198 {strides = array<i32>} : memref<16x128xf32, #tpu.memory_space<vmem>>, vector<1x128xf32>,
      %200 = vector.extract_strided_slice %198 {offsets = [0, 8], sizes = [1, 120], strides = [1, 1]} : vector<1x128xf32> to vector<1x120xf32>
      %201 = tpu.concatenate %200, %33 in 1 : vector<1x120xf32>, vector<1x8xf32> -> vector<1x128xf32>
      %c0_162 = arith.constant 0 : index
      %c0_163 = arith.constant 0 : index
      %c14 = arith.constant 14 : index
      %c0_164 = arith.constant 0 : index
      %202 = vector.load %arg2[%c0_162, %c0_163, %c14, %c0_164] : memref<1x1x16x128xf32, #tpu.memory_space<vmem>>, vector<1x1x1x128xf32>
      %203 = vector.shape_cast %202 : vector<1x1x1x128xf32> to vector<1x128xf32>
      %c0_165 = arith.constant 0 : index
      %c0_166 = arith.constant 0 : index
      %c14_167 = arith.constant 14 : index
      %c0_168 = arith.constant 0 : index
      %204 = vector.load %arg4[%c0_165, %c0_166, %c14_167, %c0_168] : memref<1x1x16x128xf32, #tpu.memory_space<vmem>>, vector<1x1x1x128xf32>
      %205 = vector.shape_cast %204 : vector<1x1x1x128xf32> to vector<1x128xf32>
      %206 = arith.mulf %203, %205 : vector<1x128xf32>
      %cst_169 = arith.constant 1.000000e+00 : f32
      %207 = vector.broadcast %cst_169 : f32 to vector<1x128xf32>
      %208 = arith.subf %207, %203 : vector<1x128xf32>
      %209 = arith.mulf %208, %201 : vector<1x128xf32>
      %210 = arith.addf %206, %209 : vector<1x128xf32>
      %c14_170 = arith.constant 14 : index
      %c0_171 = arith.constant 0 : index
      %211 = vector.load %arg7[%c14_170, %c0_171] : memref<16x128xf32, #tpu.memory_space<vmem>>, vector<1x128xf32>
      tpu.vector_store %arg7[%c14_170, %c0_171], %210 {strides = array<i32>} : memref<16x128xf32, #tpu.memory_space<vmem>>, vector<1x128xf32>,
      %212 = vector.extract_strided_slice %210 {offsets = [0, 8], sizes = [1, 120], strides = [1, 1]} : vector<1x128xf32> to vector<1x120xf32>
      %213 = tpu.concatenate %212, %33 in 1 : vector<1x120xf32>, vector<1x8xf32> -> vector<1x128xf32>
      %c0_172 = arith.constant 0 : index
      %c0_173 = arith.constant 0 : index
      %c15 = arith.constant 15 : index
      %c0_174 = arith.constant 0 : index
      %214 = vector.load %arg2[%c0_172, %c0_173, %c15, %c0_174] : memref<1x1x16x128xf32, #tpu.memory_space<vmem>>, vector<1x1x1x128xf32>
      %215 = vector.shape_cast %214 : vector<1x1x1x128xf32> to vector<1x128xf32>
      %c0_175 = arith.constant 0 : index
      %c0_176 = arith.constant 0 : index
      %c15_177 = arith.constant 15 : index
      %c0_178 = arith.constant 0 : index
      %216 = vector.load %arg4[%c0_175, %c0_176, %c15_177, %c0_178] : memref<1x1x16x128xf32, #tpu.memory_space<vmem>>, vector<1x1x1x128xf32>
      %217 = vector.shape_cast %216 : vector<1x1x1x128xf32> to vector<1x128xf32>
      %218 = arith.mulf %215, %217 : vector<1x128xf32>
      %cst_179 = arith.constant 1.000000e+00 : f32
      %219 = vector.broadcast %cst_179 : f32 to vector<1x128xf32>
      %220 = arith.subf %219, %215 : vector<1x128xf32>
      %221 = arith.mulf %220, %213 : vector<1x128xf32>
      %222 = arith.addf %218, %221 : vector<1x128xf32>
      %c15_180 = arith.constant 15 : index
      %c0_181 = arith.constant 0 : index
      %223 = vector.load %arg7[%c15_180, %c0_181] : memref<16x128xf32, #tpu.memory_space<vmem>>, vector<1x128xf32>
      tpu.vector_store %arg7[%c15_180, %c0_181], %222 {strides = array<i32>} : memref<16x128xf32, #tpu.memory_space<vmem>>, vector<1x128xf32>,
    } else {
    }
    %c2_i32 = arith.constant 2 : i32
    %9 = arith.cmpi eq, %arg1, %c2_i32 : i32
    %10 = arith.extui %9 : i1 to i32
    %c0_i32_4 = arith.constant 0 : i32
    %11 = arith.cmpi ne, %10, %c0_i32_4 : i32
    scf.if %11 {
      %c0_19 = arith.constant 0 : index
      %c0_20 = arith.constant 0 : index
      %c0_21 = arith.constant 0 : index
      %31 = vector.load %arg5[%c0_19, %c0_20, %c0_21] : memref<1x1x128xf32, #tpu.memory_space<vmem>>, vector<1x1x128xf32>
      %32 = vector.shape_cast %31 : vector<1x1x128xf32> to vector<1x128xf32>
      %33 = vector.extract_strided_slice %32 {offsets = [0, 0], sizes = [1, 8], strides = [1, 1]} : vector<1x128xf32> to vector<1x8xf32>
      %c0_22 = arith.constant 0 : index
      %c0_23 = arith.constant 0 : index
      %c15 = arith.constant 15 : index
      %c0_24 = arith.constant 0 : index
      %34 = vector.load %arg2[%c0_22, %c0_23, %c15, %c0_24] : memref<1x1x16x128xf32, #tpu.memory_space<vmem>>, vector<1x1x1x128xf32>
      %35 = vector.shape_cast %34 : vector<1x1x1x128xf32> to vector<1x128xf32>
      %c0_25 = arith.constant 0 : index
      %c0_26 = arith.constant 0 : index
      %c15_27 = arith.constant 15 : index
      %c0_28 = arith.constant 0 : index
      %36 = vector.load %arg4[%c0_25, %c0_26, %c15_27, %c0_28] : memref<1x1x16x128xf32, #tpu.memory_space<vmem>>, vector<1x1x1x128xf32>
      %37 = vector.shape_cast %36 : vector<1x1x1x128xf32> to vector<1x128xf32>
      %38 = arith.mulf %35, %37 : vector<1x128xf32>
      %cst = arith.constant 1.000000e+00 : f32
      %39 = vector.broadcast %cst : f32 to vector<1x128xf32>
      %40 = arith.subf %39, %35 : vector<1x128xf32>
      %41 = arith.mulf %40, %32 : vector<1x128xf32>
      %42 = arith.addf %38, %41 : vector<1x128xf32>
      %c15_29 = arith.constant 15 : index
      %c0_30 = arith.constant 0 : index
      %43 = vector.load %arg7[%c15_29, %c0_30] : memref<16x128xf32, #tpu.memory_space<vmem>>, vector<1x128xf32>
      tpu.vector_store %arg7[%c15_29, %c0_30], %42 {strides = array<i32>} : memref<16x128xf32, #tpu.memory_space<vmem>>, vector<1x128xf32>,
      %44 = vector.extract_strided_slice %42 {offsets = [0, 0], sizes = [1, 120], strides = [1, 1]} : vector<1x128xf32> to vector<1x120xf32>
      %45 = tpu.concatenate %33, %44 in 1 : vector<1x8xf32>, vector<1x120xf32> -> vector<1x128xf32>
      %c0_31 = arith.constant 0 : index
      %c0_32 = arith.constant 0 : index
      %c14 = arith.constant 14 : index
      %c0_33 = arith.constant 0 : index
      %46 = vector.load %arg2[%c0_31, %c0_32, %c14, %c0_33] : memref<1x1x16x128xf32, #tpu.memory_space<vmem>>, vector<1x1x1x128xf32>
      %47 = vector.shape_cast %46 : vector<1x1x1x128xf32> to vector<1x128xf32>
      %c0_34 = arith.constant 0 : index
      %c0_35 = arith.constant 0 : index
      %c14_36 = arith.constant 14 : index
      %c0_37 = arith.constant 0 : index
      %48 = vector.load %arg4[%c0_34, %c0_35, %c14_36, %c0_37] : memref<1x1x16x128xf32, #tpu.memory_space<vmem>>, vector<1x1x1x128xf32>
      %49 = vector.shape_cast %48 : vector<1x1x1x128xf32> to vector<1x128xf32>
      %50 = arith.mulf %47, %49 : vector<1x128xf32>
      %cst_38 = arith.constant 1.000000e+00 : f32
      %51 = vector.broadcast %cst_38 : f32 to vector<1x128xf32>
      %52 = arith.subf %51, %47 : vector<1x128xf32>
      %53 = arith.mulf %52, %45 : vector<1x128xf32>
      %54 = arith.addf %50, %53 : vector<1x128xf32>
      %c14_39 = arith.constant 14 : index
      %c0_40 = arith.constant 0 : index
      %55 = vector.load %arg7[%c14_39, %c0_40] : memref<16x128xf32, #tpu.memory_space<vmem>>, vector<1x128xf32>
      tpu.vector_store %arg7[%c14_39, %c0_40], %54 {strides = array<i32>} : memref<16x128xf32, #tpu.memory_space<vmem>>, vector<1x128xf32>,
      %56 = vector.extract_strided_slice %54 {offsets = [0, 0], sizes = [1, 120], strides = [1, 1]} : vector<1x128xf32> to vector<1x120xf32>
      %57 = tpu.concatenate %33, %56 in 1 : vector<1x8xf32>, vector<1x120xf32> -> vector<1x128xf32>
      %c0_41 = arith.constant 0 : index
      %c0_42 = arith.constant 0 : index
      %c13 = arith.constant 13 : index
      %c0_43 = arith.constant 0 : index
      %58 = vector.load %arg2[%c0_41, %c0_42, %c13, %c0_43] : memref<1x1x16x128xf32, #tpu.memory_space<vmem>>, vector<1x1x1x128xf32>
      %59 = vector.shape_cast %58 : vector<1x1x1x128xf32> to vector<1x128xf32>
      %c0_44 = arith.constant 0 : index
      %c0_45 = arith.constant 0 : index
      %c13_46 = arith.constant 13 : index
      %c0_47 = arith.constant 0 : index
      %60 = vector.load %arg4[%c0_44, %c0_45, %c13_46, %c0_47] : memref<1x1x16x128xf32, #tpu.memory_space<vmem>>, vector<1x1x1x128xf32>
      %61 = vector.shape_cast %60 : vector<1x1x1x128xf32> to vector<1x128xf32>
      %62 = arith.mulf %59, %61 : vector<1x128xf32>
      %cst_48 = arith.constant 1.000000e+00 : f32
      %63 = vector.broadcast %cst_48 : f32 to vector<1x128xf32>
      %64 = arith.subf %63, %59 : vector<1x128xf32>
      %65 = arith.mulf %64, %57 : vector<1x128xf32>
      %66 = arith.addf %62, %65 : vector<1x128xf32>
      %c13_49 = arith.constant 13 : index
      %c0_50 = arith.constant 0 : index
      %67 = vector.load %arg7[%c13_49, %c0_50] : memref<16x128xf32, #tpu.memory_space<vmem>>, vector<1x128xf32>
      tpu.vector_store %arg7[%c13_49, %c0_50], %66 {strides = array<i32>} : memref<16x128xf32, #tpu.memory_space<vmem>>, vector<1x128xf32>,
      %68 = vector.extract_strided_slice %66 {offsets = [0, 0], sizes = [1, 120], strides = [1, 1]} : vector<1x128xf32> to vector<1x120xf32>
      %69 = tpu.concatenate %33, %68 in 1 : vector<1x8xf32>, vector<1x120xf32> -> vector<1x128xf32>
      %c0_51 = arith.constant 0 : index
      %c0_52 = arith.constant 0 : index
      %c12 = arith.constant 12 : index
      %c0_53 = arith.constant 0 : index
      %70 = vector.load %arg2[%c0_51, %c0_52, %c12, %c0_53] : memref<1x1x16x128xf32, #tpu.memory_space<vmem>>, vector<1x1x1x128xf32>
      %71 = vector.shape_cast %70 : vector<1x1x1x128xf32> to vector<1x128xf32>
      %c0_54 = arith.constant 0 : index
      %c0_55 = arith.constant 0 : index
      %c12_56 = arith.constant 12 : index
      %c0_57 = arith.constant 0 : index
      %72 = vector.load %arg4[%c0_54, %c0_55, %c12_56, %c0_57] : memref<1x1x16x128xf32, #tpu.memory_space<vmem>>, vector<1x1x1x128xf32>
      %73 = vector.shape_cast %72 : vector<1x1x1x128xf32> to vector<1x128xf32>
      %74 = arith.mulf %71, %73 : vector<1x128xf32>
      %cst_58 = arith.constant 1.000000e+00 : f32
      %75 = vector.broadcast %cst_58 : f32 to vector<1x128xf32>
      %76 = arith.subf %75, %71 : vector<1x128xf32>
      %77 = arith.mulf %76, %69 : vector<1x128xf32>
      %78 = arith.addf %74, %77 : vector<1x128xf32>
      %c12_59 = arith.constant 12 : index
      %c0_60 = arith.constant 0 : index
      %79 = vector.load %arg7[%c12_59, %c0_60] : memref<16x128xf32, #tpu.memory_space<vmem>>, vector<1x128xf32>
      tpu.vector_store %arg7[%c12_59, %c0_60], %78 {strides = array<i32>} : memref<16x128xf32, #tpu.memory_space<vmem>>, vector<1x128xf32>,
      %80 = vector.extract_strided_slice %78 {offsets = [0, 0], sizes = [1, 120], strides = [1, 1]} : vector<1x128xf32> to vector<1x120xf32>
      %81 = tpu.concatenate %33, %80 in 1 : vector<1x8xf32>, vector<1x120xf32> -> vector<1x128xf32>
      %c0_61 = arith.constant 0 : index
      %c0_62 = arith.constant 0 : index
      %c11 = arith.constant 11 : index
      %c0_63 = arith.constant 0 : index
      %82 = vector.load %arg2[%c0_61, %c0_62, %c11, %c0_63] : memref<1x1x16x128xf32, #tpu.memory_space<vmem>>, vector<1x1x1x128xf32>
      %83 = vector.shape_cast %82 : vector<1x1x1x128xf32> to vector<1x128xf32>
      %c0_64 = arith.constant 0 : index
      %c0_65 = arith.constant 0 : index
      %c11_66 = arith.constant 11 : index
      %c0_67 = arith.constant 0 : index
      %84 = vector.load %arg4[%c0_64, %c0_65, %c11_66, %c0_67] : memref<1x1x16x128xf32, #tpu.memory_space<vmem>>, vector<1x1x1x128xf32>
      %85 = vector.shape_cast %84 : vector<1x1x1x128xf32> to vector<1x128xf32>
      %86 = arith.mulf %83, %85 : vector<1x128xf32>
      %cst_68 = arith.constant 1.000000e+00 : f32
      %87 = vector.broadcast %cst_68 : f32 to vector<1x128xf32>
      %88 = arith.subf %87, %83 : vector<1x128xf32>
      %89 = arith.mulf %88, %81 : vector<1x128xf32>
      %90 = arith.addf %86, %89 : vector<1x128xf32>
      %c11_69 = arith.constant 11 : index
      %c0_70 = arith.constant 0 : index
      %91 = vector.load %arg7[%c11_69, %c0_70] : memref<16x128xf32, #tpu.memory_space<vmem>>, vector<1x128xf32>
      tpu.vector_store %arg7[%c11_69, %c0_70], %90 {strides = array<i32>} : memref<16x128xf32, #tpu.memory_space<vmem>>, vector<1x128xf32>,
      %92 = vector.extract_strided_slice %90 {offsets = [0, 0], sizes = [1, 120], strides = [1, 1]} : vector<1x128xf32> to vector<1x120xf32>
      %93 = tpu.concatenate %33, %92 in 1 : vector<1x8xf32>, vector<1x120xf32> -> vector<1x128xf32>
      %c0_71 = arith.constant 0 : index
      %c0_72 = arith.constant 0 : index
      %c10 = arith.constant 10 : index
      %c0_73 = arith.constant 0 : index
      %94 = vector.load %arg2[%c0_71, %c0_72, %c10, %c0_73] : memref<1x1x16x128xf32, #tpu.memory_space<vmem>>, vector<1x1x1x128xf32>
      %95 = vector.shape_cast %94 : vector<1x1x1x128xf32> to vector<1x128xf32>
      %c0_74 = arith.constant 0 : index
      %c0_75 = arith.constant 0 : index
      %c10_76 = arith.constant 10 : index
      %c0_77 = arith.constant 0 : index
      %96 = vector.load %arg4[%c0_74, %c0_75, %c10_76, %c0_77] : memref<1x1x16x128xf32, #tpu.memory_space<vmem>>, vector<1x1x1x128xf32>
      %97 = vector.shape_cast %96 : vector<1x1x1x128xf32> to vector<1x128xf32>
      %98 = arith.mulf %95, %97 : vector<1x128xf32>
      %cst_78 = arith.constant 1.000000e+00 : f32
      %99 = vector.broadcast %cst_78 : f32 to vector<1x128xf32>
      %100 = arith.subf %99, %95 : vector<1x128xf32>
      %101 = arith.mulf %100, %93 : vector<1x128xf32>
      %102 = arith.addf %98, %101 : vector<1x128xf32>
      %c10_79 = arith.constant 10 : index
      %c0_80 = arith.constant 0 : index
      %103 = vector.load %arg7[%c10_79, %c0_80] : memref<16x128xf32, #tpu.memory_space<vmem>>, vector<1x128xf32>
      tpu.vector_store %arg7[%c10_79, %c0_80], %102 {strides = array<i32>} : memref<16x128xf32, #tpu.memory_space<vmem>>, vector<1x128xf32>,
      %104 = vector.extract_strided_slice %102 {offsets = [0, 0], sizes = [1, 120], strides = [1, 1]} : vector<1x128xf32> to vector<1x120xf32>
      %105 = tpu.concatenate %33, %104 in 1 : vector<1x8xf32>, vector<1x120xf32> -> vector<1x128xf32>
      %c0_81 = arith.constant 0 : index
      %c0_82 = arith.constant 0 : index
      %c9 = arith.constant 9 : index
      %c0_83 = arith.constant 0 : index
      %106 = vector.load %arg2[%c0_81, %c0_82, %c9, %c0_83] : memref<1x1x16x128xf32, #tpu.memory_space<vmem>>, vector<1x1x1x128xf32>
      %107 = vector.shape_cast %106 : vector<1x1x1x128xf32> to vector<1x128xf32>
      %c0_84 = arith.constant 0 : index
      %c0_85 = arith.constant 0 : index
      %c9_86 = arith.constant 9 : index
      %c0_87 = arith.constant 0 : index
      %108 = vector.load %arg4[%c0_84, %c0_85, %c9_86, %c0_87] : memref<1x1x16x128xf32, #tpu.memory_space<vmem>>, vector<1x1x1x128xf32>
      %109 = vector.shape_cast %108 : vector<1x1x1x128xf32> to vector<1x128xf32>
      %110 = arith.mulf %107, %109 : vector<1x128xf32>
      %cst_88 = arith.constant 1.000000e+00 : f32
      %111 = vector.broadcast %cst_88 : f32 to vector<1x128xf32>
      %112 = arith.subf %111, %107 : vector<1x128xf32>
      %113 = arith.mulf %112, %105 : vector<1x128xf32>
      %114 = arith.addf %110, %113 : vector<1x128xf32>
      %c9_89 = arith.constant 9 : index
      %c0_90 = arith.constant 0 : index
      %115 = vector.load %arg7[%c9_89, %c0_90] : memref<16x128xf32, #tpu.memory_space<vmem>>, vector<1x128xf32>
      tpu.vector_store %arg7[%c9_89, %c0_90], %114 {strides = array<i32>} : memref<16x128xf32, #tpu.memory_space<vmem>>, vector<1x128xf32>,
      %116 = vector.extract_strided_slice %114 {offsets = [0, 0], sizes = [1, 120], strides = [1, 1]} : vector<1x128xf32> to vector<1x120xf32>
      %117 = tpu.concatenate %33, %116 in 1 : vector<1x8xf32>, vector<1x120xf32> -> vector<1x128xf32>
      %c0_91 = arith.constant 0 : index
      %c0_92 = arith.constant 0 : index
      %c8 = arith.constant 8 : index
      %c0_93 = arith.constant 0 : index
      %118 = vector.load %arg2[%c0_91, %c0_92, %c8, %c0_93] : memref<1x1x16x128xf32, #tpu.memory_space<vmem>>, vector<1x1x1x128xf32>
      %119 = vector.shape_cast %118 : vector<1x1x1x128xf32> to vector<1x128xf32>
      %c0_94 = arith.constant 0 : index
      %c0_95 = arith.constant 0 : index
      %c8_96 = arith.constant 8 : index
      %c0_97 = arith.constant 0 : index
      %120 = vector.load %arg4[%c0_94, %c0_95, %c8_96, %c0_97] : memref<1x1x16x128xf32, #tpu.memory_space<vmem>>, vector<1x1x1x128xf32>
      %121 = vector.shape_cast %120 : vector<1x1x1x128xf32> to vector<1x128xf32>
      %122 = arith.mulf %119, %121 : vector<1x128xf32>
      %cst_98 = arith.constant 1.000000e+00 : f32
      %123 = vector.broadcast %cst_98 : f32 to vector<1x128xf32>
      %124 = arith.subf %123, %119 : vector<1x128xf32>
      %125 = arith.mulf %124, %117 : vector<1x128xf32>
      %126 = arith.addf %122, %125 : vector<1x128xf32>
      %c8_99 = arith.constant 8 : index
      %c0_100 = arith.constant 0 : index
      %127 = vector.load %arg7[%c8_99, %c0_100] : memref<16x128xf32, #tpu.memory_space<vmem>>, vector<1x128xf32>
      tpu.vector_store %arg7[%c8_99, %c0_100], %126 {strides = array<i32>} : memref<16x128xf32, #tpu.memory_space<vmem>>, vector<1x128xf32>,
      %128 = vector.extract_strided_slice %126 {offsets = [0, 0], sizes = [1, 120], strides = [1, 1]} : vector<1x128xf32> to vector<1x120xf32>
      %129 = tpu.concatenate %33, %128 in 1 : vector<1x8xf32>, vector<1x120xf32> -> vector<1x128xf32>
      %c0_101 = arith.constant 0 : index
      %c0_102 = arith.constant 0 : index
      %c7 = arith.constant 7 : index
      %c0_103 = arith.constant 0 : index
      %130 = vector.load %arg2[%c0_101, %c0_102, %c7, %c0_103] : memref<1x1x16x128xf32, #tpu.memory_space<vmem>>, vector<1x1x1x128xf32>
      %131 = vector.shape_cast %130 : vector<1x1x1x128xf32> to vector<1x128xf32>
      %c0_104 = arith.constant 0 : index
      %c0_105 = arith.constant 0 : index
      %c7_106 = arith.constant 7 : index
      %c0_107 = arith.constant 0 : index
      %132 = vector.load %arg4[%c0_104, %c0_105, %c7_106, %c0_107] : memref<1x1x16x128xf32, #tpu.memory_space<vmem>>, vector<1x1x1x128xf32>
      %133 = vector.shape_cast %132 : vector<1x1x1x128xf32> to vector<1x128xf32>
      %134 = arith.mulf %131, %133 : vector<1x128xf32>
      %cst_108 = arith.constant 1.000000e+00 : f32
      %135 = vector.broadcast %cst_108 : f32 to vector<1x128xf32>
      %136 = arith.subf %135, %131 : vector<1x128xf32>
      %137 = arith.mulf %136, %129 : vector<1x128xf32>
      %138 = arith.addf %134, %137 : vector<1x128xf32>
      %c7_109 = arith.constant 7 : index
      %c0_110 = arith.constant 0 : index
      %139 = vector.load %arg7[%c7_109, %c0_110] : memref<16x128xf32, #tpu.memory_space<vmem>>, vector<1x128xf32>
      tpu.vector_store %arg7[%c7_109, %c0_110], %138 {strides = array<i32>} : memref<16x128xf32, #tpu.memory_space<vmem>>, vector<1x128xf32>,
      %140 = vector.extract_strided_slice %138 {offsets = [0, 0], sizes = [1, 120], strides = [1, 1]} : vector<1x128xf32> to vector<1x120xf32>
      %141 = tpu.concatenate %33, %140 in 1 : vector<1x8xf32>, vector<1x120xf32> -> vector<1x128xf32>
      %c0_111 = arith.constant 0 : index
      %c0_112 = arith.constant 0 : index
      %c6 = arith.constant 6 : index
      %c0_113 = arith.constant 0 : index
      %142 = vector.load %arg2[%c0_111, %c0_112, %c6, %c0_113] : memref<1x1x16x128xf32, #tpu.memory_space<vmem>>, vector<1x1x1x128xf32>
      %143 = vector.shape_cast %142 : vector<1x1x1x128xf32> to vector<1x128xf32>
      %c0_114 = arith.constant 0 : index
      %c0_115 = arith.constant 0 : index
      %c6_116 = arith.constant 6 : index
      %c0_117 = arith.constant 0 : index
      %144 = vector.load %arg4[%c0_114, %c0_115, %c6_116, %c0_117] : memref<1x1x16x128xf32, #tpu.memory_space<vmem>>, vector<1x1x1x128xf32>
      %145 = vector.shape_cast %144 : vector<1x1x1x128xf32> to vector<1x128xf32>
      %146 = arith.mulf %143, %145 : vector<1x128xf32>
      %cst_118 = arith.constant 1.000000e+00 : f32
      %147 = vector.broadcast %cst_118 : f32 to vector<1x128xf32>
      %148 = arith.subf %147, %143 : vector<1x128xf32>
      %149 = arith.mulf %148, %141 : vector<1x128xf32>
      %150 = arith.addf %146, %149 : vector<1x128xf32>
      %c6_119 = arith.constant 6 : index
      %c0_120 = arith.constant 0 : index
      %151 = vector.load %arg7[%c6_119, %c0_120] : memref<16x128xf32, #tpu.memory_space<vmem>>, vector<1x128xf32>
      tpu.vector_store %arg7[%c6_119, %c0_120], %150 {strides = array<i32>} : memref<16x128xf32, #tpu.memory_space<vmem>>, vector<1x128xf32>,
      %152 = vector.extract_strided_slice %150 {offsets = [0, 0], sizes = [1, 120], strides = [1, 1]} : vector<1x128xf32> to vector<1x120xf32>
      %153 = tpu.concatenate %33, %152 in 1 : vector<1x8xf32>, vector<1x120xf32> -> vector<1x128xf32>
      %c0_121 = arith.constant 0 : index
      %c0_122 = arith.constant 0 : index
      %c5 = arith.constant 5 : index
      %c0_123 = arith.constant 0 : index
      %154 = vector.load %arg2[%c0_121, %c0_122, %c5, %c0_123] : memref<1x1x16x128xf32, #tpu.memory_space<vmem>>, vector<1x1x1x128xf32>
      %155 = vector.shape_cast %154 : vector<1x1x1x128xf32> to vector<1x128xf32>
      %c0_124 = arith.constant 0 : index
      %c0_125 = arith.constant 0 : index
      %c5_126 = arith.constant 5 : index
      %c0_127 = arith.constant 0 : index
      %156 = vector.load %arg4[%c0_124, %c0_125, %c5_126, %c0_127] : memref<1x1x16x128xf32, #tpu.memory_space<vmem>>, vector<1x1x1x128xf32>
      %157 = vector.shape_cast %156 : vector<1x1x1x128xf32> to vector<1x128xf32>
      %158 = arith.mulf %155, %157 : vector<1x128xf32>
      %cst_128 = arith.constant 1.000000e+00 : f32
      %159 = vector.broadcast %cst_128 : f32 to vector<1x128xf32>
      %160 = arith.subf %159, %155 : vector<1x128xf32>
      %161 = arith.mulf %160, %153 : vector<1x128xf32>
      %162 = arith.addf %158, %161 : vector<1x128xf32>
      %c5_129 = arith.constant 5 : index
      %c0_130 = arith.constant 0 : index
      %163 = vector.load %arg7[%c5_129, %c0_130] : memref<16x128xf32, #tpu.memory_space<vmem>>, vector<1x128xf32>
      tpu.vector_store %arg7[%c5_129, %c0_130], %162 {strides = array<i32>} : memref<16x128xf32, #tpu.memory_space<vmem>>, vector<1x128xf32>,
      %164 = vector.extract_strided_slice %162 {offsets = [0, 0], sizes = [1, 120], strides = [1, 1]} : vector<1x128xf32> to vector<1x120xf32>
      %165 = tpu.concatenate %33, %164 in 1 : vector<1x8xf32>, vector<1x120xf32> -> vector<1x128xf32>
      %c0_131 = arith.constant 0 : index
      %c0_132 = arith.constant 0 : index
      %c4 = arith.constant 4 : index
      %c0_133 = arith.constant 0 : index
      %166 = vector.load %arg2[%c0_131, %c0_132, %c4, %c0_133] : memref<1x1x16x128xf32, #tpu.memory_space<vmem>>, vector<1x1x1x128xf32>
      %167 = vector.shape_cast %166 : vector<1x1x1x128xf32> to vector<1x128xf32>
      %c0_134 = arith.constant 0 : index
      %c0_135 = arith.constant 0 : index
      %c4_136 = arith.constant 4 : index
      %c0_137 = arith.constant 0 : index
      %168 = vector.load %arg4[%c0_134, %c0_135, %c4_136, %c0_137] : memref<1x1x16x128xf32, #tpu.memory_space<vmem>>, vector<1x1x1x128xf32>
      %169 = vector.shape_cast %168 : vector<1x1x1x128xf32> to vector<1x128xf32>
      %170 = arith.mulf %167, %169 : vector<1x128xf32>
      %cst_138 = arith.constant 1.000000e+00 : f32
      %171 = vector.broadcast %cst_138 : f32 to vector<1x128xf32>
      %172 = arith.subf %171, %167 : vector<1x128xf32>
      %173 = arith.mulf %172, %165 : vector<1x128xf32>
      %174 = arith.addf %170, %173 : vector<1x128xf32>
      %c4_139 = arith.constant 4 : index
      %c0_140 = arith.constant 0 : index
      %175 = vector.load %arg7[%c4_139, %c0_140] : memref<16x128xf32, #tpu.memory_space<vmem>>, vector<1x128xf32>
      tpu.vector_store %arg7[%c4_139, %c0_140], %174 {strides = array<i32>} : memref<16x128xf32, #tpu.memory_space<vmem>>, vector<1x128xf32>,
      %176 = vector.extract_strided_slice %174 {offsets = [0, 0], sizes = [1, 120], strides = [1, 1]} : vector<1x128xf32> to vector<1x120xf32>
      %177 = tpu.concatenate %33, %176 in 1 : vector<1x8xf32>, vector<1x120xf32> -> vector<1x128xf32>
      %c0_141 = arith.constant 0 : index
      %c0_142 = arith.constant 0 : index
      %c3 = arith.constant 3 : index
      %c0_143 = arith.constant 0 : index
      %178 = vector.load %arg2[%c0_141, %c0_142, %c3, %c0_143] : memref<1x1x16x128xf32, #tpu.memory_space<vmem>>, vector<1x1x1x128xf32>
      %179 = vector.shape_cast %178 : vector<1x1x1x128xf32> to vector<1x128xf32>
      %c0_144 = arith.constant 0 : index
      %c0_145 = arith.constant 0 : index
      %c3_146 = arith.constant 3 : index
      %c0_147 = arith.constant 0 : index
      %180 = vector.load %arg4[%c0_144, %c0_145, %c3_146, %c0_147] : memref<1x1x16x128xf32, #tpu.memory_space<vmem>>, vector<1x1x1x128xf32>
      %181 = vector.shape_cast %180 : vector<1x1x1x128xf32> to vector<1x128xf32>
      %182 = arith.mulf %179, %181 : vector<1x128xf32>
      %cst_148 = arith.constant 1.000000e+00 : f32
      %183 = vector.broadcast %cst_148 : f32 to vector<1x128xf32>
      %184 = arith.subf %183, %179 : vector<1x128xf32>
      %185 = arith.mulf %184, %177 : vector<1x128xf32>
      %186 = arith.addf %182, %185 : vector<1x128xf32>
      %c3_149 = arith.constant 3 : index
      %c0_150 = arith.constant 0 : index
      %187 = vector.load %arg7[%c3_149, %c0_150] : memref<16x128xf32, #tpu.memory_space<vmem>>, vector<1x128xf32>
      tpu.vector_store %arg7[%c3_149, %c0_150], %186 {strides = array<i32>} : memref<16x128xf32, #tpu.memory_space<vmem>>, vector<1x128xf32>,
      %188 = vector.extract_strided_slice %186 {offsets = [0, 0], sizes = [1, 120], strides = [1, 1]} : vector<1x128xf32> to vector<1x120xf32>
      %189 = tpu.concatenate %33, %188 in 1 : vector<1x8xf32>, vector<1x120xf32> -> vector<1x128xf32>
      %c0_151 = arith.constant 0 : index
      %c0_152 = arith.constant 0 : index
      %c2 = arith.constant 2 : index
      %c0_153 = arith.constant 0 : index
      %190 = vector.load %arg2[%c0_151, %c0_152, %c2, %c0_153] : memref<1x1x16x128xf32, #tpu.memory_space<vmem>>, vector<1x1x1x128xf32>
      %191 = vector.shape_cast %190 : vector<1x1x1x128xf32> to vector<1x128xf32>
      %c0_154 = arith.constant 0 : index
      %c0_155 = arith.constant 0 : index
      %c2_156 = arith.constant 2 : index
      %c0_157 = arith.constant 0 : index
      %192 = vector.load %arg4[%c0_154, %c0_155, %c2_156, %c0_157] : memref<1x1x16x128xf32, #tpu.memory_space<vmem>>, vector<1x1x1x128xf32>
      %193 = vector.shape_cast %192 : vector<1x1x1x128xf32> to vector<1x128xf32>
      %194 = arith.mulf %191, %193 : vector<1x128xf32>
      %cst_158 = arith.constant 1.000000e+00 : f32
      %195 = vector.broadcast %cst_158 : f32 to vector<1x128xf32>
      %196 = arith.subf %195, %191 : vector<1x128xf32>
      %197 = arith.mulf %196, %189 : vector<1x128xf32>
      %198 = arith.addf %194, %197 : vector<1x128xf32>
      %c2_159 = arith.constant 2 : index
      %c0_160 = arith.constant 0 : index
      %199 = vector.load %arg7[%c2_159, %c0_160] : memref<16x128xf32, #tpu.memory_space<vmem>>, vector<1x128xf32>
      tpu.vector_store %arg7[%c2_159, %c0_160], %198 {strides = array<i32>} : memref<16x128xf32, #tpu.memory_space<vmem>>, vector<1x128xf32>,
      %200 = vector.extract_strided_slice %198 {offsets = [0, 0], sizes = [1, 120], strides = [1, 1]} : vector<1x128xf32> to vector<1x120xf32>
      %201 = tpu.concatenate %33, %200 in 1 : vector<1x8xf32>, vector<1x120xf32> -> vector<1x128xf32>
      %c0_161 = arith.constant 0 : index
      %c0_162 = arith.constant 0 : index
      %c1 = arith.constant 1 : index
      %c0_163 = arith.constant 0 : index
      %202 = vector.load %arg2[%c0_161, %c0_162, %c1, %c0_163] : memref<1x1x16x128xf32, #tpu.memory_space<vmem>>, vector<1x1x1x128xf32>
      %203 = vector.shape_cast %202 : vector<1x1x1x128xf32> to vector<1x128xf32>
      %c0_164 = arith.constant 0 : index
      %c0_165 = arith.constant 0 : index
      %c1_166 = arith.constant 1 : index
      %c0_167 = arith.constant 0 : index
      %204 = vector.load %arg4[%c0_164, %c0_165, %c1_166, %c0_167] : memref<1x1x16x128xf32, #tpu.memory_space<vmem>>, vector<1x1x1x128xf32>
      %205 = vector.shape_cast %204 : vector<1x1x1x128xf32> to vector<1x128xf32>
      %206 = arith.mulf %203, %205 : vector<1x128xf32>
      %cst_168 = arith.constant 1.000000e+00 : f32
      %207 = vector.broadcast %cst_168 : f32 to vector<1x128xf32>
      %208 = arith.subf %207, %203 : vector<1x128xf32>
      %209 = arith.mulf %208, %201 : vector<1x128xf32>
      %210 = arith.addf %206, %209 : vector<1x128xf32>
      %c1_169 = arith.constant 1 : index
      %c0_170 = arith.constant 0 : index
      %211 = vector.load %arg7[%c1_169, %c0_170] : memref<16x128xf32, #tpu.memory_space<vmem>>, vector<1x128xf32>
      tpu.vector_store %arg7[%c1_169, %c0_170], %210 {strides = array<i32>} : memref<16x128xf32, #tpu.memory_space<vmem>>, vector<1x128xf32>,
      %212 = vector.extract_strided_slice %210 {offsets = [0, 0], sizes = [1, 120], strides = [1, 1]} : vector<1x128xf32> to vector<1x120xf32>
      %213 = tpu.concatenate %33, %212 in 1 : vector<1x8xf32>, vector<1x120xf32> -> vector<1x128xf32>
      %c0_171 = arith.constant 0 : index
      %c0_172 = arith.constant 0 : index
      %c0_173 = arith.constant 0 : index
      %c0_174 = arith.constant 0 : index
      %214 = vector.load %arg2[%c0_171, %c0_172, %c0_173, %c0_174] : memref<1x1x16x128xf32, #tpu.memory_space<vmem>>, vector<1x1x1x128xf32>
      %215 = vector.shape_cast %214 : vector<1x1x1x128xf32> to vector<1x128xf32>
      %c0_175 = arith.constant 0 : index
      %c0_176 = arith.constant 0 : index
      %c0_177 = arith.constant 0 : index
      %c0_178 = arith.constant 0 : index
      %216 = vector.load %arg4[%c0_175, %c0_176, %c0_177, %c0_178] : memref<1x1x16x128xf32, #tpu.memory_space<vmem>>, vector<1x1x1x128xf32>
      %217 = vector.shape_cast %216 : vector<1x1x1x128xf32> to vector<1x128xf32>
      %218 = arith.mulf %215, %217 : vector<1x128xf32>
      %cst_179 = arith.constant 1.000000e+00 : f32
      %219 = vector.broadcast %cst_179 : f32 to vector<1x128xf32>
      %220 = arith.subf %219, %215 : vector<1x128xf32>
      %221 = arith.mulf %220, %213 : vector<1x128xf32>
      %222 = arith.addf %218, %221 : vector<1x128xf32>
      %c0_180 = arith.constant 0 : index
      %c0_181 = arith.constant 0 : index
      %223 = vector.load %arg7[%c0_180, %c0_181] : memref<16x128xf32, #tpu.memory_space<vmem>>, vector<1x128xf32>
      tpu.vector_store %arg7[%c0_180, %c0_181], %222 {strides = array<i32>} : memref<16x128xf32, #tpu.memory_space<vmem>>, vector<1x128xf32>,
    } else {
    }
    %c3_i32 = arith.constant 3 : i32
    %12 = arith.cmpi eq, %arg1, %c3_i32 : i32
    %13 = arith.extui %12 : i1 to i32
    %c0_i32_5 = arith.constant 0 : i32
    %14 = arith.cmpi ne, %13, %c0_i32_5 : i32
    scf.if %14 {
      %c0_19 = arith.constant 0 : index
      %c0_20 = arith.constant 0 : index
      %c0_21 = arith.constant 0 : index
      %31 = vector.load %arg5[%c0_19, %c0_20, %c0_21] : memref<1x1x128xf32, #tpu.memory_space<vmem>>, vector<1x1x128xf32>
      %32 = vector.shape_cast %31 : vector<1x1x128xf32> to vector<1x128xf32>
      %33 = vector.shape_cast %32 : vector<1x128xf32> to vector<1x128xf32>
      %34 = vector.broadcast %33 : vector<1x128xf32> to vector<2x128xf32>
      %35 = vector.extract_strided_slice %34 {offsets = [0, 0], sizes = [2, 8], strides = [1, 1]} : vector<2x128xf32> to vector<2x8xf32>
      %c0_22 = arith.constant 0 : index
      %c0_23 = arith.constant 0 : index
      %c14 = arith.constant 14 : index
      %c0_24 = arith.constant 0 : index
      %36 = vector.load %arg2[%c0_22, %c0_23, %c14, %c0_24] : memref<1x1x16x128xf32, #tpu.memory_space<vmem>>, vector<1x1x2x128xf32>
      %37 = vector.shape_cast %36 : vector<1x1x2x128xf32> to vector<2x128xf32>
      %c0_25 = arith.constant 0 : index
      %c0_26 = arith.constant 0 : index
      %c14_27 = arith.constant 14 : index
      %c0_28 = arith.constant 0 : index
      %38 = vector.load %arg4[%c0_25, %c0_26, %c14_27, %c0_28] : memref<1x1x16x128xf32, #tpu.memory_space<vmem>>, vector<1x1x2x128xf32>
      %39 = vector.shape_cast %38 : vector<1x1x2x128xf32> to vector<2x128xf32>
      %40 = arith.mulf %37, %39 : vector<2x128xf32>
      %cst = arith.constant 1.000000e+00 : f32
      %41 = vector.broadcast %cst : f32 to vector<2x128xf32>
      %42 = arith.subf %41, %37 : vector<2x128xf32>
      %43 = arith.mulf %42, %34 : vector<2x128xf32>
      %44 = arith.addf %40, %43 : vector<2x128xf32>
      %c14_29 = arith.constant 14 : index
      %c0_30 = arith.constant 0 : index
      %45 = vector.load %arg7[%c14_29, %c0_30] : memref<16x128xf32, #tpu.memory_space<vmem>>, vector<2x128xf32>
      tpu.vector_store %arg7[%c14_29, %c0_30], %44 {strides = array<i32>} : memref<16x128xf32, #tpu.memory_space<vmem>>, vector<2x128xf32>,
      %46 = vector.extract_strided_slice %44 {offsets = [0, 8], sizes = [2, 120], strides = [1, 1]} : vector<2x128xf32> to vector<2x120xf32>
      %47 = tpu.concatenate %46, %35 in 1 : vector<2x120xf32>, vector<2x8xf32> -> vector<2x128xf32>
      %c0_31 = arith.constant 0 : index
      %c0_32 = arith.constant 0 : index
      %c12 = arith.constant 12 : index
      %c0_33 = arith.constant 0 : index
      %48 = vector.load %arg2[%c0_31, %c0_32, %c12, %c0_33] : memref<1x1x16x128xf32, #tpu.memory_space<vmem>>, vector<1x1x2x128xf32>
      %49 = vector.shape_cast %48 : vector<1x1x2x128xf32> to vector<2x128xf32>
      %c0_34 = arith.constant 0 : index
      %c0_35 = arith.constant 0 : index
      %c12_36 = arith.constant 12 : index
      %c0_37 = arith.constant 0 : index
      %50 = vector.load %arg4[%c0_34, %c0_35, %c12_36, %c0_37] : memref<1x1x16x128xf32, #tpu.memory_space<vmem>>, vector<1x1x2x128xf32>
      %51 = vector.shape_cast %50 : vector<1x1x2x128xf32> to vector<2x128xf32>
      %52 = arith.mulf %49, %51 : vector<2x128xf32>
      %cst_38 = arith.constant 1.000000e+00 : f32
      %53 = vector.broadcast %cst_38 : f32 to vector<2x128xf32>
      %54 = arith.subf %53, %49 : vector<2x128xf32>
      %55 = arith.mulf %54, %47 : vector<2x128xf32>
      %56 = arith.addf %52, %55 : vector<2x128xf32>
      %c12_39 = arith.constant 12 : index
      %c0_40 = arith.constant 0 : index
      %57 = vector.load %arg7[%c12_39, %c0_40] : memref<16x128xf32, #tpu.memory_space<vmem>>, vector<2x128xf32>
      tpu.vector_store %arg7[%c12_39, %c0_40], %56 {strides = array<i32>} : memref<16x128xf32, #tpu.memory_space<vmem>>, vector<2x128xf32>,
      %58 = vector.extract_strided_slice %56 {offsets = [0, 8], sizes = [2, 120], strides = [1, 1]} : vector<2x128xf32> to vector<2x120xf32>
      %59 = tpu.concatenate %58, %35 in 1 : vector<2x120xf32>, vector<2x8xf32> -> vector<2x128xf32>
      %c0_41 = arith.constant 0 : index
      %c0_42 = arith.constant 0 : index
      %c10 = arith.constant 10 : index
      %c0_43 = arith.constant 0 : index
      %60 = vector.load %arg2[%c0_41, %c0_42, %c10, %c0_43] : memref<1x1x16x128xf32, #tpu.memory_space<vmem>>, vector<1x1x2x128xf32>
      %61 = vector.shape_cast %60 : vector<1x1x2x128xf32> to vector<2x128xf32>
      %c0_44 = arith.constant 0 : index
      %c0_45 = arith.constant 0 : index
      %c10_46 = arith.constant 10 : index
      %c0_47 = arith.constant 0 : index
      %62 = vector.load %arg4[%c0_44, %c0_45, %c10_46, %c0_47] : memref<1x1x16x128xf32, #tpu.memory_space<vmem>>, vector<1x1x2x128xf32>
      %63 = vector.shape_cast %62 : vector<1x1x2x128xf32> to vector<2x128xf32>
      %64 = arith.mulf %61, %63 : vector<2x128xf32>
      %cst_48 = arith.constant 1.000000e+00 : f32
      %65 = vector.broadcast %cst_48 : f32 to vector<2x128xf32>
      %66 = arith.subf %65, %61 : vector<2x128xf32>
      %67 = arith.mulf %66, %59 : vector<2x128xf32>
      %68 = arith.addf %64, %67 : vector<2x128xf32>
      %c10_49 = arith.constant 10 : index
      %c0_50 = arith.constant 0 : index
      %69 = vector.load %arg7[%c10_49, %c0_50] : memref<16x128xf32, #tpu.memory_space<vmem>>, vector<2x128xf32>
      tpu.vector_store %arg7[%c10_49, %c0_50], %68 {strides = array<i32>} : memref<16x128xf32, #tpu.memory_space<vmem>>, vector<2x128xf32>,
      %70 = vector.extract_strided_slice %68 {offsets = [0, 8], sizes = [2, 120], strides = [1, 1]} : vector<2x128xf32> to vector<2x120xf32>
      %71 = tpu.concatenate %70, %35 in 1 : vector<2x120xf32>, vector<2x8xf32> -> vector<2x128xf32>
      %c0_51 = arith.constant 0 : index
      %c0_52 = arith.constant 0 : index
      %c8 = arith.constant 8 : index
      %c0_53 = arith.constant 0 : index
      %72 = vector.load %arg2[%c0_51, %c0_52, %c8, %c0_53] : memref<1x1x16x128xf32, #tpu.memory_space<vmem>>, vector<1x1x2x128xf32>
      %73 = vector.shape_cast %72 : vector<1x1x2x128xf32> to vector<2x128xf32>
      %c0_54 = arith.constant 0 : index
      %c0_55 = arith.constant 0 : index
      %c8_56 = arith.constant 8 : index
      %c0_57 = arith.constant 0 : index
      %74 = vector.load %arg4[%c0_54, %c0_55, %c8_56, %c0_57] : memref<1x1x16x128xf32, #tpu.memory_space<vmem>>, vector<1x1x2x128xf32>
      %75 = vector.shape_cast %74 : vector<1x1x2x128xf32> to vector<2x128xf32>
      %76 = arith.mulf %73, %75 : vector<2x128xf32>
      %cst_58 = arith.constant 1.000000e+00 : f32
      %77 = vector.broadcast %cst_58 : f32 to vector<2x128xf32>
      %78 = arith.subf %77, %73 : vector<2x128xf32>
      %79 = arith.mulf %78, %71 : vector<2x128xf32>
      %80 = arith.addf %76, %79 : vector<2x128xf32>
      %c8_59 = arith.constant 8 : index
      %c0_60 = arith.constant 0 : index
      %81 = vector.load %arg7[%c8_59, %c0_60] : memref<16x128xf32, #tpu.memory_space<vmem>>, vector<2x128xf32>
      tpu.vector_store %arg7[%c8_59, %c0_60], %80 {strides = array<i32>} : memref<16x128xf32, #tpu.memory_space<vmem>>, vector<2x128xf32>,
      %82 = vector.extract_strided_slice %80 {offsets = [0, 8], sizes = [2, 120], strides = [1, 1]} : vector<2x128xf32> to vector<2x120xf32>
      %83 = tpu.concatenate %82, %35 in 1 : vector<2x120xf32>, vector<2x8xf32> -> vector<2x128xf32>
      %c0_61 = arith.constant 0 : index
      %c0_62 = arith.constant 0 : index
      %c6 = arith.constant 6 : index
      %c0_63 = arith.constant 0 : index
      %84 = vector.load %arg2[%c0_61, %c0_62, %c6, %c0_63] : memref<1x1x16x128xf32, #tpu.memory_space<vmem>>, vector<1x1x2x128xf32>
      %85 = vector.shape_cast %84 : vector<1x1x2x128xf32> to vector<2x128xf32>
      %c0_64 = arith.constant 0 : index
      %c0_65 = arith.constant 0 : index
      %c6_66 = arith.constant 6 : index
      %c0_67 = arith.constant 0 : index
      %86 = vector.load %arg4[%c0_64, %c0_65, %c6_66, %c0_67] : memref<1x1x16x128xf32, #tpu.memory_space<vmem>>, vector<1x1x2x128xf32>
      %87 = vector.shape_cast %86 : vector<1x1x2x128xf32> to vector<2x128xf32>
      %88 = arith.mulf %85, %87 : vector<2x128xf32>
      %cst_68 = arith.constant 1.000000e+00 : f32
      %89 = vector.broadcast %cst_68 : f32 to vector<2x128xf32>
      %90 = arith.subf %89, %85 : vector<2x128xf32>
      %91 = arith.mulf %90, %83 : vector<2x128xf32>
      %92 = arith.addf %88, %91 : vector<2x128xf32>
      %c6_69 = arith.constant 6 : index
      %c0_70 = arith.constant 0 : index
      %93 = vector.load %arg7[%c6_69, %c0_70] : memref<16x128xf32, #tpu.memory_space<vmem>>, vector<2x128xf32>
      tpu.vector_store %arg7[%c6_69, %c0_70], %92 {strides = array<i32>} : memref<16x128xf32, #tpu.memory_space<vmem>>, vector<2x128xf32>,
      %94 = vector.extract_strided_slice %92 {offsets = [0, 8], sizes = [2, 120], strides = [1, 1]} : vector<2x128xf32> to vector<2x120xf32>
      %95 = tpu.concatenate %94, %35 in 1 : vector<2x120xf32>, vector<2x8xf32> -> vector<2x128xf32>
      %c0_71 = arith.constant 0 : index
      %c0_72 = arith.constant 0 : index
      %c4 = arith.constant 4 : index
      %c0_73 = arith.constant 0 : index
      %96 = vector.load %arg2[%c0_71, %c0_72, %c4, %c0_73] : memref<1x1x16x128xf32, #tpu.memory_space<vmem>>, vector<1x1x2x128xf32>
      %97 = vector.shape_cast %96 : vector<1x1x2x128xf32> to vector<2x128xf32>
      %c0_74 = arith.constant 0 : index
      %c0_75 = arith.constant 0 : index
      %c4_76 = arith.constant 4 : index
      %c0_77 = arith.constant 0 : index
      %98 = vector.load %arg4[%c0_74, %c0_75, %c4_76, %c0_77] : memref<1x1x16x128xf32, #tpu.memory_space<vmem>>, vector<1x1x2x128xf32>
      %99 = vector.shape_cast %98 : vector<1x1x2x128xf32> to vector<2x128xf32>
      %100 = arith.mulf %97, %99 : vector<2x128xf32>
      %cst_78 = arith.constant 1.000000e+00 : f32
      %101 = vector.broadcast %cst_78 : f32 to vector<2x128xf32>
      %102 = arith.subf %101, %97 : vector<2x128xf32>
      %103 = arith.mulf %102, %95 : vector<2x128xf32>
      %104 = arith.addf %100, %103 : vector<2x128xf32>
      %c4_79 = arith.constant 4 : index
      %c0_80 = arith.constant 0 : index
      %105 = vector.load %arg7[%c4_79, %c0_80] : memref<16x128xf32, #tpu.memory_space<vmem>>, vector<2x128xf32>
      tpu.vector_store %arg7[%c4_79, %c0_80], %104 {strides = array<i32>} : memref<16x128xf32, #tpu.memory_space<vmem>>, vector<2x128xf32>,
      %106 = vector.extract_strided_slice %104 {offsets = [0, 8], sizes = [2, 120], strides = [1, 1]} : vector<2x128xf32> to vector<2x120xf32>
      %107 = tpu.concatenate %106, %35 in 1 : vector<2x120xf32>, vector<2x8xf32> -> vector<2x128xf32>
      %c0_81 = arith.constant 0 : index
      %c0_82 = arith.constant 0 : index
      %c2 = arith.constant 2 : index
      %c0_83 = arith.constant 0 : index
      %108 = vector.load %arg2[%c0_81, %c0_82, %c2, %c0_83] : memref<1x1x16x128xf32, #tpu.memory_space<vmem>>, vector<1x1x2x128xf32>
      %109 = vector.shape_cast %108 : vector<1x1x2x128xf32> to vector<2x128xf32>
      %c0_84 = arith.constant 0 : index
      %c0_85 = arith.constant 0 : index
      %c2_86 = arith.constant 2 : index
      %c0_87 = arith.constant 0 : index
      %110 = vector.load %arg4[%c0_84, %c0_85, %c2_86, %c0_87] : memref<1x1x16x128xf32, #tpu.memory_space<vmem>>, vector<1x1x2x128xf32>
      %111 = vector.shape_cast %110 : vector<1x1x2x128xf32> to vector<2x128xf32>
      %112 = arith.mulf %109, %111 : vector<2x128xf32>
      %cst_88 = arith.constant 1.000000e+00 : f32
      %113 = vector.broadcast %cst_88 : f32 to vector<2x128xf32>
      %114 = arith.subf %113, %109 : vector<2x128xf32>
      %115 = arith.mulf %114, %107 : vector<2x128xf32>
      %116 = arith.addf %112, %115 : vector<2x128xf32>
      %c2_89 = arith.constant 2 : index
      %c0_90 = arith.constant 0 : index
      %117 = vector.load %arg7[%c2_89, %c0_90] : memref<16x128xf32, #tpu.memory_space<vmem>>, vector<2x128xf32>
      tpu.vector_store %arg7[%c2_89, %c0_90], %116 {strides = array<i32>} : memref<16x128xf32, #tpu.memory_space<vmem>>, vector<2x128xf32>,
      %118 = vector.extract_strided_slice %116 {offsets = [0, 8], sizes = [2, 120], strides = [1, 1]} : vector<2x128xf32> to vector<2x120xf32>
      %119 = tpu.concatenate %118, %35 in 1 : vector<2x120xf32>, vector<2x8xf32> -> vector<2x128xf32>
      %c0_91 = arith.constant 0 : index
      %c0_92 = arith.constant 0 : index
      %c0_93 = arith.constant 0 : index
      %c0_94 = arith.constant 0 : index
      %120 = vector.load %arg2[%c0_91, %c0_92, %c0_93, %c0_94] : memref<1x1x16x128xf32, #tpu.memory_space<vmem>>, vector<1x1x2x128xf32>
      %121 = vector.shape_cast %120 : vector<1x1x2x128xf32> to vector<2x128xf32>
      %c0_95 = arith.constant 0 : index
      %c0_96 = arith.constant 0 : index
      %c0_97 = arith.constant 0 : index
      %c0_98 = arith.constant 0 : index
      %122 = vector.load %arg4[%c0_95, %c0_96, %c0_97, %c0_98] : memref<1x1x16x128xf32, #tpu.memory_space<vmem>>, vector<1x1x2x128xf32>
      %123 = vector.shape_cast %122 : vector<1x1x2x128xf32> to vector<2x128xf32>
      %124 = arith.mulf %121, %123 : vector<2x128xf32>
      %cst_99 = arith.constant 1.000000e+00 : f32
      %125 = vector.broadcast %cst_99 : f32 to vector<2x128xf32>
      %126 = arith.subf %125, %121 : vector<2x128xf32>
      %127 = arith.mulf %126, %119 : vector<2x128xf32>
      %128 = arith.addf %124, %127 : vector<2x128xf32>
      %c0_100 = arith.constant 0 : index
      %c0_101 = arith.constant 0 : index
      %129 = vector.load %arg7[%c0_100, %c0_101] : memref<16x128xf32, #tpu.memory_space<vmem>>, vector<2x128xf32>
      tpu.vector_store %arg7[%c0_100, %c0_101], %128 {strides = array<i32>} : memref<16x128xf32, #tpu.memory_space<vmem>>, vector<2x128xf32>,
    } else {
    }
    %c4_i32 = arith.constant 4 : i32
    %15 = arith.cmpi eq, %arg1, %c4_i32 : i32
    %16 = arith.extui %15 : i1 to i32
    %c0_i32_6 = arith.constant 0 : i32
    %17 = arith.cmpi ne, %16, %c0_i32_6 : i32
    scf.if %17 {
      %c0_19 = arith.constant 0 : index
      %c0_20 = arith.constant 0 : index
      %c0_21 = arith.constant 0 : index
      %31 = vector.load %arg5[%c0_19, %c0_20, %c0_21] : memref<1x1x128xf32, #tpu.memory_space<vmem>>, vector<1x1x128xf32>
      %32 = vector.shape_cast %31 : vector<1x1x128xf32> to vector<1x128xf32>
      %c0_22 = arith.constant 0 : index
      %c0_23 = arith.constant 0 : index
      %c0_24 = arith.constant 0 : index
      %c0_25 = arith.constant 0 : index
      %33 = vector.load %arg2[%c0_22, %c0_23, %c0_24, %c0_25] : memref<1x1x16x128xf32, #tpu.memory_space<vmem>>, vector<1x1x1x128xf32>
      %34 = vector.shape_cast %33 : vector<1x1x1x128xf32> to vector<1x128xf32>
      %c0_26 = arith.constant 0 : index
      %c0_27 = arith.constant 0 : index
      %c0_28 = arith.constant 0 : index
      %c0_29 = arith.constant 0 : index
      %35 = vector.load %arg4[%c0_26, %c0_27, %c0_28, %c0_29] : memref<1x1x16x128xf32, #tpu.memory_space<vmem>>, vector<1x1x1x128xf32>
      %36 = vector.shape_cast %35 : vector<1x1x1x128xf32> to vector<1x128xf32>
      %37 = arith.mulf %34, %36 : vector<1x128xf32>
      %cst = arith.constant 1.000000e+00 : f32
      %38 = vector.broadcast %cst : f32 to vector<1x128xf32>
      %39 = arith.subf %38, %34 : vector<1x128xf32>
      %40 = arith.mulf %39, %32 : vector<1x128xf32>
      %41 = arith.addf %37, %40 : vector<1x128xf32>
      %c0_30 = arith.constant 0 : index
      %c0_31 = arith.constant 0 : index
      %42 = vector.load %arg7[%c0_30, %c0_31] : memref<16x128xf32, #tpu.memory_space<vmem>>, vector<1x128xf32>
      tpu.vector_store %arg7[%c0_30, %c0_31], %41 {strides = array<i32>} : memref<16x128xf32, #tpu.memory_space<vmem>>, vector<1x128xf32>,
      %c0_32 = arith.constant 0 : index
      %c0_33 = arith.constant 0 : index
      %c1 = arith.constant 1 : index
      %c0_34 = arith.constant 0 : index
      %43 = vector.load %arg2[%c0_32, %c0_33, %c1, %c0_34] : memref<1x1x16x128xf32, #tpu.memory_space<vmem>>, vector<1x1x1x128xf32>
      %44 = vector.shape_cast %43 : vector<1x1x1x128xf32> to vector<1x128xf32>
      %c0_35 = arith.constant 0 : index
      %c0_36 = arith.constant 0 : index
      %c1_37 = arith.constant 1 : index
      %c0_38 = arith.constant 0 : index
      %45 = vector.load %arg4[%c0_35, %c0_36, %c1_37, %c0_38] : memref<1x1x16x128xf32, #tpu.memory_space<vmem>>, vector<1x1x1x128xf32>
      %46 = vector.shape_cast %45 : vector<1x1x1x128xf32> to vector<1x128xf32>
      %47 = arith.mulf %44, %46 : vector<1x128xf32>
      %cst_39 = arith.constant 1.000000e+00 : f32
      %48 = vector.broadcast %cst_39 : f32 to vector<1x128xf32>
      %49 = arith.subf %48, %44 : vector<1x128xf32>
      %50 = arith.mulf %49, %41 : vector<1x128xf32>
      %51 = arith.addf %47, %50 : vector<1x128xf32>
      %c1_40 = arith.constant 1 : index
      %c0_41 = arith.constant 0 : index
      %52 = vector.load %arg7[%c1_40, %c0_41] : memref<16x128xf32, #tpu.memory_space<vmem>>, vector<1x128xf32>
      tpu.vector_store %arg7[%c1_40, %c0_41], %51 {strides = array<i32>} : memref<16x128xf32, #tpu.memory_space<vmem>>, vector<1x128xf32>,
      %c0_42 = arith.constant 0 : index
      %c0_43 = arith.constant 0 : index
      %c2 = arith.constant 2 : index
      %c0_44 = arith.constant 0 : index
      %53 = vector.load %arg2[%c0_42, %c0_43, %c2, %c0_44] : memref<1x1x16x128xf32, #tpu.memory_space<vmem>>, vector<1x1x1x128xf32>
      %54 = vector.shape_cast %53 : vector<1x1x1x128xf32> to vector<1x128xf32>
      %c0_45 = arith.constant 0 : index
      %c0_46 = arith.constant 0 : index
      %c2_47 = arith.constant 2 : index
      %c0_48 = arith.constant 0 : index
      %55 = vector.load %arg4[%c0_45, %c0_46, %c2_47, %c0_48] : memref<1x1x16x128xf32, #tpu.memory_space<vmem>>, vector<1x1x1x128xf32>
      %56 = vector.shape_cast %55 : vector<1x1x1x128xf32> to vector<1x128xf32>
      %57 = arith.mulf %54, %56 : vector<1x128xf32>
      %cst_49 = arith.constant 1.000000e+00 : f32
      %58 = vector.broadcast %cst_49 : f32 to vector<1x128xf32>
      %59 = arith.subf %58, %54 : vector<1x128xf32>
      %60 = arith.mulf %59, %51 : vector<1x128xf32>
      %61 = arith.addf %57, %60 : vector<1x128xf32>
      %c2_50 = arith.constant 2 : index
      %c0_51 = arith.constant 0 : index
      %62 = vector.load %arg7[%c2_50, %c0_51] : memref<16x128xf32, #tpu.memory_space<vmem>>, vector<1x128xf32>
      tpu.vector_store %arg7[%c2_50, %c0_51], %61 {strides = array<i32>} : memref<16x128xf32, #tpu.memory_space<vmem>>, vector<1x128xf32>,
      %c0_52 = arith.constant 0 : index
      %c0_53 = arith.constant 0 : index
      %c3 = arith.constant 3 : index
      %c0_54 = arith.constant 0 : index
      %63 = vector.load %arg2[%c0_52, %c0_53, %c3, %c0_54] : memref<1x1x16x128xf32, #tpu.memory_space<vmem>>, vector<1x1x1x128xf32>
      %64 = vector.shape_cast %63 : vector<1x1x1x128xf32> to vector<1x128xf32>
      %c0_55 = arith.constant 0 : index
      %c0_56 = arith.constant 0 : index
      %c3_57 = arith.constant 3 : index
      %c0_58 = arith.constant 0 : index
      %65 = vector.load %arg4[%c0_55, %c0_56, %c3_57, %c0_58] : memref<1x1x16x128xf32, #tpu.memory_space<vmem>>, vector<1x1x1x128xf32>
      %66 = vector.shape_cast %65 : vector<1x1x1x128xf32> to vector<1x128xf32>
      %67 = arith.mulf %64, %66 : vector<1x128xf32>
      %cst_59 = arith.constant 1.000000e+00 : f32
      %68 = vector.broadcast %cst_59 : f32 to vector<1x128xf32>
      %69 = arith.subf %68, %64 : vector<1x128xf32>
      %70 = arith.mulf %69, %61 : vector<1x128xf32>
      %71 = arith.addf %67, %70 : vector<1x128xf32>
      %c3_60 = arith.constant 3 : index
      %c0_61 = arith.constant 0 : index
      %72 = vector.load %arg7[%c3_60, %c0_61] : memref<16x128xf32, #tpu.memory_space<vmem>>, vector<1x128xf32>
      tpu.vector_store %arg7[%c3_60, %c0_61], %71 {strides = array<i32>} : memref<16x128xf32, #tpu.memory_space<vmem>>, vector<1x128xf32>,
      %c0_62 = arith.constant 0 : index
      %c0_63 = arith.constant 0 : index
      %c4 = arith.constant 4 : index
      %c0_64 = arith.constant 0 : index
      %73 = vector.load %arg2[%c0_62, %c0_63, %c4, %c0_64] : memref<1x1x16x128xf32, #tpu.memory_space<vmem>>, vector<1x1x1x128xf32>
      %74 = vector.shape_cast %73 : vector<1x1x1x128xf32> to vector<1x128xf32>
      %c0_65 = arith.constant 0 : index
      %c0_66 = arith.constant 0 : index
      %c4_67 = arith.constant 4 : index
      %c0_68 = arith.constant 0 : index
      %75 = vector.load %arg4[%c0_65, %c0_66, %c4_67, %c0_68] : memref<1x1x16x128xf32, #tpu.memory_space<vmem>>, vector<1x1x1x128xf32>
      %76 = vector.shape_cast %75 : vector<1x1x1x128xf32> to vector<1x128xf32>
      %77 = arith.mulf %74, %76 : vector<1x128xf32>
      %cst_69 = arith.constant 1.000000e+00 : f32
      %78 = vector.broadcast %cst_69 : f32 to vector<1x128xf32>
      %79 = arith.subf %78, %74 : vector<1x128xf32>
      %80 = arith.mulf %79, %71 : vector<1x128xf32>
      %81 = arith.addf %77, %80 : vector<1x128xf32>
      %c4_70 = arith.constant 4 : index
      %c0_71 = arith.constant 0 : index
      %82 = vector.load %arg7[%c4_70, %c0_71] : memref<16x128xf32, #tpu.memory_space<vmem>>, vector<1x128xf32>
      tpu.vector_store %arg7[%c4_70, %c0_71], %81 {strides = array<i32>} : memref<16x128xf32, #tpu.memory_space<vmem>>, vector<1x128xf32>,
      %c0_72 = arith.constant 0 : index
      %c0_73 = arith.constant 0 : index
      %c5 = arith.constant 5 : index
      %c0_74 = arith.constant 0 : index
      %83 = vector.load %arg2[%c0_72, %c0_73, %c5, %c0_74] : memref<1x1x16x128xf32, #tpu.memory_space<vmem>>, vector<1x1x1x128xf32>
      %84 = vector.shape_cast %83 : vector<1x1x1x128xf32> to vector<1x128xf32>
      %c0_75 = arith.constant 0 : index
      %c0_76 = arith.constant 0 : index
      %c5_77 = arith.constant 5 : index
      %c0_78 = arith.constant 0 : index
      %85 = vector.load %arg4[%c0_75, %c0_76, %c5_77, %c0_78] : memref<1x1x16x128xf32, #tpu.memory_space<vmem>>, vector<1x1x1x128xf32>
      %86 = vector.shape_cast %85 : vector<1x1x1x128xf32> to vector<1x128xf32>
      %87 = arith.mulf %84, %86 : vector<1x128xf32>
      %cst_79 = arith.constant 1.000000e+00 : f32
      %88 = vector.broadcast %cst_79 : f32 to vector<1x128xf32>
      %89 = arith.subf %88, %84 : vector<1x128xf32>
      %90 = arith.mulf %89, %81 : vector<1x128xf32>
      %91 = arith.addf %87, %90 : vector<1x128xf32>
      %c5_80 = arith.constant 5 : index
      %c0_81 = arith.constant 0 : index
      %92 = vector.load %arg7[%c5_80, %c0_81] : memref<16x128xf32, #tpu.memory_space<vmem>>, vector<1x128xf32>
      tpu.vector_store %arg7[%c5_80, %c0_81], %91 {strides = array<i32>} : memref<16x128xf32, #tpu.memory_space<vmem>>, vector<1x128xf32>,
      %c0_82 = arith.constant 0 : index
      %c0_83 = arith.constant 0 : index
      %c6 = arith.constant 6 : index
      %c0_84 = arith.constant 0 : index
      %93 = vector.load %arg2[%c0_82, %c0_83, %c6, %c0_84] : memref<1x1x16x128xf32, #tpu.memory_space<vmem>>, vector<1x1x1x128xf32>
      %94 = vector.shape_cast %93 : vector<1x1x1x128xf32> to vector<1x128xf32>
      %c0_85 = arith.constant 0 : index
      %c0_86 = arith.constant 0 : index
      %c6_87 = arith.constant 6 : index
      %c0_88 = arith.constant 0 : index
      %95 = vector.load %arg4[%c0_85, %c0_86, %c6_87, %c0_88] : memref<1x1x16x128xf32, #tpu.memory_space<vmem>>, vector<1x1x1x128xf32>
      %96 = vector.shape_cast %95 : vector<1x1x1x128xf32> to vector<1x128xf32>
      %97 = arith.mulf %94, %96 : vector<1x128xf32>
      %cst_89 = arith.constant 1.000000e+00 : f32
      %98 = vector.broadcast %cst_89 : f32 to vector<1x128xf32>
      %99 = arith.subf %98, %94 : vector<1x128xf32>
      %100 = arith.mulf %99, %91 : vector<1x128xf32>
      %101 = arith.addf %97, %100 : vector<1x128xf32>
      %c6_90 = arith.constant 6 : index
      %c0_91 = arith.constant 0 : index
      %102 = vector.load %arg7[%c6_90, %c0_91] : memref<16x128xf32, #tpu.memory_space<vmem>>, vector<1x128xf32>
      tpu.vector_store %arg7[%c6_90, %c0_91], %101 {strides = array<i32>} : memref<16x128xf32, #tpu.memory_space<vmem>>, vector<1x128xf32>,
      %c0_92 = arith.constant 0 : index
      %c0_93 = arith.constant 0 : index
      %c7 = arith.constant 7 : index
      %c0_94 = arith.constant 0 : index
      %103 = vector.load %arg2[%c0_92, %c0_93, %c7, %c0_94] : memref<1x1x16x128xf32, #tpu.memory_space<vmem>>, vector<1x1x1x128xf32>
      %104 = vector.shape_cast %103 : vector<1x1x1x128xf32> to vector<1x128xf32>
      %c0_95 = arith.constant 0 : index
      %c0_96 = arith.constant 0 : index
      %c7_97 = arith.constant 7 : index
      %c0_98 = arith.constant 0 : index
      %105 = vector.load %arg4[%c0_95, %c0_96, %c7_97, %c0_98] : memref<1x1x16x128xf32, #tpu.memory_space<vmem>>, vector<1x1x1x128xf32>
      %106 = vector.shape_cast %105 : vector<1x1x1x128xf32> to vector<1x128xf32>
      %107 = arith.mulf %104, %106 : vector<1x128xf32>
      %cst_99 = arith.constant 1.000000e+00 : f32
      %108 = vector.broadcast %cst_99 : f32 to vector<1x128xf32>
      %109 = arith.subf %108, %104 : vector<1x128xf32>
      %110 = arith.mulf %109, %101 : vector<1x128xf32>
      %111 = arith.addf %107, %110 : vector<1x128xf32>
      %c7_100 = arith.constant 7 : index
      %c0_101 = arith.constant 0 : index
      %112 = vector.load %arg7[%c7_100, %c0_101] : memref<16x128xf32, #tpu.memory_space<vmem>>, vector<1x128xf32>
      tpu.vector_store %arg7[%c7_100, %c0_101], %111 {strides = array<i32>} : memref<16x128xf32, #tpu.memory_space<vmem>>, vector<1x128xf32>,
      %c0_102 = arith.constant 0 : index
      %c0_103 = arith.constant 0 : index
      %c8 = arith.constant 8 : index
      %c0_104 = arith.constant 0 : index
      %113 = vector.load %arg2[%c0_102, %c0_103, %c8, %c0_104] : memref<1x1x16x128xf32, #tpu.memory_space<vmem>>, vector<1x1x1x128xf32>
      %114 = vector.shape_cast %113 : vector<1x1x1x128xf32> to vector<1x128xf32>
      %c0_105 = arith.constant 0 : index
      %c0_106 = arith.constant 0 : index
      %c8_107 = arith.constant 8 : index
      %c0_108 = arith.constant 0 : index
      %115 = vector.load %arg4[%c0_105, %c0_106, %c8_107, %c0_108] : memref<1x1x16x128xf32, #tpu.memory_space<vmem>>, vector<1x1x1x128xf32>
      %116 = vector.shape_cast %115 : vector<1x1x1x128xf32> to vector<1x128xf32>
      %117 = arith.mulf %114, %116 : vector<1x128xf32>
      %cst_109 = arith.constant 1.000000e+00 : f32
      %118 = vector.broadcast %cst_109 : f32 to vector<1x128xf32>
      %119 = arith.subf %118, %114 : vector<1x128xf32>
      %120 = arith.mulf %119, %111 : vector<1x128xf32>
      %121 = arith.addf %117, %120 : vector<1x128xf32>
      %c8_110 = arith.constant 8 : index
      %c0_111 = arith.constant 0 : index
      %122 = vector.load %arg7[%c8_110, %c0_111] : memref<16x128xf32, #tpu.memory_space<vmem>>, vector<1x128xf32>
      tpu.vector_store %arg7[%c8_110, %c0_111], %121 {strides = array<i32>} : memref<16x128xf32, #tpu.memory_space<vmem>>, vector<1x128xf32>,
      %c0_112 = arith.constant 0 : index
      %c0_113 = arith.constant 0 : index
      %c9 = arith.constant 9 : index
      %c0_114 = arith.constant 0 : index
      %123 = vector.load %arg2[%c0_112, %c0_113, %c9, %c0_114] : memref<1x1x16x128xf32, #tpu.memory_space<vmem>>, vector<1x1x1x128xf32>
      %124 = vector.shape_cast %123 : vector<1x1x1x128xf32> to vector<1x128xf32>
      %c0_115 = arith.constant 0 : index
      %c0_116 = arith.constant 0 : index
      %c9_117 = arith.constant 9 : index
      %c0_118 = arith.constant 0 : index
      %125 = vector.load %arg4[%c0_115, %c0_116, %c9_117, %c0_118] : memref<1x1x16x128xf32, #tpu.memory_space<vmem>>, vector<1x1x1x128xf32>
      %126 = vector.shape_cast %125 : vector<1x1x1x128xf32> to vector<1x128xf32>
      %127 = arith.mulf %124, %126 : vector<1x128xf32>
      %cst_119 = arith.constant 1.000000e+00 : f32
      %128 = vector.broadcast %cst_119 : f32 to vector<1x128xf32>
      %129 = arith.subf %128, %124 : vector<1x128xf32>
      %130 = arith.mulf %129, %121 : vector<1x128xf32>
      %131 = arith.addf %127, %130 : vector<1x128xf32>
      %c9_120 = arith.constant 9 : index
      %c0_121 = arith.constant 0 : index
      %132 = vector.load %arg7[%c9_120, %c0_121] : memref<16x128xf32, #tpu.memory_space<vmem>>, vector<1x128xf32>
      tpu.vector_store %arg7[%c9_120, %c0_121], %131 {strides = array<i32>} : memref<16x128xf32, #tpu.memory_space<vmem>>, vector<1x128xf32>,
      %c0_122 = arith.constant 0 : index
      %c0_123 = arith.constant 0 : index
      %c10 = arith.constant 10 : index
      %c0_124 = arith.constant 0 : index
      %133 = vector.load %arg2[%c0_122, %c0_123, %c10, %c0_124] : memref<1x1x16x128xf32, #tpu.memory_space<vmem>>, vector<1x1x1x128xf32>
      %134 = vector.shape_cast %133 : vector<1x1x1x128xf32> to vector<1x128xf32>
      %c0_125 = arith.constant 0 : index
      %c0_126 = arith.constant 0 : index
      %c10_127 = arith.constant 10 : index
      %c0_128 = arith.constant 0 : index
      %135 = vector.load %arg4[%c0_125, %c0_126, %c10_127, %c0_128] : memref<1x1x16x128xf32, #tpu.memory_space<vmem>>, vector<1x1x1x128xf32>
      %136 = vector.shape_cast %135 : vector<1x1x1x128xf32> to vector<1x128xf32>
      %137 = arith.mulf %134, %136 : vector<1x128xf32>
      %cst_129 = arith.constant 1.000000e+00 : f32
      %138 = vector.broadcast %cst_129 : f32 to vector<1x128xf32>
      %139 = arith.subf %138, %134 : vector<1x128xf32>
      %140 = arith.mulf %139, %131 : vector<1x128xf32>
      %141 = arith.addf %137, %140 : vector<1x128xf32>
      %c10_130 = arith.constant 10 : index
      %c0_131 = arith.constant 0 : index
      %142 = vector.load %arg7[%c10_130, %c0_131] : memref<16x128xf32, #tpu.memory_space<vmem>>, vector<1x128xf32>
      tpu.vector_store %arg7[%c10_130, %c0_131], %141 {strides = array<i32>} : memref<16x128xf32, #tpu.memory_space<vmem>>, vector<1x128xf32>,
      %c0_132 = arith.constant 0 : index
      %c0_133 = arith.constant 0 : index
      %c11 = arith.constant 11 : index
      %c0_134 = arith.constant 0 : index
      %143 = vector.load %arg2[%c0_132, %c0_133, %c11, %c0_134] : memref<1x1x16x128xf32, #tpu.memory_space<vmem>>, vector<1x1x1x128xf32>
      %144 = vector.shape_cast %143 : vector<1x1x1x128xf32> to vector<1x128xf32>
      %c0_135 = arith.constant 0 : index
      %c0_136 = arith.constant 0 : index
      %c11_137 = arith.constant 11 : index
      %c0_138 = arith.constant 0 : index
      %145 = vector.load %arg4[%c0_135, %c0_136, %c11_137, %c0_138] : memref<1x1x16x128xf32, #tpu.memory_space<vmem>>, vector<1x1x1x128xf32>
      %146 = vector.shape_cast %145 : vector<1x1x1x128xf32> to vector<1x128xf32>
      %147 = arith.mulf %144, %146 : vector<1x128xf32>
      %cst_139 = arith.constant 1.000000e+00 : f32
      %148 = vector.broadcast %cst_139 : f32 to vector<1x128xf32>
      %149 = arith.subf %148, %144 : vector<1x128xf32>
      %150 = arith.mulf %149, %141 : vector<1x128xf32>
      %151 = arith.addf %147, %150 : vector<1x128xf32>
      %c11_140 = arith.constant 11 : index
      %c0_141 = arith.constant 0 : index
      %152 = vector.load %arg7[%c11_140, %c0_141] : memref<16x128xf32, #tpu.memory_space<vmem>>, vector<1x128xf32>
      tpu.vector_store %arg7[%c11_140, %c0_141], %151 {strides = array<i32>} : memref<16x128xf32, #tpu.memory_space<vmem>>, vector<1x128xf32>,
      %c0_142 = arith.constant 0 : index
      %c0_143 = arith.constant 0 : index
      %c12 = arith.constant 12 : index
      %c0_144 = arith.constant 0 : index
      %153 = vector.load %arg2[%c0_142, %c0_143, %c12, %c0_144] : memref<1x1x16x128xf32, #tpu.memory_space<vmem>>, vector<1x1x1x128xf32>
      %154 = vector.shape_cast %153 : vector<1x1x1x128xf32> to vector<1x128xf32>
      %c0_145 = arith.constant 0 : index
      %c0_146 = arith.constant 0 : index
      %c12_147 = arith.constant 12 : index
      %c0_148 = arith.constant 0 : index
      %155 = vector.load %arg4[%c0_145, %c0_146, %c12_147, %c0_148] : memref<1x1x16x128xf32, #tpu.memory_space<vmem>>, vector<1x1x1x128xf32>
      %156 = vector.shape_cast %155 : vector<1x1x1x128xf32> to vector<1x128xf32>
      %157 = arith.mulf %154, %156 : vector<1x128xf32>
      %cst_149 = arith.constant 1.000000e+00 : f32
      %158 = vector.broadcast %cst_149 : f32 to vector<1x128xf32>
      %159 = arith.subf %158, %154 : vector<1x128xf32>
      %160 = arith.mulf %159, %151 : vector<1x128xf32>
      %161 = arith.addf %157, %160 : vector<1x128xf32>
      %c12_150 = arith.constant 12 : index
      %c0_151 = arith.constant 0 : index
      %162 = vector.load %arg7[%c12_150, %c0_151] : memref<16x128xf32, #tpu.memory_space<vmem>>, vector<1x128xf32>
      tpu.vector_store %arg7[%c12_150, %c0_151], %161 {strides = array<i32>} : memref<16x128xf32, #tpu.memory_space<vmem>>, vector<1x128xf32>,
      %c0_152 = arith.constant 0 : index
      %c0_153 = arith.constant 0 : index
      %c13 = arith.constant 13 : index
      %c0_154 = arith.constant 0 : index
      %163 = vector.load %arg2[%c0_152, %c0_153, %c13, %c0_154] : memref<1x1x16x128xf32, #tpu.memory_space<vmem>>, vector<1x1x1x128xf32>
      %164 = vector.shape_cast %163 : vector<1x1x1x128xf32> to vector<1x128xf32>
      %c0_155 = arith.constant 0 : index
      %c0_156 = arith.constant 0 : index
      %c13_157 = arith.constant 13 : index
      %c0_158 = arith.constant 0 : index
      %165 = vector.load %arg4[%c0_155, %c0_156, %c13_157, %c0_158] : memref<1x1x16x128xf32, #tpu.memory_space<vmem>>, vector<1x1x1x128xf32>
      %166 = vector.shape_cast %165 : vector<1x1x1x128xf32> to vector<1x128xf32>
      %167 = arith.mulf %164, %166 : vector<1x128xf32>
      %cst_159 = arith.constant 1.000000e+00 : f32
      %168 = vector.broadcast %cst_159 : f32 to vector<1x128xf32>
      %169 = arith.subf %168, %164 : vector<1x128xf32>
      %170 = arith.mulf %169, %161 : vector<1x128xf32>
      %171 = arith.addf %167, %170 : vector<1x128xf32>
      %c13_160 = arith.constant 13 : index
      %c0_161 = arith.constant 0 : index
      %172 = vector.load %arg7[%c13_160, %c0_161] : memref<16x128xf32, #tpu.memory_space<vmem>>, vector<1x128xf32>
      tpu.vector_store %arg7[%c13_160, %c0_161], %171 {strides = array<i32>} : memref<16x128xf32, #tpu.memory_space<vmem>>, vector<1x128xf32>,
      %c0_162 = arith.constant 0 : index
      %c0_163 = arith.constant 0 : index
      %c14 = arith.constant 14 : index
      %c0_164 = arith.constant 0 : index
      %173 = vector.load %arg2[%c0_162, %c0_163, %c14, %c0_164] : memref<1x1x16x128xf32, #tpu.memory_space<vmem>>, vector<1x1x1x128xf32>
      %174 = vector.shape_cast %173 : vector<1x1x1x128xf32> to vector<1x128xf32>
      %c0_165 = arith.constant 0 : index
      %c0_166 = arith.constant 0 : index
      %c14_167 = arith.constant 14 : index
      %c0_168 = arith.constant 0 : index
      %175 = vector.load %arg4[%c0_165, %c0_166, %c14_167, %c0_168] : memref<1x1x16x128xf32, #tpu.memory_space<vmem>>, vector<1x1x1x128xf32>
      %176 = vector.shape_cast %175 : vector<1x1x1x128xf32> to vector<1x128xf32>
      %177 = arith.mulf %174, %176 : vector<1x128xf32>
      %cst_169 = arith.constant 1.000000e+00 : f32
      %178 = vector.broadcast %cst_169 : f32 to vector<1x128xf32>
      %179 = arith.subf %178, %174 : vector<1x128xf32>
      %180 = arith.mulf %179, %171 : vector<1x128xf32>
      %181 = arith.addf %177, %180 : vector<1x128xf32>
      %c14_170 = arith.constant 14 : index
      %c0_171 = arith.constant 0 : index
      %182 = vector.load %arg7[%c14_170, %c0_171] : memref<16x128xf32, #tpu.memory_space<vmem>>, vector<1x128xf32>
      tpu.vector_store %arg7[%c14_170, %c0_171], %181 {strides = array<i32>} : memref<16x128xf32, #tpu.memory_space<vmem>>, vector<1x128xf32>,
      %c0_172 = arith.constant 0 : index
      %c0_173 = arith.constant 0 : index
      %c15 = arith.constant 15 : index
      %c0_174 = arith.constant 0 : index
      %183 = vector.load %arg2[%c0_172, %c0_173, %c15, %c0_174] : memref<1x1x16x128xf32, #tpu.memory_space<vmem>>, vector<1x1x1x128xf32>
      %184 = vector.shape_cast %183 : vector<1x1x1x128xf32> to vector<1x128xf32>
      %c0_175 = arith.constant 0 : index
      %c0_176 = arith.constant 0 : index
      %c15_177 = arith.constant 15 : index
      %c0_178 = arith.constant 0 : index
      %185 = vector.load %arg4[%c0_175, %c0_176, %c15_177, %c0_178] : memref<1x1x16x128xf32, #tpu.memory_space<vmem>>, vector<1x1x1x128xf32>
      %186 = vector.shape_cast %185 : vector<1x1x1x128xf32> to vector<1x128xf32>
      %187 = arith.mulf %184, %186 : vector<1x128xf32>
      %cst_179 = arith.constant 1.000000e+00 : f32
      %188 = vector.broadcast %cst_179 : f32 to vector<1x128xf32>
      %189 = arith.subf %188, %184 : vector<1x128xf32>
      %190 = arith.mulf %189, %181 : vector<1x128xf32>
      %191 = arith.addf %187, %190 : vector<1x128xf32>
      %c15_180 = arith.constant 15 : index
      %c0_181 = arith.constant 0 : index
      %192 = vector.load %arg7[%c15_180, %c0_181] : memref<16x128xf32, #tpu.memory_space<vmem>>, vector<1x128xf32>
      tpu.vector_store %arg7[%c15_180, %c0_181], %191 {strides = array<i32>} : memref<16x128xf32, #tpu.memory_space<vmem>>, vector<1x128xf32>,
    } else {
    }
    %c5_i32 = arith.constant 5 : i32
    %18 = arith.cmpi eq, %arg1, %c5_i32 : i32
    %19 = arith.extui %18 : i1 to i32
    %c0_i32_7 = arith.constant 0 : i32
    %20 = arith.cmpi ne, %19, %c0_i32_7 : i32
    scf.if %20 {
      %c0_19 = arith.constant 0 : index
      %c0_20 = arith.constant 0 : index
      %c0_21 = arith.constant 0 : index
      %31 = vector.load %arg5[%c0_19, %c0_20, %c0_21] : memref<1x1x128xf32, #tpu.memory_space<vmem>>, vector<1x1x128xf32>
      %32 = vector.shape_cast %31 : vector<1x1x128xf32> to vector<1x128xf32>
      %33 = vector.shape_cast %32 : vector<1x128xf32> to vector<1x128xf32>
      %34 = vector.broadcast %33 : vector<1x128xf32> to vector<2x128xf32>
      %c0_22 = arith.constant 0 : index
      %c0_23 = arith.constant 0 : index
      %c14 = arith.constant 14 : index
      %c0_24 = arith.constant 0 : index
      %35 = vector.load %arg2[%c0_22, %c0_23, %c14, %c0_24] : memref<1x1x16x128xf32, #tpu.memory_space<vmem>>, vector<1x1x2x128xf32>
      %36 = vector.shape_cast %35 : vector<1x1x2x128xf32> to vector<2x128xf32>
      %c0_25 = arith.constant 0 : index
      %c0_26 = arith.constant 0 : index
      %c14_27 = arith.constant 14 : index
      %c0_28 = arith.constant 0 : index
      %37 = vector.load %arg4[%c0_25, %c0_26, %c14_27, %c0_28] : memref<1x1x16x128xf32, #tpu.memory_space<vmem>>, vector<1x1x2x128xf32>
      %38 = vector.shape_cast %37 : vector<1x1x2x128xf32> to vector<2x128xf32>
      %39 = arith.mulf %36, %38 : vector<2x128xf32>
      %cst = arith.constant 1.000000e+00 : f32
      %40 = vector.broadcast %cst : f32 to vector<2x128xf32>
      %41 = arith.subf %40, %36 : vector<2x128xf32>
      %42 = arith.mulf %41, %34 : vector<2x128xf32>
      %43 = arith.addf %39, %42 : vector<2x128xf32>
      %c14_29 = arith.constant 14 : index
      %c0_30 = arith.constant 0 : index
      %44 = vector.load %arg7[%c14_29, %c0_30] : memref<16x128xf32, #tpu.memory_space<vmem>>, vector<2x128xf32>
      tpu.vector_store %arg7[%c14_29, %c0_30], %43 {strides = array<i32>} : memref<16x128xf32, #tpu.memory_space<vmem>>, vector<2x128xf32>,
      %c0_31 = arith.constant 0 : index
      %c0_32 = arith.constant 0 : index
      %c12 = arith.constant 12 : index
      %c0_33 = arith.constant 0 : index
      %45 = vector.load %arg2[%c0_31, %c0_32, %c12, %c0_33] : memref<1x1x16x128xf32, #tpu.memory_space<vmem>>, vector<1x1x2x128xf32>
      %46 = vector.shape_cast %45 : vector<1x1x2x128xf32> to vector<2x128xf32>
      %c0_34 = arith.constant 0 : index
      %c0_35 = arith.constant 0 : index
      %c12_36 = arith.constant 12 : index
      %c0_37 = arith.constant 0 : index
      %47 = vector.load %arg4[%c0_34, %c0_35, %c12_36, %c0_37] : memref<1x1x16x128xf32, #tpu.memory_space<vmem>>, vector<1x1x2x128xf32>
      %48 = vector.shape_cast %47 : vector<1x1x2x128xf32> to vector<2x128xf32>
      %49 = arith.mulf %46, %48 : vector<2x128xf32>
      %cst_38 = arith.constant 1.000000e+00 : f32
      %50 = vector.broadcast %cst_38 : f32 to vector<2x128xf32>
      %51 = arith.subf %50, %46 : vector<2x128xf32>
      %52 = arith.mulf %51, %43 : vector<2x128xf32>
      %53 = arith.addf %49, %52 : vector<2x128xf32>
      %c12_39 = arith.constant 12 : index
      %c0_40 = arith.constant 0 : index
      %54 = vector.load %arg7[%c12_39, %c0_40] : memref<16x128xf32, #tpu.memory_space<vmem>>, vector<2x128xf32>
      tpu.vector_store %arg7[%c12_39, %c0_40], %53 {strides = array<i32>} : memref<16x128xf32, #tpu.memory_space<vmem>>, vector<2x128xf32>,
      %c0_41 = arith.constant 0 : index
      %c0_42 = arith.constant 0 : index
      %c10 = arith.constant 10 : index
      %c0_43 = arith.constant 0 : index
      %55 = vector.load %arg2[%c0_41, %c0_42, %c10, %c0_43] : memref<1x1x16x128xf32, #tpu.memory_space<vmem>>, vector<1x1x2x128xf32>
      %56 = vector.shape_cast %55 : vector<1x1x2x128xf32> to vector<2x128xf32>
      %c0_44 = arith.constant 0 : index
      %c0_45 = arith.constant 0 : index
      %c10_46 = arith.constant 10 : index
      %c0_47 = arith.constant 0 : index
      %57 = vector.load %arg4[%c0_44, %c0_45, %c10_46, %c0_47] : memref<1x1x16x128xf32, #tpu.memory_space<vmem>>, vector<1x1x2x128xf32>
      %58 = vector.shape_cast %57 : vector<1x1x2x128xf32> to vector<2x128xf32>
      %59 = arith.mulf %56, %58 : vector<2x128xf32>
      %cst_48 = arith.constant 1.000000e+00 : f32
      %60 = vector.broadcast %cst_48 : f32 to vector<2x128xf32>
      %61 = arith.subf %60, %56 : vector<2x128xf32>
      %62 = arith.mulf %61, %53 : vector<2x128xf32>
      %63 = arith.addf %59, %62 : vector<2x128xf32>
      %c10_49 = arith.constant 10 : index
      %c0_50 = arith.constant 0 : index
      %64 = vector.load %arg7[%c10_49, %c0_50] : memref<16x128xf32, #tpu.memory_space<vmem>>, vector<2x128xf32>
      tpu.vector_store %arg7[%c10_49, %c0_50], %63 {strides = array<i32>} : memref<16x128xf32, #tpu.memory_space<vmem>>, vector<2x128xf32>,
      %c0_51 = arith.constant 0 : index
      %c0_52 = arith.constant 0 : index
      %c8 = arith.constant 8 : index
      %c0_53 = arith.constant 0 : index
      %65 = vector.load %arg2[%c0_51, %c0_52, %c8, %c0_53] : memref<1x1x16x128xf32, #tpu.memory_space<vmem>>, vector<1x1x2x128xf32>
      %66 = vector.shape_cast %65 : vector<1x1x2x128xf32> to vector<2x128xf32>
      %c0_54 = arith.constant 0 : index
      %c0_55 = arith.constant 0 : index
      %c8_56 = arith.constant 8 : index
      %c0_57 = arith.constant 0 : index
      %67 = vector.load %arg4[%c0_54, %c0_55, %c8_56, %c0_57] : memref<1x1x16x128xf32, #tpu.memory_space<vmem>>, vector<1x1x2x128xf32>
      %68 = vector.shape_cast %67 : vector<1x1x2x128xf32> to vector<2x128xf32>
      %69 = arith.mulf %66, %68 : vector<2x128xf32>
      %cst_58 = arith.constant 1.000000e+00 : f32
      %70 = vector.broadcast %cst_58 : f32 to vector<2x128xf32>
      %71 = arith.subf %70, %66 : vector<2x128xf32>
      %72 = arith.mulf %71, %63 : vector<2x128xf32>
      %73 = arith.addf %69, %72 : vector<2x128xf32>
      %c8_59 = arith.constant 8 : index
      %c0_60 = arith.constant 0 : index
      %74 = vector.load %arg7[%c8_59, %c0_60] : memref<16x128xf32, #tpu.memory_space<vmem>>, vector<2x128xf32>
      tpu.vector_store %arg7[%c8_59, %c0_60], %73 {strides = array<i32>} : memref<16x128xf32, #tpu.memory_space<vmem>>, vector<2x128xf32>,
      %c0_61 = arith.constant 0 : index
      %c0_62 = arith.constant 0 : index
      %c6 = arith.constant 6 : index
      %c0_63 = arith.constant 0 : index
      %75 = vector.load %arg2[%c0_61, %c0_62, %c6, %c0_63] : memref<1x1x16x128xf32, #tpu.memory_space<vmem>>, vector<1x1x2x128xf32>
      %76 = vector.shape_cast %75 : vector<1x1x2x128xf32> to vector<2x128xf32>
      %c0_64 = arith.constant 0 : index
      %c0_65 = arith.constant 0 : index
      %c6_66 = arith.constant 6 : index
      %c0_67 = arith.constant 0 : index
      %77 = vector.load %arg4[%c0_64, %c0_65, %c6_66, %c0_67] : memref<1x1x16x128xf32, #tpu.memory_space<vmem>>, vector<1x1x2x128xf32>
      %78 = vector.shape_cast %77 : vector<1x1x2x128xf32> to vector<2x128xf32>
      %79 = arith.mulf %76, %78 : vector<2x128xf32>
      %cst_68 = arith.constant 1.000000e+00 : f32
      %80 = vector.broadcast %cst_68 : f32 to vector<2x128xf32>
      %81 = arith.subf %80, %76 : vector<2x128xf32>
      %82 = arith.mulf %81, %73 : vector<2x128xf32>
      %83 = arith.addf %79, %82 : vector<2x128xf32>
      %c6_69 = arith.constant 6 : index
      %c0_70 = arith.constant 0 : index
      %84 = vector.load %arg7[%c6_69, %c0_70] : memref<16x128xf32, #tpu.memory_space<vmem>>, vector<2x128xf32>
      tpu.vector_store %arg7[%c6_69, %c0_70], %83 {strides = array<i32>} : memref<16x128xf32, #tpu.memory_space<vmem>>, vector<2x128xf32>,
      %c0_71 = arith.constant 0 : index
      %c0_72 = arith.constant 0 : index
      %c4 = arith.constant 4 : index
      %c0_73 = arith.constant 0 : index
      %85 = vector.load %arg2[%c0_71, %c0_72, %c4, %c0_73] : memref<1x1x16x128xf32, #tpu.memory_space<vmem>>, vector<1x1x2x128xf32>
      %86 = vector.shape_cast %85 : vector<1x1x2x128xf32> to vector<2x128xf32>
      %c0_74 = arith.constant 0 : index
      %c0_75 = arith.constant 0 : index
      %c4_76 = arith.constant 4 : index
      %c0_77 = arith.constant 0 : index
      %87 = vector.load %arg4[%c0_74, %c0_75, %c4_76, %c0_77] : memref<1x1x16x128xf32, #tpu.memory_space<vmem>>, vector<1x1x2x128xf32>
      %88 = vector.shape_cast %87 : vector<1x1x2x128xf32> to vector<2x128xf32>
      %89 = arith.mulf %86, %88 : vector<2x128xf32>
      %cst_78 = arith.constant 1.000000e+00 : f32
      %90 = vector.broadcast %cst_78 : f32 to vector<2x128xf32>
      %91 = arith.subf %90, %86 : vector<2x128xf32>
      %92 = arith.mulf %91, %83 : vector<2x128xf32>
      %93 = arith.addf %89, %92 : vector<2x128xf32>
      %c4_79 = arith.constant 4 : index
      %c0_80 = arith.constant 0 : index
      %94 = vector.load %arg7[%c4_79, %c0_80] : memref<16x128xf32, #tpu.memory_space<vmem>>, vector<2x128xf32>
      tpu.vector_store %arg7[%c4_79, %c0_80], %93 {strides = array<i32>} : memref<16x128xf32, #tpu.memory_space<vmem>>, vector<2x128xf32>,
      %c0_81 = arith.constant 0 : index
      %c0_82 = arith.constant 0 : index
      %c2 = arith.constant 2 : index
      %c0_83 = arith.constant 0 : index
      %95 = vector.load %arg2[%c0_81, %c0_82, %c2, %c0_83] : memref<1x1x16x128xf32, #tpu.memory_space<vmem>>, vector<1x1x2x128xf32>
      %96 = vector.shape_cast %95 : vector<1x1x2x128xf32> to vector<2x128xf32>
      %c0_84 = arith.constant 0 : index
      %c0_85 = arith.constant 0 : index
      %c2_86 = arith.constant 2 : index
      %c0_87 = arith.constant 0 : index
      %97 = vector.load %arg4[%c0_84, %c0_85, %c2_86, %c0_87] : memref<1x1x16x128xf32, #tpu.memory_space<vmem>>, vector<1x1x2x128xf32>
      %98 = vector.shape_cast %97 : vector<1x1x2x128xf32> to vector<2x128xf32>
      %99 = arith.mulf %96, %98 : vector<2x128xf32>
      %cst_88 = arith.constant 1.000000e+00 : f32
      %100 = vector.broadcast %cst_88 : f32 to vector<2x128xf32>
      %101 = arith.subf %100, %96 : vector<2x128xf32>
      %102 = arith.mulf %101, %93 : vector<2x128xf32>
      %103 = arith.addf %99, %102 : vector<2x128xf32>
      %c2_89 = arith.constant 2 : index
      %c0_90 = arith.constant 0 : index
      %104 = vector.load %arg7[%c2_89, %c0_90] : memref<16x128xf32, #tpu.memory_space<vmem>>, vector<2x128xf32>
      tpu.vector_store %arg7[%c2_89, %c0_90], %103 {strides = array<i32>} : memref<16x128xf32, #tpu.memory_space<vmem>>, vector<2x128xf32>,
      %c0_91 = arith.constant 0 : index
      %c0_92 = arith.constant 0 : index
      %c0_93 = arith.constant 0 : index
      %c0_94 = arith.constant 0 : index
      %105 = vector.load %arg2[%c0_91, %c0_92, %c0_93, %c0_94] : memref<1x1x16x128xf32, #tpu.memory_space<vmem>>, vector<1x1x2x128xf32>
      %106 = vector.shape_cast %105 : vector<1x1x2x128xf32> to vector<2x128xf32>
      %c0_95 = arith.constant 0 : index
      %c0_96 = arith.constant 0 : index
      %c0_97 = arith.constant 0 : index
      %c0_98 = arith.constant 0 : index
      %107 = vector.load %arg4[%c0_95, %c0_96, %c0_97, %c0_98] : memref<1x1x16x128xf32, #tpu.memory_space<vmem>>, vector<1x1x2x128xf32>
      %108 = vector.shape_cast %107 : vector<1x1x2x128xf32> to vector<2x128xf32>
      %109 = arith.mulf %106, %108 : vector<2x128xf32>
      %cst_99 = arith.constant 1.000000e+00 : f32
      %110 = vector.broadcast %cst_99 : f32 to vector<2x128xf32>
      %111 = arith.subf %110, %106 : vector<2x128xf32>
      %112 = arith.mulf %111, %103 : vector<2x128xf32>
      %113 = arith.addf %109, %112 : vector<2x128xf32>
      %c0_100 = arith.constant 0 : index
      %c0_101 = arith.constant 0 : index
      %114 = vector.load %arg7[%c0_100, %c0_101] : memref<16x128xf32, #tpu.memory_space<vmem>>, vector<2x128xf32>
      tpu.vector_store %arg7[%c0_100, %c0_101], %113 {strides = array<i32>} : memref<16x128xf32, #tpu.memory_space<vmem>>, vector<2x128xf32>,
    } else {
    }
    %c0 = arith.constant 0 : index
    %c0_8 = arith.constant 0 : index
    %c0_9 = arith.constant 0 : index
    %21 = vector.load %arg6[%c0, %c0_8, %c0_9] : memref<1x16x128xf32, #tpu.memory_space<vmem>>, vector<1x16x128xf32>
    %22 = vector.shape_cast %21 : vector<1x16x128xf32> to vector<16x128xf32>
    %c0_10 = arith.constant 0 : index
    %c0_11 = arith.constant 0 : index
    %23 = vector.load %arg7[%c0_10, %c0_11] : memref<16x128xf32, #tpu.memory_space<vmem>>, vector<16x128xf32>
    %c0_12 = arith.constant 0 : index
    %c0_13 = arith.constant 0 : index
    %c0_14 = arith.constant 0 : index
    %c0_15 = arith.constant 0 : index
    %24 = vector.load %arg3[%c0_12, %c0_13, %c0_14, %c0_15] : memref<1x1x16x128xf32, #tpu.memory_space<vmem>>, vector<1x1x16x128xf32>
    %25 = vector.shape_cast %24 : vector<1x1x16x128xf32> to vector<16x128xf32>
    %26 = arith.mulf %23, %25 : vector<16x128xf32>
    %27 = arith.addf %22, %26 : vector<16x128xf32>
    %c0_16 = arith.constant 0 : index
    %c0_17 = arith.constant 0 : index
    %c0_18 = arith.constant 0 : index
    %28 = vector.load %arg6[%c0_16, %c0_17, %c0_18] : memref<1x16x128xf32, #tpu.memory_space<vmem>>, vector<1x16x128xf32>
    %29 = vector.shape_cast %28 : vector<1x16x128xf32> to vector<16x128xf32>
    %30 = vector.shape_cast %27 : vector<16x128xf32> to vector<1x16x128xf32>
    tpu.vector_store %arg6[%c0_16, %c0_17, %c0_18], %30 {strides = array<i32>} : memref<1x16x128xf32, #tpu.memory_space<vmem>>, vector<1x16x128xf32>,
    return
  }
  func.func @transform_0(%arg0: i32, %arg1: i32) -> (i32, i32, i32, i32) {
    %c0_i32 = arith.constant 0 : i32
    %c0_i32_0 = arith.constant 0 : i32
    %c0_i32_1 = arith.constant 0 : i32
    return %arg1, %arg0, %c0_i32, %c0_i32_0 : i32, i32, i32, i32
  }
  func.func @transform_1(%arg0: i32, %arg1: i32) -> (i32, i32, i32, i32) {
    %c0_i32 = arith.constant 0 : i32
    %c0_i32_0 = arith.constant 0 : i32
    %c0_i32_1 = arith.constant 0 : i32
    return %arg1, %arg0, %c0_i32, %c0_i32_0 : i32, i32, i32, i32
  }
  func.func @transform_2(%arg0: i32, %arg1: i32) -> (i32, i32, i32, i32) {
    %c0_i32 = arith.constant 0 : i32
    %c0_i32_0 = arith.constant 0 : i32
    %c0_i32_1 = arith.constant 0 : i32
    return %arg1, %arg0, %c0_i32, %c0_i32_0 : i32, i32, i32, i32
  }
  func.func @transform_3(%arg0: i32, %arg1: i32) -> (i32, i32, i32) {
    %c0_i32 = arith.constant 0 : i32
    %c0_i32_0 = arith.constant 0 : i32
    %c0_i32_1 = arith.constant 0 : i32
    return %arg1, %c0_i32, %c0_i32_0 : i32, i32, i32
  }
  func.func @transform_4(%arg0: i32, %arg1: i32) -> (i32, i32, i32) {
    %c0_i32 = arith.constant 0 : i32
    %c0_i32_0 = arith.constant 0 : i32
    %c0_i32_1 = arith.constant 0 : i32
    return %arg0, %c0_i32, %c0_i32_0 : i32, i32, i32
  }
}

</mosaic_0001>

<bundles_post_ra>
// kernel: gru_conv2d_forward.3
= control target key start
LH: loop header
LB: loop body
LE: loop exit
PB: predicated region body
PF: predicated region fallthrough
CT: control target
= control target key end

     0   :  { %s1009_s12 = smov 0   ;;  %s1011_s13 = smov 0   ;;  %s1349_s0 = inlined_call_operand.vmem [shape: f32[2,256,128], index: 0, kind: input, shape index: {}]   ;;  %s1350_s1 = inlined_call_operand.vmem [shape: f32[128,256], index: 1, kind: input, shape index: {}]   ;;  %s1351_s2 = inlined_call_operand.vmem [shape: f32[1,256], index: 2, kind: input, shape index: {}]   ;;  %s1352_s3 = inlined_call_operand.vmem [shape: f32[2,256,256], index: 3, kind: output, shape index: {}]  }
   0x1   :  { %s1013_s14 = smov 0  }
   0x2 LB: > { %s25_s15 = sadd.s32 1, %s982_s13  ;;  %p834_p0 = scmp.ge.s32.totalorder %s986_s14, 1  ;;  %s986_s14 = sphi %s1013_s14, %s13_s14   ;;  %s982_s13 = sphi %s1011_s13, %s1354_s13   ;;  %s978_s12 = sphi %s1009_s12, %s1353_s12  }
   0x3   : > { %p27_p1 = scmp.ge.s32.totalorder %s25_s15, 2  ;;  %p158_p2 = scmp.lt.s32.totalorder %s986_s14, 3 }
   0x5   : > { %s1356_s15 = smov (%p27_p1, %s25_s15), 0  ;;  %p159_p3 = pnand %p834_p0, %p158_p2 }
   0x6   : > { %p192_p4 = scmp.lt.s32.totalorder (!%p159_p3), %s978_s12, 1 }
   0x7   : > { %162 = sbr.rel (%p159_p3) target bundleno = 323 (0x143), region = 32 }
   0xc   : > { %v275_v0 = vld [vmem:[%s1350_s1 + $0xf8] sm:$0xff]  ;;  %v274_v1 = vld [vmem:[%s1350_s1 + $0xf0] sm:$0xff]  ;;  %v273_v2 = vld [vmem:[%s1350_s1 + $0xe8] sm:$0xff]  ;;  %s1358_s12 = smov (!%p192_p4, %s978_s12), 1  ;;  %v988_v34 = vmov 0.0  }
   0xd   : > { %288 = vmatprep.subr.mxu0 %v275_v0  ;;  %843 = vmatprep.subr.mxu1 %v275_v0  ;;  %v272_v3 = vld [vmem:[%s1350_s1 + $0xe0] sm:$0xff]  ;;  %v271_v4 = vld [vmem:[%s1350_s1 + $0xd8] sm:$0xff]  ;;  %v270_v5 = vld [vmem:[%s1350_s1 + $0xd0] sm:$0xff]  ;;  %s841_s26 = sshll.u32 %s1358_s12, 8  ;;  %s842_s17 = sshll.u32 %s1358_s12, 9 }
   0xe   : > { %289 = vmatpush1.msra.mxu0 %v274_v1  ;;  %859 = vmatpush1.msra.mxu1 %v274_v1  ;;  %v269_v6 = vld [vmem:[%s1350_s1 + $0xc8] sm:$0xff]  ;;  %v268_v7 = vld [vmem:[%s1350_s1 + $0xc0] sm:$0xff]  ;;  %v267_v8 = vld [vmem:[%s1350_s1 + $0xb8] sm:$0xff]  ;;  %s1130_s8 = scalar_lea.vmem %s1349_s0, %s841_s26  ;;  %v278_v1 = vlaneseq  ;;  %s1212_s20 = scalar_lea.vmem %s1352_s3, %s842_s17 }
   0xf   : > { %290 = vmatprep.subr.mxu0 %v273_v2  ;;  %844 = vmatprep.subr.mxu1 %v273_v2  ;;  %v266_v9 = vld [vmem:[%s1350_s1 + $0xb0] sm:$0xff]  ;;  %v265_v10 = vld [vmem:[%s1350_s1 + $0xa8] sm:$0xff]  ;;  %v264_v11 = vld [vmem:[%s1350_s1 + $0xa0] sm:$0xff] }
  0x10   : > { %291 = vmatpush1.msra.mxu0 %v272_v3  ;;  %860 = vmatpush1.msra.mxu1 %v272_v3  ;;  %v263_v12 = vld [vmem:[%s1350_s1 + $0x98] sm:$0xff]  ;;  %v262_v13 = vld [vmem:[%s1350_s1 + $0x90] sm:$0xff]  ;;  %v261_v14 = vld [vmem:[%s1350_s1 + $0x88] sm:$0xff]  ;;  %v279_v2 = vshrl.u32 %v278_v1, 7 }
  0x11   : > { %292 = vmatprep.subr.mxu0 %v271_v4  ;;  %845 = vmatprep.subr.mxu1 %v271_v4  ;;  %v260_v15 = vld [vmem:[%s1350_s1 + $0x80] sm:$0xff]  ;;  %v259_v16 = vld [vmem:[%s1350_s1 + $0x78] sm:$0xff]  ;;  %v258_v17 = vld [vmem:[%s1350_s1 + $0x70] sm:$0xff] }
  0x12   : > { %293 = vmatpush1.msra.mxu0 %v270_v5  ;;  %861 = vmatpush1.msra.mxu1 %v270_v5  ;;  %v257_v18 = vld [vmem:[%s1350_s1 + $0x68] sm:$0xff]  ;;  %v256_v19 = vld [vmem:[%s1350_s1 + $0x60] sm:$0xff]  ;;  %v255_v20 = vld [vmem:[%s1350_s1 + $0x58] sm:$0xff]  ;;  %v280_v3 = vsub.s32 0, %v279_v2  ;;  %v284_v5 = vsub.s32 1, %v279_v2 }
  0x13   : > { %294 = vmatprep.subr.mxu0 %v269_v6  ;;  %846 = vmatprep.subr.mxu1 %v269_v6  ;;  %v254_v21 = vld [vmem:[%s1350_s1 + $0x50] sm:$0xff]  ;;  %v253_v22 = vld [vmem:[%s1350_s1 + $0x48] sm:$0xff]  ;;  %v252_v23 = vld [vmem:[%s1350_s1 + $0x40] sm:$0xff] }
  0x14   : > { %295 = vmatpush1.msra.mxu0 %v268_v7  ;;  %862 = vmatpush1.msra.mxu1 %v268_v7  ;;  %v251_v24 = vld [vmem:[%s1350_s1 + $0x38] sm:$0xff]  ;;  %v250_v25 = vld [vmem:[%s1350_s1 + $0x30] sm:$0xff]  ;;  %v249_v26 = vld [vmem:[%s1350_s1 + $0x28] sm:$0xff] }
  0x15   : > { %296 = vmatprep.subr.mxu0 %v267_v8  ;;  %847 = vmatprep.subr.mxu1 %v267_v8  ;;  %v248_v27 = vld [vmem:[%s1350_s1 + $0x20] sm:$0xff]  ;;  %v247_v28 = vld [vmem:[%s1350_s1 + $0x18] sm:$0xff]  ;;  %v246_v29 = vld [vmem:[%s1350_s1 + $0x10] sm:$0xff] }
  0x16   : > { %297 = vmatpush1.msra.mxu0 %v266_v9  ;;  %863 = vmatpush1.msra.mxu1 %v266_v9  ;;  %v245_v30 = vld [vmem:[%s1350_s1 + $0x8] sm:$0xff]  ;;  %v244_v31 = vld [vmem:[%s1350_s1] sm:$0xff]  ;;  %v214_v37 = vld [vmem:[%s1130_s8 + $0x10] sm:$0xff] }
  0x17   : > { %298 = vmatprep.subr.mxu0 %v265_v10  ;;  %848 = vmatprep.subr.mxu1 %v265_v10  ;;  %v212_v32 = vld [vmem:[%s1130_s8] sm:$0xff]  ;;  %v213_v35 = vld [vmem:[%s1130_s8 + $0x8] sm:$0xff]  ;;  %v230_v38 = vld [vmem:[%s1130_s8 + $0x90] sm:$0xff] }
  0x18   : > { %299 = vmatpush1.msra.mxu0 %v264_v11  ;;  %864 = vmatpush1.msra.mxu1 %v264_v11  ;;  %v228_v33 = vld [vmem:[%s1130_s8 + $0x80] sm:$0xff]  ;;  %v229_v36 = vld [vmem:[%s1130_s8 + $0x88] sm:$0xff]  ;;  %v215_v39 = vld [vmem:[%s1130_s8 + $0x18] sm:$0xff] }
  0x19   : > { %300 = vmatprep.subr.mxu0 %v263_v12  ;;  %849 = vmatprep.subr.mxu1 %v263_v12  ;;  %v231_v40 = vld [vmem:[%s1130_s8 + $0x98] sm:$0xff]  ;;  %v216_v41 = vld [vmem:[%s1130_s8 + $0x20] sm:$0xff]  ;;  %v217_v43 = vld [vmem:[%s1130_s8 + $0x28] sm:$0xff] }
  0x1a   : > { %301 = vmatpush1.msra.mxu0 %v262_v13  ;;  %865 = vmatpush1.msra.mxu1 %v262_v13  ;;  %v232_v42 = vld [vmem:[%s1130_s8 + $0xa0] sm:$0xff]  ;;  %v233_v44 = vld [vmem:[%s1130_s8 + $0xa8] sm:$0xff]  ;;  %v218_v45 = vld [vmem:[%s1130_s8 + $0x30] sm:$0xff] }
  0x1b   : > { %302 = vmatprep.subr.mxu0 %v261_v14  ;;  %850 = vmatprep.subr.mxu1 %v261_v14  ;;  %v234_v46 = vld [vmem:[%s1130_s8 + $0xb0] sm:$0xff]  ;;  %v219_v47 = vld [vmem:[%s1130_s8 + $0x38] sm:$0xff]  ;;  %v220_v49 = vld [vmem:[%s1130_s8 + $0x40] sm:$0xff] }
  0x1c   : > { %303 = vmatpush1.msra.mxu0 %v260_v15  ;;  %866 = vmatpush1.msra.mxu1 %v260_v15  ;;  %v235_v48 = vld [vmem:[%s1130_s8 + $0xb8] sm:$0xff]  ;;  %v236_v50 = vld [vmem:[%s1130_s8 + $0xc0] sm:$0xff]  ;;  %v221_v51 = vld [vmem:[%s1130_s8 + $0x48] sm:$0xff] }
  0x1d   : > { %304 = vmatprep.subr.mxu0 %v259_v16  ;;  %851 = vmatprep.subr.mxu1 %v259_v16  ;;  %v237_v52 = vld [vmem:[%s1130_s8 + $0xc8] sm:$0xff]  ;;  %v222_v53 = vld [vmem:[%s1130_s8 + $0x50] sm:$0xff]  ;;  %v223_v55 = vld [vmem:[%s1130_s8 + $0x58] sm:$0xff] }
  0x1e   : > { %305 = vmatpush1.msra.mxu0 %v258_v17  ;;  %867 = vmatpush1.msra.mxu1 %v258_v17  ;;  %v238_v54 = vld [vmem:[%s1130_s8 + $0xd0] sm:$0xff]  ;;  %v239_v56 = vld [vmem:[%s1130_s8 + $0xd8] sm:$0xff]  ;;  %v224_v57 = vld [vmem:[%s1130_s8 + $0x60] sm:$0xff] }
  0x1f   : > { %306 = vmatprep.subr.mxu0 %v257_v18  ;;  %852 = vmatprep.subr.mxu1 %v257_v18  ;;  %v240_v58 = vld [vmem:[%s1130_s8 + $0xe0] sm:$0xff]  ;;  %v225_v59 = vld [vmem:[%s1130_s8 + $0x68] sm:$0xff]  ;;  %v226_v61 = vld [vmem:[%s1130_s8 + $0x70] sm:$0xff] }
  0x20   : > { %307 = vmatpush1.msra.mxu0 %v256_v19  ;;  %868 = vmatpush1.msra.mxu1 %v256_v19  ;;  %v241_v60 = vld [vmem:[%s1130_s8 + $0xe8] sm:$0xff]  ;;  %v242_v62 = vld [vmem:[%s1130_s8 + $0xf0] sm:$0xff]  ;;  %v227_v63 = vld [vmem:[%s1130_s8 + $0x78] sm:$0xff] }
  0x21   : > { %308 = vmatprep.subr.mxu0 %v255_v20  ;;  %853 = vmatprep.subr.mxu1 %v255_v20  ;;  %v243_v0 = vld [vmem:[%s1130_s8 + $0xf8] sm:$0xff]  ;;  %v276_v4 = vld [vmem:[%s1351_s2] sm:$0x3] }
  0x22   : > { %309 = vmatpush1.msra.mxu0 %v254_v21  ;;  %869 = vmatpush1.msra.mxu1 %v254_v21  ;;  %v1202_v6 = vrot.slane %v276_v4, %v280_v3  ;;  %v1205_v7 = vrot.slane %v276_v4, %v284_v5 }
  0x23   : > { %310 = vmatprep.subr.mxu0 %v253_v22  ;;  %854 = vmatprep.subr.mxu1 %v253_v22 }
  0x24   : > { %311 = vmatpush1.msra.mxu0 %v252_v23  ;;  %870 = vmatpush1.msra.mxu1 %v252_v23 }
  0x25   : > { %312 = vmatprep.subr.mxu0 %v251_v24  ;;  %855 = vmatprep.subr.mxu1 %v251_v24 }
  0x26   : > { %313 = vmatpush1.msra.mxu0 %v250_v25  ;;  %871 = vmatpush1.msra.mxu1 %v250_v25 }
  0x27   : > { %314 = vmatprep.subr.mxu0 %v249_v26  ;;  %856 = vmatprep.subr.mxu1 %v249_v26 }
  0x28   : > { %315 = vmatpush1.msra.mxu0 %v248_v27  ;;  %872 = vmatpush1.msra.mxu1 %v248_v27 }
  0x29   : > { %316 = vmatprep.subr.mxu0 %v247_v28  ;;  %857 = vmatprep.subr.mxu1 %v247_v28 }
  0x2a   : > { %317 = vmatpush1.msra.mxu0 %v246_v29  ;;  %873 = vmatpush1.msra.mxu1 %v246_v29 }
  0x2b   : > { %318 = vmatprep.subr.mxu0 %v245_v30  ;;  %858 = vmatprep.subr.mxu1 %v245_v30 }
  0x2c   : > { %319 = vmatpush1.msra.mxu0 %v244_v31  ;;  %874 = vmatpush1.msra.mxu1 %v244_v31 }
  0x2d   : > { %352 = vmatprep.mubr.f32.mxu0 %v988_v34  ;;  %448 = vmatprep.mubr.f32.mxu1 %v988_v34 }
  0x2e   : > { %353 = vmatmul.mubr.f32.vlgmr.msra.gmra.mxu0 %v212_v32  ;;  %449 = vmatmul.mubr.f32.vlgmr.msra.gmra.mxu1 %v228_v33 }
  0x2f   : > { %358 = vmatprep.mubr.f32.mxu0 %v988_v34  ;;  %454 = vmatprep.mubr.f32.mxu1 %v988_v34 }
  0x32   : > { %359 = vmatmul.mubr.f32.gmra.mxu0 %v213_v35  ;;  %455 = vmatmul.mubr.f32.gmra.mxu1 %v229_v36 }
  0x33   : > { %364 = vmatprep.mubr.f32.mxu0 %v988_v34  ;;  %460 = vmatprep.mubr.f32.mxu1 %v988_v34 }
  0x36   : > { %365 = vmatmul.mubr.f32.gmra.mxu0 %v214_v37  ;;  %461 = vmatmul.mubr.f32.gmra.mxu1 %v230_v38 }
  0x37   : > { %370 = vmatprep.mubr.f32.mxu0 %v988_v34  ;;  %466 = vmatprep.mubr.f32.mxu1 %v988_v34 }
  0x3a   : > { %371 = vmatmul.mubr.f32.gmra.mxu0 %v215_v39  ;;  %467 = vmatmul.mubr.f32.gmra.mxu1 %v231_v40 }
  0x3b   : > { %376 = vmatprep.mubr.f32.mxu0 %v988_v34  ;;  %472 = vmatprep.mubr.f32.mxu1 %v988_v34 }
  0x3e   : > { %377 = vmatmul.mubr.f32.gmra.mxu0 %v216_v41  ;;  %473 = vmatmul.mubr.f32.gmra.mxu1 %v232_v42 }
  0x3f   : > { %382 = vmatprep.mubr.f32.mxu0 %v988_v34  ;;  %478 = vmatprep.mubr.f32.mxu1 %v988_v34 }
  0x42   : > { %383 = vmatmul.mubr.f32.gmra.mxu0 %v217_v43  ;;  %479 = vmatmul.mubr.f32.gmra.mxu1 %v233_v44 }
  0x43   : > { %388 = vmatprep.mubr.f32.mxu0 %v988_v34  ;;  %484 = vmatprep.mubr.f32.mxu1 %v988_v34 }
  0x46   : > { %389 = vmatmul.mubr.f32.gmra.mxu0 %v218_v45  ;;  %485 = vmatmul.mubr.f32.gmra.mxu1 %v234_v46 }
  0x47   : > { %394 = vmatprep.mubr.f32.mxu0 %v988_v34  ;;  %490 = vmatprep.mubr.f32.mxu1 %v988_v34 }
  0x4a   : > { %395 = vmatmul.mubr.f32.gmra.mxu0 %v219_v47  ;;  %491 = vmatmul.mubr.f32.gmra.mxu1 %v235_v48 }
  0x4b   : > { %400 = vmatprep.mubr.f32.mxu0 %v988_v34  ;;  %496 = vmatprep.mubr.f32.mxu1 %v988_v34 }
  0x4e   : > { %401 = vmatmul.mubr.f32.gmra.mxu0 %v220_v49  ;;  %497 = vmatmul.mubr.f32.gmra.mxu1 %v236_v50 }
  0x4f   : > { %406 = vmatprep.mubr.f32.mxu0 %v988_v34  ;;  %502 = vmatprep.mubr.f32.mxu1 %v988_v34 }
  0x52   : > { %407 = vmatmul.mubr.f32.gmra.mxu0 %v221_v51  ;;  %503 = vmatmul.mubr.f32.gmra.mxu1 %v237_v52 }
  0x53   : > { %412 = vmatprep.mubr.f32.mxu0 %v988_v34  ;;  %508 = vmatprep.mubr.f32.mxu1 %v988_v34 }
  0x56   : > { %413 = vmatmul.mubr.f32.gmra.mxu0 %v222_v53  ;;  %509 = vmatmul.mubr.f32.gmra.mxu1 %v238_v54 }
  0x57   : > { %418 = vmatprep.mubr.f32.mxu0 %v988_v34  ;;  %514 = vmatprep.mubr.f32.mxu1 %v988_v34 }
  0x5a   : > { %419 = vmatmul.mubr.f32.gmra.mxu0 %v223_v55  ;;  %515 = vmatmul.mubr.f32.gmra.mxu1 %v239_v56 }
  0x5b   : > { %424 = vmatprep.mubr.f32.mxu0 %v988_v34  ;;  %520 = vmatprep.mubr.f32.mxu1 %v988_v34 }
  0x5e   : > { %425 = vmatmul.mubr.f32.gmra.mxu0 %v224_v57  ;;  %521 = vmatmul.mubr.f32.gmra.mxu1 %v240_v58 }
  0x5f   : > { %430 = vmatprep.mubr.f32.mxu0 %v988_v34  ;;  %526 = vmatprep.mubr.f32.mxu1 %v988_v34 }
  0x62   : > { %431 = vmatmul.mubr.f32.gmra.mxu0 %v225_v59  ;;  %527 = vmatmul.mubr.f32.gmra.mxu1 %v241_v60 }
  0x63   : > { %436 = vmatprep.mubr.f32.mxu0 %v988_v34  ;;  %532 = vmatprep.mubr.f32.mxu1 %v988_v34 }
  0x66   : > { %437 = vmatmul.mubr.f32.gmra.mxu0 %v226_v61  ;;  %533 = vmatmul.mubr.f32.gmra.mxu1 %v242_v62 }
  0x67   : > { %442 = vmatprep.mubr.f32.mxu0 %v988_v34  ;;  %538 = vmatprep.mubr.f32.mxu1 %v988_v34 }
  0x6a   : > { %443 = vmatmul.mubr.f32.gmra.mxu0 %v227_v63  ;;  %539 = vmatmul.mubr.f32.gmra.mxu1 %v243_v0 }
  0xee   : > { %v354_v8 = vpop.f32.mrf.mxu0  ;;  %v450_v9 = vpop.f32.mrf.mxu1 }
  0xef   : > { %v355_v10 = vadd.f32 %v354_v8, %v1202_v6  ;;  %v451_v11 = vadd.f32 %v450_v9, %v1202_v6 }
  0xf0   : > { %v356_v12 = vpop.f32.mrf.mxu0  ;;  %v452_v13 = vpop.f32.mrf.mxu1 }
  0xf1   : > { %v545_v14 = vmul.f32 0.5, %v355_v10  ;;  %v561_v15 = vmul.f32 0.5, %v451_v11  ;;  %v357_v16 = vadd.f32 %v356_v12, %v1205_v7  ;;  %v453_v17 = vadd.f32 %v452_v13, %v1205_v7 }
  0xf2   : > { %v360_v18 = vpop.f32.mrf.mxu0  ;;  %v456_v19 = vpop.f32.mrf.mxu1 }
  0xf3   : > { %900 = vtanh.f32 %v545_v14  ;;  %705 = vst [vmem:[%s1212_s20 + $0x8] sm:$0xff] %v357_v16  ;;  %721 = vst [vmem:[%s1212_s20 + $0x108] sm:$0xff] %v453_v17  ;;  %v361_v20 = vadd.f32 %v360_v18, %v1202_v6  ;;  %v457_v21 = vadd.f32 %v456_v19, %v1202_v6 }
  0xf4   : > { %902 = vtanh.f32 %v561_v15  ;;  %v362_v22 = vpop.f32.mrf.mxu0  ;;  %v458_v23 = vpop.f32.mrf.mxu1 }
  0xf5   : > { %v546_v24 = vmul.f32 0.5, %v361_v20  ;;  %v562_v25 = vmul.f32 0.5, %v457_v21  ;;  %v363_v26 = vadd.f32 %v362_v22, %v1205_v7  ;;  %v459_v27 = vadd.f32 %v458_v23, %v1205_v7 }
  0xf6   : > { %v366_v28 = vpop.f32.mrf.mxu0  ;;  %v462_v29 = vpop.f32.mrf.mxu1 }
  0xf7   : > { %904 = vtanh.f32 %v546_v24  ;;  %706 = vst [vmem:[%s1212_s20 + $0x18] sm:$0xff] %v363_v26  ;;  %722 = vst [vmem:[%s1212_s20 + $0x118] sm:$0xff] %v459_v27  ;;  %v367_v30 = vadd.f32 %v366_v28, %v1202_v6  ;;  %v463_v31 = vadd.f32 %v462_v29, %v1202_v6 }
  0xf8   : > { %906 = vtanh.f32 %v562_v25  ;;  %v368_v32 = vpop.f32.mrf.mxu0  ;;  %v464_v33 = vpop.f32.mrf.mxu1 }
  0xf9   : > { %v547_v34 = vmul.f32 0.5, %v367_v30  ;;  %v563_v35 = vmul.f32 0.5, %v463_v31  ;;  %v369_v36 = vadd.f32 %v368_v32, %v1205_v7  ;;  %v465_v37 = vadd.f32 %v464_v33, %v1205_v7 }
  0xfa   : > { %v372_v38 = vpop.f32.mrf.mxu0  ;;  %v468_v39 = vpop.f32.mrf.mxu1 }
  0xfb   : > { %908 = vtanh.f32 %v547_v34  ;;  %707 = vst [vmem:[%s1212_s20 + $0x28] sm:$0xff] %v369_v36  ;;  %723 = vst [vmem:[%s1212_s20 + $0x128] sm:$0xff] %v465_v37  ;;  %v373_v40 = vadd.f32 %v372_v38, %v1202_v6  ;;  %v469_v41 = vadd.f32 %v468_v39, %v1202_v6 }
  0xfc   : > { %910 = vtanh.f32 %v563_v35  ;;  %v374_v42 = vpop.f32.mrf.mxu0  ;;  %v470_v43 = vpop.f32.mrf.mxu1 }
  0xfd   : > { %v548_v44 = vmul.f32 0.5, %v373_v40  ;;  %v564_v45 = vmul.f32 0.5, %v469_v41  ;;  %v375_v46 = vadd.f32 %v374_v42, %v1205_v7  ;;  %v471_v47 = vadd.f32 %v470_v43, %v1205_v7 }
  0xfe   : > { %v378_v48 = vpop.f32.mrf.mxu0  ;;  %v474_v49 = vpop.f32.mrf.mxu1 }
  0xff   : > { %912 = vtanh.f32 %v548_v44  ;;  %708 = vst [vmem:[%s1212_s20 + $0x38] sm:$0xff] %v375_v46  ;;  %724 = vst [vmem:[%s1212_s20 + $0x138] sm:$0xff] %v471_v47  ;;  %v379_v50 = vadd.f32 %v378_v48, %v1202_v6  ;;  %v475_v51 = vadd.f32 %v474_v49, %v1202_v6 }
 0x100   : > { %v901_v52 = vpop.eup %900  ;;  %914 = vtanh.f32 %v564_v45  ;;  %v380_v53 = vpop.f32.mrf.mxu0 }
 0x101   : > { %v476_v54 = vpop.f32.mrf.mxu1  ;;  %v903_v55 = vpop.eup %902  ;;  %v609_v56 = vadd.f32 1.0, %v901_v52  ;;  %v549_v57 = vmul.f32 0.5, %v379_v50  ;;  %v565_v58 = vmul.f32 0.5, %v475_v51  ;;  %v381_v59 = vadd.f32 %v380_v53, %v1205_v7 }
 0x102   : > { %v625_v60 = vadd.f32 1.0, %v903_v55  ;;  %v477_v61 = vadd.f32 %v476_v54, %v1205_v7  ;;  %v384_v62 = vpop.f32.mrf.mxu0 }
 0x103   : > { %v480_v63 = vpop.f32.mrf.mxu1  ;;  %v641_v0 = vmul.f32 0.5, %v609_v56  ;;  %916 = vtanh.f32 %v549_v57  ;;  %709 = vst [vmem:[%s1212_s20 + $0x48] sm:$0xff] %v381_v59  ;;  %v385_v1 = vadd.f32 %v384_v62, %v1202_v6 }
 0x104   : > { %v481_v2 = vadd.f32 %v480_v63, %v1202_v6  ;;  %v905_v3 = vpop.eup %904  ;;  %v657_v4 = vmul.f32 0.5, %v625_v60  ;;  %918 = vtanh.f32 %v565_v58  ;;  %725 = vst [vmem:[%s1212_s20 + $0x148] sm:$0xff] %v477_v61  ;;  %v386_v5 = vpop.f32.mrf.mxu0 }
 0x105   : > { %v482_v8 = vpop.f32.mrf.mxu1  ;;  %v907_v9 = vpop.eup %906  ;;  %673 = vst [vmem:[%s1212_s20] sm:$0xff] %v641_v0  ;;  %v610_v10 = vadd.f32 1.0, %v905_v3  ;;  %v550_v11 = vmul.f32 0.5, %v385_v1  ;;  %v387_v13 = vadd.f32 %v386_v5, %v1205_v7 }
 0x106   : > { %v566_v12 = vmul.f32 0.5, %v481_v2  ;;  %689 = vst [vmem:[%s1212_s20 + $0x100] sm:$0xff] %v657_v4  ;;  %v626_v14 = vadd.f32 1.0, %v907_v9  ;;  %v483_v15 = vadd.f32 %v482_v8, %v1205_v7  ;;  %v390_v16 = vpop.f32.mrf.mxu0 }
 0x107   : > { %v486_v17 = vpop.f32.mrf.mxu1  ;;  %v642_v18 = vmul.f32 0.5, %v610_v10  ;;  %920 = vtanh.f32 %v550_v11  ;;  %710 = vst [vmem:[%s1212_s20 + $0x58] sm:$0xff] %v387_v13  ;;  %v391_v19 = vadd.f32 %v390_v16, %v1202_v6 }
 0x108   : > { %v487_v20 = vadd.f32 %v486_v17, %v1202_v6  ;;  %v909_v21 = vpop.eup %908  ;;  %v658_v22 = vmul.f32 0.5, %v626_v14  ;;  %922 = vtanh.f32 %v566_v12  ;;  %726 = vst [vmem:[%s1212_s20 + $0x158] sm:$0xff] %v483_v15  ;;  %v392_v23 = vpop.f32.mrf.mxu0 }
 0x109   : > { %v488_v24 = vpop.f32.mrf.mxu1  ;;  %v911_v25 = vpop.eup %910  ;;  %674 = vst [vmem:[%s1212_s20 + $0x10] sm:$0xff] %v642_v18  ;;  %v611_v26 = vadd.f32 1.0, %v909_v21  ;;  %v551_v27 = vmul.f32 0.5, %v391_v19  ;;  %v393_v29 = vadd.f32 %v392_v23, %v1205_v7 }
 0x10a   : > { %v567_v28 = vmul.f32 0.5, %v487_v20  ;;  %690 = vst [vmem:[%s1212_s20 + $0x110] sm:$0xff] %v658_v22  ;;  %v627_v30 = vadd.f32 1.0, %v911_v25  ;;  %v489_v31 = vadd.f32 %v488_v24, %v1205_v7  ;;  %v396_v32 = vpop.f32.mrf.mxu0 }
 0x10b   : > { %v492_v33 = vpop.f32.mrf.mxu1  ;;  %v643_v34 = vmul.f32 0.5, %v611_v26  ;;  %924 = vtanh.f32 %v551_v27  ;;  %711 = vst [vmem:[%s1212_s20 + $0x68] sm:$0xff] %v393_v29  ;;  %v397_v35 = vadd.f32 %v396_v32, %v1202_v6 }
 0x10c   : > { %v493_v36 = vadd.f32 %v492_v33, %v1202_v6  ;;  %v913_v37 = vpop.eup %912  ;;  %v659_v38 = vmul.f32 0.5, %v627_v30  ;;  %926 = vtanh.f32 %v567_v28  ;;  %727 = vst [vmem:[%s1212_s20 + $0x168] sm:$0xff] %v489_v31  ;;  %v398_v39 = vpop.f32.mrf.mxu0 }
 0x10d   : > { %v494_v40 = vpop.f32.mrf.mxu1  ;;  %v915_v41 = vpop.eup %914  ;;  %675 = vst [vmem:[%s1212_s20 + $0x20] sm:$0xff] %v643_v34  ;;  %v612_v42 = vadd.f32 1.0, %v913_v37  ;;  %v552_v43 = vmul.f32 0.5, %v397_v35  ;;  %v399_v45 = vadd.f32 %v398_v39, %v1205_v7 }
 0x10e   : > { %v568_v44 = vmul.f32 0.5, %v493_v36  ;;  %691 = vst [vmem:[%s1212_s20 + $0x120] sm:$0xff] %v659_v38  ;;  %v628_v46 = vadd.f32 1.0, %v915_v41  ;;  %v495_v47 = vadd.f32 %v494_v40, %v1205_v7  ;;  %v402_v48 = vpop.f32.mrf.mxu0 }
 0x10f   : > { %v498_v49 = vpop.f32.mrf.mxu1  ;;  %v644_v50 = vmul.f32 0.5, %v612_v42  ;;  %928 = vtanh.f32 %v552_v43  ;;  %712 = vst [vmem:[%s1212_s20 + $0x78] sm:$0xff] %v399_v45  ;;  %v403_v51 = vadd.f32 %v402_v48, %v1202_v6 }
 0x110   : > { %v499_v52 = vadd.f32 %v498_v49, %v1202_v6  ;;  %v917_v53 = vpop.eup %916  ;;  %v660_v54 = vmul.f32 0.5, %v628_v46  ;;  %930 = vtanh.f32 %v568_v44  ;;  %728 = vst [vmem:[%s1212_s20 + $0x178] sm:$0xff] %v495_v47  ;;  %v404_v55 = vpop.f32.mrf.mxu0 }
 0x111   : > { %v500_v56 = vpop.f32.mrf.mxu1  ;;  %v919_v57 = vpop.eup %918  ;;  %676 = vst [vmem:[%s1212_s20 + $0x30] sm:$0xff] %v644_v50  ;;  %v613_v58 = vadd.f32 1.0, %v917_v53  ;;  %v553_v59 = vmul.f32 0.5, %v403_v51  ;;  %v405_v61 = vadd.f32 %v404_v55, %v1205_v7 }
 0x112   : > { %v569_v60 = vmul.f32 0.5, %v499_v52  ;;  %692 = vst [vmem:[%s1212_s20 + $0x130] sm:$0xff] %v660_v54  ;;  %v629_v62 = vadd.f32 1.0, %v919_v57  ;;  %v501_v63 = vadd.f32 %v500_v56, %v1205_v7  ;;  %v408_v0 = vpop.f32.mrf.mxu0 }
 0x113   : > { %v504_v1 = vpop.f32.mrf.mxu1  ;;  %v645_v2 = vmul.f32 0.5, %v613_v58  ;;  %932 = vtanh.f32 %v553_v59  ;;  %713 = vst [vmem:[%s1212_s20 + $0x88] sm:$0xff] %v405_v61  ;;  %v409_v3 = vadd.f32 %v408_v0, %v1202_v6 }
 0x114   : > { %v505_v4 = vadd.f32 %v504_v1, %v1202_v6  ;;  %v921_v5 = vpop.eup %920  ;;  %v661_v8 = vmul.f32 0.5, %v629_v62  ;;  %934 = vtanh.f32 %v569_v60  ;;  %729 = vst [vmem:[%s1212_s20 + $0x188] sm:$0xff] %v501_v63  ;;  %v410_v9 = vpop.f32.mrf.mxu0 }
 0x115   : > { %v506_v10 = vpop.f32.mrf.mxu1  ;;  %v923_v11 = vpop.eup %922  ;;  %677 = vst [vmem:[%s1212_s20 + $0x40] sm:$0xff] %v645_v2  ;;  %v614_v12 = vadd.f32 1.0, %v921_v5  ;;  %v554_v13 = vmul.f32 0.5, %v409_v3  ;;  %v411_v15 = vadd.f32 %v410_v9, %v1205_v7 }
 0x116   : > { %v570_v14 = vmul.f32 0.5, %v505_v4  ;;  %693 = vst [vmem:[%s1212_s20 + $0x140] sm:$0xff] %v661_v8  ;;  %v630_v16 = vadd.f32 1.0, %v923_v11  ;;  %v507_v17 = vadd.f32 %v506_v10, %v1205_v7  ;;  %v414_v18 = vpop.f32.mrf.mxu0 }
 0x117   : > { %v510_v19 = vpop.f32.mrf.mxu1  ;;  %v646_v20 = vmul.f32 0.5, %v614_v12  ;;  %936 = vtanh.f32 %v554_v13  ;;  %714 = vst [vmem:[%s1212_s20 + $0x98] sm:$0xff] %v411_v15  ;;  %v415_v21 = vadd.f32 %v414_v18, %v1202_v6 }
 0x118   : > { %v511_v22 = vadd.f32 %v510_v19, %v1202_v6  ;;  %v925_v23 = vpop.eup %924  ;;  %v662_v24 = vmul.f32 0.5, %v630_v16  ;;  %938 = vtanh.f32 %v570_v14  ;;  %730 = vst [vmem:[%s1212_s20 + $0x198] sm:$0xff] %v507_v17  ;;  %v416_v25 = vpop.f32.mrf.mxu0 }
 0x119   : > { %v512_v26 = vpop.f32.mrf.mxu1  ;;  %v927_v27 = vpop.eup %926  ;;  %678 = vst [vmem:[%s1212_s20 + $0x50] sm:$0xff] %v646_v20  ;;  %v615_v28 = vadd.f32 1.0, %v925_v23  ;;  %v555_v29 = vmul.f32 0.5, %v415_v21  ;;  %v417_v31 = vadd.f32 %v416_v25, %v1205_v7 }
 0x11a   : > { %v571_v30 = vmul.f32 0.5, %v511_v22  ;;  %694 = vst [vmem:[%s1212_s20 + $0x150] sm:$0xff] %v662_v24  ;;  %v631_v32 = vadd.f32 1.0, %v927_v27  ;;  %v513_v33 = vadd.f32 %v512_v26, %v1205_v7  ;;  %v420_v34 = vpop.f32.mrf.mxu0 }
 0x11b   : > { %v516_v35 = vpop.f32.mrf.mxu1  ;;  %v647_v36 = vmul.f32 0.5, %v615_v28  ;;  %940 = vtanh.f32 %v555_v29  ;;  %715 = vst [vmem:[%s1212_s20 + $0xa8] sm:$0xff] %v417_v31  ;;  %v421_v37 = vadd.f32 %v420_v34, %v1202_v6 }
 0x11c   : > { %v517_v38 = vadd.f32 %v516_v35, %v1202_v6  ;;  %v929_v39 = vpop.eup %928  ;;  %v663_v40 = vmul.f32 0.5, %v631_v32  ;;  %942 = vtanh.f32 %v571_v30  ;;  %731 = vst [vmem:[%s1212_s20 + $0x1a8] sm:$0xff] %v513_v33  ;;  %v422_v41 = vpop.f32.mrf.mxu0 }
 0x11d   : > { %v518_v42 = vpop.f32.mrf.mxu1  ;;  %v931_v43 = vpop.eup %930  ;;  %679 = vst [vmem:[%s1212_s20 + $0x60] sm:$0xff] %v647_v36  ;;  %v616_v44 = vadd.f32 1.0, %v929_v39  ;;  %v556_v45 = vmul.f32 0.5, %v421_v37  ;;  %v423_v47 = vadd.f32 %v422_v41, %v1205_v7 }
 0x11e   : > { %v572_v46 = vmul.f32 0.5, %v517_v38  ;;  %695 = vst [vmem:[%s1212_s20 + $0x160] sm:$0xff] %v663_v40  ;;  %v632_v48 = vadd.f32 1.0, %v931_v43  ;;  %v519_v49 = vadd.f32 %v518_v42, %v1205_v7  ;;  %v426_v50 = vpop.f32.mrf.mxu0 }
 0x11f   : > { %v522_v51 = vpop.f32.mrf.mxu1  ;;  %v648_v52 = vmul.f32 0.5, %v616_v44  ;;  %944 = vtanh.f32 %v556_v45  ;;  %716 = vst [vmem:[%s1212_s20 + $0xb8] sm:$0xff] %v423_v47  ;;  %v427_v53 = vadd.f32 %v426_v50, %v1202_v6 }
 0x120   : > { %v523_v54 = vadd.f32 %v522_v51, %v1202_v6  ;;  %v933_v55 = vpop.eup %932  ;;  %v664_v56 = vmul.f32 0.5, %v632_v48  ;;  %946 = vtanh.f32 %v572_v46  ;;  %732 = vst [vmem:[%s1212_s20 + $0x1b8] sm:$0xff] %v519_v49  ;;  %v428_v57 = vpop.f32.mrf.mxu0 }
 0x121   : > { %v524_v58 = vpop.f32.mrf.mxu1  ;;  %v935_v59 = vpop.eup %934  ;;  %680 = vst [vmem:[%s1212_s20 + $0x70] sm:$0xff] %v648_v52  ;;  %v617_v60 = vadd.f32 1.0, %v933_v55  ;;  %v557_v61 = vmul.f32 0.5, %v427_v53  ;;  %v429_v63 = vadd.f32 %v428_v57, %v1205_v7 }
 0x122   : > { %v573_v62 = vmul.f32 0.5, %v523_v54  ;;  %696 = vst [vmem:[%s1212_s20 + $0x170] sm:$0xff] %v664_v56  ;;  %v633_v0 = vadd.f32 1.0, %v935_v59  ;;  %v525_v1 = vadd.f32 %v524_v58, %v1205_v7  ;;  %v432_v2 = vpop.f32.mrf.mxu0 }
 0x123   : > { %v528_v3 = vpop.f32.mrf.mxu1  ;;  %v649_v4 = vmul.f32 0.5, %v617_v60  ;;  %948 = vtanh.f32 %v557_v61  ;;  %717 = vst [vmem:[%s1212_s20 + $0xc8] sm:$0xff] %v429_v63  ;;  %v433_v5 = vadd.f32 %v432_v2, %v1202_v6 }
 0x124   : > { %v529_v8 = vadd.f32 %v528_v3, %v1202_v6  ;;  %v937_v9 = vpop.eup %936  ;;  %v665_v10 = vmul.f32 0.5, %v633_v0  ;;  %950 = vtanh.f32 %v573_v62  ;;  %733 = vst [vmem:[%s1212_s20 + $0x1c8] sm:$0xff] %v525_v1  ;;  %v434_v11 = vpop.f32.mrf.mxu0 }
 0x125   : > { %v530_v12 = vpop.f32.mrf.mxu1  ;;  %v939_v13 = vpop.eup %938  ;;  %681 = vst [vmem:[%s1212_s20 + $0x80] sm:$0xff] %v649_v4  ;;  %v618_v14 = vadd.f32 1.0, %v937_v9  ;;  %v558_v15 = vmul.f32 0.5, %v433_v5  ;;  %v435_v17 = vadd.f32 %v434_v11, %v1205_v7 }
 0x126   : > { %v574_v16 = vmul.f32 0.5, %v529_v8  ;;  %697 = vst [vmem:[%s1212_s20 + $0x180] sm:$0xff] %v665_v10  ;;  %v634_v18 = vadd.f32 1.0, %v939_v13  ;;  %v531_v19 = vadd.f32 %v530_v12, %v1205_v7  ;;  %v438_v20 = vpop.f32.mrf.mxu0 }
 0x127   : > { %v534_v21 = vpop.f32.mrf.mxu1  ;;  %v650_v22 = vmul.f32 0.5, %v618_v14  ;;  %952 = vtanh.f32 %v558_v15  ;;  %718 = vst [vmem:[%s1212_s20 + $0xd8] sm:$0xff] %v435_v17  ;;  %v439_v23 = vadd.f32 %v438_v20, %v1202_v6 }
 0x128   : > { %v535_v24 = vadd.f32 %v534_v21, %v1202_v6  ;;  %v941_v25 = vpop.eup %940  ;;  %v666_v26 = vmul.f32 0.5, %v634_v18  ;;  %954 = vtanh.f32 %v574_v16  ;;  %734 = vst [vmem:[%s1212_s20 + $0x1d8] sm:$0xff] %v531_v19  ;;  %v440_v27 = vpop.f32.mrf.mxu0 }
 0x129   : > { %v536_v28 = vpop.f32.mrf.mxu1  ;;  %v943_v29 = vpop.eup %942  ;;  %682 = vst [vmem:[%s1212_s20 + $0x90] sm:$0xff] %v650_v22  ;;  %v619_v30 = vadd.f32 1.0, %v941_v25  ;;  %v559_v31 = vmul.f32 0.5, %v439_v23  ;;  %v441_v33 = vadd.f32 %v440_v27, %v1205_v7 }
 0x12a   : > { %v575_v32 = vmul.f32 0.5, %v535_v24  ;;  %698 = vst [vmem:[%s1212_s20 + $0x190] sm:$0xff] %v666_v26  ;;  %v635_v34 = vadd.f32 1.0, %v943_v29  ;;  %v537_v35 = vadd.f32 %v536_v28, %v1205_v7  ;;  %v444_v36 = vpop.f32.mrf.mxu0 }
 0x12b   : > { %v540_v37 = vpop.f32.mrf.mxu1  ;;  %v651_v38 = vmul.f32 0.5, %v619_v30  ;;  %956 = vtanh.f32 %v559_v31  ;;  %719 = vst [vmem:[%s1212_s20 + $0xe8] sm:$0xff] %v441_v33  ;;  %v445_v39 = vadd.f32 %v444_v36, %v1202_v6 }
 0x12c   : > { %v541_v40 = vadd.f32 %v540_v37, %v1202_v6  ;;  %v945_v41 = vpop.eup %944  ;;  %v667_v42 = vmul.f32 0.5, %v635_v34  ;;  %958 = vtanh.f32 %v575_v32  ;;  %735 = vst [vmem:[%s1212_s20 + $0x1e8] sm:$0xff] %v537_v35  ;;  %v446_v43 = vpop.f32.mrf.mxu0 }
 0x12d   : > { %v542_v44 = vpop.f32.mrf.mxu1  ;;  %v947_v45 = vpop.eup %946  ;;  %683 = vst [vmem:[%s1212_s20 + $0xa0] sm:$0xff] %v651_v38  ;;  %v620_v46 = vadd.f32 1.0, %v945_v41  ;;  %v560_v47 = vmul.f32 0.5, %v445_v39  ;;  %v447_v49 = vadd.f32 %v446_v43, %v1205_v7 }
 0x12e   : > { %v576_v48 = vmul.f32 0.5, %v541_v40  ;;  %699 = vst [vmem:[%s1212_s20 + $0x1a0] sm:$0xff] %v667_v42  ;;  %v636_v50 = vadd.f32 1.0, %v947_v45  ;;  %v543_v6 = vadd.f32 %v542_v44, %v1205_v7 }
 0x12f   : > { %v652_v51 = vmul.f32 0.5, %v620_v46  ;;  %960 = vtanh.f32 %v560_v47  ;;  %720 = vst [vmem:[%s1212_s20 + $0xf8] sm:$0xff] %v447_v49 }
 0x130   : > { %v949_v52 = vpop.eup %948  ;;  %v668_v53 = vmul.f32 0.5, %v636_v50  ;;  %962 = vtanh.f32 %v576_v48  ;;  %736 = vst [vmem:[%s1212_s20 + $0x1f8] sm:$0xff] %v543_v6 }
 0x131   : > { %v951_v54 = vpop.eup %950  ;;  %684 = vst [vmem:[%s1212_s20 + $0xb0] sm:$0xff] %v652_v51  ;;  %v621_v55 = vadd.f32 1.0, %v949_v52 }
 0x132   : > { %700 = vst [vmem:[%s1212_s20 + $0x1b0] sm:$0xff] %v668_v53  ;;  %v637_v56 = vadd.f32 1.0, %v951_v54 }
 0x133   : > { %v653_v57 = vmul.f32 0.5, %v621_v55 }
 0x134   : > { %v953_v58 = vpop.eup %952  ;;  %v669_v59 = vmul.f32 0.5, %v637_v56 }
 0x135   : > { %v955_v7 = vpop.eup %954  ;;  %685 = vst [vmem:[%s1212_s20 + $0xc0] sm:$0xff] %v653_v57  ;;  %v622_v60 = vadd.f32 1.0, %v953_v58 }
 0x136   : > { %701 = vst [vmem:[%s1212_s20 + $0x1c0] sm:$0xff] %v669_v59  ;;  %v638_v61 = vadd.f32 1.0, %v955_v7 }
 0x137   : > { %v654_v62 = vmul.f32 0.5, %v622_v60 }
 0x138   : > { %v957_v63 = vpop.eup %956  ;;  %v670_v0 = vmul.f32 0.5, %v638_v61 }
 0x139   : > { %v959_v1 = vpop.eup %958  ;;  %686 = vst [vmem:[%s1212_s20 + $0xd0] sm:$0xff] %v654_v62  ;;  %v623_v2 = vadd.f32 1.0, %v957_v63 }
 0x13a   : > { %702 = vst [vmem:[%s1212_s20 + $0x1d0] sm:$0xff] %v670_v0  ;;  %v639_v3 = vadd.f32 1.0, %v959_v1 }
 0x13b   : > { %v655_v4 = vmul.f32 0.5, %v623_v2 }
 0x13c   : > { %v961_v5 = vpop.eup %960  ;;  %v671_v8 = vmul.f32 0.5, %v639_v3 }
 0x13d   : > { %v963_v9 = vpop.eup %962  ;;  %687 = vst [vmem:[%s1212_s20 + $0xe0] sm:$0xff] %v655_v4  ;;  %v624_v10 = vadd.f32 1.0, %v961_v5 }
 0x13e   : > { %703 = vst [vmem:[%s1212_s20 + $0x1e0] sm:$0xff] %v671_v8  ;;  %v640_v11 = vadd.f32 1.0, %v963_v9 }
 0x13f   : > { %v656_v12 = vmul.f32 0.5, %v624_v10 }
 0x140   : > { %v672_v13 = vmul.f32 0.5, %v640_v11 }
 0x141   : > { %688 = vst [vmem:[%s1212_s20 + $0xf0] sm:$0xff] %v656_v12 }
 0x142   : > { %704 = vst [vmem:[%s1212_s20 + $0x1f0] sm:$0xff] %v672_v13 }
 0x143 PF: > { %s13_s14 = sadd.s32 1, %s986_s14   ;;  %s1353_s12 = smov %s982_s13 }
 0x144   : > { %p10_p5 = scmp.ge.s32.totalorder %s13_s14, 4   ;;  %s1354_s13 = smov %s1356_s15 }
 0x146   :  { %12 = sbr.rel (!%p10_p5) target bundleno = 2 (0x2), region = 62 }

// kernel: gru_conv2d_forward.5
= control target key start
LH: loop header
LB: loop body
LE: loop exit
PB: predicated region body
PF: predicated region fallthrough
CT: control target
= control target key end

     0   :  { %s808_s15 = smov 0   ;;  %s810_s16 = smov 0   ;;  %s958_s0 = inlined_call_operand.vmem [shape: f32[2,2,16,128], index: 0, kind: input, shape index: {}]   ;;  %s959_s1 = inlined_call_operand.vmem [shape: f32[2,2,16,128], index: 1, kind: input, shape index: {}]   ;;  %s960_s2 = inlined_call_operand.vmem [shape: f32[2,2,16,128], index: 2, kind: input, shape index: {}]   ;;  %s961_s3 = inlined_call_operand.vmem [shape: f32[2,1,128], index: 3, kind: input, shape index: {}]   ;;  %s962_s4 = inlined_call_operand.vmem [shape: f32[2,16,128], index: 4, kind: output, shape index: {}]  }
   0x1   :  { %s812_s17 = smov 0   ;;  %s814_s18 = smov 0  }
   0x2   :  { %s816_s19 = smov 0  }
   0x3 LB: > { %s23_s20 = sadd.s32 1, %s772_s17  ;;  %s26_s21 = sadd.s32 1, %s776_s18  ;;  %s780_s19 = sphi %s816_s19, %s14_s19   ;;  %s776_s18 = sphi %s814_s18, %s966_s18   ;;  %s772_s17 = sphi %s812_s17, %s965_s17   ;;  %s768_s16 = sphi %s810_s16, %s964_s16   ;;  %s764_s15 = sphi %s808_s15, %s963_s15  }
   0x4   : > { %p24_p0 = scmp.ge.s32.totalorder %s23_s20, 2  ;;  %p684_p1 = scmp.ge.s32.totalorder %s780_s19, 1 }
   0x5   : > { %p220_p2 = scmp.lt.s32.totalorder %s780_s19, 5 }
   0x6   : > { %s968_s20 = smov (%p24_p0, %s23_s20), 0  ;;  %s970_s21 = smov (!%p24_p0, %s26_s21), %s776_s18 }
   0x7   : > { %p221_p3 = pnand %p684_p1, %p220_p2  ;;  %p28_p4 = scmp.ge.s32.totalorder %s970_s21, 2 }
   0x8   : > { %p271_p5 = scmp.lt.s32.totalorder (!%p221_p3), %s764_s15, 1  ;;  %p273_p6 = scmp.lt.s32.totalorder (!%p221_p3), %s768_s16, 1 }
   0x9   : > { %s972_s21 = smov (%p28_p4, %s970_s21), 0  ;;  %224 = sbr.rel (%p221_p3) target bundleno = 180 (0xb4), region = 36 }
   0xa   : > { %p696_p7 = scmp.ne.s32.totalorder (!%p221_p3), %s764_s15, 0 }
   0xe   : > { %s272_s22 = scalar_select %p271_p5, %s764_s15, 1 }
   0xf   : > { %s974_s16 = smov (!%p273_p6, %s768_s16), 1 }
  0x10   : > { %s686_s23 = sshll.u32 %s272_s22, 2  ;;  %s845_s26 = scalar_lea.vmem %s961_s3, %s272_s22 }
  0x11   : > { %s685_s27 = sshll.u32 %s974_s16, 1  ;;  %s700_s28 = sshll.u32 %s974_s16, 4 }
  0x12   : > { %s277_s29 = sadd.s32 %s686_s23, %s685_s27  ;;  %s850_s6 = scalar_lea.vmem %s962_s4, %s700_s28 }
  0x13   : > { %s687_s7 = sshll.u32 %s277_s29, 3  ;;  %309 = sbr.rel (%p696_p7) target bundleno = 93 (0x5d), region = 40 }
  0x14   : > { %s855_s10 = scalar_lea.vmem %s958_s0, %s687_s7  ;;  %s860_s13 = scalar_lea.vmem %s959_s1, %s687_s7 }
  0x15   : > { %s865_s16 = scalar_lea.vmem %s960_s2, %s687_s7 }
  0x18   : > { %v312_v0 = vld [vmem:[%s845_s26] sm:$0x1]  ;;  %v782_v2 = vmov 0.0   ;;  %v320_v5 = vld [vmem:[%s855_s10 + $0x1] sm:$0x1] }
  0x19   : > { %v313_v1 = vld [vmem:[%s855_s10] sm:$0x1]  ;;  %310 = vst [vmem:[%s850_s6] sm:$0xff] %v782_v2  ;;  %311 = vst [vmem:[%s850_s6 + $0x8] sm:$0xff] %v782_v2  ;;  %v321_v7 = vld [vmem:[%s865_s16 + $0x1] sm:$0x1]  ;;  %v323_v9 = vsub.f32 1.0, %v320_v5 }
  0x1a   : > { %v314_v3 = vld [vmem:[%s865_s16] sm:$0x1]  ;;  %v316_v4 = vsub.f32 1.0, %v313_v1  ;;  %v327_v10 = vld [vmem:[%s855_s10 + $0x2] sm:$0x1]  ;;  %v322_v12 = vmul.f32 %v321_v7, %v320_v5 }
  0x1b   : > { %v315_v6 = vmul.f32 %v314_v3, %v313_v1  ;;  %v328_v13 = vld [vmem:[%s865_s16 + $0x2] sm:$0x1]  ;;  %v330_v15 = vsub.f32 1.0, %v327_v10  ;;  %v334_v16 = vld [vmem:[%s855_s10 + $0x3] sm:$0x1] }
  0x1c   : > { %v317_v8 = vmul.f32 %v316_v4, %v312_v0  ;;  %v329_v18 = vmul.f32 %v328_v13, %v327_v10  ;;  %v335_v19 = vld [vmem:[%s865_s16 + $0x3] sm:$0x1]  ;;  %v337_v21 = vsub.f32 1.0, %v334_v16  ;;  %v341_v22 = vld [vmem:[%s855_s10 + $0x4] sm:$0x1] }
  0x1d   : > { %v336_v24 = vmul.f32 %v335_v19, %v334_v16  ;;  %v342_v25 = vld [vmem:[%s865_s16 + $0x4] sm:$0x1]  ;;  %v344_v27 = vsub.f32 1.0, %v341_v22  ;;  %v348_v28 = vld [vmem:[%s855_s10 + $0x5] sm:$0x1] }
  0x1e   : > { %v318_v11 = vadd.f32 %v317_v8, %v315_v6  ;;  %v343_v30 = vmul.f32 %v342_v25, %v341_v22  ;;  %v349_v31 = vld [vmem:[%s865_s16 + $0x5] sm:$0x1]  ;;  %v351_v33 = vsub.f32 1.0, %v348_v28  ;;  %v355_v34 = vld [vmem:[%s855_s10 + $0x6] sm:$0x1] }
  0x1f   : > { %v350_v36 = vmul.f32 %v349_v31, %v348_v28  ;;  %v356_v37 = vld [vmem:[%s865_s16 + $0x6] sm:$0x1]  ;;  %v358_v39 = vsub.f32 1.0, %v355_v34  ;;  %v362_v40 = vld [vmem:[%s855_s10 + $0x7] sm:$0x1] }
  0x20   : > { %319 = vst [vmem:[#allocation2] sm:$0x1] %v318_v11  ;;  %v324_v14 = vmul.f32 %v323_v9, %v318_v11  ;;  %v357_v42 = vmul.f32 %v356_v37, %v355_v34  ;;  %v363_v43 = vld [vmem:[%s865_s16 + $0x7] sm:$0x1]  ;;  %v365_v45 = vsub.f32 1.0, %v362_v40 }
  0x21   : > { %v369_v46 = vld [vmem:[%s855_s10 + $0x8] sm:$0x1]  ;;  %v364_v48 = vmul.f32 %v363_v43, %v362_v40  ;;  %v376_v52 = vld [vmem:[%s855_s10 + $0x9] sm:$0x1]  ;;  %v383_v58 = vld [vmem:[%s855_s10 + $0xa] sm:$0x1] }
  0x22   : > { %v325_v17 = vadd.f32 %v324_v14, %v322_v12  ;;  %v370_v49 = vld [vmem:[%s865_s16 + $0x8] sm:$0x1]  ;;  %v372_v51 = vsub.f32 1.0, %v369_v46  ;;  %v377_v55 = vld [vmem:[%s865_s16 + $0x9] sm:$0x1]  ;;  %v379_v57 = vsub.f32 1.0, %v376_v52 }
  0x23   : > { %v371_v54 = vmul.f32 %v370_v49, %v369_v46  ;;  %v378_v60 = vmul.f32 %v377_v55, %v376_v52  ;;  %v384_v61 = vld [vmem:[%s865_s16 + $0xa] sm:$0x1]  ;;  %v386_v63 = vsub.f32 1.0, %v383_v58  ;;  %v390_v0 = vld [vmem:[%s855_s10 + $0xb] sm:$0x1] }
  0x24   : > { %326 = vst [vmem:[#allocation2 + $0x1] sm:$0x1] %v325_v17  ;;  %v331_v20 = vmul.f32 %v330_v15, %v325_v17  ;;  %v385_v2 = vmul.f32 %v384_v61, %v383_v58  ;;  %v391_v3 = vld [vmem:[%s865_s16 + $0xb] sm:$0x1]  ;;  %v393_v5 = vsub.f32 1.0, %v390_v0 }
  0x25   : > { %v397_v6 = vld [vmem:[%s855_s10 + $0xc] sm:$0x1]  ;;  %v392_v8 = vmul.f32 %v391_v3, %v390_v0  ;;  %v404_v12 = vld [vmem:[%s855_s10 + $0xd] sm:$0x1] }
  0x26   : > { %v332_v23 = vadd.f32 %v331_v20, %v329_v18  ;;  %v398_v9 = vld [vmem:[%s865_s16 + $0xc] sm:$0x1]  ;;  %v400_v11 = vsub.f32 1.0, %v397_v6  ;;  %v405_v15 = vld [vmem:[%s865_s16 + $0xd] sm:$0x1]  ;;  %v407_v17 = vsub.f32 1.0, %v404_v12 }
  0x27   : > { %v399_v14 = vmul.f32 %v398_v9, %v397_v6  ;;  %v411_v18 = vld [vmem:[%s855_s10 + $0xe] sm:$0x1]  ;;  %v406_v20 = vmul.f32 %v405_v15, %v404_v12 }
  0x28   : > { %333 = vst [vmem:[#allocation2 + $0x2] sm:$0x1] %v332_v23  ;;  %v338_v26 = vmul.f32 %v337_v21, %v332_v23  ;;  %v412_v21 = vld [vmem:[%s865_s16 + $0xe] sm:$0x1]  ;;  %v414_v23 = vsub.f32 1.0, %v411_v18 }
  0x2a   : > { %v339_v29 = vadd.f32 %v338_v26, %v336_v24  ;;  %v418_v24 = vld [vmem:[%s855_s10 + $0xf] sm:$0x1]  ;;  %v413_v26 = vmul.f32 %v412_v21, %v411_v18 }
  0x2c   : > { %340 = vst [vmem:[#allocation2 + $0x3] sm:$0x1] %v339_v29  ;;  %v345_v32 = vmul.f32 %v344_v27, %v339_v29  ;;  %v419_v27 = vld [vmem:[%s865_s16 + $0xf] sm:$0x1]  ;;  %v421_v29 = vsub.f32 1.0, %v418_v24 }
  0x2d   : > { %v420_v31 = vmul.f32 %v419_v27, %v418_v24 }
  0x2e   : > { %v346_v35 = vadd.f32 %v345_v32, %v343_v30 }
  0x30   : > { %347 = vst [vmem:[#allocation2 + $0x4] sm:$0x1] %v346_v35  ;;  %v352_v38 = vmul.f32 %v351_v33, %v346_v35 }
  0x32   : > { %v353_v41 = vadd.f32 %v352_v38, %v350_v36 }
  0x34   : > { %354 = vst [vmem:[#allocation2 + $0x5] sm:$0x1] %v353_v41  ;;  %v359_v44 = vmul.f32 %v358_v39, %v353_v41 }
  0x36   : > { %v360_v47 = vadd.f32 %v359_v44, %v357_v42 }
  0x38   : > { %361 = vst [vmem:[#allocation2 + $0x6] sm:$0x1] %v360_v47  ;;  %v366_v50 = vmul.f32 %v365_v45, %v360_v47 }
  0x3a   : > { %v367_v53 = vadd.f32 %v366_v50, %v364_v48 }
  0x3c   : > { %368 = vst [vmem:[#allocation2 + $0x7] sm:$0x1] %v367_v53  ;;  %v373_v56 = vmul.f32 %v372_v51, %v367_v53 }
  0x3e   : > { %v374_v59 = vadd.f32 %v373_v56, %v371_v54 }
  0x40   : > { %375 = vst [vmem:[#allocation2 + $0x8] sm:$0x1] %v374_v59  ;;  %v380_v62 = vmul.f32 %v379_v57, %v374_v59 }
  0x42   : > { %v381_v1 = vadd.f32 %v380_v62, %v378_v60 }
  0x44   : > { %382 = vst [vmem:[#allocation2 + $0x9] sm:$0x1] %v381_v1  ;;  %v387_v4 = vmul.f32 %v386_v63, %v381_v1 }
  0x46   : > { %v388_v7 = vadd.f32 %v387_v4, %v385_v2 }
  0x48   : > { %389 = vst [vmem:[#allocation2 + $0xa] sm:$0x1] %v388_v7  ;;  %v394_v10 = vmul.f32 %v393_v5, %v388_v7 }
  0x4a   : > { %v395_v13 = vadd.f32 %v394_v10, %v392_v8 }
  0x4c   : > { %396 = vst [vmem:[#allocation2 + $0xb] sm:$0x1] %v395_v13  ;;  %v401_v16 = vmul.f32 %v400_v11, %v395_v13 }
  0x4e   : > { %v402_v19 = vadd.f32 %v401_v16, %v399_v14 }
  0x50   : > { %403 = vst [vmem:[#allocation2 + $0xc] sm:$0x1] %v402_v19  ;;  %v408_v22 = vmul.f32 %v407_v17, %v402_v19 }
  0x52   : > { %v409_v25 = vadd.f32 %v408_v22, %v406_v20 }
  0x54   : > { %410 = vst [vmem:[#allocation2 + $0xd] sm:$0x1] %v409_v25  ;;  %v415_v28 = vmul.f32 %v414_v23, %v409_v25 }
  0x56   : > { %v416_v30 = vadd.f32 %v415_v28, %v413_v26 }
  0x58   : > { %417 = vst [vmem:[#allocation2 + $0xe] sm:$0x1] %v416_v30  ;;  %v422_v32 = vmul.f32 %v421_v29, %v416_v30 }
  0x5a   : > { %v423_v33 = vadd.f32 %v422_v32, %v420_v31 }
  0x5c   : > { %424 = vst [vmem:[#allocation2 + $0xf] sm:$0x1] %v423_v33 }
  0x5d PF: > { %p697_p8 = scmp.ne.s32.totalorder %s764_s15, 1 }
  0x5f   : > { %428 = sbr.rel (%p697_p8) target bundleno = 168 (0xa8), region = 44 }
  0x64   : > { %v429_v34 = vld [vmem:[%s845_s26] sm:$0x1]  ;;  %v430_v35 = vld [vmem:[%s855_s10 + $0xf] sm:$0x1]  ;;  %v437_v39 = vld [vmem:[%s855_s10 + $0xe] sm:$0x1] }
  0x65   : > { %v431_v36 = vld [vmem:[%s865_s16 + $0xf] sm:$0x1]  ;;  %v433_v38 = vsub.f32 1.0, %v430_v35  ;;  %v438_v40 = vld [vmem:[%s865_s16 + $0xe] sm:$0x1]  ;;  %v440_v42 = vsub.f32 1.0, %v437_v39 }
  0x66   : > { %v432_v37 = vmul.f32 %v431_v36, %v430_v35  ;;  %v444_v43 = vld [vmem:[%s855_s10 + $0xd] sm:$0x1]  ;;  %v439_v45 = vmul.f32 %v438_v40, %v437_v39  ;;  %v451_v49 = vld [vmem:[%s855_s10 + $0xc] sm:$0x1]  ;;  %v458_v55 = vld [vmem:[%s855_s10 + $0xb] sm:$0x1] }
  0x67   : > { %v434_v41 = vmul.f32 %v433_v38, %v429_v34  ;;  %v445_v46 = vld [vmem:[%s865_s16 + $0xd] sm:$0x1]  ;;  %v447_v48 = vsub.f32 1.0, %v444_v43  ;;  %v452_v52 = vld [vmem:[%s865_s16 + $0xc] sm:$0x1]  ;;  %v454_v54 = vsub.f32 1.0, %v451_v49 }
  0x68   : > { %v446_v51 = vmul.f32 %v445_v46, %v444_v43  ;;  %v453_v57 = vmul.f32 %v452_v52, %v451_v49  ;;  %v459_v58 = vld [vmem:[%s865_s16 + $0xb] sm:$0x1]  ;;  %v461_v60 = vsub.f32 1.0, %v458_v55  ;;  %v465_v61 = vld [vmem:[%s855_s10 + $0xa] sm:$0x1] }
  0x69   : > { %v435_v44 = vadd.f32 %v434_v41, %v432_v37  ;;  %v460_v63 = vmul.f32 %v459_v58, %v458_v55  ;;  %v466_v0 = vld [vmem:[%s865_s16 + $0xa] sm:$0x1]  ;;  %v468_v2 = vsub.f32 1.0, %v465_v61  ;;  %v472_v3 = vld [vmem:[%s855_s10 + $0x9] sm:$0x1] }
  0x6a   : > { %v467_v5 = vmul.f32 %v466_v0, %v465_v61  ;;  %v473_v6 = vld [vmem:[%s865_s16 + $0x9] sm:$0x1]  ;;  %v475_v8 = vsub.f32 1.0, %v472_v3  ;;  %v479_v9 = vld [vmem:[%s855_s10 + $0x8] sm:$0x1] }
  0x6b   : > { %436 = vst [vmem:[#allocation2 + $0xf] sm:$0x1] %v435_v44  ;;  %v441_v47 = vmul.f32 %v440_v42, %v435_v44  ;;  %v474_v11 = vmul.f32 %v473_v6, %v472_v3  ;;  %v480_v12 = vld [vmem:[%s865_s16 + $0x8] sm:$0x1]  ;;  %v482_v14 = vsub.f32 1.0, %v479_v9 }
  0x6c   : > { %v486_v15 = vld [vmem:[%s855_s10 + $0x7] sm:$0x1]  ;;  %v481_v17 = vmul.f32 %v480_v12, %v479_v9  ;;  %v493_v21 = vld [vmem:[%s855_s10 + $0x6] sm:$0x1]  ;;  %v500_v27 = vld [vmem:[%s855_s10 + $0x5] sm:$0x1] }
  0x6d   : > { %v442_v50 = vadd.f32 %v441_v47, %v439_v45  ;;  %v487_v18 = vld [vmem:[%s865_s16 + $0x7] sm:$0x1]  ;;  %v489_v20 = vsub.f32 1.0, %v486_v15  ;;  %v494_v24 = vld [vmem:[%s865_s16 + $0x6] sm:$0x1]  ;;  %v496_v26 = vsub.f32 1.0, %v493_v21 }
  0x6e   : > { %v488_v23 = vmul.f32 %v487_v18, %v486_v15  ;;  %v495_v29 = vmul.f32 %v494_v24, %v493_v21  ;;  %v501_v30 = vld [vmem:[%s865_s16 + $0x5] sm:$0x1]  ;;  %v503_v32 = vsub.f32 1.0, %v500_v27  ;;  %v507_v33 = vld [vmem:[%s855_s10 + $0x4] sm:$0x1] }
  0x6f   : > { %443 = vst [vmem:[#allocation2 + $0xe] sm:$0x1] %v442_v50  ;;  %v448_v53 = vmul.f32 %v447_v48, %v442_v50  ;;  %v502_v35 = vmul.f32 %v501_v30, %v500_v27  ;;  %v508_v36 = vld [vmem:[%s865_s16 + $0x4] sm:$0x1]  ;;  %v510_v38 = vsub.f32 1.0, %v507_v33 }
  0x70   : > { %v514_v39 = vld [vmem:[%s855_s10 + $0x3] sm:$0x1]  ;;  %v509_v41 = vmul.f32 %v508_v36, %v507_v33  ;;  %v521_v45 = vld [vmem:[%s855_s10 + $0x2] sm:$0x1] }
  0x71   : > { %v449_v56 = vadd.f32 %v448_v53, %v446_v51  ;;  %v515_v42 = vld [vmem:[%s865_s16 + $0x3] sm:$0x1]  ;;  %v517_v44 = vsub.f32 1.0, %v514_v39  ;;  %v522_v48 = vld [vmem:[%s865_s16 + $0x2] sm:$0x1]  ;;  %v524_v50 = vsub.f32 1.0, %v521_v45 }
  0x72   : > { %v516_v47 = vmul.f32 %v515_v42, %v514_v39  ;;  %v528_v51 = vld [vmem:[%s855_s10 + $0x1] sm:$0x1]  ;;  %v523_v53 = vmul.f32 %v522_v48, %v521_v45 }
  0x73   : > { %450 = vst [vmem:[#allocation2 + $0xd] sm:$0x1] %v449_v56  ;;  %v455_v59 = vmul.f32 %v454_v54, %v449_v56  ;;  %v529_v54 = vld [vmem:[%s865_s16 + $0x1] sm:$0x1]  ;;  %v531_v56 = vsub.f32 1.0, %v528_v51 }
  0x75   : > { %v456_v62 = vadd.f32 %v455_v59, %v453_v57  ;;  %v535_v57 = vld [vmem:[%s855_s10] sm:$0x1]  ;;  %v530_v59 = vmul.f32 %v529_v54, %v528_v51 }
  0x77   : > { %457 = vst [vmem:[#allocation2 + $0xc] sm:$0x1] %v456_v62  ;;  %v462_v1 = vmul.f32 %v461_v60, %v456_v62  ;;  %v536_v60 = vld [vmem:[%s865_s16] sm:$0x1]  ;;  %v538_v62 = vsub.f32 1.0, %v535_v57 }
  0x78   : > { %v537_v0 = vmul.f32 %v536_v60, %v535_v57 }
  0x79   : > { %v463_v4 = vadd.f32 %v462_v1, %v460_v63 }
  0x7b   : > { %464 = vst [vmem:[#allocation2 + $0xb] sm:$0x1] %v463_v4  ;;  %v469_v7 = vmul.f32 %v468_v2, %v463_v4 }
  0x7d   : > { %v470_v10 = vadd.f32 %v469_v7, %v467_v5 }
  0x7f   : > { %471 = vst [vmem:[#allocation2 + $0xa] sm:$0x1] %v470_v10  ;;  %v476_v13 = vmul.f32 %v475_v8, %v470_v10 }
  0x81   : > { %v477_v16 = vadd.f32 %v476_v13, %v474_v11 }
  0x83   : > { %478 = vst [vmem:[#allocation2 + $0x9] sm:$0x1] %v477_v16  ;;  %v483_v19 = vmul.f32 %v482_v14, %v477_v16 }
  0x85   : > { %v484_v22 = vadd.f32 %v483_v19, %v481_v17 }
  0x87   : > { %485 = vst [vmem:[#allocation2 + $0x8] sm:$0x1] %v484_v22  ;;  %v490_v25 = vmul.f32 %v489_v20, %v484_v22 }
  0x89   : > { %v491_v28 = vadd.f32 %v490_v25, %v488_v23 }
  0x8b   : > { %492 = vst [vmem:[#allocation2 + $0x7] sm:$0x1] %v491_v28  ;;  %v497_v31 = vmul.f32 %v496_v26, %v491_v28 }
  0x8d   : > { %v498_v34 = vadd.f32 %v497_v31, %v495_v29 }
  0x8f   : > { %499 = vst [vmem:[#allocation2 + $0x6] sm:$0x1] %v498_v34  ;;  %v504_v37 = vmul.f32 %v503_v32, %v498_v34 }
  0x91   : > { %v505_v40 = vadd.f32 %v504_v37, %v502_v35 }
  0x93   : > { %506 = vst [vmem:[#allocation2 + $0x5] sm:$0x1] %v505_v40  ;;  %v511_v43 = vmul.f32 %v510_v38, %v505_v40 }
  0x95   : > { %v512_v46 = vadd.f32 %v511_v43, %v509_v41 }
  0x97   : > { %513 = vst [vmem:[#allocation2 + $0x4] sm:$0x1] %v512_v46  ;;  %v518_v49 = vmul.f32 %v517_v44, %v512_v46 }
  0x99   : > { %v519_v52 = vadd.f32 %v518_v49, %v516_v47 }
  0x9b   : > { %520 = vst [vmem:[#allocation2 + $0x3] sm:$0x1] %v519_v52  ;;  %v525_v55 = vmul.f32 %v524_v50, %v519_v52 }
  0x9d   : > { %v526_v58 = vadd.f32 %v525_v55, %v523_v53 }
  0x9f   : > { %527 = vst [vmem:[#allocation2 + $0x2] sm:$0x1] %v526_v58  ;;  %v532_v61 = vmul.f32 %v531_v56, %v526_v58 }
  0xa1   : > { %v533_v63 = vadd.f32 %v532_v61, %v530_v59 }
  0xa3   : > { %534 = vst [vmem:[#allocation2 + $0x1] sm:$0x1] %v533_v63  ;;  %v539_v1 = vmul.f32 %v538_v62, %v533_v63 }
  0xa5   : > { %v540_v2 = vadd.f32 %v539_v1, %v537_v0 }
  0xa7   : > { %541 = vst [vmem:[#allocation2] sm:$0x1] %v540_v2 }
  0xa8 PF: > { %v542_v3 = vld [vmem:[%s850_s6] sm:$0xff]  ;;  %v543_v7 = vld [vmem:[%s850_s6 + $0x8] sm:$0xff] }
  0xa9   : > { %v546_v5 = vld [vmem:[%s860_s13] sm:$0xff]  ;;  %v545_v8 = vld [vmem:[#allocation2 + $0x8] sm:$0xff] }
  0xaa   : > { %v547_v9 = vld [vmem:[%s860_s13 + $0x8] sm:$0xff] }
  0xab   : > { %v549_v10 = vmul.f32 %v547_v9, %v545_v8 }
  0xad   : > { %v551_v12 = vadd.f32 %v549_v10, %v543_v7 }
  0xae   : > { %v544_v4 = vld [vmem:[#allocation2] sm:$0xff] }
  0xaf   : > { %v548_v6 = vmul.f32 %v546_v5, %v544_v4  ;;  %553 = vst [vmem:[%s850_s6 + $0x8] sm:$0xff] %v551_v12 }
  0xb1   : > { %v550_v11 = vadd.f32 %v548_v6, %v542_v3 }
  0xb3   : > { %552 = vst [vmem:[%s850_s6] sm:$0xff] %v550_v11 }
  0xb4 PF: > { %s14_s19 = sadd.s32 1, %s780_s19   ;;  %s963_s15 = smov %s772_s17 }
  0xb5   : > { %p11_p9 = scmp.ge.s32.totalorder %s14_s19, 6   ;;  %s964_s16 = smov %s776_s18 }
  0xb6   : > { %s965_s17 = smov %s968_s20  ;;  %s966_s18 = smov %s972_s21 }
  0xb7   :  { %13 = sbr.rel (!%p11_p9) target bundleno = 3 (0x3), region = 83 }

// kernel: gru_conv2d_forward.4
= control target key start
LH: loop header
LB: loop body
LE: loop exit
PB: predicated region body
PF: predicated region fallthrough
CT: control target
= control target key end

     0   :  { %s1465_s15 = smov 0   ;;  %s1467_s16 = smov 0   ;;  %s1887_s0 = inlined_call_operand.vmem [shape: f32[6,2,16,128], index: 0, kind: input, shape index: {}]   ;;  %s1888_s1 = inlined_call_operand.vmem [shape: f32[6,2,16,128], index: 1, kind: input, shape index: {}]   ;;  %s1889_s2 = inlined_call_operand.vmem [shape: f32[6,2,16,128], index: 2, kind: input, shape index: {}]   ;;  %s1890_s3 = inlined_call_operand.vmem [shape: f32[6,1,128], index: 3, kind: input, shape index: {}]   ;;  %s1891_s4 = inlined_call_operand.vmem [shape: f32[2,16,128], index: 4, kind: output, shape index: {}]  }
   0x1   :  { %s1469_s17 = smov 0   ;;  %s1471_s18 = smov 0  }
   0x2   :  { %s1473_s19 = smov 0  }
   0x3 LB: > { %s23_s20 = sadd.s32 1, %s1425_s17  ;;  %s26_s21 = sadd.s32 1, %s1429_s18  ;;  %s1433_s19 = sphi %s1473_s19, %s14_s19   ;;  %s1429_s18 = sphi %s1471_s18, %s1895_s18   ;;  %s1425_s17 = sphi %s1469_s17, %s1894_s17   ;;  %s1421_s16 = sphi %s1467_s16, %s1893_s16   ;;  %s1417_s15 = sphi %s1465_s15, %s1892_s15  }
   0x4   : > { %p24_p0 = scmp.ge.s32.totalorder %s23_s20, 6  ;;  %p1327_p1 = scmp.ge.s32.totalorder %s1433_s19, 1 }
   0x5   : > { %p220_p2 = scmp.lt.s32.totalorder %s1433_s19, 13 }
   0x6   : > { %s1897_s20 = smov (%p24_p0, %s23_s20), 0  ;;  %s1899_s21 = smov (!%p24_p0, %s26_s21), %s1429_s18 }
   0x7   : > { %p221_p3 = pnand %p1327_p1, %p220_p2  ;;  %p28_p4 = scmp.ge.s32.totalorder %s1899_s21, 2 }
   0x8   : > { %p271_p5 = scmp.lt.s32.totalorder (!%p221_p3), %s1417_s15, 5  ;;  %p273_p6 = scmp.lt.s32.totalorder (!%p221_p3), %s1421_s16, 1 }
   0x9   : > { %s1901_s21 = smov (%p28_p4, %s1899_s21), 0  ;;  %224 = sbr.rel (%p221_p3) target bundleno = 6458 (0x193a), region = 36 }
   0xa   : > { %p1339_p7 = scmp.ne.s32.totalorder (!%p221_p3), %s1417_s15, 0 }
   0xe   : > { %s272_s22 = scalar_select %p271_p5, %s1417_s15, 5 }
   0xf   : > { %s1903_s16 = smov (!%p273_p6, %s1421_s16), 1 }
  0x10   : > { %s1329_s23 = sshll.u32 %s272_s22, 2  ;;  %s1502_s26 = scalar_lea.vmem %s1890_s3, %s272_s22 }
  0x11   : > { %s1328_s27 = sshll.u32 %s1903_s16, 1  ;;  %s1349_s28 = sshll.u32 %s1903_s16, 4 }
  0x12   : > { %s277_s29 = sadd.s32 %s1329_s23, %s1328_s27  ;;  %s1507_s6 = scalar_lea.vmem %s1891_s4, %s1349_s28 }
  0x13   : > { %s1330_s7 = sshll.u32 %s277_s29, 3  ;;  %309 = sbr.rel (%p1339_p7) target bundleno = 1833 (0x729), region = 40 }
  0x14   : > { %s1512_s10 = scalar_lea.vmem %s1887_s0, %s1330_s7  ;;  %s1517_s13 = scalar_lea.vmem %s1888_s1, %s1330_s7 }
  0x15   : > { %s1522_s16 = scalar_lea.vmem %s1889_s2, %s1330_s7  ;;  %s1435_s23 = smov (!%p1339_p7), 16  }
  0x18   : > { %v1526_v0 = vld [vmem:[%s1502_s26] sm:$0x1]  ;;  %v326_v7 = vld [vmem:[%s1512_s10 + $0x1] sm:$0x1]  ;;  %vm324_vm0 = vcmask 130048  }
  0x19   : > { %v313_v1 = vld [vmem:[%s1512_s10] sm:$0x1]  ;;  %v327_v8 = vld [vmem:[%s1522_s16 + $0x1] sm:$0x1]  ;;  %v329_v9 = vsub.f32 1.0, %v326_v7 }
  0x1a   : > { %v314_v2 = vld [vmem:[%s1522_s16] sm:$0x1]  ;;  %v316_v4 = vsub.f32 1.0, %v313_v1  ;;  %v328_v11 = vmul.f32 %v327_v8, %v326_v7  ;;  %v338_v15 = vld [vmem:[%s1512_s10 + $0x2] sm:$0x1] }
  0x1b   : > { %v315_v3 = vmul.f32 %v314_v2, %v313_v1  ;;  %v339_v16 = vld [vmem:[%s1522_s16 + $0x2] sm:$0x1]  ;;  %v341_v17 = vsub.f32 1.0, %v338_v15  ;;  %v350_v23 = vld [vmem:[%s1512_s10 + $0x3] sm:$0x1] }
  0x1c   : > { %v317_v5 = vmul.f32 %v316_v4, %v1526_v0  ;;  %v340_v19 = vmul.f32 %v339_v16, %v338_v15  ;;  %v351_v24 = vld [vmem:[%s1522_s16 + $0x3] sm:$0x1]  ;;  %v353_v25 = vsub.f32 1.0, %v350_v23  ;;  %v362_v31 = vld [vmem:[%s1512_s10 + $0x4] sm:$0x1] }
  0x1d   : > { %v352_v27 = vmul.f32 %v351_v24, %v350_v23  ;;  %v363_v32 = vld [vmem:[%s1522_s16 + $0x4] sm:$0x1]  ;;  %v365_v33 = vsub.f32 1.0, %v362_v31  ;;  %v374_v39 = vld [vmem:[%s1512_s10 + $0x5] sm:$0x1] }
  0x1e   : > { %v318_v6 = vadd.f32 %v317_v5, %v315_v3  ;;  %v364_v35 = vmul.f32 %v363_v32, %v362_v31  ;;  %v375_v40 = vld [vmem:[%s1522_s16 + $0x5] sm:$0x1]  ;;  %v377_v41 = vsub.f32 1.0, %v374_v39  ;;  %v386_v47 = vld [vmem:[%s1512_s10 + $0x6] sm:$0x1] }
  0x1f   : > { %v376_v43 = vmul.f32 %v375_v40, %v374_v39  ;;  %v387_v48 = vld [vmem:[%s1522_s16 + $0x6] sm:$0x1]  ;;  %v389_v49 = vsub.f32 1.0, %v386_v47  ;;  %v398_v55 = vld [vmem:[%s1512_s10 + $0x7] sm:$0x1] }
  0x20   : > { %321 = vrot.lane.b32.xlu0 %v318_v6, %s1435_s23  ;;  %319 = vst [vmem:[#allocation2] sm:$0x1] %v318_v6  ;;  %v388_v51 = vmul.f32 %v387_v48, %v386_v47  ;;  %v399_v56 = vld [vmem:[%s1522_s16 + $0x7] sm:$0x1]  ;;  %v401_v57 = vsub.f32 1.0, %v398_v55 }
  0x21   : > { %v400_v59 = vmul.f32 %v399_v56, %v398_v55  ;;  %v410_v63 = vld [vmem:[%s1512_s10 + $0x8] sm:$0x1]  ;;  %v422_v8 = vld [vmem:[%s1512_s10 + $0x9] sm:$0x1]  ;;  %v434_v16 = vld [vmem:[%s1512_s10 + $0xa] sm:$0x1] }
  0x22   : > { %v411_v1 = vld [vmem:[%s1522_s16 + $0x8] sm:$0x1]  ;;  %v413_v2 = vsub.f32 1.0, %v410_v63  ;;  %v446_v24 = vld [vmem:[%s1512_s10 + $0xb] sm:$0x1] }
  0x23   : > { %v412_v4 = vmul.f32 %v411_v1, %v410_v63  ;;  %v458_v32 = vld [vmem:[%s1512_s10 + $0xc] sm:$0x1]  ;;  %v470_v40 = vld [vmem:[%s1512_s10 + $0xd] sm:$0x1]  ;;  %v482_v48 = vld [vmem:[%s1512_s10 + $0xe] sm:$0x1] }
  0x92   : > { %v322_v10 = vpop.permute.xlu0 %321 }
  0x93   : > { %v325_v12 = vsel %vm324_vm0, %v1526_v0, %v322_v10  ;;  %v425_v10 = vsub.f32 1.0, %v422_v8 }
  0x94   : > { %v330_v13 = vmul.f32 %v329_v9, %v325_v12  ;;  %v423_v9 = vld [vmem:[%s1522_s16 + $0x9] sm:$0x1] }
  0x95   : > { %v424_v12 = vmul.f32 %v423_v9, %v422_v8 }
  0x96   : > { %v331_v14 = vadd.f32 %v330_v13, %v328_v11 }
  0x98   : > { %334 = vrot.lane.b32.xlu0 %v331_v14, %s1435_s23  ;;  %332 = vst [vmem:[#allocation2 + $0x1] sm:$0x1] %v331_v14 }
 0x10a   : > { %v335_v18 = vpop.permute.xlu0 %334 }
 0x10b   : > { %v337_v20 = vsel %vm324_vm0, %v1526_v0, %v335_v18  ;;  %v437_v18 = vsub.f32 1.0, %v434_v16 }
 0x10c   : > { %v342_v21 = vmul.f32 %v341_v17, %v337_v20  ;;  %v435_v17 = vld [vmem:[%s1522_s16 + $0xa] sm:$0x1] }
 0x10d   : > { %v436_v20 = vmul.f32 %v435_v17, %v434_v16 }
 0x10e   : > { %v343_v22 = vadd.f32 %v342_v21, %v340_v19 }
 0x110   : > { %346 = vrot.lane.b32.xlu1 %v343_v22, %s1435_s23  ;;  %344 = vst [vmem:[#allocation2 + $0x2] sm:$0x1] %v343_v22 }
 0x182   : > { %v347_v26 = vpop.permute.xlu1 %346 }
 0x183   : > { %v349_v28 = vsel %vm324_vm0, %v1526_v0, %v347_v26  ;;  %v449_v26 = vsub.f32 1.0, %v446_v24 }
 0x184   : > { %v354_v29 = vmul.f32 %v353_v25, %v349_v28  ;;  %v447_v25 = vld [vmem:[%s1522_s16 + $0xb] sm:$0x1] }
 0x185   : > { %v448_v28 = vmul.f32 %v447_v25, %v446_v24 }
 0x186   : > { %v355_v30 = vadd.f32 %v354_v29, %v352_v27 }
 0x188   : > { %358 = vrot.lane.b32.xlu1 %v355_v30, %s1435_s23  ;;  %356 = vst [vmem:[#allocation2 + $0x3] sm:$0x1] %v355_v30 }
 0x1fa   : > { %v359_v34 = vpop.permute.xlu1 %358 }
 0x1fb   : > { %v361_v36 = vsel %vm324_vm0, %v1526_v0, %v359_v34  ;;  %v461_v34 = vsub.f32 1.0, %v458_v32 }
 0x1fc   : > { %v366_v37 = vmul.f32 %v365_v33, %v361_v36  ;;  %v459_v33 = vld [vmem:[%s1522_s16 + $0xc] sm:$0x1] }
 0x1fd   : > { %v460_v36 = vmul.f32 %v459_v33, %v458_v32 }
 0x1fe   : > { %v367_v38 = vadd.f32 %v366_v37, %v364_v35 }
 0x200   : > { %370 = vrot.lane.b32.xlu0 %v367_v38, %s1435_s23  ;;  %368 = vst [vmem:[#allocation2 + $0x4] sm:$0x1] %v367_v38 }
 0x272   : > { %v371_v42 = vpop.permute.xlu0 %370 }
 0x273   : > { %v373_v44 = vsel %vm324_vm0, %v1526_v0, %v371_v42  ;;  %v473_v42 = vsub.f32 1.0, %v470_v40 }
 0x274   : > { %v378_v45 = vmul.f32 %v377_v41, %v373_v44  ;;  %v471_v41 = vld [vmem:[%s1522_s16 + $0xd] sm:$0x1] }
 0x275   : > { %v472_v44 = vmul.f32 %v471_v41, %v470_v40 }
 0x276   : > { %v379_v46 = vadd.f32 %v378_v45, %v376_v43 }
 0x278   : > { %382 = vrot.lane.b32.xlu1 %v379_v46, %s1435_s23  ;;  %380 = vst [vmem:[#allocation2 + $0x5] sm:$0x1] %v379_v46 }
 0x2ea   : > { %v383_v50 = vpop.permute.xlu1 %382 }
 0x2eb   : > { %v385_v52 = vsel %vm324_vm0, %v1526_v0, %v383_v50  ;;  %v485_v50 = vsub.f32 1.0, %v482_v48 }
 0x2ec   : > { %v390_v53 = vmul.f32 %v389_v49, %v385_v52  ;;  %v483_v49 = vld [vmem:[%s1522_s16 + $0xe] sm:$0x1] }
 0x2ee   : > { %v391_v54 = vadd.f32 %v390_v53, %v388_v51  ;;  %v1436_v51 = vmov 0.0   ;;  %v484_v53 = vmul.f32 %v483_v49, %v482_v48 }
 0x2ef   : > { %310 = vst [vmem:[%s1507_s6] sm:$0xff] %v1436_v51  ;;  %311 = vst [vmem:[%s1507_s6 + $0x8] sm:$0xff] %v1436_v51 }
 0x2f0   : > { %394 = vrot.lane.b32.xlu0 %v391_v54, %s1435_s23  ;;  %392 = vst [vmem:[#allocation2 + $0x6] sm:$0x1] %v391_v54 }
 0x362   : > { %v395_v58 = vpop.permute.xlu0 %394 }
 0x363   : > { %v397_v60 = vsel %vm324_vm0, %v1526_v0, %v395_v58  ;;  %v495_v58 = vld [vmem:[%s1522_s16 + $0xf] sm:$0x1] }
 0x364   : > { %v402_v61 = vmul.f32 %v401_v57, %v397_v60  ;;  %v494_v57 = vld [vmem:[%s1512_s10 + $0xf] sm:$0x1] }
 0x365   : > { %v496_v60 = vmul.f32 %v495_v58, %v494_v57 }
 0x366   : > { %v403_v62 = vadd.f32 %v402_v61, %v400_v59  ;;  %v497_v59 = vsub.f32 1.0, %v494_v57 }
 0x368   : > { %406 = vrot.lane.b32.xlu1 %v403_v62, %s1435_s23  ;;  %404 = vst [vmem:[#allocation2 + $0x7] sm:$0x1] %v403_v62 }
 0x3da   : > { %v407_v3 = vpop.permute.xlu1 %406 }
 0x3db   : > { %v409_v5 = vsel %vm324_vm0, %v1526_v0, %v407_v3 }
 0x3dc   : > { %v414_v6 = vmul.f32 %v413_v2, %v409_v5 }
 0x3de   : > { %v415_v7 = vadd.f32 %v414_v6, %v412_v4 }
 0x3e0   : > { %418 = vrot.lane.b32.xlu0 %v415_v7, %s1435_s23  ;;  %416 = vst [vmem:[#allocation2 + $0x8] sm:$0x1] %v415_v7 }
 0x452   : > { %v419_v11 = vpop.permute.xlu0 %418 }
 0x453   : > { %v421_v13 = vsel %vm324_vm0, %v1526_v0, %v419_v11 }
 0x454   : > { %v426_v14 = vmul.f32 %v425_v10, %v421_v13 }
 0x456   : > { %v427_v15 = vadd.f32 %v426_v14, %v424_v12 }
 0x458   : > { %430 = vrot.lane.b32.xlu1 %v427_v15, %s1435_s23  ;;  %428 = vst [vmem:[#allocation2 + $0x9] sm:$0x1] %v427_v15 }
 0x4ca   : > { %v431_v19 = vpop.permute.xlu1 %430 }
 0x4cb   : > { %v433_v21 = vsel %vm324_vm0, %v1526_v0, %v431_v19 }
 0x4cc   : > { %v438_v22 = vmul.f32 %v437_v18, %v433_v21 }
 0x4ce   : > { %v439_v23 = vadd.f32 %v438_v22, %v436_v20 }
 0x4d0   : > { %442 = vrot.lane.b32.xlu0 %v439_v23, %s1435_s23  ;;  %440 = vst [vmem:[#allocation2 + $0xa] sm:$0x1] %v439_v23 }
 0x542   : > { %v443_v27 = vpop.permute.xlu0 %442 }
 0x543   : > { %v445_v29 = vsel %vm324_vm0, %v1526_v0, %v443_v27 }
 0x544   : > { %v450_v30 = vmul.f32 %v449_v26, %v445_v29 }
 0x546   : > { %v451_v31 = vadd.f32 %v450_v30, %v448_v28 }
 0x548   : > { %454 = vrot.lane.b32.xlu1 %v451_v31, %s1435_s23  ;;  %452 = vst [vmem:[#allocation2 + $0xb] sm:$0x1] %v451_v31 }
 0x5ba   : > { %v455_v35 = vpop.permute.xlu1 %454 }
 0x5bb   : > { %v457_v37 = vsel %vm324_vm0, %v1526_v0, %v455_v35 }
 0x5bc   : > { %v462_v38 = vmul.f32 %v461_v34, %v457_v37 }
 0x5be   : > { %v463_v39 = vadd.f32 %v462_v38, %v460_v36 }
 0x5c0   : > { %466 = vrot.lane.b32.xlu0 %v463_v39, %s1435_s23  ;;  %464 = vst [vmem:[#allocation2 + $0xc] sm:$0x1] %v463_v39 }
 0x632   : > { %v467_v43 = vpop.permute.xlu0 %466 }
 0x633   : > { %v469_v45 = vsel %vm324_vm0, %v1526_v0, %v467_v43 }
 0x634   : > { %v474_v46 = vmul.f32 %v473_v42, %v469_v45 }
 0x636   : > { %v475_v47 = vadd.f32 %v474_v46, %v472_v44 }
 0x638   : > { %478 = vrot.lane.b32.xlu1 %v475_v47, %s1435_s23  ;;  %476 = vst [vmem:[#allocation2 + $0xd] sm:$0x1] %v475_v47 }
 0x6aa   : > { %v479_v52 = vpop.permute.xlu1 %478 }
 0x6ab   : > { %v481_v54 = vsel %vm324_vm0, %v1526_v0, %v479_v52 }
 0x6ac   : > { %v486_v55 = vmul.f32 %v485_v50, %v481_v54 }
 0x6ae   : > { %v487_v56 = vadd.f32 %v486_v55, %v484_v53 }
 0x6b0   : > { %490 = vrot.lane.b32.xlu0 %v487_v56, %s1435_s23  ;;  %488 = vst [vmem:[#allocation2 + $0xe] sm:$0x1] %v487_v56 }
 0x722   : > { %v491_v61 = vpop.permute.xlu0 %490 }
 0x723   : > { %v493_v62 = vsel %vm324_vm0, %v1526_v0, %v491_v61 }
 0x724   : > { %v498_v63 = vmul.f32 %v497_v59, %v493_v62 }
 0x726   : > { %v499_v1 = vadd.f32 %v498_v63, %v496_v60 }
 0x728   : > { %500 = vst [vmem:[#allocation2 + $0xf] sm:$0x1] %v499_v1 }
 0x729 PF: > { %p1340_p8 = scmp.ne.s32.totalorder %s1417_s15, 1 }
 0x72a   : > { %s1437_s24 = smov (!%p1340_p8), 120  }
 0x72b   : > { %504 = sbr.rel (%p1340_p8) target bundleno = 3653 (0xe45), region = 44 }
 0x730   : > { %v505_v2 = vld [vmem:[%s1502_s26] sm:$0x1]  ;;  %v518_v5 = vlaneseq  ;;  %v527_v12 = vld [vmem:[%s1512_s10 + $0x1] sm:$0x1]  ;;  %vm525_vm1 = vcmask 982016  }
 0x731   : > { %v506_v3 = vld [vmem:[%s1512_s10] sm:$0x1]  ;;  %v528_v14 = vld [vmem:[%s1522_s16 + $0x1] sm:$0x1]  ;;  %v530_v15 = vsub.f32 1.0, %v527_v12 }
 0x732   : > { %v507_v4 = vld [vmem:[%s1522_s16] sm:$0x1]  ;;  %v509_v7 = vsub.f32 1.0, %v506_v3  ;;  %v519_v8 = vshrl.u32 %v518_v5, 7  ;;  %v529_v17 = vmul.f32 %v528_v14, %v527_v12  ;;  %v539_v21 = vld [vmem:[%s1512_s10 + $0x2] sm:$0x1] }
 0x733   : > { %v508_v6 = vmul.f32 %v507_v4, %v506_v3  ;;  %v540_v22 = vld [vmem:[%s1522_s16 + $0x2] sm:$0x1]  ;;  %v542_v23 = vsub.f32 1.0, %v539_v21  ;;  %v551_v29 = vld [vmem:[%s1512_s10 + $0x3] sm:$0x1] }
 0x734   : > { %v510_v0 = vmul.f32 %v509_v7, %v505_v2  ;;  %v520_v9 = vsub.s32 0, %v519_v8  ;;  %v541_v25 = vmul.f32 %v540_v22, %v539_v21  ;;  %v552_v30 = vld [vmem:[%s1522_s16 + $0x3] sm:$0x1]  ;;  %v554_v31 = vsub.f32 1.0, %v551_v29  ;;  %v563_v37 = vld [vmem:[%s1512_s10 + $0x4] sm:$0x1] }
 0x735   : > { %v553_v33 = vmul.f32 %v552_v30, %v551_v29  ;;  %v564_v38 = vld [vmem:[%s1522_s16 + $0x4] sm:$0x1]  ;;  %v566_v39 = vsub.f32 1.0, %v563_v37  ;;  %v575_v45 = vld [vmem:[%s1512_s10 + $0x5] sm:$0x1] }
 0x736   : > { %v511_v10 = vadd.f32 %v510_v0, %v508_v6  ;;  %v521_v11 = vrot.slane %v505_v2, %v520_v9  ;;  %v565_v41 = vmul.f32 %v564_v38, %v563_v37  ;;  %v576_v46 = vld [vmem:[%s1522_s16 + $0x5] sm:$0x1]  ;;  %v578_v47 = vsub.f32 1.0, %v575_v45  ;;  %v587_v53 = vld [vmem:[%s1512_s10 + $0x6] sm:$0x1] }
 0x737   : > { %v577_v49 = vmul.f32 %v576_v46, %v575_v45  ;;  %v588_v54 = vld [vmem:[%s1522_s16 + $0x6] sm:$0x1]  ;;  %v590_v55 = vsub.f32 1.0, %v587_v53  ;;  %v599_v61 = vld [vmem:[%s1512_s10 + $0x7] sm:$0x1] }
 0x738   : > { %514 = vrot.lane.b32.xlu0 %v511_v10, %s1437_s24  ;;  %512 = vst [vmem:[#allocation2] sm:$0x1] %v511_v10  ;;  %v589_v57 = vmul.f32 %v588_v54, %v587_v53  ;;  %v600_v62 = vld [vmem:[%s1522_s16 + $0x7] sm:$0x1]  ;;  %v602_v63 = vsub.f32 1.0, %v599_v61 }
 0x739   : > { %v601_v2 = vmul.f32 %v600_v62, %v599_v61  ;;  %v611_v6 = vld [vmem:[%s1512_s10 + $0x8] sm:$0x1]  ;;  %v624_v14 = vld [vmem:[%s1522_s16 + $0x9] sm:$0x1]  ;;  %v635_v22 = vld [vmem:[%s1512_s10 + $0xa] sm:$0x1] }
 0x73a   : > { %v612_v7 = vld [vmem:[%s1522_s16 + $0x8] sm:$0x1]  ;;  %v614_v8 = vsub.f32 1.0, %v611_v6  ;;  %v647_v30 = vld [vmem:[%s1512_s10 + $0xb] sm:$0x1] }
 0x73b   : > { %v613_v9 = vmul.f32 %v612_v7, %v611_v6  ;;  %v659_v38 = vld [vmem:[%s1512_s10 + $0xc] sm:$0x1]  ;;  %v671_v46 = vld [vmem:[%s1512_s10 + $0xd] sm:$0x1]  ;;  %v683_v54 = vld [vmem:[%s1512_s10 + $0xe] sm:$0x1] }
 0x73c   : > { %522 = vrot.lane.b32.xlu0 %v521_v11, %s1437_s24  ;;  %v695_v62 = vld [vmem:[%s1512_s10 + $0xf] sm:$0x1] }
 0x7aa   : > { %v515_v13 = vpop.permute.xlu0 %514 }
 0x7ae   : > { %v1616_v16 = vpop.permute.xlu0 %522 }
 0x7af   : > { %v526_v18 = vsel %vm525_vm1, %v515_v13, %v1616_v16  ;;  %v623_v13 = vld [vmem:[%s1512_s10 + $0x9] sm:$0x1] }
 0x7b0   : > { %v531_v19 = vmul.f32 %v530_v15, %v526_v18  ;;  %v626_v15 = vsub.f32 1.0, %v623_v13  ;;  %v625_v18 = vmul.f32 %v624_v14, %v623_v13 }
 0x7b2   : > { %v532_v20 = vadd.f32 %v531_v19, %v529_v17 }
 0x7b4   : > { %535 = vrot.lane.b32.xlu1 %v532_v20, %s1437_s24  ;;  %533 = vst [vmem:[#allocation2 + $0x1] sm:$0x1] %v532_v20 }
 0x826   : > { %v536_v24 = vpop.permute.xlu1 %535 }
 0x827   : > { %v538_v26 = vsel %vm525_vm1, %v536_v24, %v1616_v16  ;;  %v638_v24 = vsub.f32 1.0, %v635_v22 }
 0x828   : > { %v543_v27 = vmul.f32 %v542_v23, %v538_v26  ;;  %v636_v23 = vld [vmem:[%s1522_s16 + $0xa] sm:$0x1] }
 0x829   : > { %v637_v26 = vmul.f32 %v636_v23, %v635_v22 }
 0x82a   : > { %v544_v28 = vadd.f32 %v543_v27, %v541_v25 }
 0x82c   : > { %547 = vrot.lane.b32.xlu1 %v544_v28, %s1437_s24  ;;  %545 = vst [vmem:[#allocation2 + $0x2] sm:$0x1] %v544_v28 }
 0x89e   : > { %v548_v32 = vpop.permute.xlu1 %547 }
 0x89f   : > { %v550_v34 = vsel %vm525_vm1, %v548_v32, %v1616_v16  ;;  %v650_v32 = vsub.f32 1.0, %v647_v30 }
 0x8a0   : > { %v555_v35 = vmul.f32 %v554_v31, %v550_v34  ;;  %v648_v31 = vld [vmem:[%s1522_s16 + $0xb] sm:$0x1] }
 0x8a1   : > { %v649_v34 = vmul.f32 %v648_v31, %v647_v30 }
 0x8a2   : > { %v556_v36 = vadd.f32 %v555_v35, %v553_v33 }
 0x8a4   : > { %559 = vrot.lane.b32.xlu0 %v556_v36, %s1437_s24  ;;  %557 = vst [vmem:[#allocation2 + $0x3] sm:$0x1] %v556_v36 }
 0x916   : > { %v560_v40 = vpop.permute.xlu0 %559 }
 0x917   : > { %v562_v42 = vsel %vm525_vm1, %v560_v40, %v1616_v16  ;;  %v662_v40 = vsub.f32 1.0, %v659_v38 }
 0x918   : > { %v567_v43 = vmul.f32 %v566_v39, %v562_v42  ;;  %v660_v39 = vld [vmem:[%s1522_s16 + $0xc] sm:$0x1] }
 0x919   : > { %v661_v42 = vmul.f32 %v660_v39, %v659_v38 }
 0x91a   : > { %v568_v44 = vadd.f32 %v567_v43, %v565_v41 }
 0x91c   : > { %571 = vrot.lane.b32.xlu1 %v568_v44, %s1437_s24  ;;  %569 = vst [vmem:[#allocation2 + $0x4] sm:$0x1] %v568_v44 }
 0x98e   : > { %v572_v48 = vpop.permute.xlu1 %571 }
 0x98f   : > { %v574_v50 = vsel %vm525_vm1, %v572_v48, %v1616_v16  ;;  %v674_v48 = vsub.f32 1.0, %v671_v46 }
 0x990   : > { %v579_v51 = vmul.f32 %v578_v47, %v574_v50  ;;  %v672_v47 = vld [vmem:[%s1522_s16 + $0xd] sm:$0x1] }
 0x991   : > { %v673_v50 = vmul.f32 %v672_v47, %v671_v46 }
 0x992   : > { %v580_v52 = vadd.f32 %v579_v51, %v577_v49 }
 0x994   : > { %583 = vrot.lane.b32.xlu0 %v580_v52, %s1437_s24  ;;  %581 = vst [vmem:[#allocation2 + $0x5] sm:$0x1] %v580_v52 }
 0xa06   : > { %v584_v56 = vpop.permute.xlu0 %583 }
 0xa07   : > { %v586_v58 = vsel %vm525_vm1, %v584_v56, %v1616_v16  ;;  %v686_v56 = vsub.f32 1.0, %v683_v54 }
 0xa08   : > { %v591_v59 = vmul.f32 %v590_v55, %v586_v58  ;;  %v684_v55 = vld [vmem:[%s1522_s16 + $0xe] sm:$0x1] }
 0xa09   : > { %v685_v58 = vmul.f32 %v684_v55, %v683_v54 }
 0xa0a   : > { %v592_v60 = vadd.f32 %v591_v59, %v589_v57 }
 0xa0c   : > { %595 = vrot.lane.b32.xlu1 %v592_v60, %s1437_s24  ;;  %593 = vst [vmem:[#allocation2 + $0x6] sm:$0x1] %v592_v60 }
 0xa7e   : > { %v596_v1 = vpop.permute.xlu1 %595 }
 0xa7f   : > { %v598_v3 = vsel %vm525_vm1, %v596_v1, %v1616_v16  ;;  %v698_v1 = vsub.f32 1.0, %v695_v62 }
 0xa80   : > { %v603_v4 = vmul.f32 %v602_v63, %v598_v3  ;;  %v696_v63 = vld [vmem:[%s1522_s16 + $0xf] sm:$0x1] }
 0xa82   : > { %v604_v5 = vadd.f32 %v603_v4, %v601_v2  ;;  %v697_v2 = vmul.f32 %v696_v63, %v695_v62 }
 0xa84   : > { %607 = vrot.lane.b32.xlu0 %v604_v5, %s1437_s24  ;;  %605 = vst [vmem:[#allocation2 + $0x7] sm:$0x1] %v604_v5 }
 0xaf6   : > { %v608_v0 = vpop.permute.xlu0 %607 }
 0xaf7   : > { %v610_v10 = vsel %vm525_vm1, %v608_v0, %v1616_v16 }
 0xaf8   : > { %v615_v11 = vmul.f32 %v614_v8, %v610_v10 }
 0xafa   : > { %v616_v12 = vadd.f32 %v615_v11, %v613_v9 }
 0xafc   : > { %619 = vrot.lane.b32.xlu1 %v616_v12, %s1437_s24  ;;  %617 = vst [vmem:[#allocation2 + $0x8] sm:$0x1] %v616_v12 }
 0xb6e   : > { %v620_v17 = vpop.permute.xlu1 %619 }
 0xb6f   : > { %v622_v19 = vsel %vm525_vm1, %v620_v17, %v1616_v16 }
 0xb70   : > { %v627_v20 = vmul.f32 %v626_v15, %v622_v19 }
 0xb72   : > { %v628_v21 = vadd.f32 %v627_v20, %v625_v18 }
 0xb74   : > { %631 = vrot.lane.b32.xlu0 %v628_v21, %s1437_s24  ;;  %629 = vst [vmem:[#allocation2 + $0x9] sm:$0x1] %v628_v21 }
 0xbe6   : > { %v632_v25 = vpop.permute.xlu0 %631 }
 0xbe7   : > { %v634_v27 = vsel %vm525_vm1, %v632_v25, %v1616_v16 }
 0xbe8   : > { %v639_v28 = vmul.f32 %v638_v24, %v634_v27 }
 0xbea   : > { %v640_v29 = vadd.f32 %v639_v28, %v637_v26 }
 0xbec   : > { %643 = vrot.lane.b32.xlu1 %v640_v29, %s1437_s24  ;;  %641 = vst [vmem:[#allocation2 + $0xa] sm:$0x1] %v640_v29 }
 0xc5e   : > { %v644_v33 = vpop.permute.xlu1 %643 }
 0xc5f   : > { %v646_v35 = vsel %vm525_vm1, %v644_v33, %v1616_v16 }
 0xc60   : > { %v651_v36 = vmul.f32 %v650_v32, %v646_v35 }
 0xc62   : > { %v652_v37 = vadd.f32 %v651_v36, %v649_v34 }
 0xc64   : > { %655 = vrot.lane.b32.xlu0 %v652_v37, %s1437_s24  ;;  %653 = vst [vmem:[#allocation2 + $0xb] sm:$0x1] %v652_v37 }
 0xcd6   : > { %v656_v41 = vpop.permute.xlu0 %655 }
 0xcd7   : > { %v658_v43 = vsel %vm525_vm1, %v656_v41, %v1616_v16 }
 0xcd8   : > { %v663_v44 = vmul.f32 %v662_v40, %v658_v43 }
 0xcda   : > { %v664_v45 = vadd.f32 %v663_v44, %v661_v42 }
 0xcdc   : > { %667 = vrot.lane.b32.xlu1 %v664_v45, %s1437_s24  ;;  %665 = vst [vmem:[#allocation2 + $0xc] sm:$0x1] %v664_v45 }
 0xd4e   : > { %v668_v49 = vpop.permute.xlu1 %667 }
 0xd4f   : > { %v670_v51 = vsel %vm525_vm1, %v668_v49, %v1616_v16 }
 0xd50   : > { %v675_v52 = vmul.f32 %v674_v48, %v670_v51 }
 0xd52   : > { %v676_v53 = vadd.f32 %v675_v52, %v673_v50 }
 0xd54   : > { %679 = vrot.lane.b32.xlu0 %v676_v53, %s1437_s24  ;;  %677 = vst [vmem:[#allocation2 + $0xd] sm:$0x1] %v676_v53 }
 0xdc6   : > { %v680_v57 = vpop.permute.xlu0 %679 }
 0xdc7   : > { %v682_v59 = vsel %vm525_vm1, %v680_v57, %v1616_v16 }
 0xdc8   : > { %v687_v60 = vmul.f32 %v686_v56, %v682_v59 }
 0xdca   : > { %v688_v61 = vadd.f32 %v687_v60, %v685_v58 }
 0xdcc   : > { %691 = vrot.lane.b32.xlu1 %v688_v61, %s1437_s24  ;;  %689 = vst [vmem:[#allocation2 + $0xe] sm:$0x1] %v688_v61 }
 0xe3e   : > { %v692_v3 = vpop.permute.xlu1 %691 }
 0xe3f   : > { %v694_v4 = vsel %vm525_vm1, %v692_v3, %v1616_v16 }
 0xe40   : > { %v699_v5 = vmul.f32 %v698_v1, %v694_v4 }
 0xe42   : > { %v700_v6 = vadd.f32 %v699_v5, %v697_v2 }
 0xe44   : > { %701 = vst [vmem:[#allocation2 + $0xf] sm:$0x1] %v700_v6 }
 0xe45 PF: > { %p1341_p9 = scmp.ne.s32.totalorder %s1417_s15, 2 }
 0xe46   : > { %s1438_s25 = smov (!%p1341_p9), 8  }
 0xe47   : > { %705 = sbr.rel (%p1341_p9) target bundleno = 5468 (0x155c), region = 48 }
 0xe4c   : > { %v1692_v7 = vld [vmem:[%s1502_s26] sm:$0x1]  ;;  %v707_v8 = vld [vmem:[%s1512_s10 + $0xf] sm:$0x1]  ;;  %v720_v12 = vld [vmem:[%s1512_s10 + $0xe] sm:$0x1] }
 0xe4d   : > { %v708_v0 = vld [vmem:[%s1522_s16 + $0xf] sm:$0x1]  ;;  %v710_v10 = vsub.f32 1.0, %v707_v8  ;;  %v721_v13 = vld [vmem:[%s1522_s16 + $0xe] sm:$0x1]  ;;  %vm718_vm2 = vcmask 64512  }
 0xe4e   : > { %v709_v9 = vmul.f32 %v708_v0, %v707_v8  ;;  %v723_v14 = vsub.f32 1.0, %v720_v12  ;;  %v722_v17 = vmul.f32 %v721_v13, %v720_v12  ;;  %v732_v21 = vld [vmem:[%s1512_s10 + $0xd] sm:$0x1]  ;;  %v744_v29 = vld [vmem:[%s1512_s10 + $0xc] sm:$0x1] }
 0xe4f   : > { %v711_v16 = vmul.f32 %v710_v10, %v1692_v7  ;;  %v733_v22 = vld [vmem:[%s1522_s16 + $0xd] sm:$0x1]  ;;  %v735_v23 = vsub.f32 1.0, %v732_v21  ;;  %v745_v30 = vld [vmem:[%s1522_s16 + $0xc] sm:$0x1]  ;;  %v747_v31 = vsub.f32 1.0, %v744_v29 }
 0xe50   : > { %v734_v25 = vmul.f32 %v733_v22, %v732_v21  ;;  %v746_v33 = vmul.f32 %v745_v30, %v744_v29  ;;  %v756_v37 = vld [vmem:[%s1512_s10 + $0xb] sm:$0x1]  ;;  %v768_v45 = vld [vmem:[%s1512_s10 + $0xa] sm:$0x1]  ;;  %v780_v53 = vld [vmem:[%s1512_s10 + $0x9] sm:$0x1] }
 0xe51   : > { %v712_v11 = vadd.f32 %v711_v16, %v709_v9  ;;  %v757_v38 = vld [vmem:[%s1522_s16 + $0xb] sm:$0x1]  ;;  %v759_v39 = vsub.f32 1.0, %v756_v37  ;;  %v769_v46 = vld [vmem:[%s1522_s16 + $0xa] sm:$0x1]  ;;  %v771_v47 = vsub.f32 1.0, %v768_v45 }
 0xe52   : > { %v758_v41 = vmul.f32 %v757_v38, %v756_v37  ;;  %v770_v49 = vmul.f32 %v769_v46, %v768_v45  ;;  %v781_v54 = vld [vmem:[%s1522_s16 + $0x9] sm:$0x1]  ;;  %v783_v55 = vsub.f32 1.0, %v780_v53  ;;  %v792_v61 = vld [vmem:[%s1512_s10 + $0x8] sm:$0x1] }
 0xe53   : > { %715 = vrot.lane.b32.xlu0 %v712_v11, %s1438_s25  ;;  %713 = vst [vmem:[#allocation2 + $0xf] sm:$0x1] %v712_v11  ;;  %v782_v57 = vmul.f32 %v781_v54, %v780_v53  ;;  %v793_v62 = vld [vmem:[%s1522_s16 + $0x8] sm:$0x1]  ;;  %v795_v63 = vsub.f32 1.0, %v792_v61 }
 0xe54   : > { %v794_v2 = vmul.f32 %v793_v62, %v792_v61  ;;  %v804_v6 = vld [vmem:[%s1512_s10 + $0x7] sm:$0x1]  ;;  %v816_v13 = vld [vmem:[%s1512_s10 + $0x6] sm:$0x1]  ;;  %v828_v22 = vld [vmem:[%s1512_s10 + $0x5] sm:$0x1] }
 0xe55   : > { %v805_v8 = vld [vmem:[%s1522_s16 + $0x7] sm:$0x1]  ;;  %v807_v0 = vsub.f32 1.0, %v804_v6  ;;  %v840_v30 = vld [vmem:[%s1512_s10 + $0x4] sm:$0x1] }
 0xe56   : > { %v806_v10 = vmul.f32 %v805_v8, %v804_v6  ;;  %v852_v38 = vld [vmem:[%s1512_s10 + $0x3] sm:$0x1]  ;;  %v864_v46 = vld [vmem:[%s1512_s10 + $0x2] sm:$0x1]  ;;  %v876_v54 = vld [vmem:[%s1512_s10 + $0x1] sm:$0x1] }
 0xe57   : > { %v888_v62 = vld [vmem:[%s1512_s10] sm:$0x1] }
 0xec5   : > { %v716_v15 = vpop.permute.xlu0 %715 }
 0xec6   : > { %v719_v18 = vsel %vm718_vm2, %v1692_v7, %v716_v15  ;;  %v819_v15 = vsub.f32 1.0, %v816_v13 }
 0xec7   : > { %v724_v19 = vmul.f32 %v723_v14, %v719_v18  ;;  %v817_v14 = vld [vmem:[%s1522_s16 + $0x6] sm:$0x1] }
 0xec8   : > { %v818_v18 = vmul.f32 %v817_v14, %v816_v13 }
 0xec9   : > { %v725_v20 = vadd.f32 %v724_v19, %v722_v17 }
 0xecb   : > { %728 = vrot.lane.b32.xlu0 %v725_v20, %s1438_s25  ;;  %726 = vst [vmem:[#allocation2 + $0xe] sm:$0x1] %v725_v20 }
 0xf3d   : > { %v729_v24 = vpop.permute.xlu0 %728 }
 0xf3e   : > { %v731_v26 = vsel %vm718_vm2, %v1692_v7, %v729_v24  ;;  %v831_v24 = vsub.f32 1.0, %v828_v22 }
 0xf3f   : > { %v736_v27 = vmul.f32 %v735_v23, %v731_v26  ;;  %v829_v23 = vld [vmem:[%s1522_s16 + $0x5] sm:$0x1] }
 0xf40   : > { %v830_v26 = vmul.f32 %v829_v23, %v828_v22 }
 0xf41   : > { %v737_v28 = vadd.f32 %v736_v27, %v734_v25 }
 0xf43   : > { %740 = vrot.lane.b32.xlu1 %v737_v28, %s1438_s25  ;;  %738 = vst [vmem:[#allocation2 + $0xd] sm:$0x1] %v737_v28 }
 0xfb5   : > { %v741_v32 = vpop.permute.xlu1 %740 }
 0xfb6   : > { %v743_v34 = vsel %vm718_vm2, %v1692_v7, %v741_v32  ;;  %v843_v32 = vsub.f32 1.0, %v840_v30 }
 0xfb7   : > { %v748_v35 = vmul.f32 %v747_v31, %v743_v34  ;;  %v841_v31 = vld [vmem:[%s1522_s16 + $0x4] sm:$0x1] }
 0xfb8   : > { %v842_v34 = vmul.f32 %v841_v31, %v840_v30 }
 0xfb9   : > { %v749_v36 = vadd.f32 %v748_v35, %v746_v33 }
 0xfbb   : > { %752 = vrot.lane.b32.xlu1 %v749_v36, %s1438_s25  ;;  %750 = vst [vmem:[#allocation2 + $0xc] sm:$0x1] %v749_v36 }
0x102d   : > { %v753_v40 = vpop.permute.xlu1 %752 }
0x102e   : > { %v755_v42 = vsel %vm718_vm2, %v1692_v7, %v753_v40  ;;  %v855_v40 = vsub.f32 1.0, %v852_v38 }
0x102f   : > { %v760_v43 = vmul.f32 %v759_v39, %v755_v42  ;;  %v853_v39 = vld [vmem:[%s1522_s16 + $0x3] sm:$0x1] }
0x1030   : > { %v854_v42 = vmul.f32 %v853_v39, %v852_v38 }
0x1031   : > { %v761_v44 = vadd.f32 %v760_v43, %v758_v41 }
0x1033   : > { %764 = vrot.lane.b32.xlu0 %v761_v44, %s1438_s25  ;;  %762 = vst [vmem:[#allocation2 + $0xb] sm:$0x1] %v761_v44 }
0x10a5   : > { %v765_v48 = vpop.permute.xlu0 %764 }
0x10a6   : > { %v767_v50 = vsel %vm718_vm2, %v1692_v7, %v765_v48  ;;  %v867_v48 = vsub.f32 1.0, %v864_v46 }
0x10a7   : > { %v772_v51 = vmul.f32 %v771_v47, %v767_v50  ;;  %v865_v47 = vld [vmem:[%s1522_s16 + $0x2] sm:$0x1] }
0x10a8   : > { %v866_v50 = vmul.f32 %v865_v47, %v864_v46 }
0x10a9   : > { %v773_v52 = vadd.f32 %v772_v51, %v770_v49 }
0x10ab   : > { %776 = vrot.lane.b32.xlu1 %v773_v52, %s1438_s25  ;;  %774 = vst [vmem:[#allocation2 + $0xa] sm:$0x1] %v773_v52 }
0x111d   : > { %v777_v56 = vpop.permute.xlu1 %776 }
0x111e   : > { %v779_v58 = vsel %vm718_vm2, %v1692_v7, %v777_v56  ;;  %v879_v56 = vsub.f32 1.0, %v876_v54 }
0x111f   : > { %v784_v59 = vmul.f32 %v783_v55, %v779_v58  ;;  %v877_v55 = vld [vmem:[%s1522_s16 + $0x1] sm:$0x1] }
0x1120   : > { %v878_v58 = vmul.f32 %v877_v55, %v876_v54 }
0x1121   : > { %v785_v60 = vadd.f32 %v784_v59, %v782_v57 }
0x1123   : > { %788 = vrot.lane.b32.xlu0 %v785_v60, %s1438_s25  ;;  %786 = vst [vmem:[#allocation2 + $0x9] sm:$0x1] %v785_v60 }
0x1195   : > { %v789_v1 = vpop.permute.xlu0 %788 }
0x1196   : > { %v791_v3 = vsel %vm718_vm2, %v1692_v7, %v789_v1  ;;  %v891_v1 = vsub.f32 1.0, %v888_v62 }
0x1197   : > { %v796_v4 = vmul.f32 %v795_v63, %v791_v3  ;;  %v889_v63 = vld [vmem:[%s1522_s16] sm:$0x1] }
0x1199   : > { %v797_v5 = vadd.f32 %v796_v4, %v794_v2  ;;  %v890_v2 = vmul.f32 %v889_v63, %v888_v62 }
0x119b   : > { %800 = vrot.lane.b32.xlu1 %v797_v5, %s1438_s25  ;;  %798 = vst [vmem:[#allocation2 + $0x8] sm:$0x1] %v797_v5 }
0x120d   : > { %v801_v9 = vpop.permute.xlu1 %800 }
0x120e   : > { %v803_v16 = vsel %vm718_vm2, %v1692_v7, %v801_v9 }
0x120f   : > { %v808_v11 = vmul.f32 %v807_v0, %v803_v16 }
0x1211   : > { %v809_v12 = vadd.f32 %v808_v11, %v806_v10 }
0x1213   : > { %812 = vrot.lane.b32.xlu0 %v809_v12, %s1438_s25  ;;  %810 = vst [vmem:[#allocation2 + $0x7] sm:$0x1] %v809_v12 }
0x1285   : > { %v813_v17 = vpop.permute.xlu0 %812 }
0x1286   : > { %v815_v19 = vsel %vm718_vm2, %v1692_v7, %v813_v17 }
0x1287   : > { %v820_v20 = vmul.f32 %v819_v15, %v815_v19 }
0x1289   : > { %v821_v21 = vadd.f32 %v820_v20, %v818_v18 }
0x128b   : > { %824 = vrot.lane.b32.xlu1 %v821_v21, %s1438_s25  ;;  %822 = vst [vmem:[#allocation2 + $0x6] sm:$0x1] %v821_v21 }
0x12fd   : > { %v825_v25 = vpop.permute.xlu1 %824 }
0x12fe   : > { %v827_v27 = vsel %vm718_vm2, %v1692_v7, %v825_v25 }
0x12ff   : > { %v832_v28 = vmul.f32 %v831_v24, %v827_v27 }
0x1301   : > { %v833_v29 = vadd.f32 %v832_v28, %v830_v26 }
0x1303   : > { %836 = vrot.lane.b32.xlu0 %v833_v29, %s1438_s25  ;;  %834 = vst [vmem:[#allocation2 + $0x5] sm:$0x1] %v833_v29 }
0x1375   : > { %v837_v33 = vpop.permute.xlu0 %836 }
0x1376   : > { %v839_v35 = vsel %vm718_vm2, %v1692_v7, %v837_v33 }
0x1377   : > { %v844_v36 = vmul.f32 %v843_v32, %v839_v35 }
0x1379   : > { %v845_v37 = vadd.f32 %v844_v36, %v842_v34 }
0x137b   : > { %848 = vrot.lane.b32.xlu1 %v845_v37, %s1438_s25  ;;  %846 = vst [vmem:[#allocation2 + $0x4] sm:$0x1] %v845_v37 }
0x13ed   : > { %v849_v41 = vpop.permute.xlu1 %848 }
0x13ee   : > { %v851_v43 = vsel %vm718_vm2, %v1692_v7, %v849_v41 }
0x13ef   : > { %v856_v44 = vmul.f32 %v855_v40, %v851_v43 }
0x13f1   : > { %v857_v45 = vadd.f32 %v856_v44, %v854_v42 }
0x13f3   : > { %860 = vrot.lane.b32.xlu0 %v857_v45, %s1438_s25  ;;  %858 = vst [vmem:[#allocation2 + $0x3] sm:$0x1] %v857_v45 }
0x1465   : > { %v861_v49 = vpop.permute.xlu0 %860 }
0x1466   : > { %v863_v51 = vsel %vm718_vm2, %v1692_v7, %v861_v49 }
0x1467   : > { %v868_v52 = vmul.f32 %v867_v48, %v863_v51 }
0x1469   : > { %v869_v53 = vadd.f32 %v868_v52, %v866_v50 }
0x146b   : > { %872 = vrot.lane.b32.xlu1 %v869_v53, %s1438_s25  ;;  %870 = vst [vmem:[#allocation2 + $0x2] sm:$0x1] %v869_v53 }
0x14dd   : > { %v873_v57 = vpop.permute.xlu1 %872 }
0x14de   : > { %v875_v59 = vsel %vm718_vm2, %v1692_v7, %v873_v57 }
0x14df   : > { %v880_v60 = vmul.f32 %v879_v56, %v875_v59 }
0x14e1   : > { %v881_v61 = vadd.f32 %v880_v60, %v878_v58 }
0x14e3   : > { %884 = vrot.lane.b32.xlu0 %v881_v61, %s1438_s25  ;;  %882 = vst [vmem:[#allocation2 + $0x1] sm:$0x1] %v881_v61 }
0x1555   : > { %v885_v3 = vpop.permute.xlu0 %884 }
0x1556   : > { %v887_v4 = vsel %vm718_vm2, %v1692_v7, %v885_v3 }
0x1557   : > { %v892_v5 = vmul.f32 %v891_v1, %v887_v4 }
0x1559   : > { %v893_v6 = vadd.f32 %v892_v5, %v890_v2 }
0x155b   : > { %894 = vst [vmem:[#allocation2] sm:$0x1] %v893_v6 }
0x155c PF: > { %p1342_p10 = scmp.ne.s32.totalorder %s1417_s15, 3 }
0x155d   : > { %s1439_s27 = smov (!%p1342_p10), 120  }
0x155e   : > { %898 = sbr.rel (%p1342_p10) target bundleno = 6327 (0x18b7), region = 52 }
0x1563   : > { %v1343_v8 = vld [vmem:[%s1502_s26] ss:$0 sm:$0xff]  ;;  %v906_v0 = vld [vmem:[%s1512_s10 + $0xe] sm:$0x3]  ;;  %v922_v7 = vld [vmem:[%s1512_s10 + $0xc] sm:$0x3] }
0x1564   : > { %v907_v9 = vld [vmem:[%s1522_s16 + $0xe] sm:$0x3]  ;;  %v909_v16 = vsub.f32 1.0, %v906_v0  ;;  %v923_v14 = vld [vmem:[%s1522_s16 + $0xc] sm:$0x3]  ;;  %vm920_vm3 = vcmask 982016  }
0x1565   : > { %v908_v10 = vmul.f32 %v907_v9, %v906_v0  ;;  %v925_v15 = vsub.f32 1.0, %v922_v7  ;;  %v924_v18 = vmul.f32 %v923_v14, %v922_v7  ;;  %v934_v22 = vld [vmem:[%s1512_s10 + $0xa] sm:$0x3]  ;;  %v946_v30 = vld [vmem:[%s1512_s10 + $0x8] sm:$0x3] }
0x1566   : > { %v910_v11 = vmul.f32 %v1343_v8, %v909_v16  ;;  %v935_v23 = vld [vmem:[%s1522_s16 + $0xa] sm:$0x3]  ;;  %v937_v24 = vsub.f32 1.0, %v934_v22  ;;  %v947_v31 = vld [vmem:[%s1522_s16 + $0x8] sm:$0x3]  ;;  %v949_v32 = vsub.f32 1.0, %v946_v30 }
0x1567   : > { %v936_v26 = vmul.f32 %v935_v23, %v934_v22  ;;  %v948_v34 = vmul.f32 %v947_v31, %v946_v30  ;;  %v958_v38 = vld [vmem:[%s1512_s10 + $0x6] sm:$0x3]  ;;  %v970_v46 = vld [vmem:[%s1512_s10 + $0x4] sm:$0x3]  ;;  %v982_v54 = vld [vmem:[%s1512_s10 + $0x2] sm:$0x3] }
0x1568   : > { %v911_v12 = vadd.f32 %v910_v11, %v908_v10  ;;  %v959_v39 = vld [vmem:[%s1522_s16 + $0x6] sm:$0x3]  ;;  %v961_v40 = vsub.f32 1.0, %v958_v38  ;;  %v971_v47 = vld [vmem:[%s1522_s16 + $0x4] sm:$0x3]  ;;  %v973_v48 = vsub.f32 1.0, %v970_v46 }
0x1569   : > { %v960_v42 = vmul.f32 %v959_v39, %v958_v38  ;;  %v972_v50 = vmul.f32 %v971_v47, %v970_v46  ;;  %v983_v55 = vld [vmem:[%s1522_s16 + $0x2] sm:$0x3]  ;;  %v985_v56 = vsub.f32 1.0, %v982_v54  ;;  %v994_v62 = vld [vmem:[%s1512_s10] sm:$0x3] }
0x156a   : > { %914 = vrot.lane.b32.xlu0 %v911_v12, %s1439_s27  ;;  %912 = vst [vmem:[#allocation2 + $0xe] sm:$0x3] %v911_v12  ;;  %v984_v58 = vmul.f32 %v983_v55, %v982_v54  ;;  %v995_v63 = vld [vmem:[%s1522_s16] sm:$0x3]  ;;  %v997_v1 = vsub.f32 1.0, %v994_v62 }
0x156b   : > { %v996_v2 = vmul.f32 %v995_v63, %v994_v62 }
0x156e   : > { %917 = vrot.lane.b32.xlu0 %v1343_v8, %s1439_s27 }
0x15dc   : > { %v915_v13 = vpop.permute.xlu0 %914 }
0x15e0   : > { %v1780_v17 = vpop.permute.xlu0 %917 }
0x15e1   : > { %v921_v19 = vsel %vm920_vm3, %v915_v13, %v1780_v17 }
0x15e2   : > { %v926_v20 = vmul.f32 %v925_v15, %v921_v19 }
0x15e4   : > { %v927_v21 = vadd.f32 %v926_v20, %v924_v18 }
0x15e6   : > { %930 = vrot.lane.b32.xlu1 %v927_v21, %s1439_s27  ;;  %928 = vst [vmem:[#allocation2 + $0xc] sm:$0x3] %v927_v21 }
0x1658   : > { %v931_v25 = vpop.permute.xlu1 %930 }
0x1659   : > { %v933_v27 = vsel %vm920_vm3, %v931_v25, %v1780_v17 }
0x165a   : > { %v938_v28 = vmul.f32 %v937_v24, %v933_v27 }
0x165c   : > { %v939_v29 = vadd.f32 %v938_v28, %v936_v26 }
0x165e   : > { %942 = vrot.lane.b32.xlu1 %v939_v29, %s1439_s27  ;;  %940 = vst [vmem:[#allocation2 + $0xa] sm:$0x3] %v939_v29 }
0x16d0   : > { %v943_v33 = vpop.permute.xlu1 %942 }
0x16d1   : > { %v945_v35 = vsel %vm920_vm3, %v943_v33, %v1780_v17 }
0x16d2   : > { %v950_v36 = vmul.f32 %v949_v32, %v945_v35 }
0x16d4   : > { %v951_v37 = vadd.f32 %v950_v36, %v948_v34 }
0x16d6   : > { %954 = vrot.lane.b32.xlu0 %v951_v37, %s1439_s27  ;;  %952 = vst [vmem:[#allocation2 + $0x8] sm:$0x3] %v951_v37 }
0x1748   : > { %v955_v41 = vpop.permute.xlu0 %954 }
0x1749   : > { %v957_v43 = vsel %vm920_vm3, %v955_v41, %v1780_v17 }
0x174a   : > { %v962_v44 = vmul.f32 %v961_v40, %v957_v43 }
0x174c   : > { %v963_v45 = vadd.f32 %v962_v44, %v960_v42 }
0x174e   : > { %966 = vrot.lane.b32.xlu1 %v963_v45, %s1439_s27  ;;  %964 = vst [vmem:[#allocation2 + $0x6] sm:$0x3] %v963_v45 }
0x17c0   : > { %v967_v49 = vpop.permute.xlu1 %966 }
0x17c1   : > { %v969_v51 = vsel %vm920_vm3, %v967_v49, %v1780_v17 }
0x17c2   : > { %v974_v52 = vmul.f32 %v973_v48, %v969_v51 }
0x17c4   : > { %v975_v53 = vadd.f32 %v974_v52, %v972_v50 }
0x17c6   : > { %978 = vrot.lane.b32.xlu0 %v975_v53, %s1439_s27  ;;  %976 = vst [vmem:[#allocation2 + $0x4] sm:$0x3] %v975_v53 }
0x1838   : > { %v979_v57 = vpop.permute.xlu0 %978 }
0x1839   : > { %v981_v59 = vsel %vm920_vm3, %v979_v57, %v1780_v17 }
0x183a   : > { %v986_v60 = vmul.f32 %v985_v56, %v981_v59 }
0x183c   : > { %v987_v61 = vadd.f32 %v986_v60, %v984_v58 }
0x183e   : > { %990 = vrot.lane.b32.xlu1 %v987_v61, %s1439_s27  ;;  %988 = vst [vmem:[#allocation2 + $0x2] sm:$0x3] %v987_v61 }
0x18b0   : > { %v991_v3 = vpop.permute.xlu1 %990 }
0x18b1   : > { %v993_v4 = vsel %vm920_vm3, %v991_v3, %v1780_v17 }
0x18b2   : > { %v998_v5 = vmul.f32 %v997_v1, %v993_v4 }
0x18b4   : > { %v999_v6 = vadd.f32 %v998_v5, %v996_v2 }
0x18b6   : > { %1000 = vst [vmem:[#allocation2] sm:$0x3] %v999_v6 }
0x18b7 PF: > { %p1344_p11 = scmp.ne.s32.totalorder %s1417_s15, 4 }
0x18b9   : > { %1004 = sbr.rel (%p1344_p11) target bundleno = 6403 (0x1903), region = 56 }
0x18be   : > { %v1005_v8 = vld [vmem:[%s1502_s26] sm:$0x1]  ;;  %v1013_v11 = vld [vmem:[%s1512_s10 + $0x1] sm:$0x1]  ;;  %v1020_v14 = vld [vmem:[%s1512_s10 + $0x2] sm:$0x1] }
0x18bf   : > { %v1006_v0 = vld [vmem:[%s1512_s10] sm:$0x1]  ;;  %v1014_v12 = vld [vmem:[%s1522_s16 + $0x1] sm:$0x1]  ;;  %v1016_v13 = vsub.f32 1.0, %v1013_v11  ;;  %v1023_v20 = vsub.f32 1.0, %v1020_v14 }
0x18c0   : > { %v1007_v9 = vld [vmem:[%s1522_s16] sm:$0x1]  ;;  %v1009_v16 = vsub.f32 1.0, %v1006_v0  ;;  %v1015_v17 = vmul.f32 %v1014_v12, %v1013_v11  ;;  %v1021_v18 = vld [vmem:[%s1522_s16 + $0x2] sm:$0x1] }
0x18c1   : > { %v1008_v10 = vmul.f32 %v1007_v9, %v1006_v0  ;;  %v1027_v21 = vld [vmem:[%s1512_s10 + $0x3] sm:$0x1]  ;;  %v1022_v23 = vmul.f32 %v1021_v18, %v1020_v14  ;;  %v1034_v27 = vld [vmem:[%s1512_s10 + $0x4] sm:$0x1]  ;;  %v1041_v33 = vld [vmem:[%s1512_s10 + $0x5] sm:$0x1] }
0x18c2   : > { %v1010_v7 = vmul.f32 %v1009_v16, %v1005_v8  ;;  %v1028_v24 = vld [vmem:[%s1522_s16 + $0x3] sm:$0x1]  ;;  %v1030_v26 = vsub.f32 1.0, %v1027_v21  ;;  %v1035_v30 = vld [vmem:[%s1522_s16 + $0x4] sm:$0x1]  ;;  %v1037_v32 = vsub.f32 1.0, %v1034_v27 }
0x18c3   : > { %v1029_v29 = vmul.f32 %v1028_v24, %v1027_v21  ;;  %v1036_v35 = vmul.f32 %v1035_v30, %v1034_v27  ;;  %v1042_v36 = vld [vmem:[%s1522_s16 + $0x5] sm:$0x1]  ;;  %v1044_v38 = vsub.f32 1.0, %v1041_v33  ;;  %v1048_v39 = vld [vmem:[%s1512_s10 + $0x6] sm:$0x1] }
0x18c4   : > { %v1011_v15 = vadd.f32 %v1010_v7, %v1008_v10  ;;  %v1043_v41 = vmul.f32 %v1042_v36, %v1041_v33  ;;  %v1049_v42 = vld [vmem:[%s1522_s16 + $0x6] sm:$0x1]  ;;  %v1051_v44 = vsub.f32 1.0, %v1048_v39  ;;  %v1055_v45 = vld [vmem:[%s1512_s10 + $0x7] sm:$0x1] }
0x18c5   : > { %v1050_v47 = vmul.f32 %v1049_v42, %v1048_v39  ;;  %v1056_v48 = vld [vmem:[%s1522_s16 + $0x7] sm:$0x1]  ;;  %v1058_v50 = vsub.f32 1.0, %v1055_v45  ;;  %v1062_v51 = vld [vmem:[%s1512_s10 + $0x8] sm:$0x1] }
0x18c6   : > { %1012 = vst [vmem:[#allocation2] sm:$0x1] %v1011_v15  ;;  %v1017_v19 = vmul.f32 %v1016_v13, %v1011_v15  ;;  %v1057_v53 = vmul.f32 %v1056_v48, %v1055_v45  ;;  %v1063_v54 = vld [vmem:[%s1522_s16 + $0x8] sm:$0x1]  ;;  %v1065_v56 = vsub.f32 1.0, %v1062_v51 }
0x18c7   : > { %v1069_v57 = vld [vmem:[%s1512_s10 + $0x9] sm:$0x1]  ;;  %v1064_v59 = vmul.f32 %v1063_v54, %v1062_v51  ;;  %v1076_v63 = vld [vmem:[%s1512_s10 + $0xa] sm:$0x1]  ;;  %v1083_v6 = vld [vmem:[%s1512_s10 + $0xb] sm:$0x1] }
0x18c8   : > { %v1018_v22 = vadd.f32 %v1017_v19, %v1015_v17  ;;  %v1070_v60 = vld [vmem:[%s1522_s16 + $0x9] sm:$0x1]  ;;  %v1072_v62 = vsub.f32 1.0, %v1069_v57  ;;  %v1077_v3 = vld [vmem:[%s1522_s16 + $0xa] sm:$0x1]  ;;  %v1079_v5 = vsub.f32 1.0, %v1076_v63 }
0x18c9   : > { %v1071_v2 = vmul.f32 %v1070_v60, %v1069_v57  ;;  %v1078_v0 = vmul.f32 %v1077_v3, %v1076_v63  ;;  %v1084_v9 = vld [vmem:[%s1522_s16 + $0xb] sm:$0x1]  ;;  %v1086_v16 = vsub.f32 1.0, %v1083_v6  ;;  %v1090_v11 = vld [vmem:[%s1512_s10 + $0xc] sm:$0x1] }
0x18ca   : > { %1019 = vst [vmem:[#allocation2 + $0x1] sm:$0x1] %v1018_v22  ;;  %v1024_v25 = vmul.f32 %v1023_v20, %v1018_v22  ;;  %v1085_v7 = vmul.f32 %v1084_v9, %v1083_v6  ;;  %v1091_v13 = vld [vmem:[%s1522_s16 + $0xc] sm:$0x1]  ;;  %v1093_v15 = vsub.f32 1.0, %v1090_v11 }
0x18cb   : > { %v1097_v17 = vld [vmem:[%s1512_s10 + $0xd] sm:$0x1]  ;;  %v1092_v19 = vmul.f32 %v1091_v13, %v1090_v11 }
0x18cc   : > { %v1025_v28 = vadd.f32 %v1024_v25, %v1022_v23  ;;  %v1098_v20 = vld [vmem:[%s1522_s16 + $0xd] sm:$0x1]  ;;  %v1100_v22 = vsub.f32 1.0, %v1097_v17  ;;  %v1104_v23 = vld [vmem:[%s1512_s10 + $0xe] sm:$0x1] }
0x18cd   : > { %v1099_v25 = vmul.f32 %v1098_v20, %v1097_v17 }
0x18ce   : > { %1026 = vst [vmem:[#allocation2 + $0x2] sm:$0x1] %v1025_v28  ;;  %v1031_v31 = vmul.f32 %v1030_v26, %v1025_v28  ;;  %v1105_v26 = vld [vmem:[%s1522_s16 + $0xe] sm:$0x1]  ;;  %v1107_v28 = vsub.f32 1.0, %v1104_v23 }
0x18d0   : > { %v1032_v34 = vadd.f32 %v1031_v31, %v1029_v29  ;;  %v1111_v29 = vld [vmem:[%s1512_s10 + $0xf] sm:$0x1]  ;;  %v1106_v31 = vmul.f32 %v1105_v26, %v1104_v23 }
0x18d2   : > { %1033 = vst [vmem:[#allocation2 + $0x3] sm:$0x1] %v1032_v34  ;;  %v1038_v37 = vmul.f32 %v1037_v32, %v1032_v34  ;;  %v1112_v32 = vld [vmem:[%s1522_s16 + $0xf] sm:$0x1]  ;;  %v1114_v34 = vsub.f32 1.0, %v1111_v29 }
0x18d3   : > { %v1113_v36 = vmul.f32 %v1112_v32, %v1111_v29 }
0x18d4   : > { %v1039_v40 = vadd.f32 %v1038_v37, %v1036_v35 }
0x18d6   : > { %1040 = vst [vmem:[#allocation2 + $0x4] sm:$0x1] %v1039_v40  ;;  %v1045_v43 = vmul.f32 %v1044_v38, %v1039_v40 }
0x18d8   : > { %v1046_v46 = vadd.f32 %v1045_v43, %v1043_v41 }
0x18da   : > { %1047 = vst [vmem:[#allocation2 + $0x5] sm:$0x1] %v1046_v46  ;;  %v1052_v49 = vmul.f32 %v1051_v44, %v1046_v46 }
0x18dc   : > { %v1053_v52 = vadd.f32 %v1052_v49, %v1050_v47 }
0x18de   : > { %1054 = vst [vmem:[#allocation2 + $0x6] sm:$0x1] %v1053_v52  ;;  %v1059_v55 = vmul.f32 %v1058_v50, %v1053_v52 }
0x18e0   : > { %v1060_v58 = vadd.f32 %v1059_v55, %v1057_v53 }
0x18e2   : > { %1061 = vst [vmem:[#allocation2 + $0x7] sm:$0x1] %v1060_v58  ;;  %v1066_v61 = vmul.f32 %v1065_v56, %v1060_v58 }
0x18e4   : > { %v1067_v1 = vadd.f32 %v1066_v61, %v1064_v59 }
0x18e6   : > { %1068 = vst [vmem:[#allocation2 + $0x8] sm:$0x1] %v1067_v1  ;;  %v1073_v4 = vmul.f32 %v1072_v62, %v1067_v1 }
0x18e8   : > { %v1074_v8 = vadd.f32 %v1073_v4, %v1071_v2 }
0x18ea   : > { %1075 = vst [vmem:[#allocation2 + $0x9] sm:$0x1] %v1074_v8  ;;  %v1080_v10 = vmul.f32 %v1079_v5, %v1074_v8 }
0x18ec   : > { %v1081_v12 = vadd.f32 %v1080_v10, %v1078_v0 }
0x18ee   : > { %1082 = vst [vmem:[#allocation2 + $0xa] sm:$0x1] %v1081_v12  ;;  %v1087_v14 = vmul.f32 %v1086_v16, %v1081_v12 }
0x18f0   : > { %v1088_v18 = vadd.f32 %v1087_v14, %v1085_v7 }
0x18f2   : > { %1089 = vst [vmem:[#allocation2 + $0xb] sm:$0x1] %v1088_v18  ;;  %v1094_v21 = vmul.f32 %v1093_v15, %v1088_v18 }
0x18f4   : > { %v1095_v24 = vadd.f32 %v1094_v21, %v1092_v19 }
0x18f6   : > { %1096 = vst [vmem:[#allocation2 + $0xc] sm:$0x1] %v1095_v24  ;;  %v1101_v27 = vmul.f32 %v1100_v22, %v1095_v24 }
0x18f8   : > { %v1102_v30 = vadd.f32 %v1101_v27, %v1099_v25 }
0x18fa   : > { %1103 = vst [vmem:[#allocation2 + $0xd] sm:$0x1] %v1102_v30  ;;  %v1108_v33 = vmul.f32 %v1107_v28, %v1102_v30 }
0x18fc   : > { %v1109_v35 = vadd.f32 %v1108_v33, %v1106_v31 }
0x18fe   : > { %1110 = vst [vmem:[#allocation2 + $0xe] sm:$0x1] %v1109_v35  ;;  %v1115_v37 = vmul.f32 %v1114_v34, %v1109_v35 }
0x1900   : > { %v1116_v38 = vadd.f32 %v1115_v37, %v1113_v36 }
0x1902   : > { %1117 = vst [vmem:[#allocation2 + $0xf] sm:$0x1] %v1116_v38 }
0x1903 PF: > { %p1345_p12 = scmp.ne.s32.totalorder %s1417_s15, 5 }
0x1905   : > { %1121 = sbr.rel (%p1345_p12) target bundleno = 6446 (0x192e), region = 60 }
0x190a   : > { %v1346_v39 = vld [vmem:[%s1502_s26] ss:$0 sm:$0xff]  ;;  %v1129_v40 = vld [vmem:[%s1512_s10 + $0xe] sm:$0x3]  ;;  %v1136_v44 = vld [vmem:[%s1512_s10 + $0xc] sm:$0x3] }
0x190b   : > { %v1130_v41 = vld [vmem:[%s1522_s16 + $0xe] sm:$0x3]  ;;  %v1132_v43 = vsub.f32 1.0, %v1129_v40  ;;  %v1137_v45 = vld [vmem:[%s1522_s16 + $0xc] sm:$0x3]  ;;  %v1139_v47 = vsub.f32 1.0, %v1136_v44 }
0x190c   : > { %v1131_v42 = vmul.f32 %v1130_v41, %v1129_v40  ;;  %v1143_v48 = vld [vmem:[%s1512_s10 + $0xa] sm:$0x3]  ;;  %v1138_v50 = vmul.f32 %v1137_v45, %v1136_v44  ;;  %v1150_v54 = vld [vmem:[%s1512_s10 + $0x8] sm:$0x3]  ;;  %v1157_v60 = vld [vmem:[%s1512_s10 + $0x6] sm:$0x3] }
0x190d   : > { %v1133_v46 = vmul.f32 %v1346_v39, %v1132_v43  ;;  %v1144_v51 = vld [vmem:[%s1522_s16 + $0xa] sm:$0x3]  ;;  %v1146_v53 = vsub.f32 1.0, %v1143_v48  ;;  %v1151_v57 = vld [vmem:[%s1522_s16 + $0x8] sm:$0x3]  ;;  %v1153_v59 = vsub.f32 1.0, %v1150_v54 }
0x190e   : > { %v1145_v56 = vmul.f32 %v1144_v51, %v1143_v48  ;;  %v1152_v62 = vmul.f32 %v1151_v57, %v1150_v54  ;;  %v1158_v63 = vld [vmem:[%s1522_s16 + $0x6] sm:$0x3]  ;;  %v1160_v2 = vsub.f32 1.0, %v1157_v60  ;;  %v1164_v3 = vld [vmem:[%s1512_s10 + $0x4] sm:$0x3] }
0x190f   : > { %v1134_v49 = vadd.f32 %v1133_v46, %v1131_v42  ;;  %v1159_v5 = vmul.f32 %v1158_v63, %v1157_v60  ;;  %v1165_v6 = vld [vmem:[%s1522_s16 + $0x4] sm:$0x3]  ;;  %v1167_v0 = vsub.f32 1.0, %v1164_v3  ;;  %v1171_v9 = vld [vmem:[%s1512_s10 + $0x2] sm:$0x3] }
0x1910   : > { %v1166_v16 = vmul.f32 %v1165_v6, %v1164_v3  ;;  %v1172_v11 = vld [vmem:[%s1522_s16 + $0x2] sm:$0x3]  ;;  %v1174_v7 = vsub.f32 1.0, %v1171_v9  ;;  %v1178_v13 = vld [vmem:[%s1512_s10] sm:$0x3] }
0x1911   : > { %1135 = vst [vmem:[#allocation2 + $0xe] sm:$0x3] %v1134_v49  ;;  %v1140_v52 = vmul.f32 %v1139_v47, %v1134_v49  ;;  %v1173_v15 = vmul.f32 %v1172_v11, %v1171_v9  ;;  %v1179_v17 = vld [vmem:[%s1522_s16] sm:$0x3]  ;;  %v1181_v19 = vsub.f32 1.0, %v1178_v13 }
0x1912   : > { %v1180_v21 = vmul.f32 %v1179_v17, %v1178_v13 }
0x1913   : > { %v1141_v55 = vadd.f32 %v1140_v52, %v1138_v50 }
0x1915   : > { %1142 = vst [vmem:[#allocation2 + $0xc] sm:$0x3] %v1141_v55  ;;  %v1147_v58 = vmul.f32 %v1146_v53, %v1141_v55 }
0x1917   : > { %v1148_v61 = vadd.f32 %v1147_v58, %v1145_v56 }
0x1919   : > { %1149 = vst [vmem:[#allocation2 + $0xa] sm:$0x3] %v1148_v61  ;;  %v1154_v1 = vmul.f32 %v1153_v59, %v1148_v61 }
0x191b   : > { %v1155_v4 = vadd.f32 %v1154_v1, %v1152_v62 }
0x191d   : > { %1156 = vst [vmem:[#allocation2 + $0x8] sm:$0x3] %v1155_v4  ;;  %v1161_v8 = vmul.f32 %v1160_v2, %v1155_v4 }
0x191f   : > { %v1162_v10 = vadd.f32 %v1161_v8, %v1159_v5 }
0x1921   : > { %1163 = vst [vmem:[#allocation2 + $0x6] sm:$0x3] %v1162_v10  ;;  %v1168_v12 = vmul.f32 %v1167_v0, %v1162_v10 }
0x1923   : > { %v1169_v14 = vadd.f32 %v1168_v12, %v1166_v16 }
0x1925   : > { %1170 = vst [vmem:[#allocation2 + $0x4] sm:$0x3] %v1169_v14  ;;  %v1175_v18 = vmul.f32 %v1174_v7, %v1169_v14 }
0x1927   : > { %v1176_v20 = vadd.f32 %v1175_v18, %v1173_v15 }
0x1929   : > { %1177 = vst [vmem:[#allocation2 + $0x2] sm:$0x3] %v1176_v20  ;;  %v1182_v22 = vmul.f32 %v1181_v19, %v1176_v20 }
0x192b   : > { %v1183_v23 = vadd.f32 %v1182_v22, %v1180_v21 }
0x192d   : > { %1184 = vst [vmem:[#allocation2] sm:$0x3] %v1183_v23 }
0x192e PF: > { %v1185_v24 = vld [vmem:[%s1507_s6] sm:$0xff]  ;;  %v1186_v28 = vld [vmem:[%s1507_s6 + $0x8] sm:$0xff] }
0x192f   : > { %v1189_v26 = vld [vmem:[%s1517_s13] sm:$0xff]  ;;  %v1188_v29 = vld [vmem:[#allocation2 + $0x8] sm:$0xff] }
0x1930   : > { %v1190_v30 = vld [vmem:[%s1517_s13 + $0x8] sm:$0xff] }
0x1931   : > { %v1192_v31 = vmul.f32 %v1190_v30, %v1188_v29 }
0x1933   : > { %v1194_v33 = vadd.f32 %v1192_v31, %v1186_v28 }
0x1934   : > { %v1187_v25 = vld [vmem:[#allocation2] sm:$0xff] }
0x1935   : > { %v1191_v27 = vmul.f32 %v1189_v26, %v1187_v25  ;;  %1196 = vst [vmem:[%s1507_s6 + $0x8] sm:$0xff] %v1194_v33 }
0x1937   : > { %v1193_v32 = vadd.f32 %v1191_v27, %v1185_v24 }
0x1939   : > { %1195 = vst [vmem:[%s1507_s6] sm:$0xff] %v1193_v32 }
0x193a PF: > { %s14_s19 = sadd.s32 1, %s1433_s19   ;;  %s1892_s15 = smov %s1425_s17 }
0x193b   : > { %p11_p13 = scmp.ge.s32.totalorder %s14_s19, 14   ;;  %s1893_s16 = smov %s1429_s18 }
0x193c   : > { %s1894_s17 = smov %s1897_s20  ;;  %s1895_s18 = smov %s1901_s21 }
0x193d   :  { %13 = sbr.rel (!%p11_p13) target bundleno = 3 (0x3), region = 99 }

</bundles_post_ra>
